<compile_context>
chip_gen: v7x
topology: tpu7x:2x2x1
jax: 0.10.0
libtpu: 0.0.40
codegen_flags: <defaults>
</compile_context>

<pallas_src>
import functools
import math

import jax
import jax.numpy as jnp
from jax.experimental import pallas as pl
from jax.experimental.pallas import tpu as pltpu


# ----------------------------------------------------------------------------
# Fused transformer kernel: one grid step == one batch element (full forward).
# ----------------------------------------------------------------------------
def _transformer_kernel(ids_ref, emb_ref, pos_ref,
                        wqkv_ref, bqkv_ref, wo_ref, bo_ref,
                        ln1g_ref, ln1b_ref, w1_ref, b1_ref,
                        w2_ref, b2_ref, ln2g_ref, ln2b_ref,
                        wout_ref, bout_ref, o_ref, *, nhead):
    S = ids_ref.shape[0]                      # sequence length (rows of this block)
    V, D = emb_ref.shape                      # vocab, d_model
    L = wqkv_ref.shape[0]                     # num layers
    dh = D // nhead
    scale = 1.0 / math.sqrt(dh)
    eps = 1e-5

    # ---- Embedding lookup as one-hot matmul (MXU-friendly gather) + pos encoding ----
    ids = ids_ref[...]                                           # (S, 1) int32
    iota = jax.lax.broadcasted_iota(jnp.int32, (S, V), 1)
    onehot = jnp.where(iota == ids, 1.0, 0.0).astype(jnp.float32)  # (S, V)
    h = jnp.dot(onehot, emb_ref[...], preferred_element_type=jnp.float32)  # (S, D)
    h = h + pos_ref[...]

    def layer_norm(x, g, b):
        m = jnp.mean(x, axis=-1, keepdims=True)
        c = x - m
        var = jnp.mean(c * c, axis=-1, keepdims=True)
        return c * jax.lax.rsqrt(var + eps) * g + b

    # ---- Encoder layers (post-norm, as nn.TransformerEncoderLayer default) ----
    for l in range(L):                                           # static unroll
        # Self-attention: fused QKV projection.
        qkv = jnp.dot(h, wqkv_ref[l], preferred_element_type=jnp.float32) + bqkv_ref[l]
        q = qkv[:, 0:D]
        k = qkv[:, D:2 * D]
        v = qkv[:, 2 * D:3 * D]

        heads = []
        for hd in range(nhead):                                  # static unroll
            c0, c1 = hd * dh, (hd + 1) * dh
            qh, kh, vh = q[:, c0:c1], k[:, c0:c1], v[:, c0:c1]   # (S, dh)
            s_ = jax.lax.dot_general(qh, kh, (((1,), (1,)), ((), ())),
                                     preferred_element_type=jnp.float32) * scale
            s_ = s_ - jnp.max(s_, axis=-1, keepdims=True)
            p = jnp.exp(s_)
            p = p / jnp.sum(p, axis=-1, keepdims=True)
            heads.append(jnp.dot(p, vh, preferred_element_type=jnp.float32))
        attn = jnp.concatenate(heads, axis=-1)                   # (S, D)
        attn = jnp.dot(attn, wo_ref[l], preferred_element_type=jnp.float32) + bo_ref[l]

        # Residual + LayerNorm1.  (dropout is identity in eval mode)
        h = layer_norm(h + attn, ln1g_ref[l], ln1b_ref[l])

        # Feed-forward: Linear -> ReLU -> Linear.
        ff = jnp.dot(h, w1_ref[l], preferred_element_type=jnp.float32) + b1_ref[l]
        ff = jnp.maximum(ff, 0.0)
        ff = jnp.dot(ff, w2_ref[l], preferred_element_type=jnp.float32) + b2_ref[l]

        # Residual + LayerNorm2.
        h = layer_norm(h + ff, ln2g_ref[l], ln2b_ref[l])

    # ---- Output projection ----
    out = jnp.dot(h, wout_ref[...], preferred_element_type=jnp.float32) + bout_ref[...]
    o_ref[...] = out.astype(o_ref.dtype)


def transformer_forward(ids, params, *, nhead=8):
    """ids: (N, S) int32 token ids.  Returns (N, S, vocab) logits."""
    N, S = ids.shape
    V, D = params["emb"].shape
    L = params["wqkv"].shape[0]
    Dff = params["w1"].shape[-1]
    assert D % nhead == 0
    assert S % 8 == 0, "seq length must be a multiple of 8 (sublane tiling)"

    ids2 = ids.reshape(N * S, 1).astype(jnp.int32)
    pos = params["pos"][:S]                                      # (S, D)

    kernel = functools.partial(_transformer_kernel, nhead=nhead)
    out = pl.pallas_call(
        kernel,
        out_shape=jax.ShapeDtypeStruct((N * S, V), jnp.float32),
        grid=(N,),
        in_specs=[
            pl.BlockSpec((S, 1), lambda n: (n, 0)),              # token ids (per seq)
            pl.BlockSpec((V, D), lambda n: (0, 0)),              # embedding table
            pl.BlockSpec((S, D), lambda n: (0, 0)),              # pos encoding
            pl.BlockSpec((L, D, 3 * D), lambda n: (0, 0, 0)),    # qkv weight
            pl.BlockSpec((L, 1, 3 * D), lambda n: (0, 0, 0)),    # qkv bias
            pl.BlockSpec((L, D, D), lambda n: (0, 0, 0)),        # attn out proj w
            pl.BlockSpec((L, 1, D), lambda n: (0, 0, 0)),        # attn out proj b
            pl.BlockSpec((L, 1, D), lambda n: (0, 0, 0)),        # ln1 gamma
            pl.BlockSpec((L, 1, D), lambda n: (0, 0, 0)),        # ln1 beta
            pl.BlockSpec((L, D, Dff), lambda n: (0, 0, 0)),      # ffn w1
            pl.BlockSpec((L, 1, Dff), lambda n: (0, 0, 0)),      # ffn b1
            pl.BlockSpec((L, Dff, D), lambda n: (0, 0, 0)),      # ffn w2
            pl.BlockSpec((L, 1, D), lambda n: (0, 0, 0)),        # ffn b2
            pl.BlockSpec((L, 1, D), lambda n: (0, 0, 0)),        # ln2 gamma
            pl.BlockSpec((L, 1, D), lambda n: (0, 0, 0)),        # ln2 beta
            pl.BlockSpec((D, V), lambda n: (0, 0)),              # output proj w
            pl.BlockSpec((1, V), lambda n: (0, 0)),              # output proj b
        ],
        out_specs=pl.BlockSpec((S, V), lambda n: (n, 0)),
        compiler_params=pltpu.CompilerParams(
            dimension_semantics=("parallel",),                   # megacore over batch
            vmem_limit_bytes=40 * 1024 * 1024,                   # weights resident in VMEM
        ),
    )(ids2, params["emb"], pos,
      params["wqkv"], params["bqkv"], params["wo"], params["bo"],
      params["ln1g"], params["ln1b"], params["w1"], params["b1"],
      params["w2"], params["b2"], params["ln2g"], params["ln2b"],
      params["wout"], params["bout"])
    return out.reshape(N, S, V)


# ----------------------------------------------------------------------------
# Pure-JAX reference (same math, XLA ops) for validation.
# ----------------------------------------------------------------------------
def reference_forward(ids, params, *, nhead=8):
    N, S = ids.shape
    V, D = params["emb"].shape
    L = params["wqkv"].shape[0]
    dh = D // nhead
    eps = 1e-5

    def layer_norm(x, g, b):
        m = jnp.mean(x, axis=-1, keepdims=True)
        c = x - m
        var = jnp.mean(c * c, axis=-1, keepdims=True)
        return c * jax.lax.rsqrt(var + eps) * g + b

    h = params["emb"][ids] + params["pos"][:S]                   # (N, S, D)
    for l in range(L):
        qkv = h @ params["wqkv"][l] + params["bqkv"][l]          # (N, S, 3D)
        q, k, v = jnp.split(qkv, 3, axis=-1)
        q = q.reshape(N, S, nhead, dh).transpose(0, 2, 1, 3)
        k = k.reshape(N, S, nhead, dh).transpose(0, 2, 1, 3)
        v = v.reshape(N, S, nhead, dh).transpose(0, 2, 1, 3)
        s_ = jnp.einsum("nhqd,nhkd->nhqk", q, k) / jnp.sqrt(jnp.float32(dh))
        p = jax.nn.softmax(s_, axis=-1)
        o = jnp.einsum("nhqk,nhkd->nhqd", p, v).transpose(0, 2, 1, 3).reshape(N, S, D)
        o = o @ params["wo"][l] + params["bo"][l]
        h = layer_norm(h + o, params["ln1g"][l], params["ln1b"][l])
        ff = jax.nn.relu(h @ params["w1"][l] + params["b1"][l])
        ff = ff @ params["w2"][l] + params["b2"][l]
        h = layer_norm(h + ff, params["ln2g"][l], params["ln2b"][l])
    return h @ params["wout"] + params["bout"]


def init_params(key, *, vocab=1000, d_model=256, num_layers=2, max_seq=64):
    d_ff = 4 * d_model
    L = num_layers
    ks = iter(jax.random.split(key, 16))
    s = 0.05

    def nrm(shape):
        return s * jax.random.normal(next(ks), shape, jnp.float32)

    # Weight layout: x @ W (i.e. PyTorch weights pre-transposed at load time).
    return {
        "emb":  nrm((vocab, d_model)),
        "pos":  nrm((max_seq, d_model)),
        "wqkv": nrm((L, d_model, 3 * d_model)),
        "bqkv": nrm((L, 1, 3 * d_model)),
        "wo":   nrm((L, d_model, d_model)),
        "bo":   nrm((L, 1, d_model)),
        "ln1g": jnp.ones((L, 1, d_model), jnp.float32),
        "ln1b": jnp.zeros((L, 1, d_model), jnp.float32),
        "w1":   nrm((L, d_model, d_ff)),
        "b1":   nrm((L, 1, d_ff)),
        "w2":   nrm((L, d_ff, d_model)),
        "b2":   nrm((L, 1, d_model)),
        "ln2g": jnp.ones((L, 1, d_model), jnp.float32),
        "ln2b": jnp.zeros((L, 1, d_model), jnp.float32),
        "wout": nrm((d_model, vocab)),
        "bout": nrm((1, vocab)),
    }
    # TODO(synk): train-mode dropout (p=0.1) is not implemented; eval semantics (identity).


if __name__ == "__main__":
    key = jax.random.PRNGKey(0)
    k_ids, k_p = jax.random.split(key)

    N, S, VOCAB = 2, 16, 1000
    ids = jax.random.randint(k_ids, (N, S), 0, VOCAB, dtype=jnp.int32)
    params = init_params(k_p, vocab=VOCAB, d_model=256, num_layers=2, max_seq=64)

    out = jax.block_until_ready(transformer_forward(ids, params, nhead=8))
    ref = jax.block_until_ready(reference_forward(ids, params, nhead=8))

    assert out.shape == (N, S, VOCAB), out.shape
    max_err = float(jnp.max(jnp.abs(out - ref)))
    assert jnp.allclose(out, ref, atol=5e-3, rtol=5e-3), max_err
    print("KERNEL_OK")
</pallas_src>

<mosaic_0001>
module attributes {stable_mosaic.version = 11 : i64} {
  func.func @_transformer_kernel(%arg0: i32, %arg1: memref<16x1xi32, #tpu.memory_space<vmem>>, %arg2: memref<1000x256xf32, #tpu.memory_space<vmem>>, %arg3: memref<16x256xf32, #tpu.memory_space<vmem>>, %arg4: memref<2x256x768xf32, #tpu.memory_space<vmem>>, %arg5: memref<2x1x768xf32, #tpu.memory_space<vmem>>, %arg6: memref<2x256x256xf32, #tpu.memory_space<vmem>>, %arg7: memref<2x1x256xf32, #tpu.memory_space<vmem>>, %arg8: memref<2x1x256xf32, #tpu.memory_space<vmem>>, %arg9: memref<2x1x256xf32, #tpu.memory_space<vmem>>, %arg10: memref<2x256x1024xf32, #tpu.memory_space<vmem>>, %arg11: memref<2x1x1024xf32, #tpu.memory_space<vmem>>, %arg12: memref<2x1024x256xf32, #tpu.memory_space<vmem>>, %arg13: memref<2x1x256xf32, #tpu.memory_space<vmem>>, %arg14: memref<2x1x256xf32, #tpu.memory_space<vmem>>, %arg15: memref<2x1x256xf32, #tpu.memory_space<vmem>>, %arg16: memref<256x1000xf32, #tpu.memory_space<vmem>>, %arg17: memref<1x1000xf32, #tpu.memory_space<vmem>>, %arg18: memref<16x1000xf32, #tpu.memory_space<vmem>>) attributes {dimension_semantics = [#tpu.dimension_semantics<parallel>], iteration_bounds = array<i64: 2>, scalar_prefetch = 0 : i64, scratch_operands = 0 : i64, tpu.core_type = #tpu.core_type<tc>, window_params = [{transform_indices = @transform_0, window_bounds = array<i64: 16, 1>}, {pipeline_mode = #tpu.pipeline_mode<synchronous>, transform_indices = @transform_1, window_bounds = array<i64: 1000, 256>}, {pipeline_mode = #tpu.pipeline_mode<synchronous>, transform_indices = @transform_2, window_bounds = array<i64: 16, 256>}, {pipeline_mode = #tpu.pipeline_mode<synchronous>, transform_indices = @transform_3, window_bounds = array<i64: 2, 256, 768>}, {pipeline_mode = #tpu.pipeline_mode<synchronous>, transform_indices = @transform_4, window_bounds = array<i64: 2, 1, 768>}, {pipeline_mode = #tpu.pipeline_mode<synchronous>, transform_indices = @transform_5, window_bounds = array<i64: 2, 256, 256>}, {pipeline_mode = #tpu.pipeline_mode<synchronous>, transform_indices = @transform_6, window_bounds = array<i64: 2, 1, 256>}, {pipeline_mode = #tpu.pipeline_mode<synchronous>, transform_indices = @transform_7, window_bounds = array<i64: 2, 1, 256>}, {pipeline_mode = #tpu.pipeline_mode<synchronous>, transform_indices = @transform_8, window_bounds = array<i64: 2, 1, 256>}, {pipeline_mode = #tpu.pipeline_mode<synchronous>, transform_indices = @transform_9, window_bounds = array<i64: 2, 256, 1024>}, {pipeline_mode = #tpu.pipeline_mode<synchronous>, transform_indices = @transform_10, window_bounds = array<i64: 2, 1, 1024>}, {pipeline_mode = #tpu.pipeline_mode<synchronous>, transform_indices = @transform_11, window_bounds = array<i64: 2, 1024, 256>}, {pipeline_mode = #tpu.pipeline_mode<synchronous>, transform_indices = @transform_12, window_bounds = array<i64: 2, 1, 256>}, {pipeline_mode = #tpu.pipeline_mode<synchronous>, transform_indices = @transform_13, window_bounds = array<i64: 2, 1, 256>}, {pipeline_mode = #tpu.pipeline_mode<synchronous>, transform_indices = @transform_14, window_bounds = array<i64: 2, 1, 256>}, {pipeline_mode = #tpu.pipeline_mode<synchronous>, transform_indices = @transform_15, window_bounds = array<i64: 256, 1000>}, {pipeline_mode = #tpu.pipeline_mode<synchronous>, transform_indices = @transform_16, window_bounds = array<i64: 1, 1000>}, {transform_indices = @transform_17, window_bounds = array<i64: 16, 1000>}]} {
    %c0 = arith.constant 0 : index
    %c0_0 = arith.constant 0 : index
    %0 = vector.load %arg1[%c0, %c0_0] : memref<16x1xi32, #tpu.memory_space<vmem>>, vector<16x1xi32>
    %1 = tpu.iota {dimensions = array<i32: 1>} : vector<16x1000xi32>
    %2 = vector.broadcast %0 : vector<16x1xi32> to vector<16x1000xi32>
    %3 = arith.cmpi eq, %1, %2 : vector<16x1000xi32>
    %cst = arith.constant 1.000000e+00 : f32
    %cst_1 = arith.constant 0.000000e+00 : f32
    %4 = vector.broadcast %cst : f32 to vector<16x1000xf32>
    %5 = vector.broadcast %cst_1 : f32 to vector<16x1000xf32>
    %6 = arith.select %3, %4, %5 : vector<16x1000xi1>, vector<16x1000xf32>
    %c0_2 = arith.constant 0 : index
    %c0_3 = arith.constant 0 : index
    %7 = vector.load %arg2[%c0_2, %c0_3] : memref<1000x256xf32, #tpu.memory_space<vmem>>, vector<1000x256xf32>
    %cst_4 = arith.constant dense<0.000000e+00> : vector<16x256xf32>
    %8 = tpu.matmul %6, %7, %cst_4 {dimension_numbers = #tpu.dot_dimension_numbers<[1], [0], [0], [1], [0, 0, 1, 1], [], []>} : vector<16x1000xf32>, vector<1000x256xf32>, vector<16x256xf32> -> vector<16x256xf32>
    %c0_5 = arith.constant 0 : index
    %c0_6 = arith.constant 0 : index
    %9 = vector.load %arg3[%c0_5, %c0_6] : memref<16x256xf32, #tpu.memory_space<vmem>>, vector<16x256xf32>
    %10 = arith.addf %8, %9 : vector<16x256xf32>
    %c0_7 = arith.constant 0 : index
    %c0_8 = arith.constant 0 : index
    %c0_9 = arith.constant 0 : index
    %11 = vector.load %arg4[%c0_7, %c0_8, %c0_9] : memref<2x256x768xf32, #tpu.memory_space<vmem>>, vector<1x256x768xf32>
    %12 = vector.shape_cast %11 : vector<1x256x768xf32> to vector<256x768xf32>
    %cst_10 = arith.constant dense<0.000000e+00> : vector<16x768xf32>
    %13 = tpu.matmul %10, %12, %cst_10 {dimension_numbers = #tpu.dot_dimension_numbers<[1], [0], [0], [1], [0, 0, 1, 1], [], []>} : vector<16x256xf32>, vector<256x768xf32>, vector<16x768xf32> -> vector<16x768xf32>
    %c0_11 = arith.constant 0 : index
    %c0_12 = arith.constant 0 : index
    %c0_13 = arith.constant 0 : index
    %14 = vector.load %arg5[%c0_11, %c0_12, %c0_13] : memref<2x1x768xf32, #tpu.memory_space<vmem>>, vector<1x1x768xf32>
    %15 = vector.shape_cast %14 : vector<1x1x768xf32> to vector<1x768xf32>
    %16 = vector.broadcast %15 : vector<1x768xf32> to vector<16x768xf32>
    %17 = arith.addf %13, %16 : vector<16x768xf32>
    %18 = vector.extract_strided_slice %17 {offsets = [0, 0], sizes = [16, 256], strides = [1, 1]} : vector<16x768xf32> to vector<16x256xf32>
    %19 = vector.extract_strided_slice %17 {offsets = [0, 256], sizes = [16, 256], strides = [1, 1]} : vector<16x768xf32> to vector<16x256xf32>
    %20 = vector.extract_strided_slice %17 {offsets = [0, 512], sizes = [16, 256], strides = [1, 1]} : vector<16x768xf32> to vector<16x256xf32>
    %21 = vector.extract_strided_slice %18 {offsets = [0, 0], sizes = [16, 32], strides = [1, 1]} : vector<16x256xf32> to vector<16x32xf32>
    %22 = vector.extract_strided_slice %19 {offsets = [0, 0], sizes = [16, 32], strides = [1, 1]} : vector<16x256xf32> to vector<16x32xf32>
    %23 = vector.extract_strided_slice %20 {offsets = [0, 0], sizes = [16, 32], strides = [1, 1]} : vector<16x256xf32> to vector<16x32xf32>
    %cst_14 = arith.constant dense<0.000000e+00> : vector<16x16xf32>
    %24 = tpu.matmul %21, %22, %cst_14 {dimension_numbers = #tpu.dot_dimension_numbers<[1], [1], [0], [0], [0, 0, 1, 0], [], []>} : vector<16x32xf32>, vector<16x32xf32>, vector<16x16xf32> -> vector<16x16xf32>
    %cst_15 = arith.constant 0.176776692 : f32
    %25 = vector.broadcast %cst_15 : f32 to vector<16x16xf32>
    %26 = arith.mulf %24, %25 : vector<16x16xf32>
    %cst_16 = arith.constant dense<0xFF800000> : vector<16xf32>
    %27 = vector.multi_reduction <maximumf>, %26, %cst_16 [1] : vector<16x16xf32> to vector<16xf32>
    %28 = vector.shape_cast %27 : vector<16xf32> to vector<16x1xf32>
    %29 = vector.broadcast %28 : vector<16x1xf32> to vector<16x16xf32>
    %30 = arith.subf %26, %29 : vector<16x16xf32>
    %31 = math.exp %30 : vector<16x16xf32>
    %cst_17 = arith.constant dense<0.000000e+00> : vector<16xf32>
    %32 = vector.multi_reduction <add>, %31, %cst_17 [1] : vector<16x16xf32> to vector<16xf32>
    %33 = vector.shape_cast %32 : vector<16xf32> to vector<16x1xf32>
    %34 = vector.broadcast %33 : vector<16x1xf32> to vector<16x16xf32>
    %35 = arith.divf %31, %34 : vector<16x16xf32>
    %cst_18 = arith.constant dense<0.000000e+00> : vector<16x32xf32>
    %36 = tpu.matmul %35, %23, %cst_18 {dimension_numbers = #tpu.dot_dimension_numbers<[1], [0], [0], [1], [0, 0, 1, 1], [], []>} : vector<16x16xf32>, vector<16x32xf32>, vector<16x32xf32> -> vector<16x32xf32>
    %37 = vector.extract_strided_slice %18 {offsets = [0, 32], sizes = [16, 32], strides = [1, 1]} : vector<16x256xf32> to vector<16x32xf32>
    %38 = vector.extract_strided_slice %19 {offsets = [0, 32], sizes = [16, 32], strides = [1, 1]} : vector<16x256xf32> to vector<16x32xf32>
    %39 = vector.extract_strided_slice %20 {offsets = [0, 32], sizes = [16, 32], strides = [1, 1]} : vector<16x256xf32> to vector<16x32xf32>
    %cst_19 = arith.constant dense<0.000000e+00> : vector<16x16xf32>
    %40 = tpu.matmul %37, %38, %cst_19 {dimension_numbers = #tpu.dot_dimension_numbers<[1], [1], [0], [0], [0, 0, 1, 0], [], []>} : vector<16x32xf32>, vector<16x32xf32>, vector<16x16xf32> -> vector<16x16xf32>
    %cst_20 = arith.constant 0.176776692 : f32
    %41 = vector.broadcast %cst_20 : f32 to vector<16x16xf32>
    %42 = arith.mulf %40, %41 : vector<16x16xf32>
    %cst_21 = arith.constant dense<0xFF800000> : vector<16xf32>
    %43 = vector.multi_reduction <maximumf>, %42, %cst_21 [1] : vector<16x16xf32> to vector<16xf32>
    %44 = vector.shape_cast %43 : vector<16xf32> to vector<16x1xf32>
    %45 = vector.broadcast %44 : vector<16x1xf32> to vector<16x16xf32>
    %46 = arith.subf %42, %45 : vector<16x16xf32>
    %47 = math.exp %46 : vector<16x16xf32>
    %cst_22 = arith.constant dense<0.000000e+00> : vector<16xf32>
    %48 = vector.multi_reduction <add>, %47, %cst_22 [1] : vector<16x16xf32> to vector<16xf32>
    %49 = vector.shape_cast %48 : vector<16xf32> to vector<16x1xf32>
    %50 = vector.broadcast %49 : vector<16x1xf32> to vector<16x16xf32>
    %51 = arith.divf %47, %50 : vector<16x16xf32>
    %cst_23 = arith.constant dense<0.000000e+00> : vector<16x32xf32>
    %52 = tpu.matmul %51, %39, %cst_23 {dimension_numbers = #tpu.dot_dimension_numbers<[1], [0], [0], [1], [0, 0, 1, 1], [], []>} : vector<16x16xf32>, vector<16x32xf32>, vector<16x32xf32> -> vector<16x32xf32>
    %53 = vector.extract_strided_slice %18 {offsets = [0, 64], sizes = [16, 32], strides = [1, 1]} : vector<16x256xf32> to vector<16x32xf32>
    %54 = vector.extract_strided_slice %19 {offsets = [0, 64], sizes = [16, 32], strides = [1, 1]} : vector<16x256xf32> to vector<16x32xf32>
    %55 = vector.extract_strided_slice %20 {offsets = [0, 64], sizes = [16, 32], strides = [1, 1]} : vector<16x256xf32> to vector<16x32xf32>
    %cst_24 = arith.constant dense<0.000000e+00> : vector<16x16xf32>
    %56 = tpu.matmul %53, %54, %cst_24 {dimension_numbers = #tpu.dot_dimension_numbers<[1], [1], [0], [0], [0, 0, 1, 0], [], []>} : vector<16x32xf32>, vector<16x32xf32>, vector<16x16xf32> -> vector<16x16xf32>
    %cst_25 = arith.constant 0.176776692 : f32
    %57 = vector.broadcast %cst_25 : f32 to vector<16x16xf32>
    %58 = arith.mulf %56, %57 : vector<16x16xf32>
    %cst_26 = arith.constant dense<0xFF800000> : vector<16xf32>
    %59 = vector.multi_reduction <maximumf>, %58, %cst_26 [1] : vector<16x16xf32> to vector<16xf32>
    %60 = vector.shape_cast %59 : vector<16xf32> to vector<16x1xf32>
    %61 = vector.broadcast %60 : vector<16x1xf32> to vector<16x16xf32>
    %62 = arith.subf %58, %61 : vector<16x16xf32>
    %63 = math.exp %62 : vector<16x16xf32>
    %cst_27 = arith.constant dense<0.000000e+00> : vector<16xf32>
    %64 = vector.multi_reduction <add>, %63, %cst_27 [1] : vector<16x16xf32> to vector<16xf32>
    %65 = vector.shape_cast %64 : vector<16xf32> to vector<16x1xf32>
    %66 = vector.broadcast %65 : vector<16x1xf32> to vector<16x16xf32>
    %67 = arith.divf %63, %66 : vector<16x16xf32>
    %cst_28 = arith.constant dense<0.000000e+00> : vector<16x32xf32>
    %68 = tpu.matmul %67, %55, %cst_28 {dimension_numbers = #tpu.dot_dimension_numbers<[1], [0], [0], [1], [0, 0, 1, 1], [], []>} : vector<16x16xf32>, vector<16x32xf32>, vector<16x32xf32> -> vector<16x32xf32>
    %69 = vector.extract_strided_slice %18 {offsets = [0, 96], sizes = [16, 32], strides = [1, 1]} : vector<16x256xf32> to vector<16x32xf32>
    %70 = vector.extract_strided_slice %19 {offsets = [0, 96], sizes = [16, 32], strides = [1, 1]} : vector<16x256xf32> to vector<16x32xf32>
    %71 = vector.extract_strided_slice %20 {offsets = [0, 96], sizes = [16, 32], strides = [1, 1]} : vector<16x256xf32> to vector<16x32xf32>
    %cst_29 = arith.constant dense<0.000000e+00> : vector<16x16xf32>
    %72 = tpu.matmul %69, %70, %cst_29 {dimension_numbers = #tpu.dot_dimension_numbers<[1], [1], [0], [0], [0, 0, 1, 0], [], []>} : vector<16x32xf32>, vector<16x32xf32>, vector<16x16xf32> -> vector<16x16xf32>
    %cst_30 = arith.constant 0.176776692 : f32
    %73 = vector.broadcast %cst_30 : f32 to vector<16x16xf32>
    %74 = arith.mulf %72, %73 : vector<16x16xf32>
    %cst_31 = arith.constant dense<0xFF800000> : vector<16xf32>
    %75 = vector.multi_reduction <maximumf>, %74, %cst_31 [1] : vector<16x16xf32> to vector<16xf32>
    %76 = vector.shape_cast %75 : vector<16xf32> to vector<16x1xf32>
    %77 = vector.broadcast %76 : vector<16x1xf32> to vector<16x16xf32>
    %78 = arith.subf %74, %77 : vector<16x16xf32>
    %79 = math.exp %78 : vector<16x16xf32>
    %cst_32 = arith.constant dense<0.000000e+00> : vector<16xf32>
    %80 = vector.multi_reduction <add>, %79, %cst_32 [1] : vector<16x16xf32> to vector<16xf32>
    %81 = vector.shape_cast %80 : vector<16xf32> to vector<16x1xf32>
    %82 = vector.broadcast %81 : vector<16x1xf32> to vector<16x16xf32>
    %83 = arith.divf %79, %82 : vector<16x16xf32>
    %cst_33 = arith.constant dense<0.000000e+00> : vector<16x32xf32>
    %84 = tpu.matmul %83, %71, %cst_33 {dimension_numbers = #tpu.dot_dimension_numbers<[1], [0], [0], [1], [0, 0, 1, 1], [], []>} : vector<16x16xf32>, vector<16x32xf32>, vector<16x32xf32> -> vector<16x32xf32>
    %85 = vector.extract_strided_slice %18 {offsets = [0, 128], sizes = [16, 32], strides = [1, 1]} : vector<16x256xf32> to vector<16x32xf32>
    %86 = vector.extract_strided_slice %19 {offsets = [0, 128], sizes = [16, 32], strides = [1, 1]} : vector<16x256xf32> to vector<16x32xf32>
    %87 = vector.extract_strided_slice %20 {offsets = [0, 128], sizes = [16, 32], strides = [1, 1]} : vector<16x256xf32> to vector<16x32xf32>
    %cst_34 = arith.constant dense<0.000000e+00> : vector<16x16xf32>
    %88 = tpu.matmul %85, %86, %cst_34 {dimension_numbers = #tpu.dot_dimension_numbers<[1], [1], [0], [0], [0, 0, 1, 0], [], []>} : vector<16x32xf32>, vector<16x32xf32>, vector<16x16xf32> -> vector<16x16xf32>
    %cst_35 = arith.constant 0.176776692 : f32
    %89 = vector.broadcast %cst_35 : f32 to vector<16x16xf32>
    %90 = arith.mulf %88, %89 : vector<16x16xf32>
    %cst_36 = arith.constant dense<0xFF800000> : vector<16xf32>
    %91 = vector.multi_reduction <maximumf>, %90, %cst_36 [1] : vector<16x16xf32> to vector<16xf32>
    %92 = vector.shape_cast %91 : vector<16xf32> to vector<16x1xf32>
    %93 = vector.broadcast %92 : vector<16x1xf32> to vector<16x16xf32>
    %94 = arith.subf %90, %93 : vector<16x16xf32>
    %95 = math.exp %94 : vector<16x16xf32>
    %cst_37 = arith.constant dense<0.000000e+00> : vector<16xf32>
    %96 = vector.multi_reduction <add>, %95, %cst_37 [1] : vector<16x16xf32> to vector<16xf32>
    %97 = vector.shape_cast %96 : vector<16xf32> to vector<16x1xf32>
    %98 = vector.broadcast %97 : vector<16x1xf32> to vector<16x16xf32>
    %99 = arith.divf %95, %98 : vector<16x16xf32>
    %cst_38 = arith.constant dense<0.000000e+00> : vector<16x32xf32>
    %100 = tpu.matmul %99, %87, %cst_38 {dimension_numbers = #tpu.dot_dimension_numbers<[1], [0], [0], [1], [0, 0, 1, 1], [], []>} : vector<16x16xf32>, vector<16x32xf32>, vector<16x32xf32> -> vector<16x32xf32>
    %101 = vector.extract_strided_slice %18 {offsets = [0, 160], sizes = [16, 32], strides = [1, 1]} : vector<16x256xf32> to vector<16x32xf32>
    %102 = vector.extract_strided_slice %19 {offsets = [0, 160], sizes = [16, 32], strides = [1, 1]} : vector<16x256xf32> to vector<16x32xf32>
    %103 = vector.extract_strided_slice %20 {offsets = [0, 160], sizes = [16, 32], strides = [1, 1]} : vector<16x256xf32> to vector<16x32xf32>
    %cst_39 = arith.constant dense<0.000000e+00> : vector<16x16xf32>
    %104 = tpu.matmul %101, %102, %cst_39 {dimension_numbers = #tpu.dot_dimension_numbers<[1], [1], [0], [0], [0, 0, 1, 0], [], []>} : vector<16x32xf32>, vector<16x32xf32>, vector<16x16xf32> -> vector<16x16xf32>
    %cst_40 = arith.constant 0.176776692 : f32
    %105 = vector.broadcast %cst_40 : f32 to vector<16x16xf32>
    %106 = arith.mulf %104, %105 : vector<16x16xf32>
    %cst_41 = arith.constant dense<0xFF800000> : vector<16xf32>
    %107 = vector.multi_reduction <maximumf>, %106, %cst_41 [1] : vector<16x16xf32> to vector<16xf32>
    %108 = vector.shape_cast %107 : vector<16xf32> to vector<16x1xf32>
    %109 = vector.broadcast %108 : vector<16x1xf32> to vector<16x16xf32>
    %110 = arith.subf %106, %109 : vector<16x16xf32>
    %111 = math.exp %110 : vector<16x16xf32>
    %cst_42 = arith.constant dense<0.000000e+00> : vector<16xf32>
    %112 = vector.multi_reduction <add>, %111, %cst_42 [1] : vector<16x16xf32> to vector<16xf32>
    %113 = vector.shape_cast %112 : vector<16xf32> to vector<16x1xf32>
    %114 = vector.broadcast %113 : vector<16x1xf32> to vector<16x16xf32>
    %115 = arith.divf %111, %114 : vector<16x16xf32>
    %cst_43 = arith.constant dense<0.000000e+00> : vector<16x32xf32>
    %116 = tpu.matmul %115, %103, %cst_43 {dimension_numbers = #tpu.dot_dimension_numbers<[1], [0], [0], [1], [0, 0, 1, 1], [], []>} : vector<16x16xf32>, vector<16x32xf32>, vector<16x32xf32> -> vector<16x32xf32>
    %117 = vector.extract_strided_slice %18 {offsets = [0, 192], sizes = [16, 32], strides = [1, 1]} : vector<16x256xf32> to vector<16x32xf32>
    %118 = vector.extract_strided_slice %19 {offsets = [0, 192], sizes = [16, 32], strides = [1, 1]} : vector<16x256xf32> to vector<16x32xf32>
    %119 = vector.extract_strided_slice %20 {offsets = [0, 192], sizes = [16, 32], strides = [1, 1]} : vector<16x256xf32> to vector<16x32xf32>
    %cst_44 = arith.constant dense<0.000000e+00> : vector<16x16xf32>
    %120 = tpu.matmul %117, %118, %cst_44 {dimension_numbers = #tpu.dot_dimension_numbers<[1], [1], [0], [0], [0, 0, 1, 0], [], []>} : vector<16x32xf32>, vector<16x32xf32>, vector<16x16xf32> -> vector<16x16xf32>
    %cst_45 = arith.constant 0.176776692 : f32
    %121 = vector.broadcast %cst_45 : f32 to vector<16x16xf32>
    %122 = arith.mulf %120, %121 : vector<16x16xf32>
    %cst_46 = arith.constant dense<0xFF800000> : vector<16xf32>
    %123 = vector.multi_reduction <maximumf>, %122, %cst_46 [1] : vector<16x16xf32> to vector<16xf32>
    %124 = vector.shape_cast %123 : vector<16xf32> to vector<16x1xf32>
    %125 = vector.broadcast %124 : vector<16x1xf32> to vector<16x16xf32>
    %126 = arith.subf %122, %125 : vector<16x16xf32>
    %127 = math.exp %126 : vector<16x16xf32>
    %cst_47 = arith.constant dense<0.000000e+00> : vector<16xf32>
    %128 = vector.multi_reduction <add>, %127, %cst_47 [1] : vector<16x16xf32> to vector<16xf32>
    %129 = vector.shape_cast %128 : vector<16xf32> to vector<16x1xf32>
    %130 = vector.broadcast %129 : vector<16x1xf32> to vector<16x16xf32>
    %131 = arith.divf %127, %130 : vector<16x16xf32>
    %cst_48 = arith.constant dense<0.000000e+00> : vector<16x32xf32>
    %132 = tpu.matmul %131, %119, %cst_48 {dimension_numbers = #tpu.dot_dimension_numbers<[1], [0], [0], [1], [0, 0, 1, 1], [], []>} : vector<16x16xf32>, vector<16x32xf32>, vector<16x32xf32> -> vector<16x32xf32>
    %133 = vector.extract_strided_slice %18 {offsets = [0, 224], sizes = [16, 32], strides = [1, 1]} : vector<16x256xf32> to vector<16x32xf32>
    %134 = vector.extract_strided_slice %19 {offsets = [0, 224], sizes = [16, 32], strides = [1, 1]} : vector<16x256xf32> to vector<16x32xf32>
    %135 = vector.extract_strided_slice %20 {offsets = [0, 224], sizes = [16, 32], strides = [1, 1]} : vector<16x256xf32> to vector<16x32xf32>
    %cst_49 = arith.constant dense<0.000000e+00> : vector<16x16xf32>
    %136 = tpu.matmul %133, %134, %cst_49 {dimension_numbers = #tpu.dot_dimension_numbers<[1], [1], [0], [0], [0, 0, 1, 0], [], []>} : vector<16x32xf32>, vector<16x32xf32>, vector<16x16xf32> -> vector<16x16xf32>
    %cst_50 = arith.constant 0.176776692 : f32
    %137 = vector.broadcast %cst_50 : f32 to vector<16x16xf32>
    %138 = arith.mulf %136, %137 : vector<16x16xf32>
    %cst_51 = arith.constant dense<0xFF800000> : vector<16xf32>
    %139 = vector.multi_reduction <maximumf>, %138, %cst_51 [1] : vector<16x16xf32> to vector<16xf32>
    %140 = vector.shape_cast %139 : vector<16xf32> to vector<16x1xf32>
    %141 = vector.broadcast %140 : vector<16x1xf32> to vector<16x16xf32>
    %142 = arith.subf %138, %141 : vector<16x16xf32>
    %143 = math.exp %142 : vector<16x16xf32>
    %cst_52 = arith.constant dense<0.000000e+00> : vector<16xf32>
    %144 = vector.multi_reduction <add>, %143, %cst_52 [1] : vector<16x16xf32> to vector<16xf32>
    %145 = vector.shape_cast %144 : vector<16xf32> to vector<16x1xf32>
    %146 = vector.broadcast %145 : vector<16x1xf32> to vector<16x16xf32>
    %147 = arith.divf %143, %146 : vector<16x16xf32>
    %cst_53 = arith.constant dense<0.000000e+00> : vector<16x32xf32>
    %148 = tpu.matmul %147, %135, %cst_53 {dimension_numbers = #tpu.dot_dimension_numbers<[1], [0], [0], [1], [0, 0, 1, 1], [], []>} : vector<16x16xf32>, vector<16x32xf32>, vector<16x32xf32> -> vector<16x32xf32>
    %149 = tpu.concatenate %36, %52, %68, %84, %100, %116, %132, %148 in 1 : vector<16x32xf32>, vector<16x32xf32>, vector<16x32xf32>, vector<16x32xf32>, vector<16x32xf32>, vector<16x32xf32>, vector<16x32xf32>, vector<16x32xf32> -> vector<16x256xf32>
    %c0_54 = arith.constant 0 : index
    %c0_55 = arith.constant 0 : index
    %c0_56 = arith.constant 0 : index
    %150 = vector.load %arg6[%c0_54, %c0_55, %c0_56] : memref<2x256x256xf32, #tpu.memory_space<vmem>>, vector<1x256x256xf32>
    %151 = vector.shape_cast %150 : vector<1x256x256xf32> to vector<256x256xf32>
    %cst_57 = arith.constant dense<0.000000e+00> : vector<16x256xf32>
    %152 = tpu.matmul %149, %151, %cst_57 {dimension_numbers = #tpu.dot_dimension_numbers<[1], [0], [0], [1], [0, 0, 1, 1], [], []>} : vector<16x256xf32>, vector<256x256xf32>, vector<16x256xf32> -> vector<16x256xf32>
    %c0_58 = arith.constant 0 : index
    %c0_59 = arith.constant 0 : index
    %c0_60 = arith.constant 0 : index
    %153 = vector.load %arg7[%c0_58, %c0_59, %c0_60] : memref<2x1x256xf32, #tpu.memory_space<vmem>>, vector<1x1x256xf32>
    %154 = vector.shape_cast %153 : vector<1x1x256xf32> to vector<1x256xf32>
    %155 = vector.broadcast %154 : vector<1x256xf32> to vector<16x256xf32>
    %156 = arith.addf %152, %155 : vector<16x256xf32>
    %157 = arith.addf %10, %156 : vector<16x256xf32>
    %c0_61 = arith.constant 0 : index
    %c0_62 = arith.constant 0 : index
    %c0_63 = arith.constant 0 : index
    %158 = vector.load %arg8[%c0_61, %c0_62, %c0_63] : memref<2x1x256xf32, #tpu.memory_space<vmem>>, vector<1x1x256xf32>
    %159 = vector.shape_cast %158 : vector<1x1x256xf32> to vector<1x256xf32>
    %c0_64 = arith.constant 0 : index
    %c0_65 = arith.constant 0 : index
    %c0_66 = arith.constant 0 : index
    %160 = vector.load %arg9[%c0_64, %c0_65, %c0_66] : memref<2x1x256xf32, #tpu.memory_space<vmem>>, vector<1x1x256xf32>
    %161 = vector.shape_cast %160 : vector<1x1x256xf32> to vector<1x256xf32>
    %cst_67 = arith.constant dense<0.000000e+00> : vector<16xf32>
    %162 = vector.multi_reduction <add>, %157, %cst_67 [1] : vector<16x256xf32> to vector<16xf32>
    %163 = vector.shape_cast %162 : vector<16xf32> to vector<16x1xf32>
    %cst_68 = arith.constant 2.560000e+02 : f32
    %164 = vector.broadcast %cst_68 : f32 to vector<16x1xf32>
    %165 = arith.divf %163, %164 : vector<16x1xf32>
    %166 = vector.broadcast %165 : vector<16x1xf32> to vector<16x256xf32>
    %167 = arith.subf %157, %166 : vector<16x256xf32>
    %168 = arith.mulf %167, %167 : vector<16x256xf32>
    %cst_69 = arith.constant dense<0.000000e+00> : vector<16xf32>
    %169 = vector.multi_reduction <add>, %168, %cst_69 [1] : vector<16x256xf32> to vector<16xf32>
    %170 = vector.shape_cast %169 : vector<16xf32> to vector<16x1xf32>
    %cst_70 = arith.constant 2.560000e+02 : f32
    %171 = vector.broadcast %cst_70 : f32 to vector<16x1xf32>
    %172 = arith.divf %170, %171 : vector<16x1xf32>
    %cst_71 = arith.constant 9.99999974E-6 : f32
    %173 = vector.broadcast %cst_71 : f32 to vector<16x1xf32>
    %174 = arith.addf %172, %173 : vector<16x1xf32>
    %175 = math.rsqrt %174 : vector<16x1xf32>
    %176 = vector.broadcast %175 : vector<16x1xf32> to vector<16x256xf32>
    %177 = arith.mulf %167, %176 : vector<16x256xf32>
    %178 = vector.broadcast %159 : vector<1x256xf32> to vector<16x256xf32>
    %179 = arith.mulf %177, %178 : vector<16x256xf32>
    %180 = vector.broadcast %161 : vector<1x256xf32> to vector<16x256xf32>
    %181 = arith.addf %179, %180 : vector<16x256xf32>
    %c0_72 = arith.constant 0 : index
    %c0_73 = arith.constant 0 : index
    %c0_74 = arith.constant 0 : index
    %182 = vector.load %arg10[%c0_72, %c0_73, %c0_74] : memref<2x256x1024xf32, #tpu.memory_space<vmem>>, vector<1x256x1024xf32>
    %183 = vector.shape_cast %182 : vector<1x256x1024xf32> to vector<256x1024xf32>
    %cst_75 = arith.constant dense<0.000000e+00> : vector<16x1024xf32>
    %184 = tpu.matmul %181, %183, %cst_75 {dimension_numbers = #tpu.dot_dimension_numbers<[1], [0], [0], [1], [0, 0, 1, 1], [], []>} : vector<16x256xf32>, vector<256x1024xf32>, vector<16x1024xf32> -> vector<16x1024xf32>
    %c0_76 = arith.constant 0 : index
    %c0_77 = arith.constant 0 : index
    %c0_78 = arith.constant 0 : index
    %185 = vector.load %arg11[%c0_76, %c0_77, %c0_78] : memref<2x1x1024xf32, #tpu.memory_space<vmem>>, vector<1x1x1024xf32>
    %186 = vector.shape_cast %185 : vector<1x1x1024xf32> to vector<1x1024xf32>
    %187 = vector.broadcast %186 : vector<1x1024xf32> to vector<16x1024xf32>
    %188 = arith.addf %184, %187 : vector<16x1024xf32>
    %cst_79 = arith.constant 0.000000e+00 : f32
    %189 = vector.broadcast %cst_79 : f32 to vector<16x1024xf32>
    %190 = arith.maximumf %188, %189 : vector<16x1024xf32>
    %c0_80 = arith.constant 0 : index
    %c0_81 = arith.constant 0 : index
    %c0_82 = arith.constant 0 : index
    %191 = vector.load %arg12[%c0_80, %c0_81, %c0_82] : memref<2x1024x256xf32, #tpu.memory_space<vmem>>, vector<1x1024x256xf32>
    %192 = vector.shape_cast %191 : vector<1x1024x256xf32> to vector<1024x256xf32>
    %cst_83 = arith.constant dense<0.000000e+00> : vector<16x256xf32>
    %193 = tpu.matmul %190, %192, %cst_83 {dimension_numbers = #tpu.dot_dimension_numbers<[1], [0], [0], [1], [0, 0, 1, 1], [], []>} : vector<16x1024xf32>, vector<1024x256xf32>, vector<16x256xf32> -> vector<16x256xf32>
    %c0_84 = arith.constant 0 : index
    %c0_85 = arith.constant 0 : index
    %c0_86 = arith.constant 0 : index
    %194 = vector.load %arg13[%c0_84, %c0_85, %c0_86] : memref<2x1x256xf32, #tpu.memory_space<vmem>>, vector<1x1x256xf32>
    %195 = vector.shape_cast %194 : vector<1x1x256xf32> to vector<1x256xf32>
    %196 = vector.broadcast %195 : vector<1x256xf32> to vector<16x256xf32>
    %197 = arith.addf %193, %196 : vector<16x256xf32>
    %198 = arith.addf %181, %197 : vector<16x256xf32>
    %c0_87 = arith.constant 0 : index
    %c0_88 = arith.constant 0 : index
    %c0_89 = arith.constant 0 : index
    %199 = vector.load %arg14[%c0_87, %c0_88, %c0_89] : memref<2x1x256xf32, #tpu.memory_space<vmem>>, vector<1x1x256xf32>
    %200 = vector.shape_cast %199 : vector<1x1x256xf32> to vector<1x256xf32>
    %c0_90 = arith.constant 0 : index
    %c0_91 = arith.constant 0 : index
    %c0_92 = arith.constant 0 : index
    %201 = vector.load %arg15[%c0_90, %c0_91, %c0_92] : memref<2x1x256xf32, #tpu.memory_space<vmem>>, vector<1x1x256xf32>
    %202 = vector.shape_cast %201 : vector<1x1x256xf32> to vector<1x256xf32>
    %cst_93 = arith.constant dense<0.000000e+00> : vector<16xf32>
    %203 = vector.multi_reduction <add>, %198, %cst_93 [1] : vector<16x256xf32> to vector<16xf32>
    %204 = vector.shape_cast %203 : vector<16xf32> to vector<16x1xf32>
    %cst_94 = arith.constant 2.560000e+02 : f32
    %205 = vector.broadcast %cst_94 : f32 to vector<16x1xf32>
    %206 = arith.divf %204, %205 : vector<16x1xf32>
    %207 = vector.broadcast %206 : vector<16x1xf32> to vector<16x256xf32>
    %208 = arith.subf %198, %207 : vector<16x256xf32>
    %209 = arith.mulf %208, %208 : vector<16x256xf32>
    %cst_95 = arith.constant dense<0.000000e+00> : vector<16xf32>
    %210 = vector.multi_reduction <add>, %209, %cst_95 [1] : vector<16x256xf32> to vector<16xf32>
    %211 = vector.shape_cast %210 : vector<16xf32> to vector<16x1xf32>
    %cst_96 = arith.constant 2.560000e+02 : f32
    %212 = vector.broadcast %cst_96 : f32 to vector<16x1xf32>
    %213 = arith.divf %211, %212 : vector<16x1xf32>
    %cst_97 = arith.constant 9.99999974E-6 : f32
    %214 = vector.broadcast %cst_97 : f32 to vector<16x1xf32>
    %215 = arith.addf %213, %214 : vector<16x1xf32>
    %216 = math.rsqrt %215 : vector<16x1xf32>
    %217 = vector.broadcast %216 : vector<16x1xf32> to vector<16x256xf32>
    %218 = arith.mulf %208, %217 : vector<16x256xf32>
    %219 = vector.broadcast %200 : vector<1x256xf32> to vector<16x256xf32>
    %220 = arith.mulf %218, %219 : vector<16x256xf32>
    %221 = vector.broadcast %202 : vector<1x256xf32> to vector<16x256xf32>
    %222 = arith.addf %220, %221 : vector<16x256xf32>
    %c1 = arith.constant 1 : index
    %c0_98 = arith.constant 0 : index
    %c0_99 = arith.constant 0 : index
    %223 = vector.load %arg4[%c1, %c0_98, %c0_99] : memref<2x256x768xf32, #tpu.memory_space<vmem>>, vector<1x256x768xf32>
    %224 = vector.shape_cast %223 : vector<1x256x768xf32> to vector<256x768xf32>
    %cst_100 = arith.constant dense<0.000000e+00> : vector<16x768xf32>
    %225 = tpu.matmul %222, %224, %cst_100 {dimension_numbers = #tpu.dot_dimension_numbers<[1], [0], [0], [1], [0, 0, 1, 1], [], []>} : vector<16x256xf32>, vector<256x768xf32>, vector<16x768xf32> -> vector<16x768xf32>
    %c1_101 = arith.constant 1 : index
    %c0_102 = arith.constant 0 : index
    %c0_103 = arith.constant 0 : index
    %226 = vector.load %arg5[%c1_101, %c0_102, %c0_103] : memref<2x1x768xf32, #tpu.memory_space<vmem>>, vector<1x1x768xf32>
    %227 = vector.shape_cast %226 : vector<1x1x768xf32> to vector<1x768xf32>
    %228 = vector.broadcast %227 : vector<1x768xf32> to vector<16x768xf32>
    %229 = arith.addf %225, %228 : vector<16x768xf32>
    %230 = vector.extract_strided_slice %229 {offsets = [0, 0], sizes = [16, 256], strides = [1, 1]} : vector<16x768xf32> to vector<16x256xf32>
    %231 = vector.extract_strided_slice %229 {offsets = [0, 256], sizes = [16, 256], strides = [1, 1]} : vector<16x768xf32> to vector<16x256xf32>
    %232 = vector.extract_strided_slice %229 {offsets = [0, 512], sizes = [16, 256], strides = [1, 1]} : vector<16x768xf32> to vector<16x256xf32>
    %233 = vector.extract_strided_slice %230 {offsets = [0, 0], sizes = [16, 32], strides = [1, 1]} : vector<16x256xf32> to vector<16x32xf32>
    %234 = vector.extract_strided_slice %231 {offsets = [0, 0], sizes = [16, 32], strides = [1, 1]} : vector<16x256xf32> to vector<16x32xf32>
    %235 = vector.extract_strided_slice %232 {offsets = [0, 0], sizes = [16, 32], strides = [1, 1]} : vector<16x256xf32> to vector<16x32xf32>
    %cst_104 = arith.constant dense<0.000000e+00> : vector<16x16xf32>
    %236 = tpu.matmul %233, %234, %cst_104 {dimension_numbers = #tpu.dot_dimension_numbers<[1], [1], [0], [0], [0, 0, 1, 0], [], []>} : vector<16x32xf32>, vector<16x32xf32>, vector<16x16xf32> -> vector<16x16xf32>
    %cst_105 = arith.constant 0.176776692 : f32
    %237 = vector.broadcast %cst_105 : f32 to vector<16x16xf32>
    %238 = arith.mulf %236, %237 : vector<16x16xf32>
    %cst_106 = arith.constant dense<0xFF800000> : vector<16xf32>
    %239 = vector.multi_reduction <maximumf>, %238, %cst_106 [1] : vector<16x16xf32> to vector<16xf32>
    %240 = vector.shape_cast %239 : vector<16xf32> to vector<16x1xf32>
    %241 = vector.broadcast %240 : vector<16x1xf32> to vector<16x16xf32>
    %242 = arith.subf %238, %241 : vector<16x16xf32>
    %243 = math.exp %242 : vector<16x16xf32>
    %cst_107 = arith.constant dense<0.000000e+00> : vector<16xf32>
    %244 = vector.multi_reduction <add>, %243, %cst_107 [1] : vector<16x16xf32> to vector<16xf32>
    %245 = vector.shape_cast %244 : vector<16xf32> to vector<16x1xf32>
    %246 = vector.broadcast %245 : vector<16x1xf32> to vector<16x16xf32>
    %247 = arith.divf %243, %246 : vector<16x16xf32>
    %cst_108 = arith.constant dense<0.000000e+00> : vector<16x32xf32>
    %248 = tpu.matmul %247, %235, %cst_108 {dimension_numbers = #tpu.dot_dimension_numbers<[1], [0], [0], [1], [0, 0, 1, 1], [], []>} : vector<16x16xf32>, vector<16x32xf32>, vector<16x32xf32> -> vector<16x32xf32>
    %249 = vector.extract_strided_slice %230 {offsets = [0, 32], sizes = [16, 32], strides = [1, 1]} : vector<16x256xf32> to vector<16x32xf32>
    %250 = vector.extract_strided_slice %231 {offsets = [0, 32], sizes = [16, 32], strides = [1, 1]} : vector<16x256xf32> to vector<16x32xf32>
    %251 = vector.extract_strided_slice %232 {offsets = [0, 32], sizes = [16, 32], strides = [1, 1]} : vector<16x256xf32> to vector<16x32xf32>
    %cst_109 = arith.constant dense<0.000000e+00> : vector<16x16xf32>
    %252 = tpu.matmul %249, %250, %cst_109 {dimension_numbers = #tpu.dot_dimension_numbers<[1], [1], [0], [0], [0, 0, 1, 0], [], []>} : vector<16x32xf32>, vector<16x32xf32>, vector<16x16xf32> -> vector<16x16xf32>
    %cst_110 = arith.constant 0.176776692 : f32
    %253 = vector.broadcast %cst_110 : f32 to vector<16x16xf32>
    %254 = arith.mulf %252, %253 : vector<16x16xf32>
    %cst_111 = arith.constant dense<0xFF800000> : vector<16xf32>
    %255 = vector.multi_reduction <maximumf>, %254, %cst_111 [1] : vector<16x16xf32> to vector<16xf32>
    %256 = vector.shape_cast %255 : vector<16xf32> to vector<16x1xf32>
    %257 = vector.broadcast %256 : vector<16x1xf32> to vector<16x16xf32>
    %258 = arith.subf %254, %257 : vector<16x16xf32>
    %259 = math.exp %258 : vector<16x16xf32>
    %cst_112 = arith.constant dense<0.000000e+00> : vector<16xf32>
    %260 = vector.multi_reduction <add>, %259, %cst_112 [1] : vector<16x16xf32> to vector<16xf32>
    %261 = vector.shape_cast %260 : vector<16xf32> to vector<16x1xf32>
    %262 = vector.broadcast %261 : vector<16x1xf32> to vector<16x16xf32>
    %263 = arith.divf %259, %262 : vector<16x16xf32>
    %cst_113 = arith.constant dense<0.000000e+00> : vector<16x32xf32>
    %264 = tpu.matmul %263, %251, %cst_113 {dimension_numbers = #tpu.dot_dimension_numbers<[1], [0], [0], [1], [0, 0, 1, 1], [], []>} : vector<16x16xf32>, vector<16x32xf32>, vector<16x32xf32> -> vector<16x32xf32>
    %265 = vector.extract_strided_slice %230 {offsets = [0, 64], sizes = [16, 32], strides = [1, 1]} : vector<16x256xf32> to vector<16x32xf32>
    %266 = vector.extract_strided_slice %231 {offsets = [0, 64], sizes = [16, 32], strides = [1, 1]} : vector<16x256xf32> to vector<16x32xf32>
    %267 = vector.extract_strided_slice %232 {offsets = [0, 64], sizes = [16, 32], strides = [1, 1]} : vector<16x256xf32> to vector<16x32xf32>
    %cst_114 = arith.constant dense<0.000000e+00> : vector<16x16xf32>
    %268 = tpu.matmul %265, %266, %cst_114 {dimension_numbers = #tpu.dot_dimension_numbers<[1], [1], [0], [0], [0, 0, 1, 0], [], []>} : vector<16x32xf32>, vector<16x32xf32>, vector<16x16xf32> -> vector<16x16xf32>
    %cst_115 = arith.constant 0.176776692 : f32
    %269 = vector.broadcast %cst_115 : f32 to vector<16x16xf32>
    %270 = arith.mulf %268, %269 : vector<16x16xf32>
    %cst_116 = arith.constant dense<0xFF800000> : vector<16xf32>
    %271 = vector.multi_reduction <maximumf>, %270, %cst_116 [1] : vector<16x16xf32> to vector<16xf32>
    %272 = vector.shape_cast %271 : vector<16xf32> to vector<16x1xf32>
    %273 = vector.broadcast %272 : vector<16x1xf32> to vector<16x16xf32>
    %274 = arith.subf %270, %273 : vector<16x16xf32>
    %275 = math.exp %274 : vector<16x16xf32>
    %cst_117 = arith.constant dense<0.000000e+00> : vector<16xf32>
    %276 = vector.multi_reduction <add>, %275, %cst_117 [1] : vector<16x16xf32> to vector<16xf32>
    %277 = vector.shape_cast %276 : vector<16xf32> to vector<16x1xf32>
    %278 = vector.broadcast %277 : vector<16x1xf32> to vector<16x16xf32>
    %279 = arith.divf %275, %278 : vector<16x16xf32>
    %cst_118 = arith.constant dense<0.000000e+00> : vector<16x32xf32>
    %280 = tpu.matmul %279, %267, %cst_118 {dimension_numbers = #tpu.dot_dimension_numbers<[1], [0], [0], [1], [0, 0, 1, 1], [], []>} : vector<16x16xf32>, vector<16x32xf32>, vector<16x32xf32> -> vector<16x32xf32>
    %281 = vector.extract_strided_slice %230 {offsets = [0, 96], sizes = [16, 32], strides = [1, 1]} : vector<16x256xf32> to vector<16x32xf32>
    %282 = vector.extract_strided_slice %231 {offsets = [0, 96], sizes = [16, 32], strides = [1, 1]} : vector<16x256xf32> to vector<16x32xf32>
    %283 = vector.extract_strided_slice %232 {offsets = [0, 96], sizes = [16, 32], strides = [1, 1]} : vector<16x256xf32> to vector<16x32xf32>
    %cst_119 = arith.constant dense<0.000000e+00> : vector<16x16xf32>
    %284 = tpu.matmul %281, %282, %cst_119 {dimension_numbers = #tpu.dot_dimension_numbers<[1], [1], [0], [0], [0, 0, 1, 0], [], []>} : vector<16x32xf32>, vector<16x32xf32>, vector<16x16xf32> -> vector<16x16xf32>
    %cst_120 = arith.constant 0.176776692 : f32
    %285 = vector.broadcast %cst_120 : f32 to vector<16x16xf32>
    %286 = arith.mulf %284, %285 : vector<16x16xf32>
    %cst_121 = arith.constant dense<0xFF800000> : vector<16xf32>
    %287 = vector.multi_reduction <maximumf>, %286, %cst_121 [1] : vector<16x16xf32> to vector<16xf32>
    %288 = vector.shape_cast %287 : vector<16xf32> to vector<16x1xf32>
    %289 = vector.broadcast %288 : vector<16x1xf32> to vector<16x16xf32>
    %290 = arith.subf %286, %289 : vector<16x16xf32>
    %291 = math.exp %290 : vector<16x16xf32>
    %cst_122 = arith.constant dense<0.000000e+00> : vector<16xf32>
    %292 = vector.multi_reduction <add>, %291, %cst_122 [1] : vector<16x16xf32> to vector<16xf32>
    %293 = vector.shape_cast %292 : vector<16xf32> to vector<16x1xf32>
    %294 = vector.broadcast %293 : vector<16x1xf32> to vector<16x16xf32>
    %295 = arith.divf %291, %294 : vector<16x16xf32>
    %cst_123 = arith.constant dense<0.000000e+00> : vector<16x32xf32>
    %296 = tpu.matmul %295, %283, %cst_123 {dimension_numbers = #tpu.dot_dimension_numbers<[1], [0], [0], [1], [0, 0, 1, 1], [], []>} : vector<16x16xf32>, vector<16x32xf32>, vector<16x32xf32> -> vector<16x32xf32>
    %297 = vector.extract_strided_slice %230 {offsets = [0, 128], sizes = [16, 32], strides = [1, 1]} : vector<16x256xf32> to vector<16x32xf32>
    %298 = vector.extract_strided_slice %231 {offsets = [0, 128], sizes = [16, 32], strides = [1, 1]} : vector<16x256xf32> to vector<16x32xf32>
    %299 = vector.extract_strided_slice %232 {offsets = [0, 128], sizes = [16, 32], strides = [1, 1]} : vector<16x256xf32> to vector<16x32xf32>
    %cst_124 = arith.constant dense<0.000000e+00> : vector<16x16xf32>
    %300 = tpu.matmul %297, %298, %cst_124 {dimension_numbers = #tpu.dot_dimension_numbers<[1], [1], [0], [0], [0, 0, 1, 0], [], []>} : vector<16x32xf32>, vector<16x32xf32>, vector<16x16xf32> -> vector<16x16xf32>
    %cst_125 = arith.constant 0.176776692 : f32
    %301 = vector.broadcast %cst_125 : f32 to vector<16x16xf32>
    %302 = arith.mulf %300, %301 : vector<16x16xf32>
    %cst_126 = arith.constant dense<0xFF800000> : vector<16xf32>
    %303 = vector.multi_reduction <maximumf>, %302, %cst_126 [1] : vector<16x16xf32> to vector<16xf32>
    %304 = vector.shape_cast %303 : vector<16xf32> to vector<16x1xf32>
    %305 = vector.broadcast %304 : vector<16x1xf32> to vector<16x16xf32>
    %306 = arith.subf %302, %305 : vector<16x16xf32>
    %307 = math.exp %306 : vector<16x16xf32>
    %cst_127 = arith.constant dense<0.000000e+00> : vector<16xf32>
    %308 = vector.multi_reduction <add>, %307, %cst_127 [1] : vector<16x16xf32> to vector<16xf32>
    %309 = vector.shape_cast %308 : vector<16xf32> to vector<16x1xf32>
    %310 = vector.broadcast %309 : vector<16x1xf32> to vector<16x16xf32>
    %311 = arith.divf %307, %310 : vector<16x16xf32>
    %cst_128 = arith.constant dense<0.000000e+00> : vector<16x32xf32>
    %312 = tpu.matmul %311, %299, %cst_128 {dimension_numbers = #tpu.dot_dimension_numbers<[1], [0], [0], [1], [0, 0, 1, 1], [], []>} : vector<16x16xf32>, vector<16x32xf32>, vector<16x32xf32> -> vector<16x32xf32>
    %313 = vector.extract_strided_slice %230 {offsets = [0, 160], sizes = [16, 32], strides = [1, 1]} : vector<16x256xf32> to vector<16x32xf32>
    %314 = vector.extract_strided_slice %231 {offsets = [0, 160], sizes = [16, 32], strides = [1, 1]} : vector<16x256xf32> to vector<16x32xf32>
    %315 = vector.extract_strided_slice %232 {offsets = [0, 160], sizes = [16, 32], strides = [1, 1]} : vector<16x256xf32> to vector<16x32xf32>
    %cst_129 = arith.constant dense<0.000000e+00> : vector<16x16xf32>
    %316 = tpu.matmul %313, %314, %cst_129 {dimension_numbers = #tpu.dot_dimension_numbers<[1], [1], [0], [0], [0, 0, 1, 0], [], []>} : vector<16x32xf32>, vector<16x32xf32>, vector<16x16xf32> -> vector<16x16xf32>
    %cst_130 = arith.constant 0.176776692 : f32
    %317 = vector.broadcast %cst_130 : f32 to vector<16x16xf32>
    %318 = arith.mulf %316, %317 : vector<16x16xf32>
    %cst_131 = arith.constant dense<0xFF800000> : vector<16xf32>
    %319 = vector.multi_reduction <maximumf>, %318, %cst_131 [1] : vector<16x16xf32> to vector<16xf32>
    %320 = vector.shape_cast %319 : vector<16xf32> to vector<16x1xf32>
    %321 = vector.broadcast %320 : vector<16x1xf32> to vector<16x16xf32>
    %322 = arith.subf %318, %321 : vector<16x16xf32>
    %323 = math.exp %322 : vector<16x16xf32>
    %cst_132 = arith.constant dense<0.000000e+00> : vector<16xf32>
    %324 = vector.multi_reduction <add>, %323, %cst_132 [1] : vector<16x16xf32> to vector<16xf32>
    %325 = vector.shape_cast %324 : vector<16xf32> to vector<16x1xf32>
    %326 = vector.broadcast %325 : vector<16x1xf32> to vector<16x16xf32>
    %327 = arith.divf %323, %326 : vector<16x16xf32>
    %cst_133 = arith.constant dense<0.000000e+00> : vector<16x32xf32>
    %328 = tpu.matmul %327, %315, %cst_133 {dimension_numbers = #tpu.dot_dimension_numbers<[1], [0], [0], [1], [0, 0, 1, 1], [], []>} : vector<16x16xf32>, vector<16x32xf32>, vector<16x32xf32> -> vector<16x32xf32>
    %329 = vector.extract_strided_slice %230 {offsets = [0, 192], sizes = [16, 32], strides = [1, 1]} : vector<16x256xf32> to vector<16x32xf32>
    %330 = vector.extract_strided_slice %231 {offsets = [0, 192], sizes = [16, 32], strides = [1, 1]} : vector<16x256xf32> to vector<16x32xf32>
    %331 = vector.extract_strided_slice %232 {offsets = [0, 192], sizes = [16, 32], strides = [1, 1]} : vector<16x256xf32> to vector<16x32xf32>
    %cst_134 = arith.constant dense<0.000000e+00> : vector<16x16xf32>
    %332 = tpu.matmul %329, %330, %cst_134 {dimension_numbers = #tpu.dot_dimension_numbers<[1], [1], [0], [0], [0, 0, 1, 0], [], []>} : vector<16x32xf32>, vector<16x32xf32>, vector<16x16xf32> -> vector<16x16xf32>
    %cst_135 = arith.constant 0.176776692 : f32
    %333 = vector.broadcast %cst_135 : f32 to vector<16x16xf32>
    %334 = arith.mulf %332, %333 : vector<16x16xf32>
    %cst_136 = arith.constant dense<0xFF800000> : vector<16xf32>
    %335 = vector.multi_reduction <maximumf>, %334, %cst_136 [1] : vector<16x16xf32> to vector<16xf32>
    %336 = vector.shape_cast %335 : vector<16xf32> to vector<16x1xf32>
    %337 = vector.broadcast %336 : vector<16x1xf32> to vector<16x16xf32>
    %338 = arith.subf %334, %337 : vector<16x16xf32>
    %339 = math.exp %338 : vector<16x16xf32>
    %cst_137 = arith.constant dense<0.000000e+00> : vector<16xf32>
    %340 = vector.multi_reduction <add>, %339, %cst_137 [1] : vector<16x16xf32> to vector<16xf32>
    %341 = vector.shape_cast %340 : vector<16xf32> to vector<16x1xf32>
    %342 = vector.broadcast %341 : vector<16x1xf32> to vector<16x16xf32>
    %343 = arith.divf %339, %342 : vector<16x16xf32>
    %cst_138 = arith.constant dense<0.000000e+00> : vector<16x32xf32>
    %344 = tpu.matmul %343, %331, %cst_138 {dimension_numbers = #tpu.dot_dimension_numbers<[1], [0], [0], [1], [0, 0, 1, 1], [], []>} : vector<16x16xf32>, vector<16x32xf32>, vector<16x32xf32> -> vector<16x32xf32>
    %345 = vector.extract_strided_slice %230 {offsets = [0, 224], sizes = [16, 32], strides = [1, 1]} : vector<16x256xf32> to vector<16x32xf32>
    %346 = vector.extract_strided_slice %231 {offsets = [0, 224], sizes = [16, 32], strides = [1, 1]} : vector<16x256xf32> to vector<16x32xf32>
    %347 = vector.extract_strided_slice %232 {offsets = [0, 224], sizes = [16, 32], strides = [1, 1]} : vector<16x256xf32> to vector<16x32xf32>
    %cst_139 = arith.constant dense<0.000000e+00> : vector<16x16xf32>
    %348 = tpu.matmul %345, %346, %cst_139 {dimension_numbers = #tpu.dot_dimension_numbers<[1], [1], [0], [0], [0, 0, 1, 0], [], []>} : vector<16x32xf32>, vector<16x32xf32>, vector<16x16xf32> -> vector<16x16xf32>
    %cst_140 = arith.constant 0.176776692 : f32
    %349 = vector.broadcast %cst_140 : f32 to vector<16x16xf32>
    %350 = arith.mulf %348, %349 : vector<16x16xf32>
    %cst_141 = arith.constant dense<0xFF800000> : vector<16xf32>
    %351 = vector.multi_reduction <maximumf>, %350, %cst_141 [1] : vector<16x16xf32> to vector<16xf32>
    %352 = vector.shape_cast %351 : vector<16xf32> to vector<16x1xf32>
    %353 = vector.broadcast %352 : vector<16x1xf32> to vector<16x16xf32>
    %354 = arith.subf %350, %353 : vector<16x16xf32>
    %355 = math.exp %354 : vector<16x16xf32>
    %cst_142 = arith.constant dense<0.000000e+00> : vector<16xf32>
    %356 = vector.multi_reduction <add>, %355, %cst_142 [1] : vector<16x16xf32> to vector<16xf32>
    %357 = vector.shape_cast %356 : vector<16xf32> to vector<16x1xf32>
    %358 = vector.broadcast %357 : vector<16x1xf32> to vector<16x16xf32>
    %359 = arith.divf %355, %358 : vector<16x16xf32>
    %cst_143 = arith.constant dense<0.000000e+00> : vector<16x32xf32>
    %360 = tpu.matmul %359, %347, %cst_143 {dimension_numbers = #tpu.dot_dimension_numbers<[1], [0], [0], [1], [0, 0, 1, 1], [], []>} : vector<16x16xf32>, vector<16x32xf32>, vector<16x32xf32> -> vector<16x32xf32>
    %361 = tpu.concatenate %248, %264, %280, %296, %312, %328, %344, %360 in 1 : vector<16x32xf32>, vector<16x32xf32>, vector<16x32xf32>, vector<16x32xf32>, vector<16x32xf32>, vector<16x32xf32>, vector<16x32xf32>, vector<16x32xf32> -> vector<16x256xf32>
    %c1_144 = arith.constant 1 : index
    %c0_145 = arith.constant 0 : index
    %c0_146 = arith.constant 0 : index
    %362 = vector.load %arg6[%c1_144, %c0_145, %c0_146] : memref<2x256x256xf32, #tpu.memory_space<vmem>>, vector<1x256x256xf32>
    %363 = vector.shape_cast %362 : vector<1x256x256xf32> to vector<256x256xf32>
    %cst_147 = arith.constant dense<0.000000e+00> : vector<16x256xf32>
    %364 = tpu.matmul %361, %363, %cst_147 {dimension_numbers = #tpu.dot_dimension_numbers<[1], [0], [0], [1], [0, 0, 1, 1], [], []>} : vector<16x256xf32>, vector<256x256xf32>, vector<16x256xf32> -> vector<16x256xf32>
    %c1_148 = arith.constant 1 : index
    %c0_149 = arith.constant 0 : index
    %c0_150 = arith.constant 0 : index
    %365 = vector.load %arg7[%c1_148, %c0_149, %c0_150] : memref<2x1x256xf32, #tpu.memory_space<vmem>>, vector<1x1x256xf32>
    %366 = vector.shape_cast %365 : vector<1x1x256xf32> to vector<1x256xf32>
    %367 = vector.broadcast %366 : vector<1x256xf32> to vector<16x256xf32>
    %368 = arith.addf %364, %367 : vector<16x256xf32>
    %369 = arith.addf %222, %368 : vector<16x256xf32>
    %c1_151 = arith.constant 1 : index
    %c0_152 = arith.constant 0 : index
    %c0_153 = arith.constant 0 : index
    %370 = vector.load %arg8[%c1_151, %c0_152, %c0_153] : memref<2x1x256xf32, #tpu.memory_space<vmem>>, vector<1x1x256xf32>
    %371 = vector.shape_cast %370 : vector<1x1x256xf32> to vector<1x256xf32>
    %c1_154 = arith.constant 1 : index
    %c0_155 = arith.constant 0 : index
    %c0_156 = arith.constant 0 : index
    %372 = vector.load %arg9[%c1_154, %c0_155, %c0_156] : memref<2x1x256xf32, #tpu.memory_space<vmem>>, vector<1x1x256xf32>
    %373 = vector.shape_cast %372 : vector<1x1x256xf32> to vector<1x256xf32>
    %cst_157 = arith.constant dense<0.000000e+00> : vector<16xf32>
    %374 = vector.multi_reduction <add>, %369, %cst_157 [1] : vector<16x256xf32> to vector<16xf32>
    %375 = vector.shape_cast %374 : vector<16xf32> to vector<16x1xf32>
    %cst_158 = arith.constant 2.560000e+02 : f32
    %376 = vector.broadcast %cst_158 : f32 to vector<16x1xf32>
    %377 = arith.divf %375, %376 : vector<16x1xf32>
    %378 = vector.broadcast %377 : vector<16x1xf32> to vector<16x256xf32>
    %379 = arith.subf %369, %378 : vector<16x256xf32>
    %380 = arith.mulf %379, %379 : vector<16x256xf32>
    %cst_159 = arith.constant dense<0.000000e+00> : vector<16xf32>
    %381 = vector.multi_reduction <add>, %380, %cst_159 [1] : vector<16x256xf32> to vector<16xf32>
    %382 = vector.shape_cast %381 : vector<16xf32> to vector<16x1xf32>
    %cst_160 = arith.constant 2.560000e+02 : f32
    %383 = vector.broadcast %cst_160 : f32 to vector<16x1xf32>
    %384 = arith.divf %382, %383 : vector<16x1xf32>
    %cst_161 = arith.constant 9.99999974E-6 : f32
    %385 = vector.broadcast %cst_161 : f32 to vector<16x1xf32>
    %386 = arith.addf %384, %385 : vector<16x1xf32>
    %387 = math.rsqrt %386 : vector<16x1xf32>
    %388 = vector.broadcast %387 : vector<16x1xf32> to vector<16x256xf32>
    %389 = arith.mulf %379, %388 : vector<16x256xf32>
    %390 = vector.broadcast %371 : vector<1x256xf32> to vector<16x256xf32>
    %391 = arith.mulf %389, %390 : vector<16x256xf32>
    %392 = vector.broadcast %373 : vector<1x256xf32> to vector<16x256xf32>
    %393 = arith.addf %391, %392 : vector<16x256xf32>
    %c1_162 = arith.constant 1 : index
    %c0_163 = arith.constant 0 : index
    %c0_164 = arith.constant 0 : index
    %394 = vector.load %arg10[%c1_162, %c0_163, %c0_164] : memref<2x256x1024xf32, #tpu.memory_space<vmem>>, vector<1x256x1024xf32>
    %395 = vector.shape_cast %394 : vector<1x256x1024xf32> to vector<256x1024xf32>
    %cst_165 = arith.constant dense<0.000000e+00> : vector<16x1024xf32>
    %396 = tpu.matmul %393, %395, %cst_165 {dimension_numbers = #tpu.dot_dimension_numbers<[1], [0], [0], [1], [0, 0, 1, 1], [], []>} : vector<16x256xf32>, vector<256x1024xf32>, vector<16x1024xf32> -> vector<16x1024xf32>
    %c1_166 = arith.constant 1 : index
    %c0_167 = arith.constant 0 : index
    %c0_168 = arith.constant 0 : index
    %397 = vector.load %arg11[%c1_166, %c0_167, %c0_168] : memref<2x1x1024xf32, #tpu.memory_space<vmem>>, vector<1x1x1024xf32>
    %398 = vector.shape_cast %397 : vector<1x1x1024xf32> to vector<1x1024xf32>
    %399 = vector.broadcast %398 : vector<1x1024xf32> to vector<16x1024xf32>
    %400 = arith.addf %396, %399 : vector<16x1024xf32>
    %cst_169 = arith.constant 0.000000e+00 : f32
    %401 = vector.broadcast %cst_169 : f32 to vector<16x1024xf32>
    %402 = arith.maximumf %400, %401 : vector<16x1024xf32>
    %c1_170 = arith.constant 1 : index
    %c0_171 = arith.constant 0 : index
    %c0_172 = arith.constant 0 : index
    %403 = vector.load %arg12[%c1_170, %c0_171, %c0_172] : memref<2x1024x256xf32, #tpu.memory_space<vmem>>, vector<1x1024x256xf32>
    %404 = vector.shape_cast %403 : vector<1x1024x256xf32> to vector<1024x256xf32>
    %cst_173 = arith.constant dense<0.000000e+00> : vector<16x256xf32>
    %405 = tpu.matmul %402, %404, %cst_173 {dimension_numbers = #tpu.dot_dimension_numbers<[1], [0], [0], [1], [0, 0, 1, 1], [], []>} : vector<16x1024xf32>, vector<1024x256xf32>, vector<16x256xf32> -> vector<16x256xf32>
    %c1_174 = arith.constant 1 : index
    %c0_175 = arith.constant 0 : index
    %c0_176 = arith.constant 0 : index
    %406 = vector.load %arg13[%c1_174, %c0_175, %c0_176] : memref<2x1x256xf32, #tpu.memory_space<vmem>>, vector<1x1x256xf32>
    %407 = vector.shape_cast %406 : vector<1x1x256xf32> to vector<1x256xf32>
    %408 = vector.broadcast %407 : vector<1x256xf32> to vector<16x256xf32>
    %409 = arith.addf %405, %408 : vector<16x256xf32>
    %410 = arith.addf %393, %409 : vector<16x256xf32>
    %c1_177 = arith.constant 1 : index
    %c0_178 = arith.constant 0 : index
    %c0_179 = arith.constant 0 : index
    %411 = vector.load %arg14[%c1_177, %c0_178, %c0_179] : memref<2x1x256xf32, #tpu.memory_space<vmem>>, vector<1x1x256xf32>
    %412 = vector.shape_cast %411 : vector<1x1x256xf32> to vector<1x256xf32>
    %c1_180 = arith.constant 1 : index
    %c0_181 = arith.constant 0 : index
    %c0_182 = arith.constant 0 : index
    %413 = vector.load %arg15[%c1_180, %c0_181, %c0_182] : memref<2x1x256xf32, #tpu.memory_space<vmem>>, vector<1x1x256xf32>
    %414 = vector.shape_cast %413 : vector<1x1x256xf32> to vector<1x256xf32>
    %cst_183 = arith.constant dense<0.000000e+00> : vector<16xf32>
    %415 = vector.multi_reduction <add>, %410, %cst_183 [1] : vector<16x256xf32> to vector<16xf32>
    %416 = vector.shape_cast %415 : vector<16xf32> to vector<16x1xf32>
    %cst_184 = arith.constant 2.560000e+02 : f32
    %417 = vector.broadcast %cst_184 : f32 to vector<16x1xf32>
    %418 = arith.divf %416, %417 : vector<16x1xf32>
    %419 = vector.broadcast %418 : vector<16x1xf32> to vector<16x256xf32>
    %420 = arith.subf %410, %419 : vector<16x256xf32>
    %421 = arith.mulf %420, %420 : vector<16x256xf32>
    %cst_185 = arith.constant dense<0.000000e+00> : vector<16xf32>
    %422 = vector.multi_reduction <add>, %421, %cst_185 [1] : vector<16x256xf32> to vector<16xf32>
    %423 = vector.shape_cast %422 : vector<16xf32> to vector<16x1xf32>
    %cst_186 = arith.constant 2.560000e+02 : f32
    %424 = vector.broadcast %cst_186 : f32 to vector<16x1xf32>
    %425 = arith.divf %423, %424 : vector<16x1xf32>
    %cst_187 = arith.constant 9.99999974E-6 : f32
    %426 = vector.broadcast %cst_187 : f32 to vector<16x1xf32>
    %427 = arith.addf %425, %426 : vector<16x1xf32>
    %428 = math.rsqrt %427 : vector<16x1xf32>
    %429 = vector.broadcast %428 : vector<16x1xf32> to vector<16x256xf32>
    %430 = arith.mulf %420, %429 : vector<16x256xf32>
    %431 = vector.broadcast %412 : vector<1x256xf32> to vector<16x256xf32>
    %432 = arith.mulf %430, %431 : vector<16x256xf32>
    %433 = vector.broadcast %414 : vector<1x256xf32> to vector<16x256xf32>
    %434 = arith.addf %432, %433 : vector<16x256xf32>
    %c0_188 = arith.constant 0 : index
    %c0_189 = arith.constant 0 : index
    %435 = vector.load %arg16[%c0_188, %c0_189] : memref<256x1000xf32, #tpu.memory_space<vmem>>, vector<256x1000xf32>
    %cst_190 = arith.constant dense<0.000000e+00> : vector<16x1000xf32>
    %436 = tpu.matmul %434, %435, %cst_190 {dimension_numbers = #tpu.dot_dimension_numbers<[1], [0], [0], [1], [0, 0, 1, 1], [], []>} : vector<16x256xf32>, vector<256x1000xf32>, vector<16x1000xf32> -> vector<16x1000xf32>
    %c0_191 = arith.constant 0 : index
    %c0_192 = arith.constant 0 : index
    %437 = vector.load %arg17[%c0_191, %c0_192] : memref<1x1000xf32, #tpu.memory_space<vmem>>, vector<1x1000xf32>
    %438 = vector.broadcast %437 : vector<1x1000xf32> to vector<16x1000xf32>
    %439 = arith.addf %436, %438 : vector<16x1000xf32>
    %c0_193 = arith.constant 0 : index
    %c0_194 = arith.constant 0 : index
    %440 = vector.load %arg18[%c0_193, %c0_194] : memref<16x1000xf32, #tpu.memory_space<vmem>>, vector<16x1000xf32>
    tpu.vector_store %arg18[%c0_193, %c0_194], %439 {strides = array<i32>} : memref<16x1000xf32, #tpu.memory_space<vmem>>, vector<16x1000xf32>,
    return
  }
  func.func @transform_0(%arg0: i32) -> (i32, i32) {
    %c0_i32 = arith.constant 0 : i32
    %c0_i32_0 = arith.constant 0 : i32
    return %arg0, %c0_i32 : i32, i32
  }
  func.func @transform_1(%arg0: i32) -> (i32, i32) {
    %c0_i32 = arith.constant 0 : i32
    %c0_i32_0 = arith.constant 0 : i32
    %c0_i32_1 = arith.constant 0 : i32
    return %c0_i32, %c0_i32_0 : i32, i32
  }
  func.func @transform_2(%arg0: i32) -> (i32, i32) {
    %c0_i32 = arith.constant 0 : i32
    %c0_i32_0 = arith.constant 0 : i32
    %c0_i32_1 = arith.constant 0 : i32
    return %c0_i32, %c0_i32_0 : i32, i32
  }
  func.func @transform_3(%arg0: i32) -> (i32, i32, i32) {
    %c0_i32 = arith.constant 0 : i32
    %c0_i32_0 = arith.constant 0 : i32
    %c0_i32_1 = arith.constant 0 : i32
    %c0_i32_2 = arith.constant 0 : i32
    return %c0_i32, %c0_i32_0, %c0_i32_1 : i32, i32, i32
  }
  func.func @transform_4(%arg0: i32) -> (i32, i32, i32) {
    %c0_i32 = arith.constant 0 : i32
    %c0_i32_0 = arith.constant 0 : i32
    %c0_i32_1 = arith.constant 0 : i32
    %c0_i32_2 = arith.constant 0 : i32
    return %c0_i32, %c0_i32_0, %c0_i32_1 : i32, i32, i32
  }
  func.func @transform_5(%arg0: i32) -> (i32, i32, i32) {
    %c0_i32 = arith.constant 0 : i32
    %c0_i32_0 = arith.constant 0 : i32
    %c0_i32_1 = arith.constant 0 : i32
    %c0_i32_2 = arith.constant 0 : i32
    return %c0_i32, %c0_i32_0, %c0_i32_1 : i32, i32, i32
  }
  func.func @transform_6(%arg0: i32) -> (i32, i32, i32) {
    %c0_i32 = arith.constant 0 : i32
    %c0_i32_0 = arith.constant 0 : i32
    %c0_i32_1 = arith.constant 0 : i32
    %c0_i32_2 = arith.constant 0 : i32
    return %c0_i32, %c0_i32_0, %c0_i32_1 : i32, i32, i32
  }
  func.func @transform_7(%arg0: i32) -> (i32, i32, i32) {
    %c0_i32 = arith.constant 0 : i32
    %c0_i32_0 = arith.constant 0 : i32
    %c0_i32_1 = arith.constant 0 : i32
    %c0_i32_2 = arith.constant 0 : i32
    return %c0_i32, %c0_i32_0, %c0_i32_1 : i32, i32, i32
  }
  func.func @transform_8(%arg0: i32) -> (i32, i32, i32) {
    %c0_i32 = arith.constant 0 : i32
    %c0_i32_0 = arith.constant 0 : i32
    %c0_i32_1 = arith.constant 0 : i32
    %c0_i32_2 = arith.constant 0 : i32
    return %c0_i32, %c0_i32_0, %c0_i32_1 : i32, i32, i32
  }
  func.func @transform_9(%arg0: i32) -> (i32, i32, i32) {
    %c0_i32 = arith.constant 0 : i32
    %c0_i32_0 = arith.constant 0 : i32
    %c0_i32_1 = arith.constant 0 : i32
    %c0_i32_2 = arith.constant 0 : i32
    return %c0_i32, %c0_i32_0, %c0_i32_1 : i32, i32, i32
  }
  func.func @transform_10(%arg0: i32) -> (i32, i32, i32) {
    %c0_i32 = arith.constant 0 : i32
    %c0_i32_0 = arith.constant 0 : i32
    %c0_i32_1 = arith.constant 0 : i32
    %c0_i32_2 = arith.constant 0 : i32
    return %c0_i32, %c0_i32_0, %c0_i32_1 : i32, i32, i32
  }
  func.func @transform_11(%arg0: i32) -> (i32, i32, i32) {
    %c0_i32 = arith.constant 0 : i32
    %c0_i32_0 = arith.constant 0 : i32
    %c0_i32_1 = arith.constant 0 : i32
    %c0_i32_2 = arith.constant 0 : i32
    return %c0_i32, %c0_i32_0, %c0_i32_1 : i32, i32, i32
  }
  func.func @transform_12(%arg0: i32) -> (i32, i32, i32) {
    %c0_i32 = arith.constant 0 : i32
    %c0_i32_0 = arith.constant 0 : i32
    %c0_i32_1 = arith.constant 0 : i32
    %c0_i32_2 = arith.constant 0 : i32
    return %c0_i32, %c0_i32_0, %c0_i32_1 : i32, i32, i32
  }
  func.func @transform_13(%arg0: i32) -> (i32, i32, i32) {
    %c0_i32 = arith.constant 0 : i32
    %c0_i32_0 = arith.constant 0 : i32
    %c0_i32_1 = arith.constant 0 : i32
    %c0_i32_2 = arith.constant 0 : i32
    return %c0_i32, %c0_i32_0, %c0_i32_1 : i32, i32, i32
  }
  func.func @transform_14(%arg0: i32) -> (i32, i32, i32) {
    %c0_i32 = arith.constant 0 : i32
    %c0_i32_0 = arith.constant 0 : i32
    %c0_i32_1 = arith.constant 0 : i32
    %c0_i32_2 = arith.constant 0 : i32
    return %c0_i32, %c0_i32_0, %c0_i32_1 : i32, i32, i32
  }
  func.func @transform_15(%arg0: i32) -> (i32, i32) {
    %c0_i32 = arith.constant 0 : i32
    %c0_i32_0 = arith.constant 0 : i32
    %c0_i32_1 = arith.constant 0 : i32
    return %c0_i32, %c0_i32_0 : i32, i32
  }
  func.func @transform_16(%arg0: i32) -> (i32, i32) {
    %c0_i32 = arith.constant 0 : i32
    %c0_i32_0 = arith.constant 0 : i32
    %c0_i32_1 = arith.constant 0 : i32
    return %c0_i32, %c0_i32_0 : i32, i32
  }
  func.func @transform_17(%arg0: i32) -> (i32, i32) {
    %c0_i32 = arith.constant 0 : i32
    %c0_i32_0 = arith.constant 0 : i32
    return %arg0, %c0_i32 : i32, i32
  }
}

</mosaic_0001>

<bundles_post_ra>
// kernel: tpu_custom_call.1
= control target key start
LH: loop header
LB: loop body
LE: loop exit
PB: predicated region body
PF: predicated region fallthrough
CT: control target
= control target key end

     0   :  { %s16940_s0 = inlined_call_operand.vmem [shape: s32[32,1], index: 0, kind: input, shape index: {}]   ;;  %s16941_s1 = inlined_call_operand.hbm [shape: f32[1000,256], index: 1, kind: input, shape index: {}]   ;;  %s16942_s2 = inlined_call_operand.hbm [shape: f32[16,256], index: 2, kind: input, shape index: {}]   ;;  %s16943_s3 = inlined_call_operand.hbm [shape: f32[2,256,768], index: 3, kind: input, shape index: {}]   ;;  %s16944_s4 = inlined_call_operand.hbm [shape: f32[2,1,768], index: 4, kind: input, shape index: {}]   ;;  %s16945_s5 = inlined_call_operand.hbm [shape: f32[2,256,256], index: 5, kind: input, shape index: {}]   ;;  %s16946_s6 = inlined_call_operand.vmem [shape: f32[2,1,256], index: 6, kind: input, shape index: {}]   ;;  %s16947_s7 = inlined_call_operand.hbm [shape: f32[2,1,256], index: 7, kind: input, shape index: {}]   ;;  %s16948_s8 = inlined_call_operand.hbm [shape: f32[2,1,256], index: 8, kind: input, shape index: {}]   ;;  %s16949_s9 = inlined_call_operand.vmem [shape: f32[2,256,1024], index: 9, kind: input, shape index: {}]   ;;  %s16950_s10 = inlined_call_operand.vmem [shape: f32[2,1,1024], index: 10, kind: input, shape index: {}]   ;;  %s16951_s11 = inlined_call_operand.hbm [shape: f32[2,1024,256], index: 11, kind: input, shape index: {}]   ;;  %s16952_s12 = inlined_call_operand.vmem [shape: f32[2,1,256], index: 12, kind: input, shape index: {}]   ;;  %s16953_s13 = inlined_call_operand.vmem [shape: f32[2,1,256], index: 13, kind: input, shape index: {}]   ;;  %s16954_s14 = inlined_call_operand.vmem [shape: f32[2,1,256], index: 14, kind: input, shape index: {}]   ;;  %s16955_s15 = inlined_call_operand.vmem [shape: f32[256,1000], index: 15, kind: input, shape index: {}]   ;;  %s16956_s16 = inlined_call_operand.vmem [shape: f32[1,1000], index: 16, kind: input, shape index: {}]   ;;  %s16957_s17 = inlined_call_operand.hbm [shape: f32[32,1000], index: 17, kind: output, shape index: {}]  }
   0x1   :  { %16982 = sst [smem:[#allocation31_spill]] %s16940_s0 }
   0x2   :  { %16983 = sst [smem:[#allocation32_spill]] %s16941_s1 }
   0x3   :  { %16984 = sst [smem:[#allocation33_spill]] %s16942_s2 }
   0x4   :  { %16985 = sst [smem:[#allocation34_spill]] %s16944_s4 }
   0x5   :  { %16986 = sst [smem:[#allocation35_spill]] %s16947_s7 }
   0x6   :  { %16987 = sst [smem:[#allocation36_spill]] %s16953_s13 }
   0x7   :  { %16988 = sst [smem:[#allocation37_spill]] %s16954_s14 }
   0x8   :  { %16989 = sst [smem:[#allocation38_spill]] %s16955_s15 }
   0x9   :  { %16990 = sst [smem:[#allocation39_spill]] %s16956_s16 }
   0xa   :  { %16991 = sst [smem:[#allocation40_spill]] %s16957_s17 }
   0xb   :  { %22 = vsyncpa [#allocation3], 0 }
   0xc   :  { %23 = vsyncpa [#allocation6], 0 }
   0xd   :  { %24 = vsyncpa [#allocation9], 0 }
   0xe   :  { %25 = vsyncpa [#allocation12], 0 }
   0xf   :  { %26 = vsyncpa [#allocation15], 0 }
  0x10   :  { %27 = vsyncpa [#allocation4], 0 }
  0x11   :  { %29 = vsyncpa [#allocation4 + $0x1], 0  ;;  %s13170_s24 = smov 0   ;;  %s13172_s25 = smov 0  }
  0x12   :  { %s13174_s26 = smov 0   ;;  %s13176_s27 = smov 0  }
  0x13 LB: > { %16992 = sst [smem:[#allocation23_spill]] %s13042_s24  ;;  %s13191_s28 = sadd.s32 4294967295, %s13054_s27   ;;  %s13054_s27 = sphi %s13176_s27, %s17041_s27   ;;  %s13050_s26 = sphi %s13174_s26, %s17044_s26   ;;  %s13046_s25 = sphi %s13172_s25, %s17043_s25   ;;  %s13042_s24 = sphi %s13170_s24, %s17042_s24  }
  0x14   : > { %16993 = sst [smem:[#allocation24_spill]] %s13046_s25  ;;  %s9284_s29 = sadd.s32 4294967294, %s13054_s27  }
  0x15   : > { %16994 = sst [smem:[#allocation25_spill]] %s13050_s26  ;;  %s13195_s0 = sadd.s32 1, %s13054_s27  }
  0x16   : > { %16995 = sst [smem:[#allocation26_spill]] %s13054_s27  ;;  %s404_s30 = sadd.s32 1, %s13050_s26 }
  0x17   : > { %16996 = sst [smem:[#allocation27_spill]] %s13195_s0  ;;  %s401_s18 = ssub.s32 %s13054_s27, %s13195_s0 }
  0x18   : > { %p414_p0 = scmp.ne.s32.totalorder %s13050_s26, %s13046_s25  ;;  %p402_p1 = scmp.eq.s32.totalorder %s401_s18, 0 }
  0x19   : > { %p415_p2 = scmp.eq.s32.totalorder %s13191_s28, 1  ;;  %p420_p3 = scmp.ne.s32.totalorder %s13046_s25, %s13042_s24 }
  0x1a   : > { %p421_p4 = scmp.eq.s32.totalorder %s9284_s29, 1  ;;  %p9285_p7 = scmp.ge.s32.totalorder %s13054_s27, 1 }
  0x1b   : > { %s13206_s19 = scalar_select %p402_p1, %s13050_s26, %s404_s30  }
  0x1c   : > { %p13208_p5 = por %p415_p2, %p414_p0  ;;  %p13212_p6 = por %p421_p4, %p420_p3 }
  0x1d   : > { %16997 = sst [smem:[#allocation28_spill]] %s13206_s19  ;;  %p428_p8 = scmp.lt.s32.totalorder %s13054_s27, 3 }
  0x1e   : > { %s16998_s1 = scalar_select %p13208_p5, 1, 0 }
  0x1f   : > { %s17000_s20 = scalar_select %p13212_p6, 1, 0 }
  0x20   : > { %16999 = sst [smem:[#allocation29_spill]] %s16998_s1  ;;  %p16965_p9 = scmp.eq.s32.totalorder %s13191_s28, 0 }
  0x21   : > { %17001 = sst [smem:[#allocation30_spill]] %s17000_s20  ;;  %p13219_p10 = pnand %p9285_p7, %p428_p8 }
  0x22   : > { %s13056_s22 = smov [#allocation5]   ;;  %s13057_s30 = smov [#allocation8]  }
  0x23   : > { %s17002_s21 = scalar_select %p13219_p10, 1, 0 }
  0x24   : > { %p12322_p11 = pneg %p13219_p10  ;;  %s453_s23 = sshll.u32 %s13056_s22, 4  ;;  %s454_s23 = int_to_ptr.vmem [resolvable:$true] %s453_s23 }
  0x25   : > { %s479_s18 = sshll.u32 %s13057_s30, 4  ;;  %s17004_s2 = sld [smem:[#allocation33_spill]]  ;;  %s13231_s18 = int_to_ptr.vmem [resolvable:$true] %s479_s18 }
  0x26   : > { %p13227_p12 = pnand %p16965_p9, %p12322_p11 }
  0x28   : > { %p13241_p0 = pneg %p13227_p12 }
  0x2b   : > { %s12748_s0 = scalar_lea.hbm %s17004_s2, 512 }
  0x2c   : > { %p12749_p13 = scmp.ne.s32.totalorder %s17004_s2, %s12748_s0  ;;  %p12755_p3 = scmp.lt.u32.totalorder %s12748_s0, %s17004_s2 }
  0x2e   : > { %p12751_p1 = pnand %p13241_p0, %p12749_p13 }
  0x30   : > { %p12752_p2 = pneg %p12751_p1 }
  0x32   : > { %p12757_p4 = pnand %p12755_p3, %p12752_p2 }
  0x34   : > { %12760 = shalt.err (!%p12757_p4)
}
  0x35   : > { %s12761_s26 = scalar_lea.vmem %s454_s23, 512  ;;  %p12769_p9 = scmp.lt.s32.totalorder %s454_s23, %s454_s23 }
  0x36   : > { %p12762_p7 = scmp.ne.s32.totalorder %s454_s23, %s12761_s26  ;;  %p12770_p6 = scmp.lt.s32.totalorder %s12761_s26, %s12761_s26 }
  0x38   : > { %p12764_p8 = pnand %p12762_p7, %p13241_p0  ;;  %p12771_p5 = por %p12770_p6, %p12769_p9 }
  0x3a   : > { %p12765_p11 = pneg %p12764_p8 }
  0x3c   : > { %p12772_p10 = pnand %p12771_p5, %p12765_p11 }
  0x3e   : > { %12775 = shalt.err (!%p12772_p10)
}
  0x3f   : > { %s16973_s24 = smov 256   ;;  %s16975_s19 = smov 16  }
  0x40   : > { %12328 = dma.hbm_to_vmem [thread:$0]  (!%p13227_p12), %s17004_s2, 512, %s454_s23, [#allocation6], %s16973_s24, %s16973_s24, %s16975_s19  }
  0x41   : > { %s17006_s4 = sld [smem:[#allocation34_spill]] }
  0x47   : > { %s12776_s17 = scalar_lea.hbm %s17006_s4, 192 }
  0x48   : > { %p12777_p5 = scmp.ne.s32.totalorder %s17006_s4, %s12776_s17  ;;  %p12783_p10 = scmp.lt.u32.totalorder %s12776_s17, %s17006_s4 }
  0x4a   : > { %p12779_p6 = pnand %p12777_p5, %p13241_p0 }
  0x4c   : > { %p12780_p9 = pneg %p12779_p6 }
  0x4e   : > { %p12785_p13 = pnand %p12783_p10, %p12780_p9 }
  0x50   : > { %12788 = shalt.err (!%p12785_p13)
}
  0x51   : > { %s12789_s23 = scalar_lea.vmem %s13231_s18, 192  ;;  %p12797_p4 = scmp.lt.s32.totalorder %s13231_s18, %s13231_s18 }
  0x52   : > { %p12790_p1 = scmp.ne.s32.totalorder %s13231_s18, %s12789_s23  ;;  %p12798_p7 = scmp.lt.s32.totalorder %s12789_s23, %s12789_s23 }
  0x54   : > { %p12792_p2 = pnand %p12790_p1, %p13241_p0  ;;  %p12799_p8 = por %p12798_p7, %p12797_p4 }
  0x56   : > { %p12793_p3 = pneg %p12792_p2 }
  0x58   : > { %p12800_p11 = pnand %p12799_p8, %p12793_p3 }
  0x5a   : > { %12803 = shalt.err (!%p12800_p11)
}
  0x5b   : > { %s13060_s1 = smov 96   ;;  %s13061_s16 = smov 6  }
  0x5c   : > { %12334 = dma.hbm_to_vmem [thread:$0]  (!%p13227_p12), %s17006_s4, 192, %s13231_s18, [#allocation9], %s13060_s1, %s13060_s1, %s13061_s16  }
  0x5d   : > { %s13062_s27 = smov [#allocation11]   ;;  %s17007_s7 = sld [smem:[#allocation35_spill]] }
  0x5e   : > { %s508_s0 = sshll.u32 %s13062_s27, 4  ;;  %s509_s0 = int_to_ptr.vmem [resolvable:$true] %s508_s0 }
  0x63   : > { %s12804_s26 = scalar_lea.hbm %s17007_s7, 64 }
  0x64   : > { %p12805_p5 = scmp.ne.s32.totalorder %s17007_s7, %s12804_s26  ;;  %p12811_p10 = scmp.lt.u32.totalorder %s12804_s26, %s17007_s7 }
  0x66   : > { %p12807_p6 = pnand %p12805_p5, %p13241_p0 }
  0x68   : > { %p12808_p9 = pneg %p12807_p6 }
  0x6a   : > { %p12813_p13 = pnand %p12811_p10, %p12808_p9 }
  0x6c   : > { %12816 = shalt.err (!%p12813_p13)
}
  0x6d   : > { %s12817_s18 = scalar_lea.vmem %s509_s0, 64  ;;  %p12825_p4 = scmp.lt.s32.totalorder %s509_s0, %s509_s0 }
  0x6e   : > { %p12818_p1 = scmp.ne.s32.totalorder %s509_s0, %s12817_s18  ;;  %p12826_p7 = scmp.lt.s32.totalorder %s12817_s18, %s12817_s18 }
  0x70   : > { %p12820_p2 = pnand %p12818_p1, %p13241_p0  ;;  %p12827_p8 = por %p12826_p7, %p12825_p4 }
  0x72   : > { %p12821_p3 = pneg %p12820_p2 }
  0x74   : > { %p12828_p11 = pnand %p12827_p8, %p12821_p3 }
  0x76   : > { %12831 = shalt.err (!%p12828_p11)
}
  0x77   : > { %s16980_s24 = smov 32   ;;  %s16981_s1 = smov 2  }
  0x78   : > { %12340 = dma.hbm_to_vmem [thread:$0]  (!%p13227_p12), %s17007_s7, 64, %s509_s0, [#allocation12], %s16980_s24, %s16980_s24, %s16981_s1  }
  0x79   : > { %s13065_s16 = smov [#allocation2]   ;;  %s13066_s25 = smov [#allocation7]  }
  0x7a   : > { %s440_s17 = sshll.u32 %s13065_s16, 4  ;;  %s466_s27 = sshll.u32 %s13066_s25, 4  ;;  %s441_s17 = int_to_ptr.vmem [resolvable:$true] %s440_s17  ;;  %s467_s27 = int_to_ptr.vmem [resolvable:$true] %s466_s27 }
  0x7b   : > { %s17008_s26 = sld [smem:[#allocation32_spill]] }
  0x81   : > { %s17009_s23 = smov %s17008_s26  ;;  %s12832_s18 = scalar_lea.hbm %s17008_s26, 32000 }
  0x82   : > { %p12833_p5 = scmp.ne.s32.totalorder %s17009_s23, %s12832_s18  ;;  %p12839_p10 = scmp.lt.u32.totalorder %s12832_s18, %s17009_s23 }
  0x84   : > { %p12835_p6 = pnand %p12833_p5, %p13241_p0 }
  0x86   : > { %p12836_p9 = pneg %p12835_p6 }
  0x88   : > { %p12841_p13 = pnand %p12839_p10, %p12836_p9 }
  0x8a   : > { %12844 = shalt.err (!%p12841_p13)
}
  0x8b   : > { %s12845_s0 = scalar_lea.vmem %s441_s17, 32000  ;;  %p12853_p4 = scmp.lt.s32.totalorder %s441_s17, %s441_s17 }
  0x8c   : > { %p12846_p1 = scmp.ne.s32.totalorder %s441_s17, %s12845_s0  ;;  %p12854_p7 = scmp.lt.s32.totalorder %s12845_s0, %s12845_s0 }
  0x8e   : > { %p12848_p2 = pnand %p12846_p1, %p13241_p0  ;;  %p12855_p8 = por %p12854_p7, %p12853_p4 }
  0x90   : > { %p12849_p3 = pneg %p12848_p2 }
  0x92   : > { %p12856_p11 = pnand %p12855_p8, %p12849_p3 }
  0x94   : > { %12859 = shalt.err (!%p12856_p11)
}
  0x95   : > { %s17010_s4 = smov 16   ;;  %s17011_s15 = smov 256  }
  0x96   : > { %12325 = dma.hbm_to_vmem [thread:$0]  (!%p13227_p12), %s17009_s23, 32000, %s441_s17, [#allocation3], %s17011_s15, %s17011_s15, %s17010_s4  }
  0x97   : > { %s12860_s16 = scalar_lea.hbm %s16943_s3, 49152 }
  0x98   : > { %p12861_p5 = scmp.ne.s32.totalorder %s16943_s3, %s12860_s16  ;;  %p12867_p10 = scmp.lt.u32.totalorder %s12860_s16, %s16943_s3 }
  0x9a   : > { %p12863_p6 = pnand %p12861_p5, %p13241_p0 }
  0x9c   : > { %p12864_p9 = pneg %p12863_p6 }
  0x9e   : > { %p12869_p13 = pnand %p12867_p10, %p12864_p9 }
  0xa0   : > { %12872 = shalt.err (!%p12869_p13)
}
  0xa1   : > { %s12873_s18 = scalar_lea.vmem %s467_s27, 49152  ;;  %p12881_p4 = scmp.lt.s32.totalorder %s467_s27, %s467_s27 }
  0xa2   : > { %p12874_p1 = scmp.ne.s32.totalorder %s467_s27, %s12873_s18  ;;  %p12882_p7 = scmp.lt.s32.totalorder %s12873_s18, %s12873_s18 }
  0xa4   : > { %p12876_p2 = pnand %p12874_p1, %p13241_p0  ;;  %p12883_p8 = por %p12882_p7, %p12881_p4 }
  0xa6   : > { %p12877_p3 = pneg %p12876_p2 }
  0xa8   : > { %p12884_p11 = pnand %p12883_p8, %p12877_p3 }
  0xaa   : > { %12887 = shalt.err (!%p12884_p11)
}
  0xab   : > { %s13067_s17 = smov 768   ;;  %s13068_s0 = smov 48  }
  0xac   : > { %12331 = dma.hbm_to_vmem [thread:$0]  (!%p13227_p12), %s16943_s3, 49152, %s467_s27, [#allocation6], %s13067_s17, %s13067_s17, %s13068_s0  }
  0xad   : > { %s13069_s2 = smov [#allocation10]   ;;  %s13070_s16 = smov [#allocation13]  }
  0xae   : > { %s492_s19 = sshll.u32 %s13069_s2, 4  ;;  %s521_s25 = sshll.u32 %s13070_s16, 4  ;;  %s493_s19 = int_to_ptr.vmem [resolvable:$true] %s492_s19  ;;  %s522_s25 = int_to_ptr.vmem [resolvable:$true] %s521_s25 }
  0xaf   : > { %s12888_s26 = scalar_lea.hbm %s16945_s5, 16384 }
  0xb0   : > { %p12889_p5 = scmp.ne.s32.totalorder %s16945_s5, %s12888_s26  ;;  %p12895_p10 = scmp.lt.u32.totalorder %s12888_s26, %s16945_s5 }
  0xb2   : > { %p12891_p6 = pnand %p12889_p5, %p13241_p0 }
  0xb4   : > { %p12892_p9 = pneg %p12891_p6 }
  0xb6   : > { %p12897_p13 = pnand %p12895_p10, %p12892_p9 }
  0xb8   : > { %12900 = shalt.err (!%p12897_p13)
}
  0xb9   : > { %s12901_s27 = scalar_lea.vmem %s493_s19, 16384  ;;  %p12909_p4 = scmp.lt.s32.totalorder %s493_s19, %s493_s19 }
  0xba   : > { %p12902_p1 = scmp.ne.s32.totalorder %s493_s19, %s12901_s27  ;;  %p12910_p7 = scmp.lt.s32.totalorder %s12901_s27, %s12901_s27 }
  0xbc   : > { %p12904_p2 = pnand %p12902_p1, %p13241_p0  ;;  %p12911_p8 = por %p12910_p7, %p12909_p4 }
  0xbe   : > { %p12905_p3 = pneg %p12904_p2 }
  0xc0   : > { %p12912_p11 = pnand %p12911_p8, %p12905_p3 }
  0xc2   : > { %12915 = shalt.err (!%p12912_p11)
}
  0xc3   : > { %12337 = dma.hbm_to_vmem [thread:$0]  (!%p13227_p12), %s16945_s5, 16384, %s493_s19, [#allocation9], %s17011_s15, %s17011_s15, %s17010_s4  }
  0xc4   : > { %s12916_s0 = scalar_lea.hbm %s16948_s8, 64 }
  0xc5   : > { %p12917_p5 = scmp.ne.s32.totalorder %s16948_s8, %s12916_s0  ;;  %p12923_p10 = scmp.lt.u32.totalorder %s12916_s0, %s16948_s8 }
  0xc7   : > { %p12919_p6 = pnand %p12917_p5, %p13241_p0 }
  0xc9   : > { %p12920_p9 = pneg %p12919_p6 }
  0xcb   : > { %p12925_p13 = pnand %p12923_p10, %p12920_p9 }
  0xcd   : > { %12928 = shalt.err (!%p12925_p13)
}
  0xce   : > { %s12929_s20 = scalar_lea.vmem %s522_s25, 64  ;;  %p12937_p4 = scmp.lt.s32.totalorder %s522_s25, %s522_s25 }
  0xcf   : > { %p12930_p1 = scmp.ne.s32.totalorder %s522_s25, %s12929_s20  ;;  %p12938_p7 = scmp.lt.s32.totalorder %s12929_s20, %s12929_s20 }
  0xd1   : > { %p12932_p2 = pnand %p12930_p1, %p13241_p0  ;;  %p12939_p8 = por %p12938_p7, %p12937_p4 }
  0xd3   : > { %p12933_p3 = pneg %p12932_p2 }
  0xd5   : > { %p12940_p11 = pnand %p12939_p8, %p12933_p3 }
  0xd7   : > { %12943 = shalt.err (!%p12940_p11)
}
  0xd8   : > { %s17012_s19 = smov 2   ;;  %s17013_s30 = smov 32  }
  0xd9   : > { %12343 = dma.hbm_to_vmem [thread:$0]  (!%p13227_p12), %s16948_s8, 64, %s522_s25, [#allocation12], %s17013_s30, %s17013_s30, %s17012_s19  }
  0xda   : > { %s13071_s27 = smov [#allocation14]   ;;  %s12944_s17 = scalar_lea.hbm %s16951_s11, 65536 }
  0xdb   : > { %s540_s7 = sshll.u32 %s13071_s27, 4  ;;  %p12945_p5 = scmp.ne.s32.totalorder %s16951_s11, %s12944_s17  ;;  %s541_s7 = int_to_ptr.vmem [resolvable:$true] %s540_s7 }
  0xdc   : > { %p12951_p10 = scmp.lt.u32.totalorder %s12944_s17, %s16951_s11 }
  0xdd   : > { %p12947_p6 = pnand %p12945_p5, %p13241_p0 }
  0xdf   : > { %p12948_p9 = pneg %p12947_p6 }
  0xe1   : > { %p12953_p13 = pnand %p12951_p10, %p12948_p9 }
  0xe3   : > { %12956 = shalt.err (!%p12953_p13)
}
  0xe4   : > { %s12957_s25 = scalar_lea.vmem %s541_s7, 65536  ;;  %p12965_p4 = scmp.lt.s32.totalorder %s541_s7, %s541_s7 }
  0xe5   : > { %p12958_p1 = scmp.ne.s32.totalorder %s541_s7, %s12957_s25  ;;  %p12966_p7 = scmp.lt.s32.totalorder %s12957_s25, %s12957_s25 }
  0xe7   : > { %p12960_p2 = pnand %p12958_p1, %p13241_p0  ;;  %p12967_p8 = por %p12966_p7, %p12965_p4 }
  0xe9   : > { %p12961_p3 = pneg %p12960_p2 }
  0xeb   : > { %p12968_p11 = pnand %p12967_p8, %p12961_p3 }
  0xed   : > { %12971 = shalt.err (!%p12968_p11)
}
  0xee   : > { %12346 = dma.hbm_to_vmem [thread:$0]  (!%p13227_p12), %s16951_s11, 65536, %s541_s7, [#allocation15], %s17011_s15, %s17011_s15, %s17010_s4  }
  0xef   : > { %p17014_p5 = scmp.ne.s32.totalorder %s17002_s21, 0 }
  0xf0   : > { %p17015_p0 = scmp.eq.s32.totalorder (!%p17014_p5), %s13191_s28, 0 }
  0xf1   : > { %580 = sbr.rel (%p17014_p5) target bundleno = 10985 (0x2ae9), region = 88 }
  0xf8   : > { %13017 = dma.done.wait (%p17015_p0), [#allocation3], 32000   ;;  %p17016_p6 = pmov %p17015_p0 }
  0xf9   : > { %p17017_p9 = pmov %p17015_p0 }
  0xfa   : > { %13019 = vsyncadd (%p17016_p6), [#allocation3], 4294935296 }
  0xfb   : > { %13021 = dma.done.wait (%p17017_p9), [#allocation6], 49664   ;;  %p17018_p10 = pmov %p17015_p0 }
  0xfc   : > { %p17019_p13 = pmov %p17015_p0 }
  0xfd   : > { %13023 = vsyncadd (%p17018_p10), [#allocation6], 4294917632 }
  0xfe   : > { %13025 = dma.done.wait (%p17019_p13), [#allocation9], 16576   ;;  %p17020_p12 = pmov %p17015_p0 }
  0xff   : > { %p17021_p1 = pmov %p17015_p0 }
 0x100   : > { %13027 = vsyncadd (%p17020_p12), [#allocation9], 4294950720 }
 0x101   : > { %13029 = dma.done.wait (%p17021_p1), [#allocation12], 128   ;;  %p17022_p2 = pmov %p17015_p0 }
 0x102   : > { %p17023_p3 = pmov %p17015_p0 }
 0x103   : > { %13031 = vsyncadd (%p17022_p2), [#allocation12], 4294967168 }
 0x104   : > { %13033 = dma.done.wait (%p17023_p3), [#allocation15], 65536   ;;  %p17024_p4 = pmov %p17015_p0 }
 0x105   : > { %s9305_s21 = sshll.u32 %s13191_s28, 1  ;;  %v13072_v0 = vmov 0   ;;  %s17025_s15 = sld [smem:[#allocation31_spill]]  ;;  %v717_v3 = vld [vmem:[#allocation2 + $0x8] sm:$0xff]  ;;  %v719_v4 = vld [vmem:[#allocation2 + $0x18] sm:$0xff]  ;;  %v716_v5 = vld [vmem:[#allocation2] sm:$0xff] }
 0x106   : > { %13035 = vsyncadd (%p17024_p4), [#allocation15], 4294901760  ;;  %12423 = vset.pattern.permute.xlu0 %v13072_v0  ;;  %p661_p7 = scmp.lt.s32.totalorder %s9305_s21, 3  ;;  %v718_v6 = vld [vmem:[#allocation2 + $0x10] sm:$0xff]  ;;  %v10040_v7 = vpack.c.bf16 %v719_v4, %v717_v3  ;;  %v721_v9 = vld [vmem:[#allocation2 + $0x28] sm:$0xff]  ;;  %vm970_vm12 = vcmask 850944  }
 0x107   : > { %v10042_v8 = vpack.c.bf16 %v718_v6, %v716_v5  ;;  %v723_v10 = vld [vmem:[#allocation2 + $0x38] sm:$0xff]  ;;  %v720_v11 = vld [vmem:[#allocation2 + $0x20] sm:$0xff]  ;;  %v722_v13 = vld [vmem:[#allocation2 + $0x30] sm:$0xff]  ;;  %s13075_s30 = smov 96   ;;  %s13076_s26 = smov 64  }
 0x108   : > { %s17046_s21 = smov (!%p661_p7, %s9305_s21), 3  ;;  %v10044_v12 = vpack.c.bf16 %v723_v10, %v721_v9  ;;  %v725_v14 = vld [vmem:[#allocation2 + $0x48] sm:$0xff]  ;;  %v727_v15 = vld [vmem:[#allocation2 + $0x58] sm:$0xff]  ;;  %10041 = vmatprep.subr.bf16.mxu0 %v10040_v7  ;;  %v10046_v16 = vpack.c.bf16 %v722_v13, %v720_v11  ;;  %v724_v18 = vld [vmem:[#allocation2 + $0x40] sm:$0xff]  ;;  %s13077_s18 = smov 32  }
 0x109   : > { %s9306_s29 = sshll.u32 %s17046_s21, 3  ;;  %10043 = vmatpush1.bf16.msra.mxu0 %v10042_v8  ;;  %v10048_v17 = vpack.c.bf16 %v727_v15, %v725_v14  ;;  %v726_v19 = vld [vmem:[#allocation2 + $0x50] sm:$0xff]  ;;  %v729_v20 = vld [vmem:[#allocation2 + $0x68] sm:$0xff]  ;;  %v731_v21 = vld [vmem:[#allocation2 + $0x78] sm:$0xff]  ;;  %s17029_s7 = sld [smem:[#allocation37_spill]] }
 0x10a   : > { %10045 = vmatprep.subr.bf16.mxu0 %v10044_v12  ;;  %v10050_v22 = vpack.c.bf16 %v726_v19, %v724_v18  ;;  %v10052_v23 = vpack.c.bf16 %v731_v21, %v729_v20  ;;  %v728_v24 = vld [vmem:[#allocation2 + $0x60] sm:$0xff]  ;;  %v730_v25 = vld [vmem:[#allocation2 + $0x70] sm:$0xff]  ;;  %v733_v26 = vld [vmem:[#allocation2 + $0x88] sm:$0xff]  ;;  %s17031_s22 = sld [smem:[#allocation24_spill]]  ;;  %s17032_s14 = sld [smem:[#allocation39_spill]] }
 0x10b   : > { %s664_s19 = scalar_lea.vmem %s17025_s15, %s9306_s29  ;;  %v735_v27 = vld [vmem:[#allocation2 + $0x98] sm:$0xff]  ;;  %v10054_v28 = vpack.c.bf16 %v730_v25, %v728_v24  ;;  %v732_v30 = vld [vmem:[#allocation2 + $0x80] sm:$0xff]  ;;  %v734_v31 = vld [vmem:[#allocation2 + $0x90] sm:$0xff]  ;;  %s17028_s15 = sld [smem:[#allocation36_spill]] }
 0x10c   : > { %v667_v1 = vld [vmem:[%s664_s19] sm:$0xff]  ;;  %v668_v2 = vld [vmem:[%s664_s19 + $0x8] sm:$0xff]  ;;  %v10056_v29 = vpack.c.bf16 %v735_v27, %v733_v26  ;;  %v739_v33 = vld [vmem:[#allocation2 + $0xb8] sm:$0xff]  ;;  %v10058_v34 = vpack.c.bf16 %v734_v31, %v732_v30  ;;  %s17030_s19 = sld [smem:[#allocation38_spill]]  ;;  %s17033_s16 = sld [smem:[#allocation29_spill]] }
 0x10d   : > { %679 = vperm.xlu0 %12423, %v667_v1   ;;  %10047 = vmatpush1.bf16.msra.mxu0 %v10046_v16  ;;  %v737_v32 = vld [vmem:[#allocation2 + $0xa8] sm:$0xff]  ;;  %v736_v36 = vld [vmem:[#allocation2 + $0xa0] sm:$0xff]  ;;  %v738_v37 = vld [vmem:[#allocation2 + $0xb0] sm:$0xff]  ;;  %s9687_s20 = sshll.u32 %s13191_s28, 11  ;;  %s17034_s27 = sld [smem:[#allocation40_spill]] }
 0x10e   : > { %10049 = vmatprep.subr.bf16.mxu0 %v10048_v17  ;;  %v10060_v35 = vpack.c.bf16 %v739_v33, %v737_v32  ;;  %v741_v38 = vld [vmem:[#allocation2 + $0xc8] sm:$0xff]  ;;  %v743_v39 = vld [vmem:[#allocation2 + $0xd8] sm:$0xff]  ;;  %v10062_v40 = vpack.c.bf16 %v738_v37, %v736_v36  ;;  %v740_v42 = vld [vmem:[#allocation2 + $0xc0] sm:$0xff]  ;;  %s13078_s1 = smov [#allocation16]  }
 0x10f   : > { %v10064_v41 = vpack.c.bf16 %v743_v39, %v741_v38  ;;  %v742_v43 = vld [vmem:[#allocation2 + $0xd0] sm:$0xff]  ;;  %v745_v44 = vld [vmem:[#allocation2 + $0xe8] sm:$0xff]  ;;  %v747_v45 = vld [vmem:[#allocation2 + $0xf8] sm:$0xff]  ;;  %v669_v38 = vlaneseq  ;;  %s12976_s0 = sshll.u32 %s13078_s1, 4  ;;  %s12977_s0 = int_to_ptr.vmem [resolvable:$false] %s12976_s0 }
 0x110   : > { %v10066_v46 = vpack.c.bf16 %v742_v43, %v740_v42  ;;  %v10068_v47 = vpack.c.bf16 %v747_v45, %v745_v44  ;;  %v744_v48 = vld [vmem:[#allocation2 + $0xe0] sm:$0xff]  ;;  %v746_v49 = vld [vmem:[#allocation2 + $0xf0] sm:$0xff]  ;;  %v749_v50 = vld [vmem:[#allocation2 + $0x108] sm:$0xff]  ;;  %s657_s17 = sand.u32 1, %s17031_s22   ;;  %s12978_s13 = scalar_lea.vmem %s12977_s0, 4096 }
 0x111   : > { %682 = vperm.xlu0 %12423, %v668_v2   ;;  %10051 = vmatpush1.bf16.msra.mxu0 %v10050_v22  ;;  %v751_v51 = vld [vmem:[#allocation2 + $0x118] sm:$0xff]  ;;  %v10070_v52 = vpack.c.bf16 %v746_v49, %v744_v48  ;;  %v748_v54 = vld [vmem:[#allocation2 + $0x100] sm:$0xff]  ;;  %v750_v55 = vld [vmem:[#allocation2 + $0x110] sm:$0xff]  ;;  %v13433_v39 = vand.u32 127, %v669_v38  ;;  %s9304_s2 = sshll.u32 %s657_s17, 7  ;;  %s16898_s28 = scalar_lea.sflag [#allocation4], %s657_s17 }
 0x112   : > { %10053 = vmatprep.subr.bf16.mxu0 %v10052_v23  ;;  %v10072_v53 = vpack.c.bf16 %v751_v51, %v749_v50  ;;  %v753_v56 = vld [vmem:[#allocation2 + $0x128] sm:$0xff]  ;;  %v755_v57 = vld [vmem:[#allocation2 + $0x138] sm:$0xff]  ;;  %v10074_v58 = vpack.c.bf16 %v750_v55, %v748_v54  ;;  %v752_v60 = vld [vmem:[#allocation2 + $0x120] sm:$0xff]  ;;  %v13073_v50 = vmov 1.0   ;;  %s16861_s25 = scalar_lea.vmem [#allocation16], %s9304_s2  ;;  %p17036_p11 = scmp.ne.s32.totalorder %s17033_s16, 0 }
 0x113   : > { %v10076_v59 = vpack.c.bf16 %v755_v57, %v753_v56  ;;  %v754_v61 = vld [vmem:[#allocation2 + $0x130] sm:$0xff]  ;;  %v757_v62 = vld [vmem:[#allocation2 + $0x148] sm:$0xff]  ;;  %v759_v63 = vld [vmem:[#allocation2 + $0x158] sm:$0xff]  ;;  %s9143_s21 = sshll.u32 %s16861_s25, 4  ;;  %s16891_s21 = int_to_ptr.vmem [resolvable:$true] %s9143_s21 }
 0x114   : > { %v10078_v0 = vpack.c.bf16 %v754_v61, %v752_v60  ;;  %v10080_v1 = vpack.c.bf16 %v759_v63, %v757_v62  ;;  %v756_v2 = vld [vmem:[#allocation2 + $0x140] sm:$0xff]  ;;  %v758_v3 = vld [vmem:[#allocation2 + $0x150] sm:$0xff]  ;;  %v761_v4 = vld [vmem:[#allocation2 + $0x168] sm:$0xff]  ;;  %s12972_s24 = scalar_lea.vmem %s16891_s21, 2048  ;;  %p12979_p6 = scmp.lt.s32.totalorder %s16891_s21, %s12977_s0 }
 0x115   : > { %10055 = vmatpush1.bf16.msra.mxu0 %v10054_v28  ;;  %v763_v5 = vld [vmem:[#allocation2 + $0x178] sm:$0xff]  ;;  %v10082_v6 = vpack.c.bf16 %v758_v3, %v756_v2  ;;  %v760_v8 = vld [vmem:[#allocation2 + $0x160] sm:$0xff]  ;;  %v762_v9 = vld [vmem:[#allocation2 + $0x170] sm:$0xff]  ;;  %p12973_p8 = scmp.ne.s32.totalorder %s16891_s21, %s12972_s24  ;;  %p12980_p9 = scmp.lt.s32.totalorder %s12978_s13, %s12972_s24 }
 0x116   : > { %10057 = vmatprep.subr.bf16.mxu0 %v10056_v29  ;;  %v10084_v7 = vpack.c.bf16 %v763_v5, %v761_v4  ;;  %v765_v10 = vld [vmem:[#allocation2 + $0x188] sm:$0xff]  ;;  %v767_v11 = vld [vmem:[#allocation2 + $0x198] sm:$0xff]  ;;  %v10086_v12 = vpack.c.bf16 %v762_v9, %v760_v8  ;;  %v764_v14 = vld [vmem:[#allocation2 + $0x180] sm:$0xff] }
 0x117   : > { %v10088_v13 = vpack.c.bf16 %v767_v11, %v765_v10  ;;  %v766_v15 = vld [vmem:[#allocation2 + $0x190] sm:$0xff]  ;;  %v769_v16 = vld [vmem:[#allocation2 + $0x1a8] sm:$0xff]  ;;  %v771_v17 = vld [vmem:[#allocation2 + $0x1b8] sm:$0xff]  ;;  %p12974_p5 = pnand %p12973_p8, %p17036_p11  ;;  %p12981_p10 = por %p12980_p9, %p12979_p6 }
 0x118   : > { %v10090_v18 = vpack.c.bf16 %v766_v15, %v764_v14  ;;  %v10092_v19 = vpack.c.bf16 %v771_v17, %v769_v16  ;;  %v768_v20 = vld [vmem:[#allocation2 + $0x1a0] sm:$0xff]  ;;  %v770_v21 = vld [vmem:[#allocation2 + $0x1b0] sm:$0xff]  ;;  %v773_v22 = vld [vmem:[#allocation2 + $0x1c8] sm:$0xff] }
 0x119   : > { %10059 = vmatpush1.bf16.msra.mxu0 %v10058_v34  ;;  %v775_v23 = vld [vmem:[#allocation2 + $0x1d8] sm:$0xff]  ;;  %v10094_v24 = vpack.c.bf16 %v770_v21, %v768_v20  ;;  %v772_v26 = vld [vmem:[#allocation2 + $0x1c0] sm:$0xff]  ;;  %v774_v27 = vld [vmem:[#allocation2 + $0x1d0] sm:$0xff]  ;;  %p12975_p0 = pneg %p12974_p5 }
 0x11a   : > { %10061 = vmatprep.subr.bf16.mxu0 %v10060_v35  ;;  %v10096_v25 = vpack.c.bf16 %v775_v23, %v773_v22  ;;  %v777_v28 = vld [vmem:[#allocation2 + $0x1e8] sm:$0xff]  ;;  %v779_v29 = vld [vmem:[#allocation2 + $0x1f8] sm:$0xff]  ;;  %v10098_v30 = vpack.c.bf16 %v774_v27, %v772_v26  ;;  %v776_v32 = vld [vmem:[#allocation2 + $0x1e0] sm:$0xff] }
 0x11b   : > { %v10100_v31 = vpack.c.bf16 %v779_v29, %v777_v28  ;;  %v778_v33 = vld [vmem:[#allocation2 + $0x1f0] sm:$0xff]  ;;  %v781_v34 = vld [vmem:[#allocation2 + $0x208] sm:$0xff]  ;;  %v783_v35 = vld [vmem:[#allocation2 + $0x218] sm:$0xff]  ;;  %p12982_p13 = pnand %p12981_p10, %p12975_p0 }
 0x11c   : > { %v10102_v36 = vpack.c.bf16 %v778_v33, %v776_v32  ;;  %v10104_v37 = vpack.c.bf16 %v783_v35, %v781_v34  ;;  %v782_v42 = vld [vmem:[#allocation2 + $0x210] sm:$0xff]  ;;  %v785_v43 = vld [vmem:[#allocation2 + $0x228] sm:$0xff]  ;;  %v787_v44 = vld [vmem:[#allocation2 + $0x238] sm:$0xff] }
 0x11d   : > { %10063 = vmatpush1.bf16.msra.mxu0 %v10062_v40  ;;  %v671_v40 = vadd.s32 128, %v13433_v39  ;;  %v784_v48 = vld [vmem:[#allocation2 + $0x220] sm:$0xff]  ;;  %v786_v49 = vld [vmem:[#allocation2 + $0x230] sm:$0xff]  ;;  %v789_v51 = vld [vmem:[#allocation2 + $0x248] sm:$0xff] }
 0x11e   : > { %10065 = vmatprep.subr.bf16.mxu0 %v10064_v41  ;;  %v780_v41 = vld [vmem:[#allocation2 + $0x200] sm:$0xff]  ;;  %v10110_v55 = vpack.c.bf16 %v786_v49, %v784_v48  ;;  %v795_v60 = vld [vmem:[#allocation2 + $0x278] sm:$0xff] }
 0x11f   : > { %v788_v57 = vld [vmem:[#allocation2 + $0x240] sm:$0xff]  ;;  %v799_v2 = vld [vmem:[#allocation2 + $0x298] sm:$0xff] }
 0x120   : > { %v792_v63 = vld [vmem:[#allocation2 + $0x260] sm:$0xff]  ;;  %v803_v8 = vld [vmem:[#allocation2 + $0x2b8] sm:$0xff] }
 0x121   : > { %10067 = vmatpush1.bf16.msra.mxu0 %v10066_v46  ;;  %v10106_v46 = vpack.c.bf16 %v782_v42, %v780_v41  ;;  %v796_v5 = vld [vmem:[#allocation2 + $0x280] sm:$0xff]  ;;  %v807_v14 = vld [vmem:[#allocation2 + $0x2d8] sm:$0xff] }
 0x122   : > { %10069 = vmatprep.subr.bf16.mxu0 %v10068_v47  ;;  %v10108_v47 = vpack.c.bf16 %v787_v44, %v785_v43  ;;  %v800_v11 = vld [vmem:[#allocation2 + $0x2a0] sm:$0xff]  ;;  %v811_v20 = vld [vmem:[#allocation2 + $0x2f8] sm:$0xff]  ;;  %v822_v44 = vld [vmem:[#allocation2 + $0x350] sm:$0xff] }
 0x123   : > { %v804_v17 = vld [vmem:[#allocation2 + $0x2c0] sm:$0xff]  ;;  %v815_v26 = vld [vmem:[#allocation2 + $0x318] sm:$0xff] }
 0x124   : > { %v808_v23 = vld [vmem:[#allocation2 + $0x2e0] sm:$0xff]  ;;  %v819_v32 = vld [vmem:[#allocation2 + $0x338] sm:$0xff] }
 0x125   : > { %10071 = vmatpush1.bf16.msra.mxu0 %v10070_v52  ;;  %v791_v52 = vld [vmem:[#allocation2 + $0x258] sm:$0xff]  ;;  %v812_v29 = vld [vmem:[#allocation2 + $0x300] sm:$0xff] }
 0x126   : > { %10073 = vmatprep.subr.bf16.mxu0 %v10072_v53  ;;  %v13444_v53 = vadd.s32 384, %v13433_v39  ;;  %v10112_v56 = vpack.c.bf16 %v791_v52, %v789_v51  ;;  %v816_v35 = vld [vmem:[#allocation2 + $0x320] sm:$0xff]  ;;  %v826_v52 = vld [vmem:[#allocation2 + $0x370] sm:$0xff] }
 0x127   : > { %v820_v43 = vld [vmem:[#allocation2 + $0x340] sm:$0xff] }
 0x128   : > { %v10146_v48 = vpack.c.bf16 %v822_v44, %v820_v43  ;;  %v824_v51 = vld [vmem:[#allocation2 + $0x360] sm:$0xff] }
 0x129   : > { %10075 = vmatpush1.bf16.msra.mxu0 %v10074_v58  ;;  %v790_v58 = vld [vmem:[#allocation2 + $0x250] sm:$0xff]  ;;  %v1303_v43 = vld [vmem:[#allocation7 + $0x90] sm:$0xff] }
 0x12a   : > { %10077 = vmatprep.subr.bf16.mxu0 %v10076_v59  ;;  %v793_v59 = vld [vmem:[#allocation2 + $0x268] sm:$0xff]  ;;  %v10114_v61 = vpack.c.bf16 %v790_v58, %v788_v57  ;;  %v10150_v57 = vpack.c.bf16 %v826_v52, %v824_v51  ;;  %v854_v51 = vld [vmem:[#allocation2 + $0x450] sm:$0xff]  ;;  %v859_v52 = vld [vmem:[#allocation2 + $0x478] sm:$0xff] }
 0x12b   : > { %v10116_v62 = vpack.c.bf16 %v795_v60, %v793_v59  ;;  %v828_v59 = vld [vmem:[#allocation2 + $0x380] sm:$0xff]  ;;  %v830_v60 = vld [vmem:[#allocation2 + $0x390] sm:$0xff] }
 0x12d   : > { %10079 = vmatpush1.bf16.msra.mxu0 %v10078_v0  ;;  %v794_v0 = vld [vmem:[#allocation2 + $0x270] sm:$0xff] }
 0x12e   : > { %10081 = vmatprep.subr.bf16.mxu0 %v10080_v1  ;;  %v797_v1 = vld [vmem:[#allocation2 + $0x288] sm:$0xff]  ;;  %v10118_v3 = vpack.c.bf16 %v794_v0, %v792_v63  ;;  %v10154_v63 = vpack.c.bf16 %v830_v60, %v828_v59  ;;  %v1322_v60 = vld [vmem:[#allocation7 + $0x128] sm:$0xff] }
 0x12f   : > { %v10120_v4 = vpack.c.bf16 %v799_v2, %v797_v1  ;;  %v832_v1 = vld [vmem:[#allocation2 + $0x3a0] sm:$0xff]  ;;  %v834_v2 = vld [vmem:[#allocation2 + $0x3b0] sm:$0xff] }
 0x131   : > { %10083 = vmatpush1.bf16.msra.mxu0 %v10082_v6  ;;  %v798_v6 = vld [vmem:[#allocation2 + $0x290] sm:$0xff] }
 0x132   : > { %10085 = vmatprep.subr.bf16.mxu0 %v10084_v7  ;;  %v801_v7 = vld [vmem:[#allocation2 + $0x2a8] sm:$0xff]  ;;  %v10122_v9 = vpack.c.bf16 %v798_v6, %v796_v5  ;;  %v10158_v5 = vpack.c.bf16 %v834_v2, %v832_v1  ;;  %v863_v2 = vld [vmem:[#allocation2 + $0x498] sm:$0xff] }
 0x133   : > { %v10124_v10 = vpack.c.bf16 %v803_v8, %v801_v7  ;;  %v836_v7 = vld [vmem:[#allocation2 + $0x3c0] sm:$0xff]  ;;  %v838_v8 = vld [vmem:[#allocation2 + $0x3d0] sm:$0xff]  ;;  %v861_v1 = vld [vmem:[#allocation2 + $0x488] sm:$0xff] }
 0x135   : > { %10087 = vmatpush1.bf16.msra.mxu0 %v10086_v12  ;;  %v802_v12 = vld [vmem:[#allocation2 + $0x2b0] sm:$0xff] }
 0x136   : > { %10089 = vmatprep.subr.bf16.mxu0 %v10088_v13  ;;  %v805_v13 = vld [vmem:[#allocation2 + $0x2c8] sm:$0xff]  ;;  %v10126_v15 = vpack.c.bf16 %v802_v12, %v800_v11  ;;  %v10162_v11 = vpack.c.bf16 %v838_v8, %v836_v7  ;;  %v1334_v8 = vld [vmem:[#allocation7 + $0x188] sm:$0xff] }
 0x137   : > { %v10128_v16 = vpack.c.bf16 %v807_v14, %v805_v13  ;;  %v840_v13 = vld [vmem:[#allocation2 + $0x3e0] sm:$0xff]  ;;  %v842_v14 = vld [vmem:[#allocation2 + $0x3f0] sm:$0xff] }
 0x139   : > { %10091 = vmatpush1.bf16.msra.mxu0 %v10090_v18  ;;  %v806_v18 = vld [vmem:[#allocation2 + $0x2d0] sm:$0xff] }
 0x13a   : > { %10093 = vmatprep.subr.bf16.mxu0 %v10092_v19  ;;  %v809_v19 = vld [vmem:[#allocation2 + $0x2e8] sm:$0xff]  ;;  %v10130_v21 = vpack.c.bf16 %v806_v18, %v804_v17  ;;  %v10166_v17 = vpack.c.bf16 %v842_v14, %v840_v13  ;;  %v867_v14 = vld [vmem:[#allocation2 + $0x4b8] sm:$0xff] }
 0x13b   : > { %v10132_v22 = vpack.c.bf16 %v811_v20, %v809_v19  ;;  %v844_v19 = vld [vmem:[#allocation2 + $0x400] sm:$0xff]  ;;  %v846_v20 = vld [vmem:[#allocation2 + $0x410] sm:$0xff]  ;;  %v865_v13 = vld [vmem:[#allocation2 + $0x4a8] sm:$0xff] }
 0x13d   : > { %10095 = vmatpush1.bf16.msra.mxu0 %v10094_v24  ;;  %v810_v24 = vld [vmem:[#allocation2 + $0x2f0] sm:$0xff] }
 0x13e   : > { %10097 = vmatprep.subr.bf16.mxu0 %v10096_v25  ;;  %v813_v25 = vld [vmem:[#allocation2 + $0x308] sm:$0xff]  ;;  %v10134_v27 = vpack.c.bf16 %v810_v24, %v808_v23  ;;  %v851_v23 = vld [vmem:[#allocation2 + $0x438] sm:$0xff]  ;;  %v848_v24 = vld [vmem:[#allocation2 + $0x420] sm:$0xff] }
 0x13f   : > { %v10136_v28 = vpack.c.bf16 %v815_v26, %v813_v25  ;;  %v10170_v25 = vpack.c.bf16 %v846_v20, %v844_v19  ;;  %v850_v26 = vld [vmem:[#allocation2 + $0x430] sm:$0xff]  ;;  %v1346_v20 = vld [vmem:[#allocation7 + $0x1e8] sm:$0xff] }
 0x140   : > { %v10174_v44 = vpack.c.bf16 %v850_v26, %v848_v24  ;;  %v866_v24 = vld [vmem:[#allocation2 + $0x4b0] sm:$0xff]  ;;  %v871_v26 = vld [vmem:[#allocation2 + $0x4d8] sm:$0xff] }
 0x141   : > { %10099 = vmatpush1.bf16.msra.mxu0 %v10098_v30  ;;  %v814_v30 = vld [vmem:[#allocation2 + $0x310] sm:$0xff] }
 0x142   : > { %10101 = vmatprep.subr.bf16.mxu0 %v10100_v31  ;;  %v817_v31 = vld [vmem:[#allocation2 + $0x328] sm:$0xff]  ;;  %v10138_v33 = vpack.c.bf16 %v814_v30, %v812_v29  ;;  %v1286_v30 = vld [vmem:[#allocation7 + $0x8] sm:$0xff] }
 0x143   : > { %v10140_v34 = vpack.c.bf16 %v819_v32, %v817_v31  ;;  %v1292_v31 = vld [vmem:[#allocation7 + $0x38] sm:$0xff]  ;;  %v1285_v32 = vld [vmem:[#allocation7] sm:$0xff] }
 0x145   : > { %10103 = vmatpush1.bf16.msra.mxu0 %v10102_v36  ;;  %v818_v36 = vld [vmem:[#allocation2 + $0x330] sm:$0xff] }
 0x146   : > { %10105 = vmatprep.subr.bf16.mxu0 %v10104_v37  ;;  %v821_v37 = vld [vmem:[#allocation2 + $0x348] sm:$0xff]  ;;  %v10142_v41 = vpack.c.bf16 %v818_v36, %v816_v35  ;;  %v1298_v35 = vld [vmem:[#allocation7 + $0x68] sm:$0xff] }
 0x147   : > { %v1304_v36 = vld [vmem:[#allocation7 + $0x98] sm:$0xff] }
 0x18c   : > { %v13436_v45 = vpop.permute.xlu0 %679 }
 0x18d   : > { %vm685_vm0 = vcmp.eq.s32.totalorder %v671_v40, %v13436_v45  ;;  %vm684_vm1 = vcmp.eq.s32.totalorder %v13433_v39, %v13436_v45  ;;  %vm687_vm4 = vcmp.eq.s32.totalorder %v13444_v53, %v13436_v45 }
 0x18e   : > { %9307 = vmatprep.mubr.msk.f32.mxu0 %vm685_vm0, %v13073_v50 }
 0x18f   : > { %9308 = vmatmul.mubr.msk.f32.vlgmr.msra.gmra.mrb[0].mxu0 %vm684_vm1, %v13073_v50  ;;  %vm1740_vm1 = vcmask 261120  }
 0x190   : > { %10107 = vmatpush1.bf16.msra.mxu0 %v10106_v46  ;;  %v13446_v54 = vpop.permute.xlu0 %682  ;;  %v825_v46 = vld [vmem:[#allocation2 + $0x368] sm:$0xff] }
 0x191   : > { %vm693_vm2 = vcmp.eq.s32.totalorder %v671_v40, %v13446_v54  ;;  %10109 = vmatprep.subr.bf16.mxu0 %v10108_v47  ;;  %vm692_vm3 = vcmp.eq.s32.totalorder %v13433_v39, %v13446_v54  ;;  %v823_v40 = vld [vmem:[#allocation2 + $0x358] sm:$0xff]  ;;  %vm695_vm6 = vcmp.eq.s32.totalorder %v13444_v53, %v13446_v54  ;;  %v857_v53 = vld [vmem:[#allocation2 + $0x468] sm:$0xff] }
 0x192   : > { %9309 = vmatprep.mubr.msk.f32.mxu0 %vm693_vm2, %v13073_v50  ;;  %v10144_v42 = vpack.c.bf16 %v823_v40, %v821_v37  ;;  %v827_v47 = vld [vmem:[#allocation2 + $0x378] sm:$0xff]  ;;  %v13462_v37 = vadd.s32 640, %v13433_v39  ;;  %vm13546_vm2 = vmpackc.low %vm1740_vm1, %vm1740_vm1 }
 0x193   : > { %9310 = vmatmul.mubr.msk.f32.gmra.mrb[2].mxu0 %vm692_vm3, %v13073_v50  ;;  %v10148_v49 = vpack.c.bf16 %v827_v47, %v825_v46  ;;  %v1310_v46 = vld [vmem:[#allocation7 + $0xc8] sm:$0xff]  ;;  %v1316_v47 = vld [vmem:[#allocation7 + $0xf8] sm:$0xff]  ;;  %vm1830_vm3 = vcmask 130048  }
 0x194   : > { %10111 = vmatpush1.bf16.msra.mxu0 %v10110_v55  ;;  %9311 = vmatprep.mubr.msk.f32.mxu0 %vm687_vm4, %v13073_v50  ;;  %v829_v55 = vld [vmem:[#allocation2 + $0x388] sm:$0xff]  ;;  %vm689_vm8 = vcmp.eq.s32.totalorder %v13462_v37, %v13436_v45  ;;  %vm697_vm10 = vcmp.eq.s32.totalorder %v13462_v37, %v13446_v54  ;;  %vm3392_vm4 = vcmask 523264  }
 0x195   : > { %10113 = vmatprep.subr.bf16.mxu0 %v10112_v56  ;;  %v831_v56 = vld [vmem:[#allocation2 + $0x398] sm:$0xff] }
 0x196   : > { %v10152_v58 = vpack.c.bf16 %v831_v56, %v829_v55  ;;  %v10296_v56 = vpack.c.bf16 %v1316_v47, %v1310_v46  ;;  %v1363_v46 = vld [vmem:[#allocation7 + $0x270] sm:$0xff] }
 0x198   : > { %10115 = vmatpush1.bf16.msra.mxu0 %v10114_v61  ;;  %v833_v61 = vld [vmem:[#allocation2 + $0x3a8] sm:$0xff] }
 0x199   : > { %10117 = vmatprep.subr.bf16.mxu0 %v10116_v62  ;;  %v835_v62 = vld [vmem:[#allocation2 + $0x3b8] sm:$0xff] }
 0x19a   : > { %v10156_v0 = vpack.c.bf16 %v835_v62, %v833_v61  ;;  %v1328_v61 = vld [vmem:[#allocation7 + $0x158] sm:$0xff]  ;;  %v10180_v62 = vpack.c.bf16 %v859_v52, %v857_v53  ;;  %v872_v53 = vld [vmem:[#allocation2 + $0x4e0] sm:$0xff]  ;;  %v874_v52 = vld [vmem:[#allocation2 + $0x4f0] sm:$0xff] }
 0x19c   : > { %10119 = vmatpush1.bf16.msra.mxu0 %v10118_v3  ;;  %v837_v3 = vld [vmem:[#allocation2 + $0x3c8] sm:$0xff] }
 0x19d   : > { %10121 = vmatprep.subr.bf16.mxu0 %v10120_v4  ;;  %v839_v4 = vld [vmem:[#allocation2 + $0x3d8] sm:$0xff] }
 0x19e   : > { %v10160_v6 = vpack.c.bf16 %v839_v4, %v837_v3  ;;  %v10300_v4 = vpack.c.bf16 %v1328_v61, %v1322_v60  ;;  %v1375_v60 = vld [vmem:[#allocation7 + $0x2d0] sm:$0xff]  ;;  %v10198_v61 = vpack.c.bf16 %v874_v52, %v872_v53  ;;  %v1436_v53 = vld [vmem:[#allocation7 + $0x4b8] sm:$0xff] }
 0x1a0   : > { %10123 = vmatpush1.bf16.msra.mxu0 %v10122_v9  ;;  %v841_v9 = vld [vmem:[#allocation2 + $0x3e8] sm:$0xff] }
 0x1a1   : > { %10125 = vmatprep.subr.bf16.mxu0 %v10124_v10  ;;  %v843_v10 = vld [vmem:[#allocation2 + $0x3f8] sm:$0xff] }
 0x1a2   : > { %v10164_v12 = vpack.c.bf16 %v843_v10, %v841_v9  ;;  %v1340_v9 = vld [vmem:[#allocation7 + $0x1b8] sm:$0xff]  ;;  %v10184_v10 = vpack.c.bf16 %v863_v2, %v861_v1  ;;  %v876_v1 = vld [vmem:[#allocation2 + $0x500] sm:$0xff]  ;;  %v878_v2 = vld [vmem:[#allocation2 + $0x510] sm:$0xff] }
 0x1a4   : > { %10127 = vmatpush1.bf16.msra.mxu0 %v10126_v15  ;;  %v845_v15 = vld [vmem:[#allocation2 + $0x408] sm:$0xff] }
 0x1a5   : > { %10129 = vmatprep.subr.bf16.mxu0 %v10128_v16  ;;  %v847_v16 = vld [vmem:[#allocation2 + $0x418] sm:$0xff] }
 0x1a6   : > { %v10168_v18 = vpack.c.bf16 %v847_v16, %v845_v15  ;;  %v10304_v16 = vpack.c.bf16 %v1340_v9, %v1334_v8  ;;  %v1387_v8 = vld [vmem:[#allocation7 + $0x330] sm:$0xff]  ;;  %v10202_v9 = vpack.c.bf16 %v878_v2, %v876_v1  ;;  %v1448_v1 = vld [vmem:[#allocation7 + $0x518] sm:$0xff] }
 0x1a8   : > { %10131 = vmatpush1.bf16.msra.mxu0 %v10130_v21  ;;  %v672_v21 = vadd.s32 256, %v13433_v39 }
 0x1a9   : > { %10133 = vmatprep.subr.bf16.mxu0 %v10132_v22  ;;  %v849_v22 = vld [vmem:[#allocation2 + $0x428] sm:$0xff] }
 0x1aa   : > { %v10172_v29 = vpack.c.bf16 %v851_v23, %v849_v22  ;;  %vm686_vm5 = vcmp.eq.s32.totalorder %v672_v21, %v13436_v45  ;;  %vm694_vm7 = vcmp.eq.s32.totalorder %v672_v21, %v13446_v54  ;;  %v1352_v21 = vld [vmem:[#allocation7 + $0x218] sm:$0xff]  ;;  %v10188_v22 = vpack.c.bf16 %v867_v14, %v865_v13  ;;  %v864_v23 = vld [vmem:[#allocation2 + $0x4a0] sm:$0xff]  ;;  %v882_v14 = vld [vmem:[#allocation2 + $0x530] sm:$0xff] }
 0x1ab   : > { %v880_v13 = vld [vmem:[#allocation2 + $0x520] sm:$0xff] }
 0x1ac   : > { %10135 = vmatpush1.bf16.msra.mxu0 %v10134_v27  ;;  %v853_v27 = vld [vmem:[#allocation2 + $0x448] sm:$0xff] }
 0x1ad   : > { %10137 = vmatprep.subr.bf16.mxu0 %v10136_v28  ;;  %v855_v28 = vld [vmem:[#allocation2 + $0x458] sm:$0xff] }
 0x1b0   : > { %10139 = vmatpush1.bf16.msra.mxu0 %v10138_v33  ;;  %v10288_v33 = vpack.c.bf16 %v1292_v31, %v1286_v30  ;;  %v1351_v30 = vld [vmem:[#allocation7 + $0x210] sm:$0xff]  ;;  %v10190_v31 = vpack.c.bf16 %v866_v24, %v864_v23  ;;  %v1412_v23 = vld [vmem:[#allocation7 + $0x3f8] sm:$0xff] }
 0x1b1   : > { %10141 = vmatprep.subr.bf16.mxu0 %v10140_v34  ;;  %v1291_v34 = vld [vmem:[#allocation7 + $0x30] sm:$0xff] }
 0x1b2   : > { %v10290_v40 = vpack.c.bf16 %v1291_v34, %v1285_v32  ;;  %10289 = vmatprep.subr.bf16.mxu1 %v10288_v33  ;;  %v1358_v32 = vld [vmem:[#allocation7 + $0x248] sm:$0xff]  ;;  %v1364_v33 = vld [vmem:[#allocation7 + $0x278] sm:$0xff] }
 0x1b4   : > { %10143 = vmatpush1.bf16.msra.mxu0 %v10142_v41  ;;  %v10292_v41 = vpack.c.bf16 %v1304_v36, %v1298_v35  ;;  %10291 = vmatpush1.bf16.msra.mxu1 %v10290_v40  ;;  %v868_v35 = vld [vmem:[#allocation2 + $0x4c0] sm:$0xff]  ;;  %v870_v36 = vld [vmem:[#allocation2 + $0x4d0] sm:$0xff]  ;;  %v873_v40 = vld [vmem:[#allocation2 + $0x4e8] sm:$0xff] }
 0x1b5   : > { %10145 = vmatprep.subr.bf16.mxu0 %v10144_v42  ;;  %v1297_v42 = vld [vmem:[#allocation7 + $0x60] sm:$0xff]  ;;  %v10194_v47 = vpack.c.bf16 %v870_v36, %v868_v35  ;;  %v1424_v35 = vld [vmem:[#allocation7 + $0x458] sm:$0xff] }
 0x1b6   : > { %v10294_v55 = vpack.c.bf16 %v1303_v43, %v1297_v42  ;;  %10293 = vmatprep.subr.bf16.mxu1 %v10292_v41  ;;  %v875_v41 = vld [vmem:[#allocation2 + $0x4f8] sm:$0xff]  ;;  %v10312_v43 = vpack.c.bf16 %v1364_v33, %v1358_v32  ;;  %v1411_v32 = vld [vmem:[#allocation7 + $0x3f0] sm:$0xff] }
 0x1b8   : > { %10147 = vmatpush1.bf16.msra.mxu0 %v10146_v48  ;;  %v10176_v48 = vpack.c.bf16 %v855_v28, %v853_v27  ;;  %10295 = vmatpush1.bf16.msra.mxu1 %v10294_v55  ;;  %v10308_v28 = vpack.c.bf16 %v1352_v21, %v1346_v20  ;;  %v877_v55 = vld [vmem:[#allocation2 + $0x508] sm:$0xff]  ;;  %v1399_v20 = vld [vmem:[#allocation7 + $0x390] sm:$0xff]  ;;  %v10206_v21 = vpack.c.bf16 %v882_v14, %v880_v13 }
 0x1b9   : > { %10149 = vmatprep.subr.bf16.mxu0 %v10148_v49  ;;  %v852_v49 = vld [vmem:[#allocation2 + $0x440] sm:$0xff]  ;;  %10297 = vmatprep.subr.bf16.mxu1 %v10296_v56  ;;  %v879_v56 = vld [vmem:[#allocation2 + $0x518] sm:$0xff]  ;;  %v1460_v13 = vld [vmem:[#allocation7 + $0x578] sm:$0xff] }
 0x1ba   : > { %v10178_v59 = vpack.c.bf16 %v854_v51, %v852_v49  ;;  %v1376_v49 = vld [vmem:[#allocation7 + $0x2d8] sm:$0xff]  ;;  %v10196_v51 = vpack.c.bf16 %v875_v41, %v873_v40  ;;  %v888_v40 = vld [vmem:[#allocation2 + $0x560] sm:$0xff]  ;;  %v890_v41 = vld [vmem:[#allocation2 + $0x570] sm:$0xff] }
 0x1bc   : > { %10151 = vmatpush1.bf16.msra.mxu0 %v10150_v57  ;;  %v1309_v57 = vld [vmem:[#allocation7 + $0xc0] sm:$0xff] }
 0x1bd   : > { %10153 = vmatprep.subr.bf16.mxu0 %v10152_v58  ;;  %v1315_v58 = vld [vmem:[#allocation7 + $0xf0] sm:$0xff] }
 0x1be   : > { %v10298_v3 = vpack.c.bf16 %v1315_v58, %v1309_v57 }
 0x1c0   : > { %10155 = vmatpush1.bf16.msra.mxu0 %v10154_v63  ;;  %v856_v63 = vld [vmem:[#allocation2 + $0x460] sm:$0xff]  ;;  %10299 = vmatpush1.bf16.msra.mxu1 %v10298_v3  ;;  %v881_v3 = vld [vmem:[#allocation2 + $0x528] sm:$0xff] }
 0x1c1   : > { %10157 = vmatprep.subr.bf16.mxu0 %v10156_v0  ;;  %v858_v0 = vld [vmem:[#allocation2 + $0x470] sm:$0xff]  ;;  %10301 = vmatprep.subr.bf16.mxu1 %v10300_v4  ;;  %v883_v4 = vld [vmem:[#allocation2 + $0x538] sm:$0xff] }
 0x1c2   : > { %v10182_v7 = vpack.c.bf16 %v858_v0, %v856_v63  ;;  %v1388_v63 = vld [vmem:[#allocation7 + $0x338] sm:$0xff]  ;;  %v10200_v0 = vpack.c.bf16 %v879_v56, %v877_v55  ;;  %v892_v55 = vld [vmem:[#allocation2 + $0x580] sm:$0xff]  ;;  %v894_v56 = vld [vmem:[#allocation2 + $0x590] sm:$0xff] }
 0x1c4   : > { %10159 = vmatpush1.bf16.msra.mxu0 %v10158_v5  ;;  %v1321_v5 = vld [vmem:[#allocation7 + $0x120] sm:$0xff] }
 0x1c5   : > { %10161 = vmatprep.subr.bf16.mxu0 %v10160_v6  ;;  %v1327_v6 = vld [vmem:[#allocation7 + $0x150] sm:$0xff] }
 0x1c6   : > { %v10302_v15 = vpack.c.bf16 %v1327_v6, %v1321_v5 }
 0x1c8   : > { %10163 = vmatpush1.bf16.msra.mxu0 %v10162_v11  ;;  %v860_v11 = vld [vmem:[#allocation2 + $0x480] sm:$0xff]  ;;  %10303 = vmatpush1.bf16.msra.mxu1 %v10302_v15  ;;  %v885_v15 = vld [vmem:[#allocation2 + $0x548] sm:$0xff] }
 0x1c9   : > { %10165 = vmatprep.subr.bf16.mxu0 %v10164_v12  ;;  %v862_v12 = vld [vmem:[#allocation2 + $0x490] sm:$0xff]  ;;  %10305 = vmatprep.subr.bf16.mxu1 %v10304_v16  ;;  %v887_v16 = vld [vmem:[#allocation2 + $0x558] sm:$0xff] }
 0x1ca   : > { %v10186_v19 = vpack.c.bf16 %v862_v12, %v860_v11  ;;  %v1400_v11 = vld [vmem:[#allocation7 + $0x398] sm:$0xff]  ;;  %v10204_v12 = vpack.c.bf16 %v883_v4, %v881_v3  ;;  %v10208_v24 = vpack.c.bf16 %v887_v16, %v885_v15  ;;  %v896_v3 = vld [vmem:[#allocation2 + $0x5a0] sm:$0xff]  ;;  %v898_v4 = vld [vmem:[#allocation2 + $0x5b0] sm:$0xff] }
 0x1cb   : > { %v900_v15 = vld [vmem:[#allocation2 + $0x5c0] sm:$0xff]  ;;  %v902_v16 = vld [vmem:[#allocation2 + $0x5d0] sm:$0xff] }
 0x1cc   : > { %10167 = vmatpush1.bf16.msra.mxu0 %v10166_v17  ;;  %v1333_v17 = vld [vmem:[#allocation7 + $0x180] sm:$0xff] }
 0x1cd   : > { %10169 = vmatprep.subr.bf16.mxu0 %v10168_v18  ;;  %v1339_v18 = vld [vmem:[#allocation7 + $0x1b0] sm:$0xff] }
 0x1ce   : > { %v10306_v27 = vpack.c.bf16 %v1339_v18, %v1333_v17 }
 0x1cf   : > { %9312 = vmatmul.mubr.msk.f32.vlgmr.msra.gmra.mrb[0].mxu0 %vm686_vm5, %v13073_v50  ;;  %vm3395_vm5 = vcmask 785408  }
 0x1d0   : > { %9313 = vmatprep.mubr.msk.f32.mxu0 %vm695_vm6, %v13073_v50  ;;  %10171 = vmatpush1.bf16.msra.mxu0 %v10170_v25  ;;  %v869_v25 = vld [vmem:[#allocation2 + $0x4c8] sm:$0xff] }
 0x1d1   : > { %10173 = vmatprep.subr.bf16.mxu0 %v10172_v29  ;;  %v1345_v29 = vld [vmem:[#allocation7 + $0x1e0] sm:$0xff]  ;;  %v10192_v34 = vpack.c.bf16 %v871_v26, %v869_v25  ;;  %10307 = vmatpush1.bf16.msra.mxu1 %v10306_v27  ;;  %v884_v25 = vld [vmem:[#allocation2 + $0x540] sm:$0xff]  ;;  %v889_v27 = vld [vmem:[#allocation2 + $0x568] sm:$0xff] }
 0x1d2   : > { %v10310_v42 = vpack.c.bf16 %v1351_v30, %v1345_v29  ;;  %10309 = vmatprep.subr.bf16.mxu1 %v10308_v28  ;;  %v886_v26 = vld [vmem:[#allocation2 + $0x550] sm:$0xff]  ;;  %v891_v28 = vld [vmem:[#allocation2 + $0x578] sm:$0xff] }
 0x1d3   : > { %9314 = vmatmul.mubr.msk.f32.gmra.mrb[2].mxu0 %vm694_vm7, %v13073_v50  ;;  %v10210_v33 = vpack.c.bf16 %v886_v26, %v884_v25  ;;  %v10212_v36 = vpack.c.bf16 %v891_v28, %v889_v27  ;;  %v904_v25 = vld [vmem:[#allocation2 + $0x5e0] sm:$0xff]  ;;  %v906_v26 = vld [vmem:[#allocation2 + $0x5f0] sm:$0xff]  ;;  %v909_v27 = vld [vmem:[#allocation2 + $0x608] sm:$0xff] }
 0x1d4   : > { %10175 = vmatpush1.bf16.msra.mxu0 %v10174_v44  ;;  %9315 = vmatprep.mubr.msk.f32.mxu0 %vm689_vm8, %v13073_v50  ;;  %v1357_v44 = vld [vmem:[#allocation7 + $0x240] sm:$0xff]  ;;  %v911_v28 = vld [vmem:[#allocation2 + $0x618] sm:$0xff] }
 0x1d5   : > { %10177 = vmatprep.subr.bf16.mxu0 %v10176_v48  ;;  %v1370_v48 = vld [vmem:[#allocation7 + $0x2a8] sm:$0xff]  ;;  %10311 = vmatpush1.bf16.msra.mxu1 %v10310_v42  ;;  %v10314_v57 = vpack.c.bf16 %v1363_v46, %v1357_v44  ;;  %v893_v42 = vld [vmem:[#allocation2 + $0x588] sm:$0xff] }
 0x1d6   : > { %10313 = vmatprep.subr.bf16.mxu1 %v10312_v43  ;;  %v10316_v58 = vpack.c.bf16 %v1376_v49, %v1370_v48  ;;  %v895_v43 = vld [vmem:[#allocation2 + $0x598] sm:$0xff]  ;;  %v1423_v48 = vld [vmem:[#allocation7 + $0x450] sm:$0xff]  ;;  %v10214_v49 = vpack.c.bf16 %v890_v41, %v888_v40  ;;  %v13472_v41 = vadd.s32 896, %v13433_v39 }
 0x1d7   : > { %v10216_v52 = vpack.c.bf16 %v895_v43, %v893_v42  ;;  %v912_v43 = vld [vmem:[#allocation2 + $0x620] sm:$0xff] }
 0x1d8   : > { %10179 = vmatpush1.bf16.msra.mxu0 %v10178_v59  ;;  %v1369_v59 = vld [vmem:[#allocation7 + $0x2a0] sm:$0xff]  ;;  %vm691_vm11 = vcmp.eq.s32.totalorder %v13472_v41, %v13436_v45  ;;  %vm699_vm14 = vcmp.eq.s32.totalorder %v13472_v41, %v13446_v54  ;;  %v1288_v41 = vld [vmem:[#allocation7 + $0x18] sm:$0xff] }
 0x1d9   : > { %10181 = vmatprep.subr.bf16.mxu0 %v10180_v62  ;;  %v1382_v62 = vld [vmem:[#allocation7 + $0x308] sm:$0xff]  ;;  %10315 = vmatpush1.bf16.msra.mxu1 %v10314_v57  ;;  %v10318_v5 = vpack.c.bf16 %v1375_v60, %v1369_v59  ;;  %v897_v57 = vld [vmem:[#allocation2 + $0x5a8] sm:$0xff] }
 0x1da   : > { %10317 = vmatprep.subr.bf16.mxu1 %v10316_v58  ;;  %v10320_v6 = vpack.c.bf16 %v1388_v63, %v1382_v62  ;;  %v899_v58 = vld [vmem:[#allocation2 + $0x5b8] sm:$0xff]  ;;  %v1435_v62 = vld [vmem:[#allocation7 + $0x4b0] sm:$0xff]  ;;  %v10218_v63 = vpack.c.bf16 %v894_v56, %v892_v55  ;;  %v13074_v56 = vmov 0.0  }
 0x1db   : > { %v10220_v2 = vpack.c.bf16 %v899_v58, %v897_v57  ;;  %v923_v55 = vld [vmem:[#allocation2 + $0x678] sm:$0xff]  ;;  %v707_v37 = vsel %vm691_vm11, 1.0, %v13074_v56 }
 0x1dc   : > { %10183 = vmatpush1.bf16.msra.mxu0 %v10182_v7  ;;  %v1381_v7 = vld [vmem:[#allocation7 + $0x300] sm:$0xff] }
 0x1dd   : > { %10185 = vmatprep.subr.bf16.mxu0 %v10184_v10  ;;  %v1394_v10 = vld [vmem:[#allocation7 + $0x368] sm:$0xff]  ;;  %10319 = vmatpush1.bf16.msra.mxu1 %v10318_v5  ;;  %v10322_v17 = vpack.c.bf16 %v1387_v8, %v1381_v7  ;;  %v901_v5 = vld [vmem:[#allocation2 + $0x5c8] sm:$0xff] }
 0x1de   : > { %10321 = vmatprep.subr.bf16.mxu1 %v10320_v6  ;;  %v10324_v18 = vpack.c.bf16 %v1400_v11, %v1394_v10  ;;  %v903_v6 = vld [vmem:[#allocation2 + $0x5d8] sm:$0xff]  ;;  %v1447_v10 = vld [vmem:[#allocation7 + $0x510] sm:$0xff]  ;;  %v10222_v11 = vpack.c.bf16 %v898_v4, %v896_v3  ;;  %v929_v3 = vld [vmem:[#allocation2 + $0x6a8] sm:$0xff] }
 0x1df   : > { %v10224_v14 = vpack.c.bf16 %v903_v6, %v901_v5  ;;  %v931_v4 = vld [vmem:[#allocation2 + $0x6b8] sm:$0xff] }
 0x1e0   : > { %10187 = vmatpush1.bf16.msra.mxu0 %v10186_v19  ;;  %v1393_v19 = vld [vmem:[#allocation7 + $0x360] sm:$0xff]  ;;  %v10252_v6 = vpack.c.bf16 %v931_v4, %v929_v3  ;;  %v964_v3 = vld [vmem:[#allocation2 + $0x7c0] sm:$0xff]  ;;  %v715_v4 = vsel %vm699_vm14, 1.0, %v13074_v56 }
 0x1e1   : > { %10189 = vmatprep.subr.bf16.mxu0 %v10188_v22  ;;  %v1406_v22 = vld [vmem:[#allocation7 + $0x3c8] sm:$0xff]  ;;  %10323 = vmatpush1.bf16.msra.mxu1 %v10322_v17  ;;  %v10326_v29 = vpack.c.bf16 %v1399_v20, %v1393_v19  ;;  %v905_v17 = vld [vmem:[#allocation2 + $0x5e8] sm:$0xff]  ;;  %v1287_v56 = vld [vmem:[#allocation7 + $0x10] sm:$0xff] }
 0x1e2   : > { %10325 = vmatprep.subr.bf16.mxu1 %v10324_v18  ;;  %v10328_v30 = vpack.c.bf16 %v1412_v23, %v1406_v22  ;;  %v907_v18 = vld [vmem:[#allocation2 + $0x5f8] sm:$0xff]  ;;  %v1459_v22 = vld [vmem:[#allocation7 + $0x570] sm:$0xff]  ;;  %v10226_v23 = vpack.c.bf16 %v902_v16, %v900_v15  ;;  %v937_v15 = vld [vmem:[#allocation2 + $0x6e8] sm:$0xff] }
 0x1e3   : > { %v939_v16 = vld [vmem:[#allocation2 + $0x6f8] sm:$0xff] }
 0x1e4   : > { %10191 = vmatpush1.bf16.msra.mxu0 %v10190_v31  ;;  %v1405_v31 = vld [vmem:[#allocation7 + $0x3c0] sm:$0xff] }
 0x1e5   : > { %10193 = vmatprep.subr.bf16.mxu0 %v10192_v34  ;;  %v1418_v34 = vld [vmem:[#allocation7 + $0x428] sm:$0xff]  ;;  %10327 = vmatpush1.bf16.msra.mxu1 %v10326_v29  ;;  %v10330_v44 = vpack.c.bf16 %v1411_v32, %v1405_v31  ;;  %v10232_v31 = vpack.c.bf16 %v911_v28, %v909_v27  ;;  %v908_v32 = vld [vmem:[#allocation2 + $0x600] sm:$0xff]  ;;  %v945_v27 = vld [vmem:[#allocation2 + $0x728] sm:$0xff] }
 0x1e6   : > { %10329 = vmatprep.subr.bf16.mxu1 %v10328_v30  ;;  %v10332_v46 = vpack.c.bf16 %v1424_v35, %v1418_v34  ;;  %v10230_v30 = vpack.c.bf16 %v906_v26, %v904_v25  ;;  %v674_v34 = vadd.s32 512, %v13433_v39  ;;  %v913_v35 = vld [vmem:[#allocation2 + $0x628] sm:$0xff]  ;;  %v940_v25 = vld [vmem:[#allocation2 + $0x700] sm:$0xff]  ;;  %v942_v26 = vld [vmem:[#allocation2 + $0x710] sm:$0xff] }
 0x1e7   : > { %v947_v28 = vld [vmem:[#allocation2 + $0x738] sm:$0xff] }
 0x1e8   : > { %10195 = vmatpush1.bf16.msra.mxu0 %v10194_v47  ;;  %v1417_v47 = vld [vmem:[#allocation7 + $0x420] sm:$0xff]  ;;  %vm688_vm9 = vcmp.eq.s32.totalorder %v674_v34, %v13436_v45  ;;  %vm696_vm13 = vcmp.eq.s32.totalorder %v674_v34, %v13446_v54  ;;  %v951_v34 = vld [vmem:[#allocation2 + $0x758] sm:$0xff] }
 0x1e9   : > { %10197 = vmatprep.subr.bf16.mxu0 %v10196_v51  ;;  %v1430_v51 = vld [vmem:[#allocation7 + $0x488] sm:$0xff]  ;;  %10331 = vmatpush1.bf16.msra.mxu1 %v10330_v44  ;;  %v10334_v59 = vpack.c.bf16 %v1423_v48, %v1417_v47  ;;  %v914_v44 = vld [vmem:[#allocation2 + $0x630] sm:$0xff] }
 0x1ea   : > { %10333 = vmatprep.subr.bf16.mxu1 %v10332_v46  ;;  %v10336_v60 = vpack.c.bf16 %v1436_v53, %v1430_v51  ;;  %v917_v46 = vld [vmem:[#allocation2 + $0x648] sm:$0xff]  ;;  %v919_v47 = vld [vmem:[#allocation2 + $0x658] sm:$0xff]  ;;  %v10238_v48 = vpack.c.bf16 %v914_v44, %v912_v43  ;;  %v916_v51 = vld [vmem:[#allocation2 + $0x640] sm:$0xff] }
 0x1eb   : > { %v918_v53 = vld [vmem:[#allocation2 + $0x650] sm:$0xff]  ;;  %v953_v43 = vld [vmem:[#allocation2 + $0x768] sm:$0xff]  ;;  %v955_v44 = vld [vmem:[#allocation2 + $0x778] sm:$0xff] }
 0x1ec   : > { %10199 = vmatpush1.bf16.msra.mxu0 %v10198_v61  ;;  %v1429_v61 = vld [vmem:[#allocation7 + $0x480] sm:$0xff]  ;;  %v10242_v57 = vpack.c.bf16 %v918_v53, %v916_v51  ;;  %v957_v51 = vld [vmem:[#allocation2 + $0x788] sm:$0xff]  ;;  %v959_v53 = vld [vmem:[#allocation2 + $0x798] sm:$0xff] }
 0x1ed   : > { %10201 = vmatprep.subr.bf16.mxu0 %v10200_v0  ;;  %v1442_v0 = vld [vmem:[#allocation7 + $0x4e8] sm:$0xff]  ;;  %10335 = vmatpush1.bf16.msra.mxu1 %v10334_v59  ;;  %v10338_v7 = vpack.c.bf16 %v1435_v62, %v1429_v61  ;;  %v920_v59 = vld [vmem:[#allocation2 + $0x660] sm:$0xff]  ;;  %v925_v61 = vld [vmem:[#allocation2 + $0x688] sm:$0xff] }
 0x1ee   : > { %10337 = vmatprep.subr.bf16.mxu1 %v10336_v60  ;;  %v10340_v8 = vpack.c.bf16 %v1448_v1, %v1442_v0  ;;  %v922_v60 = vld [vmem:[#allocation2 + $0x670] sm:$0xff]  ;;  %v927_v62 = vld [vmem:[#allocation2 + $0x698] sm:$0xff]  ;;  %v924_v1 = vld [vmem:[#allocation2 + $0x680] sm:$0xff] }
 0x1ef   : > { %v10248_v0 = vpack.c.bf16 %v927_v62, %v925_v61  ;;  %v960_v62 = vld [vmem:[#allocation2 + $0x7a0] sm:$0xff] }
 0x1f0   : > { %10203 = vmatpush1.bf16.msra.mxu0 %v10202_v9  ;;  %v1441_v9 = vld [vmem:[#allocation7 + $0x4e0] sm:$0xff] }
 0x1f1   : > { %10205 = vmatprep.subr.bf16.mxu0 %v10204_v12  ;;  %v1454_v12 = vld [vmem:[#allocation7 + $0x548] sm:$0xff]  ;;  %10339 = vmatpush1.bf16.msra.mxu1 %v10338_v7  ;;  %v10342_v19 = vpack.c.bf16 %v1447_v10, %v1441_v9  ;;  %v928_v7 = vld [vmem:[#allocation2 + $0x6a0] sm:$0xff]  ;;  %v933_v9 = vld [vmem:[#allocation2 + $0x6c8] sm:$0xff] }
 0x1f2   : > { %10341 = vmatprep.subr.bf16.mxu1 %v10340_v8  ;;  %v10344_v20 = vpack.c.bf16 %v1460_v13, %v1454_v12  ;;  %v930_v8 = vld [vmem:[#allocation2 + $0x6b0] sm:$0xff]  ;;  %v935_v10 = vld [vmem:[#allocation2 + $0x6d8] sm:$0xff]  ;;  %v932_v13 = vld [vmem:[#allocation2 + $0x6c0] sm:$0xff] }
 0x1f3   : > { %v10256_v12 = vpack.c.bf16 %v935_v10, %v933_v9 }
 0x1f4   : > { %10207 = vmatpush1.bf16.msra.mxu0 %v10206_v21  ;;  %v1453_v21 = vld [vmem:[#allocation7 + $0x540] sm:$0xff] }
 0x1f5   : > { %10209 = vmatprep.subr.bf16.mxu0 %v10208_v24  ;;  %v10228_v24 = vpack.c.bf16 %v907_v18, %v905_v17  ;;  %10343 = vmatpush1.bf16.msra.mxu1 %v10342_v19  ;;  %v10346_v29 = vpack.c.bf16 %v1459_v22, %v1453_v21  ;;  %v10260_v18 = vpack.c.bf16 %v939_v16, %v937_v15  ;;  %v936_v19 = vld [vmem:[#allocation2 + $0x6e0] sm:$0xff]  ;;  %v941_v21 = vld [vmem:[#allocation2 + $0x708] sm:$0xff]  ;;  %v943_v22 = vld [vmem:[#allocation2 + $0x718] sm:$0xff] }
 0x1f6   : > { %10345 = vmatprep.subr.bf16.mxu1 %v10344_v20  ;;  %v938_v20 = vld [vmem:[#allocation2 + $0x6f0] sm:$0xff]  ;;  %v1306_v15 = vld [vmem:[#allocation7 + $0xa8] sm:$0xff] }
 0x1f8   : > { %10211 = vmatpush1.bf16.msra.mxu0 %v10210_v33  ;;  %v910_v33 = vld [vmem:[#allocation2 + $0x610] sm:$0xff] }
 0x1f9   : > { %10213 = vmatprep.subr.bf16.mxu0 %v10212_v36  ;;  %v915_v36 = vld [vmem:[#allocation2 + $0x638] sm:$0xff]  ;;  %10347 = vmatpush1.bf16.msra.mxu1 %v10346_v29  ;;  %v10234_v40 = vpack.c.bf16 %v910_v33, %v908_v32  ;;  %v10266_v29 = vpack.c.bf16 %v942_v26, %v940_v25  ;;  %v946_v32 = vld [vmem:[#allocation2 + $0x730] sm:$0xff]  ;;  %v949_v33 = vld [vmem:[#allocation2 + $0x748] sm:$0xff] }
 0x1fa   : > { %v10236_v42 = vpack.c.bf16 %v915_v36, %v913_v35  ;;  %v10272_v36 = vpack.c.bf16 %v951_v34, %v949_v33  ;;  %v1312_v25 = vld [vmem:[#allocation7 + $0xd8] sm:$0xff]  ;;  %v1318_v26 = vld [vmem:[#allocation7 + $0x108] sm:$0xff]  ;;  %v1317_v33 = vld [vmem:[#allocation7 + $0x100] sm:$0xff] }
 0x1fb   : > { %v1324_v34 = vld [vmem:[#allocation7 + $0x138] sm:$0xff] }
 0x1fc   : > { %10215 = vmatpush1.bf16.msra.mxu0 %v10214_v49  ;;  %v10240_v49 = vpack.c.bf16 %v919_v47, %v917_v46  ;;  %v10276_v47 = vpack.c.bf16 %v955_v44, %v953_v43  ;;  %v1329_v43 = vld [vmem:[#allocation7 + $0x160] sm:$0xff]  ;;  %v1336_v44 = vld [vmem:[#allocation7 + $0x198] sm:$0xff] }
 0x1fd   : > { %10217 = vmatprep.subr.bf16.mxu0 %v10216_v52  ;;  %v921_v52 = vld [vmem:[#allocation2 + $0x668] sm:$0xff] }
 0x1fe   : > { %v10244_v58 = vpack.c.bf16 %v923_v55, %v921_v52  ;;  %v10280_v55 = vpack.c.bf16 %v959_v53, %v957_v51  ;;  %v1341_v51 = vld [vmem:[#allocation7 + $0x1c0] sm:$0xff]  ;;  %v1348_v53 = vld [vmem:[#allocation7 + $0x1f8] sm:$0xff] }
 0x200   : > { %10219 = vmatpush1.bf16.msra.mxu0 %v10218_v63  ;;  %v10246_v63 = vpack.c.bf16 %v922_v60, %v920_v59  ;;  %v963_v59 = vld [vmem:[#allocation2 + $0x7b8] sm:$0xff] }
 0x201   : > { %10221 = vmatprep.subr.bf16.mxu0 %v10220_v2  ;;  %v926_v2 = vld [vmem:[#allocation2 + $0x690] sm:$0xff] }
 0x202   : > { %v10250_v5 = vpack.c.bf16 %v926_v2, %v924_v1  ;;  %v965_v1 = vld [vmem:[#allocation2 + $0x7c8] sm:$0xff]  ;;  %v676_v2 = vadd.s32 768, %v13433_v39 }
 0x203   : > { %v1472_v39 = vld [vmem:[#allocation7 + $0x5d8] sm:$0xff] }
 0x204   : > { %10223 = vmatpush1.bf16.msra.mxu0 %v10222_v11  ;;  %v10254_v11 = vpack.c.bf16 %v930_v8, %v928_v7  ;;  %vm690_vm15 = vcmp.eq.s32.totalorder %v676_v2, %v13436_v45  ;;  %vm698_vm0 = vcmp.eq.s32.totalorder %v676_v2, %v13446_v54  ;;  %v1465_v7 = vld [vmem:[#allocation7 + $0x5a0] sm:$0xff]  ;;  %v1471_v8 = vld [vmem:[#allocation7 + $0x5d0] sm:$0xff]  ;;  %v1294_v45 = vld [vmem:[#allocation7 + $0x48] sm:$0xff] }
 0x205   : > { %10225 = vmatprep.subr.bf16.mxu0 %v10224_v14  ;;  %v934_v14 = vld [vmem:[#allocation2 + $0x6d0] sm:$0xff]  ;;  %v10350_v9 = vpack.c.bf16 %v1471_v8, %v1465_v7  ;;  %v10352_v10 = vpack.c.bf16 %v1294_v45, %v1288_v41  ;;  %v1300_v54 = vld [vmem:[#allocation7 + $0x78] sm:$0xff]  ;;  %v1378_v2 = vld [vmem:[#allocation7 + $0x2e8] sm:$0xff] }
 0x206   : > { %v10258_v17 = vpack.c.bf16 %v934_v14, %v932_v13  ;;  %v966_v13 = vld [vmem:[#allocation5] sm:$0xff]  ;;  %v1390_v7 = vld [vmem:[#allocation7 + $0x348] sm:$0xff]  ;;  %v1383_v41 = vld [vmem:[#allocation7 + $0x310] sm:$0xff] }
 0x207   : > { %v1389_v45 = vld [vmem:[#allocation7 + $0x340] sm:$0xff] }
 0x208   : > { %10227 = vmatpush1.bf16.msra.mxu0 %v10226_v23  ;;  %v10262_v23 = vpack.c.bf16 %v938_v20, %v936_v19  ;;  %v969_v19 = vld [vmem:[#allocation5 + $0x18] sm:$0xff]  ;;  %v10356_v20 = vpack.c.bf16 %v1306_v15, %v1300_v54  ;;  %v1414_v15 = vld [vmem:[#allocation7 + $0x408] sm:$0xff] }
 0x209   : > { %10229 = vmatprep.subr.bf16.mxu0 %v10228_v24  ;;  %v10264_v24 = vpack.c.bf16 %v943_v22, %v941_v21  ;;  %v1299_v21 = vld [vmem:[#allocation7 + $0x70] sm:$0xff]  ;;  %v1305_v22 = vld [vmem:[#allocation7 + $0xa0] sm:$0xff]  ;;  %v1408_v54 = vld [vmem:[#allocation7 + $0x3d8] sm:$0xff] }
 0x20c   : > { %10231 = vmatpush1.bf16.msra.mxu0 %v10230_v30  ;;  %v10268_v30 = vpack.c.bf16 %v947_v28, %v945_v27 }
 0x20d   : > { %10233 = vmatprep.subr.bf16.mxu0 %v10232_v31  ;;  %v944_v31 = vld [vmem:[#allocation2 + $0x720] sm:$0xff] }
 0x20e   : > { %v10270_v35 = vpack.c.bf16 %v946_v32, %v944_v31  ;;  %v10360_v31 = vpack.c.bf16 %v1318_v26, %v1312_v25  ;;  %v1311_v32 = vld [vmem:[#allocation7 + $0xd0] sm:$0xff]  ;;  %v1425_v26 = vld [vmem:[#allocation7 + $0x460] sm:$0xff] }
 0x20f   : > { %9316 = vmatmul.mubr.msk.f32.vlgmr.msra.gmra.mrb[0].mxu0 %vm688_vm9, %v13073_v50  ;;  %v1419_v25 = vld [vmem:[#allocation7 + $0x430] sm:$0xff] }
 0x210   : > { %9317 = vmatprep.mubr.msk.f32.mxu0 %vm697_vm10, %v13073_v50  ;;  %10235 = vmatpush1.bf16.msra.mxu0 %v10234_v40  ;;  %v948_v40 = vld [vmem:[#allocation2 + $0x740] sm:$0xff] }
 0x211   : > { %10237 = vmatprep.subr.bf16.mxu0 %v10236_v42  ;;  %v950_v42 = vld [vmem:[#allocation2 + $0x750] sm:$0xff] }
 0x212   : > { %v10274_v46 = vpack.c.bf16 %v950_v42, %v948_v40  ;;  %v1323_v42 = vld [vmem:[#allocation7 + $0x130] sm:$0xff] }
 0x213   : > { %9318 = vmatmul.mubr.msk.f32.gmra.mrb[2].mxu0 %vm696_vm13, %v13073_v50 }
 0x214   : > { %10239 = vmatpush1.bf16.msra.mxu0 %v10238_v48  ;;  %9319 = vmatprep.mubr.msk.f32.mxu0 %vm970_vm12, %v707_v37  ;;  %v952_v48 = vld [vmem:[#allocation2 + $0x760] sm:$0xff] }
 0x215   : > { %10241 = vmatprep.subr.bf16.mxu0 %v10240_v49  ;;  %v954_v49 = vld [vmem:[#allocation2 + $0x770] sm:$0xff]  ;;  %v956_v37 = vld [vmem:[#allocation2 + $0x780] sm:$0xff] }
 0x216   : > { %v10278_v52 = vpack.c.bf16 %v954_v49, %v952_v48  ;;  %v1335_v49 = vld [vmem:[#allocation7 + $0x190] sm:$0xff] }
 0x218   : > { %10243 = vmatpush1.bf16.msra.mxu0 %v10242_v57  ;;  %v958_v57 = vld [vmem:[#allocation2 + $0x790] sm:$0xff] }
 0x219   : > { %10245 = vmatprep.subr.bf16.mxu0 %v10244_v58  ;;  %v961_v58 = vld [vmem:[#allocation2 + $0x7a8] sm:$0xff]  ;;  %v10282_v60 = vpack.c.bf16 %v958_v57, %v956_v37  ;;  %v1347_v57 = vld [vmem:[#allocation7 + $0x1f0] sm:$0xff] }
 0x21a   : > { %v10284_v61 = vpack.c.bf16 %v963_v59, %v961_v58  ;;  %v1353_v58 = vld [vmem:[#allocation7 + $0x220] sm:$0xff]  ;;  %v1360_v59 = vld [vmem:[#allocation7 + $0x258] sm:$0xff] }
 0x21c   : > { %10247 = vmatpush1.bf16.msra.mxu0 %v10246_v63  ;;  %v962_v63 = vld [vmem:[#allocation2 + $0x7b0] sm:$0xff] }
 0x21d   : > { %10249 = vmatprep.subr.bf16.mxu0 %v10248_v0  ;;  %v10286_v0 = vpack.c.bf16 %v962_v63, %v960_v62  ;;  %v1359_v63 = vld [vmem:[#allocation7 + $0x250] sm:$0xff] }
 0x220   : > { %10251 = vmatpush1.bf16.msra.mxu0 %v10250_v5  ;;  %v1466_v5 = vld [vmem:[#allocation7 + $0x5a8] sm:$0xff] }
 0x221   : > { %10253 = vmatprep.subr.bf16.mxu0 %v10252_v6  ;;  %v10348_v6 = vpack.c.bf16 %v1472_v39, %v1466_v5  ;;  %v1371_v5 = vld [vmem:[#allocation7 + $0x2b0] sm:$0xff]  ;;  %v1377_v39 = vld [vmem:[#allocation7 + $0x2e0] sm:$0xff] }
 0x222   : > { %v10382_v8 = vpack.c.bf16 %v1377_v39, %v1371_v5  ;;  %v1301_v39 = vld [vmem:[#allocation7 + $0x80] sm:$0xff] }
 0x223   : > { %10349 = vmatprep.subr.bf16.mxu1 %v10348_v6  ;;  %v1384_v6 = vld [vmem:[#allocation7 + $0x318] sm:$0xff] }
 0x224   : > { %10255 = vmatpush1.bf16.msra.mxu0 %v10254_v11  ;;  %10351 = vmatpush1.bf16.msra.mxu1 %v10350_v9  ;;  %v967_v11 = vld [vmem:[#allocation5 + $0x8] sm:$0xff]  ;;  %v10384_v9 = vpack.c.bf16 %v1390_v7, %v1384_v6  ;;  %v1307_v6 = vld [vmem:[#allocation7 + $0xb0] sm:$0xff] }
 0x225   : > { %10257 = vmatprep.subr.bf16.mxu0 %v10256_v12  ;;  %10353 = vmatprep.subr.bf16.mxu1 %v10352_v10  ;;  %v1293_v12 = vld [vmem:[#allocation7 + $0x40] sm:$0xff]  ;;  %v1396_v10 = vld [vmem:[#allocation7 + $0x378] sm:$0xff]  ;;  %v1314_v7 = vld [vmem:[#allocation7 + $0xe8] sm:$0xff] }
 0x228   : > { %10259 = vmatpush1.bf16.msra.mxu0 %v10258_v17  ;;  %v10354_v17 = vpack.c.bf16 %v1293_v12, %v1287_v56  ;;  %v10386_v56 = vpack.c.bf16 %v1389_v45, %v1383_v41  ;;  %v1313_v45 = vld [vmem:[#allocation7 + $0xe0] sm:$0xff] }
 0x229   : > { %10261 = vmatprep.subr.bf16.mxu0 %v10260_v18 }
 0x22c   : > { %10263 = vmatpush1.bf16.msra.mxu0 %v10262_v23  ;;  %v968_v23 = vld [vmem:[#allocation5 + $0x10] sm:$0xff] }
 0x22d   : > { %10265 = vmatprep.subr.bf16.mxu0 %v10264_v24 }
 0x230   : > { %10267 = vmatpush1.bf16.msra.mxu0 %v10266_v29  ;;  %v10358_v29 = vpack.c.bf16 %v1305_v22, %v1299_v21  ;;  %v1420_v21 = vld [vmem:[#allocation7 + $0x438] sm:$0xff]  ;;  %v1426_v22 = vld [vmem:[#allocation7 + $0x468] sm:$0xff] }
 0x231   : > { %10269 = vmatprep.subr.bf16.mxu0 %v10268_v30 }
 0x234   : > { %10271 = vmatpush1.bf16.msra.mxu0 %v10270_v35  ;;  %v1330_v35 = vld [vmem:[#allocation7 + $0x168] sm:$0xff] }
 0x235   : > { %10273 = vmatprep.subr.bf16.mxu0 %v10272_v36  ;;  %v10362_v36 = vpack.c.bf16 %v1317_v33, %v1311_v32  ;;  %v10364_v40 = vpack.c.bf16 %v1330_v35, %v1324_v34  ;;  %v1431_v33 = vld [vmem:[#allocation7 + $0x490] sm:$0xff]  ;;  %v1437_v34 = vld [vmem:[#allocation7 + $0x4c0] sm:$0xff]  ;;  %v1444_v35 = vld [vmem:[#allocation7 + $0x4f8] sm:$0xff] }
 0x238   : > { %10275 = vmatpush1.bf16.msra.mxu0 %v10274_v46  ;;  %v1342_v46 = vld [vmem:[#allocation7 + $0x1c8] sm:$0xff] }
 0x239   : > { %10277 = vmatprep.subr.bf16.mxu0 %v10276_v47  ;;  %v10366_v47 = vpack.c.bf16 %v1329_v43, %v1323_v42  ;;  %v10368_v48 = vpack.c.bf16 %v1342_v46, %v1336_v44  ;;  %v1443_v43 = vld [vmem:[#allocation7 + $0x4f0] sm:$0xff]  ;;  %v1449_v44 = vld [vmem:[#allocation7 + $0x520] sm:$0xff]  ;;  %v1456_v46 = vld [vmem:[#allocation7 + $0x558] sm:$0xff] }
 0x23c   : > { %10279 = vmatpush1.bf16.msra.mxu0 %v10278_v52  ;;  %v1354_v52 = vld [vmem:[#allocation7 + $0x228] sm:$0xff] }
 0x23d   : > { %10281 = vmatprep.subr.bf16.mxu0 %v10280_v55  ;;  %v10370_v55 = vpack.c.bf16 %v1341_v51, %v1335_v49  ;;  %v10372_v37 = vpack.c.bf16 %v1354_v52, %v1348_v53  ;;  %v1455_v51 = vld [vmem:[#allocation7 + $0x550] sm:$0xff]  ;;  %v1461_v53 = vld [vmem:[#allocation7 + $0x580] sm:$0xff]  ;;  %v1468_v52 = vld [vmem:[#allocation7 + $0x5b8] sm:$0xff] }
 0x240   : > { %10283 = vmatpush1.bf16.msra.mxu0 %v10282_v60  ;;  %v1366_v60 = vld [vmem:[#allocation7 + $0x288] sm:$0xff] }
 0x241   : > { %10285 = vmatprep.subr.bf16.mxu0 %v10284_v61  ;;  %v10374_v61 = vpack.c.bf16 %v1353_v58, %v1347_v57  ;;  %v10376_v62 = vpack.c.bf16 %v1366_v60, %v1360_v59  ;;  %v1467_v58 = vld [vmem:[#allocation7 + $0x5b0] sm:$0xff]  ;;  %v1473_v59 = vld [vmem:[#allocation7 + $0x5e0] sm:$0xff]  ;;  %v1290_v60 = vld [vmem:[#allocation7 + $0x28] sm:$0xff] }
 0x244   : > { %10287 = vmatpush1.bf16.msra.mxu0 %v10286_v0  ;;  %v1365_v0 = vld [vmem:[#allocation7 + $0x280] sm:$0xff] }
 0x245   : > { %1264 = vmatprep.subr.mxu0 %v965_v1  ;;  %v1372_v1 = vld [vmem:[#allocation7 + $0x2b8] sm:$0xff] }
 0x248   : > { %1265 = vmatpush1.msra.mxu0 %v964_v3  ;;  %v10378_v3 = vpack.c.bf16 %v1365_v0, %v1359_v63  ;;  %v1289_v0 = vld [vmem:[#allocation7 + $0x20] sm:$0xff] }
 0x249   : > { %9320 = vmatmul.mubr.msk.f32.vlgmr.msra.gmra.mrb[0].mxu0 %vm690_vm15, %v13073_v50 }
 0x24a   : > { %9321 = vmatprep.mubr.msk.f32.mxu0 %vm970_vm12, %v715_v4  ;;  %v10380_v4 = vpack.c.bf16 %v1378_v2, %v1372_v1  ;;  %v1295_v1 = vld [vmem:[#allocation7 + $0x50] sm:$0xff]  ;;  %v1302_v2 = vld [vmem:[#allocation7 + $0x88] sm:$0xff] }
 0x24d   : > { %9322 = vmatmul.mubr.msk.f32.gmra.mrb[2].mxu0 %vm698_vm0, %v13073_v50 }
 0x31c   : > { %v1274_v14 = vpop.f32.mrb[0].mxu0 }
 0x31d   : > { %v1276_v50 = vpop.f32.mrb[1].mxu0  ;;  %v13496_v18 = vadd.f32 %v1274_v14, %v966_v13  ;;  %v1395_v13 = vld [vmem:[#allocation7 + $0x370] sm:$0xff]  ;;  %v1401_v14 = vld [vmem:[#allocation7 + $0x3a0] sm:$0xff] }
 0x31e   : > { %v13494_v16 = vadd.f32 %v1276_v50, %v967_v11  ;;  %v1402_v11 = vld [vmem:[#allocation7 + $0x3a8] sm:$0xff]  ;;  %v10390_v50 = vpack.c.bf16 %v1401_v14, %v1395_v13  ;;  %v1325_v14 = vld [vmem:[#allocation7 + $0x140] sm:$0xff] }
 0x31f   : > { %v10388_v12 = vpack.c.bf16 %v1402_v11, %v1396_v10  ;;  %v1319_v10 = vld [vmem:[#allocation7 + $0x110] sm:$0xff]  ;;  %v1326_v11 = vld [vmem:[#allocation7 + $0x148] sm:$0xff] }
 0x320   : > { %v1280_v24 = vpop.f32.mrb[2].mxu0  ;;  %1573 = vmatprep.mubr.f32.mxu1 %v13494_v16 }
 0x321   : > { %v1282_v27 = vpop.f32.mrb[3].mxu0  ;;  %1574 = vmatmul.mubr.f32.vlgmr.msra.gmra.mrb[0].mxu1 %v13496_v18  ;;  %v13502_v30 = vadd.f32 %v1280_v24, %v968_v23  ;;  %v10396_v24 = vpack.c.bf16 %v1426_v22, %v1420_v21  ;;  %v1343_v21 = vld [vmem:[#allocation7 + $0x1d0] sm:$0xff]  ;;  %v1350_v22 = vld [vmem:[#allocation7 + $0x208] sm:$0xff] }
 0x322   : > { %v13500_v28 = vadd.f32 %v1282_v27, %v969_v19  ;;  %10355 = vmatpush1.bf16.msra.mxu1 %v10354_v17  ;;  %v10392_v17 = vpack.c.bf16 %v1414_v15, %v1408_v54  ;;  %v1407_v19 = vld [vmem:[#allocation7 + $0x3d0] sm:$0xff]  ;;  %v1432_v27 = vld [vmem:[#allocation7 + $0x498] sm:$0xff]  ;;  %v1338_v15 = vld [vmem:[#allocation7 + $0x1a8] sm:$0xff] }
 0x323   : > { %10357 = vmatprep.subr.bf16.mxu1 %v10356_v20  ;;  %v1413_v20 = vld [vmem:[#allocation7 + $0x400] sm:$0xff]  ;;  %v1331_v54 = vld [vmem:[#allocation7 + $0x170] sm:$0xff] }
 0x324   : > { %1579 = vmatprep.mubr.f32.mxu1 %v13500_v28  ;;  %v10394_v23 = vpack.c.bf16 %v1413_v20, %v1407_v19  ;;  %v1337_v20 = vld [vmem:[#allocation7 + $0x1a0] sm:$0xff] }
 0x325   : > { %1580 = vmatmul.mubr.f32.gmra.mrb[2].mxu1 %v13502_v30 }
 0x326   : > { %10359 = vmatpush1.bf16.msra.mxu1 %v10358_v29  ;;  %1650 = vmatprep.mubr.f32.mxu1 %v13494_v16  ;;  %v1438_v29 = vld [vmem:[#allocation7 + $0x4c8] sm:$0xff] }
 0x327   : > { %10361 = vmatprep.subr.bf16.mxu1 %v10360_v31  ;;  %v10398_v31 = vpack.c.bf16 %v1425_v26, %v1419_v25  ;;  %v10400_v32 = vpack.c.bf16 %v1438_v29, %v1432_v27  ;;  %v1349_v26 = vld [vmem:[#allocation7 + $0x200] sm:$0xff]  ;;  %v1355_v27 = vld [vmem:[#allocation7 + $0x230] sm:$0xff]  ;;  %v1362_v29 = vld [vmem:[#allocation7 + $0x268] sm:$0xff] }
 0x32a   : > { %10363 = vmatpush1.bf16.msra.mxu1 %v10362_v36  ;;  %v1450_v36 = vld [vmem:[#allocation7 + $0x528] sm:$0xff] }
 0x32b   : > { %10365 = vmatprep.subr.bf16.mxu1 %v10364_v40  ;;  %v10402_v40 = vpack.c.bf16 %v1437_v34, %v1431_v33  ;;  %v10404_v42 = vpack.c.bf16 %v1450_v36, %v1444_v35  ;;  %v1361_v34 = vld [vmem:[#allocation7 + $0x260] sm:$0xff]  ;;  %v1367_v35 = vld [vmem:[#allocation7 + $0x290] sm:$0xff]  ;;  %v1374_v36 = vld [vmem:[#allocation7 + $0x2c8] sm:$0xff] }
 0x32e   : > { %10367 = vmatpush1.bf16.msra.mxu1 %v10366_v47  ;;  %v1462_v47 = vld [vmem:[#allocation7 + $0x588] sm:$0xff] }
 0x32f   : > { %10369 = vmatprep.subr.bf16.mxu1 %v10368_v48  ;;  %v10406_v48 = vpack.c.bf16 %v1449_v44, %v1443_v43  ;;  %v10408_v49 = vpack.c.bf16 %v1462_v47, %v1456_v46  ;;  %v1373_v44 = vld [vmem:[#allocation7 + $0x2c0] sm:$0xff]  ;;  %v1379_v46 = vld [vmem:[#allocation7 + $0x2f0] sm:$0xff]  ;;  %v1386_v47 = vld [vmem:[#allocation7 + $0x328] sm:$0xff] }
 0x332   : > { %10371 = vmatpush1.bf16.msra.mxu1 %v10370_v55  ;;  %v1474_v55 = vld [vmem:[#allocation7 + $0x5e8] sm:$0xff] }
 0x333   : > { %10373 = vmatprep.subr.bf16.mxu1 %v10372_v37  ;;  %v10410_v37 = vpack.c.bf16 %v1461_v53, %v1455_v51  ;;  %v10412_v57 = vpack.c.bf16 %v1474_v55, %v1468_v52  ;;  %v1385_v53 = vld [vmem:[#allocation7 + $0x320] sm:$0xff]  ;;  %v1391_v52 = vld [vmem:[#allocation7 + $0x350] sm:$0xff]  ;;  %v1398_v55 = vld [vmem:[#allocation7 + $0x388] sm:$0xff] }
 0x336   : > { %10375 = vmatpush1.bf16.msra.mxu1 %v10374_v61  ;;  %v1296_v61 = vld [vmem:[#allocation7 + $0x58] sm:$0xff] }
 0x337   : > { %10377 = vmatprep.subr.bf16.mxu1 %v10376_v62  ;;  %v10414_v62 = vpack.c.bf16 %v1473_v59, %v1467_v58  ;;  %v10416_v63 = vpack.c.bf16 %v1296_v61, %v1290_v60  ;;  %v1397_v59 = vld [vmem:[#allocation7 + $0x380] sm:$0xff]  ;;  %v1403_v60 = vld [vmem:[#allocation7 + $0x3b0] sm:$0xff]  ;;  %v1410_v61 = vld [vmem:[#allocation7 + $0x3e8] sm:$0xff] }
 0x33a   : > { %10379 = vmatpush1.bf16.msra.mxu1 %v10378_v3  ;;  %v1308_v3 = vld [vmem:[#allocation7 + $0xb8] sm:$0xff] }
 0x33b   : > { %10381 = vmatprep.subr.bf16.mxu1 %v10380_v4  ;;  %v10418_v4 = vpack.c.bf16 %v1295_v1, %v1289_v0  ;;  %v10420_v5 = vpack.c.bf16 %v1308_v3, %v1302_v2  ;;  %v1409_v1 = vld [vmem:[#allocation7 + $0x3e0] sm:$0xff]  ;;  %v1415_v2 = vld [vmem:[#allocation7 + $0x410] sm:$0xff]  ;;  %v1422_v3 = vld [vmem:[#allocation7 + $0x448] sm:$0xff] }
 0x33e   : > { %10383 = vmatpush1.bf16.msra.mxu1 %v10382_v8  ;;  %v1320_v8 = vld [vmem:[#allocation7 + $0x118] sm:$0xff] }
 0x33f   : > { %10385 = vmatprep.subr.bf16.mxu1 %v10384_v9  ;;  %v10422_v9 = vpack.c.bf16 %v1307_v6, %v1301_v39  ;;  %v10424_v41 = vpack.c.bf16 %v1320_v8, %v1314_v7  ;;  %v1421_v6 = vld [vmem:[#allocation7 + $0x440] sm:$0xff]  ;;  %v1427_v7 = vld [vmem:[#allocation7 + $0x470] sm:$0xff]  ;;  %v1434_v8 = vld [vmem:[#allocation7 + $0x4a8] sm:$0xff] }
 0x342   : > { %10387 = vmatpush1.bf16.msra.mxu1 %v10386_v56  ;;  %v1332_v56 = vld [vmem:[#allocation7 + $0x178] sm:$0xff] }
 0x343   : > { %10389 = vmatprep.subr.bf16.mxu1 %v10388_v12  ;;  %v10426_v12 = vpack.c.bf16 %v1319_v10, %v1313_v45  ;;  %v10428_v13 = vpack.c.bf16 %v1332_v56, %v1326_v11  ;;  %v1433_v10 = vld [vmem:[#allocation7 + $0x4a0] sm:$0xff]  ;;  %v1439_v11 = vld [vmem:[#allocation7 + $0x4d0] sm:$0xff]  ;;  %v1446_v56 = vld [vmem:[#allocation7 + $0x508] sm:$0xff] }
 0x346   : > { %10391 = vmatpush1.bf16.msra.mxu1 %v10390_v50  ;;  %v1344_v50 = vld [vmem:[#allocation7 + $0x1d8] sm:$0xff] }
 0x347   : > { %10393 = vmatprep.subr.bf16.mxu1 %v10392_v17  ;;  %v10430_v17 = vpack.c.bf16 %v1331_v54, %v1325_v14  ;;  %v10432_v19 = vpack.c.bf16 %v1344_v50, %v1338_v15  ;;  %v1445_v54 = vld [vmem:[#allocation7 + $0x500] sm:$0xff]  ;;  %v1451_v15 = vld [vmem:[#allocation7 + $0x530] sm:$0xff]  ;;  %v1458_v50 = vld [vmem:[#allocation7 + $0x568] sm:$0xff] }
 0x34a   : > { %10395 = vmatpush1.bf16.msra.mxu1 %v10394_v23  ;;  %v1356_v23 = vld [vmem:[#allocation7 + $0x238] sm:$0xff] }
 0x34b   : > { %10397 = vmatprep.subr.bf16.mxu1 %v10396_v24  ;;  %v10434_v24 = vpack.c.bf16 %v1343_v21, %v1337_v20  ;;  %v10436_v25 = vpack.c.bf16 %v1356_v23, %v1350_v22  ;;  %v1457_v21 = vld [vmem:[#allocation7 + $0x560] sm:$0xff]  ;;  %v1463_v22 = vld [vmem:[#allocation7 + $0x590] sm:$0xff]  ;;  %v1470_v23 = vld [vmem:[#allocation7 + $0x5c8] sm:$0xff] }
 0x34e   : > { %10399 = vmatpush1.bf16.msra.mxu1 %v10398_v31  ;;  %v1368_v31 = vld [vmem:[#allocation7 + $0x298] sm:$0xff] }
 0x34f   : > { %10401 = vmatprep.subr.bf16.mxu1 %v10400_v32  ;;  %v10438_v32 = vpack.c.bf16 %v1355_v27, %v1349_v26  ;;  %v10440_v33 = vpack.c.bf16 %v1368_v31, %v1362_v29  ;;  %v1469_v27 = vld [vmem:[#allocation7 + $0x5c0] sm:$0xff]  ;;  %v1475_v29 = vld [vmem:[#allocation7 + $0x5f0] sm:$0xff] }
 0x350   : > { %v10478_v31 = vpack.c.bf16 %v1475_v29, %v1469_v27 }
 0x352   : > { %10403 = vmatpush1.bf16.msra.mxu1 %v10402_v40  ;;  %v1380_v40 = vld [vmem:[#allocation7 + $0x2f8] sm:$0xff] }
 0x353   : > { %10405 = vmatprep.subr.bf16.mxu1 %v10404_v42  ;;  %v10442_v42 = vpack.c.bf16 %v1367_v35, %v1361_v34  ;;  %v10444_v43 = vpack.c.bf16 %v1380_v40, %v1374_v36  ;;  %v13520_v34 = vld [vmem:[#allocation8] sm:$0x3f] }
 0x356   : > { %10407 = vmatpush1.bf16.msra.mxu1 %v10406_v48  ;;  %v1392_v48 = vld [vmem:[#allocation7 + $0x358] sm:$0xff] }
 0x357   : > { %10409 = vmatprep.subr.bf16.mxu1 %v10408_v49  ;;  %v10446_v49 = vpack.c.bf16 %v1379_v46, %v1373_v44  ;;  %v10448_v51 = vpack.c.bf16 %v1392_v48, %v1386_v47 }
 0x35a   : > { %10411 = vmatpush1.bf16.msra.mxu1 %v10410_v37  ;;  %v1404_v37 = vld [vmem:[#allocation7 + $0x3b8] sm:$0xff] }
 0x35b   : > { %10413 = vmatprep.subr.bf16.mxu1 %v10412_v57  ;;  %v10450_v57 = vpack.c.bf16 %v1391_v52, %v1385_v53  ;;  %v10452_v58 = vpack.c.bf16 %v1404_v37, %v1398_v55 }
 0x35e   : > { %10415 = vmatpush1.bf16.msra.mxu1 %v10414_v62  ;;  %v1416_v62 = vld [vmem:[#allocation7 + $0x418] sm:$0xff] }
 0x35f   : > { %10417 = vmatprep.subr.bf16.mxu1 %v10416_v63  ;;  %v10454_v63 = vpack.c.bf16 %v1403_v60, %v1397_v59  ;;  %v10456_v0 = vpack.c.bf16 %v1416_v62, %v1410_v61 }
 0x361   : > { %1651 = vmatmul.mubr.f32.vlgmr.msra.gmra.mrb[4].mxu1 %v13496_v18 }
 0x362   : > { %1656 = vmatprep.mubr.f32.mxu1 %v13500_v28  ;;  %10419 = vmatpush1.bf16.msra.mxu1 %v10418_v4  ;;  %v1428_v4 = vld [vmem:[#allocation7 + $0x478] sm:$0xff] }
 0x363   : > { %10421 = vmatprep.subr.bf16.mxu1 %v10420_v5  ;;  %v10458_v5 = vpack.c.bf16 %v1415_v2, %v1409_v1  ;;  %v10460_v39 = vpack.c.bf16 %v1428_v4, %v1422_v3 }
 0x365   : > { %1657 = vmatmul.mubr.f32.gmra.mrb[6].mxu1 %v13502_v30 }
 0x366   : > { %10423 = vmatpush1.bf16.msra.mxu1 %v10422_v9  ;;  %1727 = vmatprep.mubr.f32.mxu1 %v13494_v16  ;;  %v1440_v9 = vld [vmem:[#allocation7 + $0x4d8] sm:$0xff] }
 0x367   : > { %10425 = vmatprep.subr.bf16.mxu1 %v10424_v41  ;;  %v10462_v41 = vpack.c.bf16 %v1427_v7, %v1421_v6  ;;  %v10464_v45 = vpack.c.bf16 %v1440_v9, %v1434_v8 }
 0x36a   : > { %10427 = vmatpush1.bf16.msra.mxu1 %v10426_v12  ;;  %v1452_v12 = vld [vmem:[#allocation7 + $0x538] sm:$0xff] }
 0x36b   : > { %10429 = vmatprep.subr.bf16.mxu1 %v10428_v13  ;;  %v10466_v13 = vpack.c.bf16 %v1439_v11, %v1433_v10  ;;  %v10468_v14 = vpack.c.bf16 %v1452_v12, %v1446_v56 }
 0x36e   : > { %10431 = vmatpush1.bf16.msra.mxu1 %v10430_v17  ;;  %v1464_v17 = vld [vmem:[#allocation7 + $0x598] sm:$0xff] }
 0x36f   : > { %10433 = vmatprep.subr.bf16.mxu1 %v10432_v19  ;;  %v10470_v19 = vpack.c.bf16 %v1451_v15, %v1445_v54  ;;  %v10472_v20 = vpack.c.bf16 %v1464_v17, %v1458_v50 }
 0x372   : > { %10435 = vmatpush1.bf16.msra.mxu1 %v10434_v24  ;;  %v1476_v24 = vld [vmem:[#allocation7 + $0x5f8] sm:$0xff] }
 0x373   : > { %10437 = vmatprep.subr.bf16.mxu1 %v10436_v25  ;;  %v10474_v25 = vpack.c.bf16 %v1463_v22, %v1457_v21  ;;  %v10476_v26 = vpack.c.bf16 %v1476_v24, %v1470_v23 }
 0x376   : > { %10439 = vmatpush1.bf16.msra.mxu1 %v10438_v32  ;;  %v13515_v32 = vshrl.u32 %v669_v38, 7 }
 0x377   : > { %10441 = vmatprep.subr.bf16.mxu1 %v10440_v33 }
 0x378   : > { %v13518_v33 = vsub.s32 0, %v13515_v32  ;;  %v13535_v46 = vsub.s32 2, %v13515_v32  ;;  %v13538_v47 = vsub.s32 3, %v13515_v32  ;;  %v13563_v1 = vsub.s32 4, %v13515_v32 }
 0x379   : > { %v13566_v2 = vsub.s32 5, %v13515_v32 }
 0x37a   : > { %10443 = vmatpush1.bf16.msra.mxu1 %v10442_v42  ;;  %v1482_v35 = vrot.slane %v13520_v34, %v13518_v33  ;;  %v1494_v53 = vrot.slane %v13520_v34, %v13538_v47  ;;  %v1498_v4 = vrot.slane %v13520_v34, %v13563_v1 }
 0x37b   : > { %10445 = vmatprep.subr.bf16.mxu1 %v10444_v43 }
 0x37e   : > { %10447 = vmatpush1.bf16.msra.mxu1 %v10446_v49  ;;  %v1490_v49 = vrot.slane %v13520_v34, %v13535_v46 }
 0x37f   : > { %10449 = vmatprep.subr.bf16.mxu1 %v10448_v51 }
 0x382   : > { %10451 = vmatpush1.bf16.msra.mxu1 %v10450_v57 }
 0x383   : > { %10453 = vmatprep.subr.bf16.mxu1 %v10452_v58 }
 0x386   : > { %10455 = vmatpush1.bf16.msra.mxu1 %v10454_v63 }
 0x387   : > { %10457 = vmatprep.subr.bf16.mxu1 %v10456_v0 }
 0x38a   : > { %10459 = vmatpush1.bf16.msra.mxu1 %v10458_v5 }
 0x38b   : > { %10461 = vmatprep.subr.bf16.mxu1 %v10460_v39  ;;  %v1502_v39 = vrot.slane %v13520_v34, %v13566_v2 }
 0x38e   : > { %10463 = vmatpush1.bf16.msra.mxu1 %v10462_v41 }
 0x38f   : > { %10465 = vmatprep.subr.bf16.mxu1 %v10464_v45 }
 0x392   : > { %10467 = vmatpush1.bf16.msra.mxu1 %v10466_v13 }
 0x393   : > { %10469 = vmatprep.subr.bf16.mxu1 %v10468_v14 }
 0x396   : > { %10471 = vmatpush1.bf16.msra.mxu1 %v10470_v19 }
 0x397   : > { %10473 = vmatprep.subr.bf16.mxu1 %v10472_v20 }
 0x39a   : > { %10475 = vmatpush1.bf16.msra.mxu1 %v10474_v25 }
 0x39b   : > { %10477 = vmatprep.subr.bf16.mxu1 %v10476_v26 }
 0x39e   : > { %10479 = vmatpush1.bf16.msra.mxu1 %v10478_v31 }
 0x3a1   : > { %1728 = vmatmul.mubr.f32.vlgmr.msra.gmra.mrb[8].mxu1 %v13496_v18 }
 0x3a2   : > { %1733 = vmatprep.mubr.f32.mxu1 %v13500_v28 }
 0x3a5   : > { %1734 = vmatmul.mubr.f32.gmra.mrb[10].mxu1 %v13502_v30 }
 0x3f4   : > { %v1575_v36 = vpop.f32.mrb[0].mxu1 }
 0x3f5   : > { %v13524_v40 = vadd.f32 %v1575_v36, %v1482_v35  ;;  %v13526_v42 = vpop.f32.mrb[1].mxu1 }
 0x3f7   : > { %9820 = vmatprep.mubr.msk.f32.mxu1 %vm1740_vm1, %v13524_v40 }
 0x3f8   : > { %v1581_v43 = vpop.f32.mrb[2].mxu1 }
 0x3f9   : > { %v13530_v38 = vadd.f32 %v1581_v43, %v1482_v35  ;;  %v13532_v44 = vpop.f32.mrb[3].mxu1 }
 0x434   : > { %v1652_v48 = vpop.f32.mrb[4].mxu1 }
 0x435   : > { %v1654_v51 = vpop.f32.mrb[5].mxu1  ;;  %v1653_v55 = vadd.f32 %v1652_v48, %v1490_v49 }
 0x436   : > { %v1655_v58 = vadd.f32 %v1654_v51, %v1494_v53 }
 0x438   : > { %v1658_v52 = vpop.f32.mrb[6].mxu1 }
 0x439   : > { %v1659_v37 = vadd.f32 %v1658_v52, %v1490_v49  ;;  %v1660_v57 = vpop.f32.mrb[7].mxu1 }
 0x43a   : > { %v1661_v59 = vadd.f32 %v1660_v57, %v1494_v53 }
 0x43b   : > { %v10480_v61 = vpack.c.bf16 %v1659_v37, %v1653_v55  ;;  %v13550_v62 = vpack.i.bf16 %v1659_v37, %v1653_v55 }
 0x43c   : > { %v13552_v63 = vpack.c.bf16 %v1661_v59, %v1655_v58  ;;  %v13554_v0 = vpack.i.bf16 %v1661_v59, %v1655_v58 }
 0x43d   : > { %10482 = vmatprep.subr.msk.bf16.mxu1 %vm13546_vm2, %v10480_v61 }
 0x43e   : > { %10485 = vmatpush3.bf16.xpose.msk.msra.mxu1 %vm13546_vm2, %v10480_v61 }
 0x445   : > { %9821 = vmatmul.mubr.msk.f32.vlgmr.msra.gmra.mrb[12].mxu1 %vm1740_vm1, %v13530_v38 }
 0x474   : > { %v1729_v3 = vpop.f32.mrb[8].mxu1 }
 0x475   : > { %v1731_v5 = vpop.f32.mrb[9].mxu1  ;;  %v1730_v7 = vadd.f32 %v1729_v3, %v1498_v4 }
 0x476   : > { %v1732_v41 = vadd.f32 %v1731_v5, %v1502_v39 }
 0x478   : > { %v1735_v6 = vpop.f32.mrb[10].mxu1 }
 0x479   : > { %v1736_v8 = vadd.f32 %v1735_v6, %v1498_v4  ;;  %v1737_v9 = vpop.f32.mrb[11].mxu1 }
 0x47a   : > { %v1738_v45 = vadd.f32 %v1737_v9, %v1502_v39 }
 0x47b   : > { %v10486_v10 = vpack.c.bf16 %v1736_v8, %v1730_v7  ;;  %v13572_v11 = vpack.i.bf16 %v1736_v8, %v1730_v7 }
 0x47c   : > { %v13574_v56 = vpack.c.bf16 %v1738_v45, %v1732_v41  ;;  %v13576_v12 = vpack.i.bf16 %v1738_v45, %v1732_v41 }
 0x47d   : > { %10487 = vmatprep.subr.bf16.mxu1 %v10486_v10 }
 0x47e   : > { %10489 = vmatpush3.bf16.msra.mxu1 %v10486_v10 }
 0x518   : > { %v9822_v13 = vpop.f32.mrb[12].mxu1 }
 0x519   : > { %v1819_v14 = vpop.f32.mrb[13].mxu1  ;;  %v1829_v15 = vmul.f32 0.17677669, %v9822_v13 }
 0x51a   : > { %v1828_v54 = vmul.f32 0.17677669, %v1819_v14 }
 0x51b   : > { %v1834_v17 = vsel %vm1830_vm3, %v1829_v15, -inf }
 0x51c   : > { %v1831_v50 = vsel %vm1830_vm3, %v1828_v54, -inf }
 0x51d   : > { %1832 = vmax.xlane.f32.xlu1 %v1831_v50 }
 0x521   : > { %1835 = vmax.xlane.f32.xlu1 %v1834_v17 }
 0x5aa   : > { %v1833_v19 = vpop.xlane.xlu1 %1832 }
 0x5ab   : > { %v1837_v20 = vsub.f32 %v1828_v54, %v1833_v19 }
 0x5ad   : > { %v1839_v21 = vmul.f32 1.442695, %v1837_v20 }
 0x5ae   : > { %v1836_v22 = vpop.xlane.xlu1 %1835 }
 0x5af   : > { %12604 = vpow2.f32 %v1839_v21  ;;  %v1838_v23 = vsub.f32 %v1829_v15, %v1836_v22 }
 0x5b1   : > { %v1841_v24 = vmul.f32 1.442695, %v1838_v23 }
 0x5b3   : > { %12606 = vpow2.f32 %v1841_v24 }
 0x5b9   : > { %v12605_v25 = vpop.eup %12604 }
 0x5ba   : > { %v1843_v26 = vsel %vm1830_vm3, %v12605_v25, 0.0 }
 0x5bb   : > { %1844 = vadd.xlane.f32.xlu0 %v1843_v26 }
 0x5bd   : > { %v12607_v27 = vpop.eup %12606 }
 0x5be   : > { %v1846_v29 = vsel %vm1830_vm3, %v12607_v27, 0.0 }
 0x5bf   : > { %1847 = vadd.xlane.f32.xlu1 %v1846_v29 }
 0x5d0   : > { %12425 = vrot.lane.b32.xlu1 %v13550_v62, %s13075_s30 }
 0x5d4   : > { %1934 = vrot.lane.b32.xlu1 %v13524_v40, %s13075_s30 }
 0x5d8   : > { %1936 = vrot.lane.b32.xlu1 %v13530_v38, %s13075_s30 }
 0x648   : > { %v1845_v31 = vpop.xlane.xlu0 %1844 }
 0x649   : > { %12608 = vrcp.f32 %v1845_v31 }
 0x64c   : > { %v1848_v35 = vpop.xlane.xlu1 %1847 }
 0x64d   : > { %12610 = vrcp.f32 %v1848_v35 }
 0x650   : > { %v12426_v36 = vpop.permute.xlu1 %12425 }
 0x651   : > { %v12428_v43 = vunpack.i.h.bf16 %v12426_v36  ;;  %v12427_v48 = vunpack.i.l.bf16 %v12426_v36 }
 0x653   : > { %v12609_v49 = vpop.eup %12608  ;;  %v10490_v51 = vpack.c.bf16 %v12428_v43, %v12427_v48 }
 0x654   : > { %v1850_v53 = vmul.f32 %v12609_v49, %v12605_v25  ;;  %v1935_v37 = vpop.permute.xlu1 %1934 }
 0x655   : > { %10492 = vmatprep.subr.msk.bf16.mxu1 %vm13546_vm2, %v10490_v51 }
 0x656   : > { %9827 = vmatprep.mubr.msk.f32.mxu1 %vm1830_vm3, %v1850_v53 }
 0x657   : > { %v12611_v52 = vpop.eup %12610 }
 0x658   : > { %v1852_v55 = vmul.f32 %v12611_v52, %v12607_v27  ;;  %v1937_v57 = vpop.permute.xlu1 %1936 }
 0x65a   : > { %9828 = vmatmul.mubr.msk.f32.vlgmr.msra.gmra.mrb[14].mxu1 %vm1830_vm3, %v1852_v55 }
 0x65b   : > { %10495 = vmatpush3.bf16.xpose.msk.msra.mxu1 %vm13546_vm2, %v10490_v51  ;;  %9834 = vmatprep.mubr.msk.f32.mxu1 %vm1740_vm1, %v1935_v37 }
 0x662   : > { %9835 = vmatmul.mubr.msk.f32.vlgmr.msra.gmra.mrb[16].mxu1 %vm1740_vm1, %v1937_v57 }
 0x72d   : > { %v13596_v58 = vpop.f32.mrb[14].mxu1 }
 0x72e   : > { %v13598_v59 = vpop.f32.mrb[15].mxu1 }
 0x735   : > { %v9836_v61 = vpop.f32.mrb[16].mxu1 }
 0x736   : > { %v2026_v3 = vmul.f32 0.17677669, %v9836_v61  ;;  %v2016_v4 = vpop.f32.mrb[17].mxu1 }
 0x737   : > { %v2025_v5 = vmul.f32 0.17677669, %v2016_v4 }
 0x738   : > { %v2030_v39 = vsel %vm1830_vm3, %v2026_v3, -inf }
 0x739   : > { %2031 = vmax.xlane.f32.xlu0 %v2030_v39  ;;  %v2027_v6 = vsel %vm1830_vm3, %v2025_v5, -inf }
 0x73a   : > { %2028 = vmax.xlane.f32.xlu1 %v2027_v6 }
 0x74b   : > { %2138 = vrot.lane.b32.xlu1 %v13524_v40, %s13076_s26 }
 0x74f   : > { %12430 = vrot.lane.b32.xlu0 %v13572_v11, %s13075_s30 }
 0x7c6   : > { %v2032_v7 = vpop.xlane.xlu0 %2031 }
 0x7c7   : > { %v2034_v8 = vsub.f32 %v2026_v3, %v2032_v7  ;;  %v2029_v9 = vpop.xlane.xlu1 %2028 }
 0x7c8   : > { %v2033_v41 = vsub.f32 %v2025_v5, %v2029_v9 }
 0x7c9   : > { %v2037_v45 = vmul.f32 1.442695, %v2034_v8 }
 0x7ca   : > { %v2035_v10 = vmul.f32 1.442695, %v2033_v41  ;;  %v12431_v13 = vpop.permute.xlu0 %12430 }
 0x7cb   : > { %12612 = vpow2.f32 %v2037_v45  ;;  %v12433_v14 = vunpack.i.h.bf16 %v12431_v13  ;;  %v12432_v54 = vunpack.i.l.bf16 %v12431_v13  ;;  %v2139_v36 = vpop.permute.xlu1 %2138 }
 0x7cc   : > { %12614 = vpow2.f32 %v2035_v10 }
 0x7cd   : > { %v10496_v15 = vpack.c.bf16 %v12433_v14, %v12432_v54 }
 0x7cf   : > { %10497 = vmatprep.subr.bf16.mxu1 %v10496_v15 }
 0x7d0   : > { %10499 = vmatpush3.bf16.msra.mxu1 %v10496_v15 }
 0x7d5   : > { %v12613_v50 = vpop.eup %12612 }
 0x7d6   : > { %v2042_v17 = vsel %vm1830_vm3, %v12613_v50, 0.0  ;;  %v12615_v19 = vpop.eup %12614 }
 0x7d7   : > { %2043 = vadd.xlane.f32.xlu0 %v2042_v17  ;;  %v2039_v20 = vsel %vm1830_vm3, %v12615_v19, 0.0 }
 0x7db   : > { %2040 = vadd.xlane.f32.xlu0 %v2039_v20 }
 0x7f1   : > { %12435 = vrot.lane.b32.xlu0 %v13550_v62, %s13076_s26 }
 0x7f5   : > { %2140 = vrot.lane.b32.xlu0 %v13530_v38, %s13076_s26 }
 0x864   : > { %v2044_v21 = vpop.xlane.xlu0 %2043 }
 0x865   : > { %12616 = vrcp.f32 %v2044_v21 }
 0x868   : > { %v2041_v22 = vpop.xlane.xlu0 %2040 }
 0x869   : > { %12618 = vrcp.f32 %v2041_v22 }
 0x86c   : > { %v12436_v23 = vpop.permute.xlu0 %12435 }
 0x86d   : > { %v12438_v24 = vunpack.i.h.bf16 %v12436_v23  ;;  %v12437_v25 = vunpack.i.l.bf16 %v12436_v23 }
 0x86f   : > { %v10500_v26 = vpack.c.bf16 %v12438_v24, %v12437_v25  ;;  %v12617_v27 = vpop.eup %12616 }
 0x870   : > { %v2048_v35 = vmul.f32 %v12617_v27, %v12613_v50  ;;  %v2141_v43 = vpop.permute.xlu0 %2140 }
 0x871   : > { %10502 = vmatprep.subr.msk.bf16.mxu1 %vm13546_vm2, %v10500_v26 }
 0x873   : > { %v12619_v29 = vpop.eup %12618 }
 0x874   : > { %v2046_v31 = vmul.f32 %v12619_v29, %v12615_v19 }
 0x876   : > { %9841 = vmatprep.mubr.msk.f32.mxu1 %vm1830_vm3, %v2046_v31 }
 0x877   : > { %9842 = vmatmul.mubr.msk.f32.vlgmr.msra.gmra.mrb[18].mxu1 %vm1830_vm3, %v2048_v35 }
 0x878   : > { %10505 = vmatpush3.bf16.xpose.msk.msra.mxu1 %vm13546_vm2, %v10500_v26  ;;  %9848 = vmatprep.mubr.msk.f32.mxu1 %vm1740_vm1, %v2139_v36 }
 0x87f   : > { %9849 = vmatmul.mubr.msk.f32.vlgmr.msra.gmra.mrb[20].mxu1 %vm1740_vm1, %v2141_v43  ;;  %v13651_v43 = vsub.s32 1, %v13515_v32 }
 0x94a   : > { %v13620_v48 = vpop.f32.mrb[18].mxu1 }
 0x94b   : > { %v13622_v49 = vpop.f32.mrb[19].mxu1 }
 0x952   : > { %v9850_v51 = vpop.f32.mrb[20].mxu1 }
 0x953   : > { %v2230_v53 = vmul.f32 0.17677669, %v9850_v51  ;;  %v2220_v52 = vpop.f32.mrb[21].mxu1  ;;  %v1486_v51 = vrot.slane %v13520_v34, %v13651_v43 }
 0x954   : > { %v2229_v55 = vmul.f32 0.17677669, %v2220_v52 }
 0x955   : > { %v2234_v37 = vsel %vm1830_vm3, %v2230_v53, -inf  ;;  %v13663_v52 = vadd.f32 %v13532_v44, %v1486_v51 }
 0x956   : > { %2235 = vmax.xlane.f32.xlu1 %v2234_v37  ;;  %v2231_v57 = vsel %vm1830_vm3, %v2229_v55, -inf }
 0x957   : > { %2232 = vmax.xlane.f32.xlu0 %v2231_v57 }
 0x967   : > { %12445 = vrot.lane.b32.xlu1 %v13550_v62, %s13077_s18 }
 0x96b   : > { %2342 = vrot.lane.b32.xlu1 %v13530_v38, %s13077_s18 }
 0x9e3   : > { %v2236_v61 = vpop.xlane.xlu1 %2235 }
 0x9e4   : > { %v2238_v3 = vsub.f32 %v2230_v53, %v2236_v61  ;;  %v2233_v4 = vpop.xlane.xlu0 %2232  ;;  %v13658_v53 = vadd.f32 %v13526_v42, %v1486_v51 }
 0x9e5   : > { %v2237_v5 = vsub.f32 %v2229_v55, %v2233_v4 }
 0x9e6   : > { %v2241_v39 = vmul.f32 1.442695, %v2238_v3 }
 0x9e7   : > { %v2239_v6 = vmul.f32 1.442695, %v2237_v5  ;;  %v12446_v45 = vpop.permute.xlu1 %12445 }
 0x9e8   : > { %12620 = vpow2.f32 %v2241_v39  ;;  %v12448_v13 = vunpack.i.h.bf16 %v12446_v45  ;;  %v12447_v14 = vunpack.i.l.bf16 %v12446_v45 }
 0x9e9   : > { %12622 = vpow2.f32 %v2239_v6 }
 0x9ea   : > { %v10510_v17 = vpack.c.bf16 %v12448_v13, %v12447_v14 }
 0x9eb   : > { %v2343_v23 = vpop.permute.xlu1 %2342 }
 0x9f2   : > { %v12621_v7 = vpop.eup %12620 }
 0x9f3   : > { %v2246_v8 = vsel %vm1830_vm3, %v12621_v7, 0.0  ;;  %v12623_v9 = vpop.eup %12622 }
 0x9f4   : > { %2247 = vadd.xlane.f32.xlu0 %v2246_v8  ;;  %v2243_v41 = vsel %vm1830_vm3, %v12623_v9, 0.0 }
 0x9f8   : > { %2244 = vadd.xlane.f32.xlu0 %v2243_v41 }
 0xa0e   : > { %12440 = vrot.lane.b32.xlu0 %v13572_v11, %s13076_s26 }
 0xa12   : > { %2340 = vrot.lane.b32.xlu0 %v13524_v40, %s13077_s18 }
 0xa81   : > { %v2248_v38 = vpop.xlane.xlu0 %2247 }
 0xa82   : > { %12624 = vrcp.f32 %v2248_v38 }
 0xa85   : > { %v2245_v62 = vpop.xlane.xlu0 %2244 }
 0xa86   : > { %12626 = vrcp.f32 %v2245_v62 }
 0xa89   : > { %v12441_v10 = vpop.permute.xlu0 %12440 }
 0xa8a   : > { %v12443_v54 = vunpack.i.h.bf16 %v12441_v10  ;;  %v12442_v15 = vunpack.i.l.bf16 %v12441_v10 }
 0xa8c   : > { %v10506_v50 = vpack.c.bf16 %v12443_v54, %v12442_v15  ;;  %v12625_v19 = vpop.eup %12624 }
 0xa8d   : > { %v2252_v21 = vmul.f32 %v12625_v19, %v12621_v7  ;;  %v2341_v22 = vpop.permute.xlu0 %2340 }
 0xa8e   : > { %10507 = vmatprep.subr.bf16.mxu1 %v10506_v50 }
 0xa8f   : > { %10509 = vmatpush3.bf16.msra.mxu1 %v10506_v50 }
 0xa90   : > { %v12627_v20 = vpop.eup %12626  ;;  %10512 = vmatprep.subr.msk.bf16.mxu1 %vm13546_vm2, %v10510_v17 }
 0xa91   : > { %v2250_v40 = vmul.f32 %v12627_v20, %v12623_v9 }
 0xa93   : > { %9855 = vmatprep.mubr.msk.f32.mxu1 %vm1830_vm3, %v2250_v40 }
 0xa94   : > { %9856 = vmatmul.mubr.msk.f32.vlgmr.msra.gmra.mrb[22].mxu1 %vm1830_vm3, %v2252_v21 }
 0xa95   : > { %9862 = vmatprep.mubr.msk.f32.mxu1 %vm1740_vm1, %v2341_v22 }
 0xa98   : > { %10515 = vmatpush3.bf16.xpose.msk.msra.mxu1 %vm13546_vm2, %v10510_v17 }
 0xa9f   : > { %9863 = vmatmul.mubr.msk.f32.vlgmr.msra.gmra.mrb[24].mxu1 %vm1740_vm1, %v2343_v23 }
 0xb67   : > { %v13644_v24 = vpop.f32.mrb[22].mxu1 }
 0xb68   : > { %v13646_v25 = vpop.f32.mrb[23].mxu1 }
 0xb72   : > { %v9864_v26 = vpop.f32.mrb[24].mxu1 }
 0xb73   : > { %v2432_v27 = vmul.f32 0.17677669, %v9864_v26  ;;  %v2422_v29 = vpop.f32.mrb[25].mxu1 }
 0xb74   : > { %v2431_v31 = vmul.f32 0.17677669, %v2422_v29 }
 0xb75   : > { %v2436_v35 = vsel %vm1830_vm3, %v2432_v27, -inf }
 0xb76   : > { %2437 = vmax.xlane.f32.xlu1 %v2436_v35  ;;  %v2433_v36 = vsel %vm1830_vm3, %v2431_v31, -inf }
 0xb77   : > { %2434 = vmax.xlane.f32.xlu0 %v2433_v36 }
 0xb87   : > { %12450 = vrot.lane.b32.xlu1 %v13572_v11, %s13077_s18 }
 0xb8b   : > { %2734 = vrot.lane.b32.xlu1 %v13658_v53, %s13075_s30 }
 0xb8f   : > { %2736 = vrot.lane.b32.xlu1 %v13663_v52, %s13075_s30 }
 0xc03   : > { %v2438_v55 = vpop.xlane.xlu1 %2437 }
 0xc04   : > { %v2440_v37 = vsub.f32 %v2432_v27, %v2438_v55  ;;  %v2435_v57 = vpop.xlane.xlu0 %2434 }
 0xc05   : > { %v2439_v61 = vsub.f32 %v2431_v31, %v2435_v57 }
 0xc06   : > { %v2443_v34 = vmul.f32 1.442695, %v2440_v37 }
 0xc07   : > { %v2441_v3 = vmul.f32 1.442695, %v2439_v61  ;;  %v12451_v4 = vpop.permute.xlu1 %12450 }
 0xc08   : > { %v12453_v11 = vunpack.i.h.bf16 %v12451_v4  ;;  %v12452_v5 = vunpack.i.l.bf16 %v12451_v4 }
 0xc09   : > { %12628 = vpow2.f32 %v2441_v3 }
 0xc0a   : > { %v10516_v42 = vpack.c.bf16 %v12453_v11, %v12452_v5  ;;  %12630 = vpow2.f32 %v2443_v34 }
 0xc0b   : > { %v2735_v39 = vpop.permute.xlu1 %2734 }
 0xc0c   : > { %10517 = vmatprep.subr.bf16.mxu1 %v10516_v42  ;;  %9890 = vmatprep.mubr.msk.f32.mxu0 %vm1740_vm1, %v2735_v39 }
 0xc0d   : > { %10519 = vmatpush3.bf16.msra.mxu1 %v10516_v42 }
 0xc0e   : > { %10522 = vmatprep.subr.msk.bf16.mxu1 %vm13546_vm2, %v13552_v63 }
 0xc0f   : > { %v2737_v50 = vpop.permute.xlu1 %2736 }
 0xc13   : > { %v12629_v44 = vpop.eup %12628 }
 0xc14   : > { %v2445_v6 = vsel %vm1830_vm3, %v12629_v44, 0.0  ;;  %v12631_v7 = vpop.eup %12630 }
 0xc15   : > { %2446 = vadd.xlane.f32.xlu0 %v2445_v6  ;;  %v2448_v8 = vsel %vm1830_vm3, %v12631_v7, 0.0 }
 0xc19   : > { %2449 = vadd.xlane.f32.xlu0 %v2448_v8 }
 0xc2f   : > { %12455 = vrot.lane.b32.xlu0 %v13554_v0, %s13075_s30 }
 0xca2   : > { %v2447_v9 = vpop.xlane.xlu0 %2446 }
 0xca3   : > { %12632 = vrcp.f32 %v2447_v9 }
 0xca6   : > { %v2450_v41 = vpop.xlane.xlu0 %2449 }
 0xca7   : > { %12634 = vrcp.f32 %v2450_v41 }
 0xcaa   : > { %v12456_v38 = vpop.permute.xlu0 %12455 }
 0xcab   : > { %v12458_v62 = vunpack.i.h.bf16 %v12456_v38  ;;  %v12457_v45 = vunpack.i.l.bf16 %v12456_v38 }
 0xcad   : > { %v12633_v10 = vpop.eup %12632  ;;  %v10530_v13 = vpack.c.bf16 %v12458_v62, %v12457_v45 }
 0xcae   : > { %v2452_v14 = vmul.f32 %v12633_v10, %v12629_v44 }
 0xcaf   : > { %10532 = vmatprep.subr.msk.bf16.mxu0 %vm13546_vm2, %v10530_v13 }
 0xcb0   : > { %9869 = vmatprep.mubr.msk.f32.mxu1 %vm1830_vm3, %v2452_v14  ;;  %10535 = vmatpush3.bf16.xpose.msk.msra.mxu0 %vm13546_vm2, %v10530_v13 }
 0xcb1   : > { %v12635_v54 = vpop.eup %12634 }
 0xcb2   : > { %v2454_v15 = vmul.f32 %v12635_v54, %v12631_v7 }
 0xcb4   : > { %9870 = vmatmul.mubr.msk.f32.vlgmr.msra.gmra.mrb[26].mxu1 %vm1830_vm3, %v2454_v15 }
 0xcb5   : > { %10525 = vmatpush3.bf16.xpose.msk.msra.mxu1 %vm13546_vm2, %v13552_v63  ;;  %9876 = vmatprep.mubr.msk.f32.mxu1 %vm1740_vm1, %v13658_v53 }
 0xcb6   : > { %10527 = vmatprep.subr.bf16.mxu1 %v13574_v56 }
 0xcb7   : > { %9891 = vmatmul.mubr.msk.f32.vlgmr.msra.gmra.mrb[4].mxu0 %vm1740_vm1, %v2737_v50 }
 0xcbc   : > { %9877 = vmatmul.mubr.msk.f32.vlgmr.msra.gmra.mrb[28].mxu1 %vm1740_vm1, %v13663_v52 }
 0xcbd   : > { %10529 = vmatpush3.bf16.msra.mxu1 %v13574_v56 }
 0xd87   : > { %v13691_v17 = vpop.f32.mrb[26].mxu1 }
 0xd88   : > { %v13693_v19 = vpop.f32.mrb[27].mxu1 }
 0xd8a   : > { %v9892_v20 = vpop.f32.mrb[4].mxu0 }
 0xd8b   : > { %v2816_v40 = vpop.f32.mrb[5].mxu0  ;;  %v2826_v31 = vmul.f32 0.17677669, %v9892_v20 }
 0xd8c   : > { %v2825_v27 = vmul.f32 0.17677669, %v2816_v40 }
 0xd8d   : > { %v2830_v35 = vsel %vm1830_vm3, %v2826_v31, -inf }
 0xd8e   : > { %v2827_v56 = vsel %vm1830_vm3, %v2825_v27, -inf }
 0xd8f   : > { %v9878_v63 = vpop.f32.mrb[28].mxu1 }
 0xd90   : > { %v2630_v21 = vmul.f32 0.17677669, %v9878_v63  ;;  %v2620_v22 = vpop.f32.mrb[29].mxu1 }
 0xd91   : > { %v2629_v23 = vmul.f32 0.17677669, %v2620_v22 }
 0xd92   : > { %v2634_v26 = vsel %vm1830_vm3, %v2630_v21, -inf }
 0xd93   : > { %2635 = vmax.xlane.f32.xlu1 %v2634_v26  ;;  %v2631_v29 = vsel %vm1830_vm3, %v2629_v23, -inf }
 0xd94   : > { %2632 = vmax.xlane.f32.xlu0 %v2631_v29 }
 0xd98   : > { %2828 = vmax.xlane.f32.xlu0 %v2827_v56 }
 0xd9c   : > { %2831 = vmax.xlane.f32.xlu0 %v2830_v35 }
 0xe20   : > { %v2636_v36 = vpop.xlane.xlu1 %2635 }
 0xe21   : > { %v2638_v51 = vsub.f32 %v2630_v21, %v2636_v36  ;;  %v2633_v55 = vpop.xlane.xlu0 %2632 }
 0xe22   : > { %v2637_v57 = vsub.f32 %v2629_v23, %v2633_v55 }
 0xe23   : > { %v2641_v37 = vmul.f32 1.442695, %v2638_v51 }
 0xe24   : > { %v2639_v3 = vmul.f32 1.442695, %v2637_v57 }
 0xe25   : > { %12636 = vpow2.f32 %v2641_v37  ;;  %v2829_v61 = vpop.xlane.xlu0 %2828 }
 0xe26   : > { %v2833_v34 = vsub.f32 %v2825_v27, %v2829_v61 }
 0xe28   : > { %v2835_v4 = vmul.f32 1.442695, %v2833_v34 }
 0xe29   : > { %v2832_v11 = vpop.xlane.xlu0 %2831 }
 0xe2a   : > { %12638 = vpow2.f32 %v2835_v4  ;;  %v2834_v5 = vsub.f32 %v2826_v31, %v2832_v11 }
 0xe2b   : > { %12640 = vpow2.f32 %v2639_v3 }
 0xe2c   : > { %v2837_v42 = vmul.f32 1.442695, %v2834_v5 }
 0xe2e   : > { %12642 = vpow2.f32 %v2837_v42 }
 0xe2f   : > { %v12637_v39 = vpop.eup %12636 }
 0xe30   : > { %v2646_v44 = vsel %vm1830_vm3, %v12637_v39, 0.0 }
 0xe31   : > { %2647 = vadd.xlane.f32.xlu0 %v2646_v44 }
 0xe34   : > { %v12639_v6 = vpop.eup %12638 }
 0xe35   : > { %v2839_v7 = vsel %vm1830_vm3, %v12639_v6, 0.0  ;;  %v12641_v8 = vpop.eup %12640 }
 0xe36   : > { %2840 = vadd.xlane.f32.xlu1 %v2839_v7  ;;  %v2643_v41 = vsel %vm1830_vm3, %v12641_v8, 0.0 }
 0xe38   : > { %v12643_v9 = vpop.eup %12642 }
 0xe39   : > { %v2842_v38 = vsel %vm1830_vm3, %v12643_v9, 0.0 }
 0xe3a   : > { %2644 = vadd.xlane.f32.xlu1 %v2643_v41  ;;  %2843 = vadd.xlane.f32.xlu0 %v2842_v38 }
 0xe4b   : > { %12460 = vrot.lane.b32.xlu1 %v13576_v12, %s13075_s30 }
 0xe4f   : > { %12470 = vrot.lane.b32.xlu1 %v13554_v0, %s13077_s18 }
 0xe50   : > { %12465 = vrot.lane.b32.xlu0 %v13554_v0, %s13076_s26 }
 0xe53   : > { %2938 = vrot.lane.b32.xlu1 %v13658_v53, %s13076_s26 }
 0xe54   : > { %2940 = vrot.lane.b32.xlu0 %v13663_v52, %s13076_s26 }
 0xe57   : > { %3140 = vrot.lane.b32.xlu1 %v13658_v53, %s13077_s18 }
 0xe58   : > { %3142 = vrot.lane.b32.xlu0 %v13663_v52, %s13077_s18 }
 0xebe   : > { %v2648_v62 = vpop.xlane.xlu0 %2647 }
 0xebf   : > { %12644 = vrcp.f32 %v2648_v62 }
 0xec3   : > { %v2841_v45 = vpop.xlane.xlu1 %2840 }
 0xec4   : > { %12646 = vrcp.f32 %v2841_v45 }
 0xec7   : > { %v2645_v10 = vpop.xlane.xlu1 %2644  ;;  %v2844_v13 = vpop.xlane.xlu0 %2843 }
 0xec8   : > { %12648 = vrcp.f32 %v2645_v10 }
 0xec9   : > { %12650 = vrcp.f32 %v2844_v13  ;;  %v12645_v20 = vpop.eup %12644 }
 0xeca   : > { %v2652_v23 = vmul.f32 %v12645_v20, %v12637_v39 }
 0xecb   : > { %v12461_v0 = vpop.permute.xlu1 %12460  ;;  %v12466_v50 = vpop.permute.xlu0 %12465 }
 0xecc   : > { %v12463_v14 = vunpack.i.h.bf16 %v12461_v0  ;;  %v12462_v54 = vunpack.i.l.bf16 %v12461_v0  ;;  %v12468_v63 = vunpack.i.h.bf16 %v12466_v50  ;;  %v12467_v21 = vunpack.i.l.bf16 %v12466_v50 }
 0xece   : > { %v10536_v15 = vpack.c.bf16 %v12463_v14, %v12462_v54  ;;  %v12647_v40 = vpop.eup %12646  ;;  %v10540_v29 = vpack.c.bf16 %v12468_v63, %v12467_v21 }
 0xecf   : > { %v12471_v22 = vpop.permute.xlu1 %12470  ;;  %v2846_v27 = vmul.f32 %v12647_v40, %v12639_v6  ;;  %v2941_v55 = vpop.permute.xlu0 %2940 }
 0xed0   : > { %10537 = vmatprep.subr.bf16.mxu1 %v10536_v15  ;;  %v12473_v35 = vunpack.i.h.bf16 %v12471_v22  ;;  %v12472_v36 = vunpack.i.l.bf16 %v12471_v22 }
 0xed2   : > { %v12649_v53 = vpop.eup %12648  ;;  %v10550_v51 = vpack.c.bf16 %v12473_v35, %v12472_v36 }
 0xed3   : > { %v2650_v52 = vmul.f32 %v12649_v53, %v12641_v8  ;;  %v12651_v26 = vpop.eup %12650  ;;  %v2939_v56 = vpop.permute.xlu1 %2938 }
 0xed4   : > { %v2848_v31 = vmul.f32 %v12651_v26, %v12643_v9  ;;  %v3143_v57 = vpop.permute.xlu0 %3142 }
 0xed5   : > { %9883 = vmatprep.mubr.msk.f32.mxu1 %vm1830_vm3, %v2650_v52 }
 0xed6   : > { %9884 = vmatmul.mubr.msk.f32.vlgmr.msra.gmra.mrb[30].mxu1 %vm1830_vm3, %v2652_v23 }
 0xed7   : > { %10539 = vmatpush3.bf16.msra.mxu1 %v10536_v15  ;;  %9897 = vmatprep.mubr.msk.f32.mxu1 %vm1830_vm3, %v2846_v27  ;;  %v3141_v37 = vpop.permute.xlu1 %3140 }
 0xed8   : > { %10542 = vmatprep.subr.msk.bf16.mxu1 %vm13546_vm2, %v10540_v29 }
 0xeda   : > { %9898 = vmatmul.mubr.msk.f32.vlgmr.msra.gmra.mrb[32].mxu1 %vm1830_vm3, %v2848_v31 }
 0xedb   : > { %9904 = vmatprep.mubr.msk.f32.mxu1 %vm1740_vm1, %v2939_v56 }
 0xee0   : > { %10545 = vmatpush3.bf16.xpose.msk.msra.mxu1 %vm13546_vm2, %v10540_v29 }
 0xee1   : > { %10552 = vmatprep.subr.msk.bf16.mxu1 %vm13546_vm2, %v10550_v51 }
 0xee7   : > { %9905 = vmatmul.mubr.msk.f32.vlgmr.msra.gmra.mrb[34].mxu1 %vm1740_vm1, %v2941_v55 }
 0xee8   : > { %10555 = vmatpush3.bf16.xpose.msk.msra.mxu1 %vm13546_vm2, %v10550_v51  ;;  %9918 = vmatprep.mubr.msk.f32.mxu1 %vm1740_vm1, %v3141_v37 }
 0xeef   : > { %9919 = vmatmul.mubr.msk.f32.vlgmr.msra.gmra.mrb[36].mxu1 %vm1740_vm1, %v3143_v57 }
 0xfa9   : > { %v13733_v61 = vpop.f32.mrb[30].mxu1 }
 0xfaa   : > { %v13735_v34 = vpop.f32.mrb[31].mxu1 }
 0xfad   : > { %v13737_v3 = vpop.f32.mrb[32].mxu1 }
 0xfae   : > { %v12499_v4 = vpack.i.bf16 %v13620_v48, %v13737_v3  ;;  %v2929_v11 = vpop.f32.mrb[33].mxu1 }
 0xfaf   : > { %v12484_v5 = vpack.i.bf16 %v13622_v49, %v2929_v11 }
 0xfba   : > { %v9906_v42 = vpop.f32.mrb[34].mxu1 }
 0xfbb   : > { %v3030_v39 = vmul.f32 0.17677669, %v9906_v42  ;;  %v3020_v44 = vpop.f32.mrb[35].mxu1 }
 0xfbc   : > { %v3029_v6 = vmul.f32 0.17677669, %v3020_v44 }
 0xfbd   : > { %v3034_v7 = vsel %vm1830_vm3, %v3030_v39, -inf }
 0xfbe   : > { %3035 = vmax.xlane.f32.xlu0 %v3034_v7  ;;  %v3031_v8 = vsel %vm1830_vm3, %v3029_v6, -inf }
 0xfbf   : > { %3032 = vmax.xlane.f32.xlu1 %v3031_v8 }
 0xfc2   : > { %v9920_v9 = vpop.f32.mrb[36].mxu1 }
 0xfc3   : > { %v3232_v41 = vmul.f32 0.17677669, %v9920_v9  ;;  %v3222_v38 = vpop.f32.mrb[37].mxu1 }
 0xfc4   : > { %v3231_v62 = vmul.f32 0.17677669, %v3222_v38 }
 0xfc5   : > { %v3236_v45 = vsel %vm1830_vm3, %v3232_v41, -inf }
 0xfc6   : > { %3237 = vmax.xlane.f32.xlu1 %v3236_v45  ;;  %v3233_v10 = vsel %vm1830_vm3, %v3231_v62, -inf }
 0xfc7   : > { %3234 = vmax.xlane.f32.xlu0 %v3233_v10  ;;  %v3405_v10 = vld [vmem:[#allocation10 + $0x8] sm:$0xff] }
0x104b   : > { %v3036_v49 = vpop.xlane.xlu0 %3035 }
0x104c   : > { %v3038_v13 = vsub.f32 %v3030_v39, %v3036_v49  ;;  %v3033_v0 = vpop.xlane.xlu1 %3032  ;;  %v3407_v49 = vld [vmem:[#allocation10 + $0x18] sm:$0xff] }
0x104d   : > { %v3037_v14 = vsub.f32 %v3029_v6, %v3033_v0  ;;  %v10560_v0 = vpack.c.bf16 %v3407_v49, %v3405_v10  ;;  %v3433_v10 = vld [vmem:[#allocation10 + $0xe8] sm:$0xff]  ;;  %v3435_v49 = vld [vmem:[#allocation10 + $0xf8] sm:$0xff] }
0x104e   : > { %v3041_v54 = vmul.f32 1.442695, %v3038_v13  ;;  %v3404_v13 = vld [vmem:[#allocation10] sm:$0xff] }
0x104f   : > { %v3039_v15 = vmul.f32 1.442695, %v3037_v14  ;;  %v3406_v14 = vld [vmem:[#allocation10 + $0x10] sm:$0xff] }
0x1050   : > { %12652 = vpow2.f32 %v3041_v54  ;;  %v3409_v54 = vld [vmem:[#allocation10 + $0x28] sm:$0xff] }
0x1051   : > { %12654 = vpow2.f32 %v3039_v15  ;;  %v3411_v15 = vld [vmem:[#allocation10 + $0x38] sm:$0xff] }
0x1053   : > { %v3238_v50 = vpop.xlane.xlu1 %3237 }
0x1054   : > { %v3240_v20 = vsub.f32 %v3232_v41, %v3238_v50  ;;  %v3235_v40 = vpop.xlane.xlu0 %3234  ;;  %v10562_v50 = vpack.c.bf16 %v3406_v14, %v3404_v13  ;;  %v3432_v14 = vld [vmem:[#allocation10 + $0xe0] sm:$0xff] }
0x1055   : > { %v3239_v53 = vsub.f32 %v3231_v62, %v3235_v40  ;;  %v3408_v40 = vld [vmem:[#allocation10 + $0x20] sm:$0xff] }
0x1056   : > { %v3243_v63 = vmul.f32 1.442695, %v3240_v20  ;;  %v10564_v20 = vpack.c.bf16 %v3411_v15, %v3409_v54  ;;  %v3434_v54 = vld [vmem:[#allocation10 + $0xf0] sm:$0xff]  ;;  %v3437_v15 = vld [vmem:[#allocation10 + $0x108] sm:$0xff] }
0x1057   : > { %v3241_v21 = vmul.f32 1.442695, %v3239_v53  ;;  %v3410_v53 = vld [vmem:[#allocation10 + $0x30] sm:$0xff] }
0x1058   : > { %12656 = vpow2.f32 %v3243_v63  ;;  %v3413_v63 = vld [vmem:[#allocation10 + $0x48] sm:$0xff] }
0x1059   : > { %12658 = vpow2.f32 %v3241_v21  ;;  %v3415_v21 = vld [vmem:[#allocation10 + $0x58] sm:$0xff] }
0x105a   : > { %v12653_v52 = vpop.eup %12652 }
0x105b   : > { %v12655_v22 = vpop.eup %12654  ;;  %v3046_v23 = vsel %vm1830_vm3, %v12653_v52, 0.0 }
0x105c   : > { %3047 = vadd.xlane.f32.xlu1 %v3046_v23  ;;  %v3043_v26 = vsel %vm1830_vm3, %v12655_v22, 0.0  ;;  %v3412_v23 = vld [vmem:[#allocation10 + $0x40] sm:$0xff] }
0x105d   : > { %3044 = vadd.xlane.f32.xlu0 %v3043_v26  ;;  %v3414_v26 = vld [vmem:[#allocation10 + $0x50] sm:$0xff] }
0x1062   : > { %v12657_v27 = vpop.eup %12656 }
0x1063   : > { %v12659_v29 = vpop.eup %12658  ;;  %v3248_v31 = vsel %vm1830_vm3, %v12657_v27, 0.0 }
0x1064   : > { %3249 = vadd.xlane.f32.xlu1 %v3248_v31  ;;  %v3245_v56 = vsel %vm1830_vm3, %v12659_v29, 0.0  ;;  %v10570_v31 = vpack.c.bf16 %v3414_v26, %v3412_v23  ;;  %v3440_v26 = vld [vmem:[#allocation10 + $0x120] sm:$0xff] }
0x1065   : > { %3246 = vadd.xlane.f32.xlu0 %v3245_v56 }
0x1075   : > { %12480 = vrot.lane.b32.xlu1 %v13576_v12, %s13077_s18 }
0x1079   : > { %12485 = vrot.lane.b32.xlu1 %v12484_v5, %s13077_s18 }
0x107b   : > { %12475 = vrot.lane.b32.xlu0 %v13576_v12, %s13076_s26 }
0x10e9   : > { %v3048_v36 = vpop.xlane.xlu1 %3047 }
0x10ea   : > { %v3045_v35 = vpop.xlane.xlu0 %3044 }
0x10eb   : > { %12660 = vrcp.f32 %v3045_v35  ;;  %v3416_v35 = vld [vmem:[#allocation10 + $0x60] sm:$0xff] }
0x10ec   : > { %12662 = vrcp.f32 %v3048_v36  ;;  %v3418_v36 = vld [vmem:[#allocation10 + $0x70] sm:$0xff] }
0x10f1   : > { %v3250_v51 = vpop.xlane.xlu1 %3249 }
0x10f2   : > { %12664 = vrcp.f32 %v3250_v51  ;;  %v3247_v55 = vpop.xlane.xlu0 %3246  ;;  %v3421_v51 = vld [vmem:[#allocation10 + $0x88] sm:$0xff] }
0x10f3   : > { %12666 = vrcp.f32 %v3247_v55  ;;  %v3423_v55 = vld [vmem:[#allocation10 + $0x98] sm:$0xff] }
0x10f5   : > { %v12661_v37 = vpop.eup %12660  ;;  %v12481_v57 = vpop.permute.xlu1 %12480 }
0x10f6   : > { %v12483_v11 = vunpack.i.h.bf16 %v12481_v57  ;;  %v12482_v42 = vunpack.i.l.bf16 %v12481_v57  ;;  %v12476_v39 = vpop.permute.xlu0 %12475  ;;  %v3050_v44 = vmul.f32 %v12661_v37, %v12655_v22  ;;  %v12663_v8 = vpop.eup %12662  ;;  %v10568_v22 = vpack.c.bf16 %v3415_v21, %v3413_v63  ;;  %v3438_v63 = vld [vmem:[#allocation10 + $0x110] sm:$0xff]  ;;  %v3441_v21 = vld [vmem:[#allocation10 + $0x128] sm:$0xff] }
0x10f7   : > { %v12478_v6 = vunpack.i.h.bf16 %v12476_v39  ;;  %v12477_v7 = vunpack.i.l.bf16 %v12476_v39  ;;  %v3052_v38 = vmul.f32 %v12663_v8, %v12653_v52  ;;  %v10566_v52 = vpack.c.bf16 %v3410_v53, %v3408_v40  ;;  %v3425_v39 = vld [vmem:[#allocation10 + $0xa8] sm:$0xff]  ;;  %v3436_v53 = vld [vmem:[#allocation10 + $0x100] sm:$0xff] }
0x10f8   : > { %v10556_v5 = vpack.c.bf16 %v12483_v11, %v12482_v42  ;;  %9911 = vmatprep.mubr.msk.f32.mxu0 %vm1830_vm3, %v3050_v44  ;;  %v10574_v37 = vpack.c.bf16 %v3418_v36, %v3416_v35  ;;  %v10576_v57 = vpack.c.bf16 %v3423_v55, %v3421_v51  ;;  %v3420_v11 = vld [vmem:[#allocation10 + $0x80] sm:$0xff]  ;;  %v3422_v42 = vld [vmem:[#allocation10 + $0x90] sm:$0xff]  ;;  %v3427_v44 = vld [vmem:[#allocation10 + $0xb8] sm:$0xff] }
0x10f9   : > { %v10546_v12 = vpack.c.bf16 %v12478_v6, %v12477_v7  ;;  %v10578_v6 = vpack.c.bf16 %v3422_v42, %v3420_v11  ;;  %v10580_v7 = vpack.c.bf16 %v3427_v44, %v3425_v39  ;;  %v3429_v8 = vld [vmem:[#allocation10 + $0xc8] sm:$0xff]  ;;  %v3444_v36 = vld [vmem:[#allocation10 + $0x140] sm:$0xff]  ;;  %v3446_v51 = vld [vmem:[#allocation10 + $0x150] sm:$0xff] }
0x10fa   : > { %10557 = vmatprep.subr.bf16.mxu1 %v10556_v5  ;;  %v3449_v55 = vld [vmem:[#allocation10 + $0x168] sm:$0xff]  ;;  %v3448_v42 = vld [vmem:[#allocation10 + $0x160] sm:$0xff]  ;;  %v3450_v39 = vld [vmem:[#allocation10 + $0x170] sm:$0xff] }
0x10fb   : > { %10547 = vmatprep.subr.bf16.mxu0 %v10546_v12  ;;  %10559 = vmatpush3.bf16.msra.mxu1 %v10556_v5  ;;  %v3424_v5 = vld [vmem:[#allocation10 + $0xa0] sm:$0xff]  ;;  %v3453_v44 = vld [vmem:[#allocation10 + $0x188] sm:$0xff] }
0x10fc   : > { %v12665_v9 = vpop.eup %12664  ;;  %10549 = vmatpush3.bf16.msra.mxu0 %v10546_v12  ;;  %10561 = vmatprep.subr.bf16.mxu1 %v10560_v0  ;;  %v3426_v12 = vld [vmem:[#allocation10 + $0xb0] sm:$0xff]  ;;  %v10588_v0 = vpack.c.bf16 %v3435_v49, %v3433_v10  ;;  %v3461_v49 = vld [vmem:[#allocation10 + $0x1c8] sm:$0xff] }
0x10fd   : > { %v12667_v41 = vpop.eup %12666  ;;  %v3254_v45 = vmul.f32 %v12665_v9, %v12657_v27  ;;  %v3417_v27 = vld [vmem:[#allocation10 + $0x68] sm:$0xff]  ;;  %v3431_v9 = vld [vmem:[#allocation10 + $0xd8] sm:$0xff]  ;;  %v3458_v10 = vld [vmem:[#allocation10 + $0x1b0] sm:$0xff] }
0x10fe   : > { %v3252_v62 = vmul.f32 %v12667_v41, %v12659_v29  ;;  %v3419_v29 = vld [vmem:[#allocation10 + $0x78] sm:$0xff]  ;;  %v10582_v41 = vpack.c.bf16 %v3426_v12, %v3424_v5  ;;  %v3452_v12 = vld [vmem:[#allocation10 + $0x180] sm:$0xff] }
0x10ff   : > { %9912 = vmatmul.mubr.msk.f32.vlgmr.msra.gmra.mrb[6].mxu0 %vm1830_vm3, %v3052_v38  ;;  %v10572_v56 = vpack.c.bf16 %v3419_v29, %v3417_v27  ;;  %v10584_v38 = vpack.c.bf16 %v3431_v9, %v3429_v8  ;;  %v3442_v27 = vld [vmem:[#allocation10 + $0x130] sm:$0xff]  ;;  %v3445_v29 = vld [vmem:[#allocation10 + $0x148] sm:$0xff] }
0x1100   : > { %9925 = vmatprep.mubr.msk.f32.mxu1 %vm1830_vm3, %v3252_v62  ;;  %v3428_v62 = vld [vmem:[#allocation10 + $0xc0] sm:$0xff]  ;;  %v3454_v8 = vld [vmem:[#allocation10 + $0x190] sm:$0xff]  ;;  %v3457_v9 = vld [vmem:[#allocation10 + $0x1a8] sm:$0xff] }
0x1101   : > { %9926 = vmatmul.mubr.msk.f32.vlgmr.msra.gmra.mrb[38].mxu1 %vm1830_vm3, %v3254_v45  ;;  %v3430_v45 = vld [vmem:[#allocation10 + $0xd0] sm:$0xff] }
0x1102   : > { %10563 = vmatpush1.bf16.msra.mxu1 %v10562_v50  ;;  %v10586_v13 = vpack.c.bf16 %v3430_v45, %v3428_v62  ;;  %v3439_v50 = vld [vmem:[#allocation10 + $0x118] sm:$0xff]  ;;  %v3456_v45 = vld [vmem:[#allocation10 + $0x1a0] sm:$0xff] }
0x1103   : > { %10565 = vmatprep.subr.bf16.mxu1 %v10564_v20  ;;  %v10590_v20 = vpack.c.bf16 %v3434_v54, %v3432_v14  ;;  %v10592_v40 = vpack.c.bf16 %v3439_v50, %v3437_v15  ;;  %v3460_v54 = vld [vmem:[#allocation10 + $0x1c0] sm:$0xff]  ;;  %v3462_v15 = vld [vmem:[#allocation10 + $0x1d0] sm:$0xff] }
0x1104   : > { %v10618_v50 = vpack.c.bf16 %v3462_v15, %v3460_v54 }
0x1106   : > { %10567 = vmatpush1.bf16.msra.mxu1 %v10566_v52  ;;  %v3443_v52 = vld [vmem:[#allocation10 + $0x138] sm:$0xff] }
0x1107   : > { %10569 = vmatprep.subr.bf16.mxu1 %v10568_v22  ;;  %v10594_v22 = vpack.c.bf16 %v3438_v63, %v3436_v53  ;;  %v10596_v23 = vpack.c.bf16 %v3443_v52, %v3441_v21  ;;  %v3464_v63 = vld [vmem:[#allocation10 + $0x1e0] sm:$0xff]  ;;  %v3466_v21 = vld [vmem:[#allocation10 + $0x1f0] sm:$0xff] }
0x1108   : > { %v10622_v52 = vpack.c.bf16 %v3466_v21, %v3464_v63 }
0x110a   : > { %10571 = vmatpush1.bf16.msra.mxu1 %v10570_v31  ;;  %v3447_v31 = vld [vmem:[#allocation10 + $0x158] sm:$0xff] }
0x110b   : > { %10573 = vmatprep.subr.bf16.mxu1 %v10572_v56  ;;  %v10598_v56 = vpack.c.bf16 %v3442_v27, %v3440_v26  ;;  %v10600_v35 = vpack.c.bf16 %v3447_v31, %v3445_v29 }
0x110e   : > { %10575 = vmatpush1.bf16.msra.mxu1 %v10574_v37  ;;  %v3451_v37 = vld [vmem:[#allocation10 + $0x178] sm:$0xff] }
0x110f   : > { %10577 = vmatprep.subr.bf16.mxu1 %v10576_v57  ;;  %v10602_v57 = vpack.c.bf16 %v3446_v51, %v3444_v36  ;;  %v10604_v11 = vpack.c.bf16 %v3451_v37, %v3449_v55 }
0x1112   : > { %10579 = vmatpush1.bf16.msra.mxu1 %v10578_v6  ;;  %v3455_v6 = vld [vmem:[#allocation10 + $0x198] sm:$0xff] }
0x1113   : > { %10581 = vmatprep.subr.bf16.mxu1 %v10580_v7  ;;  %v10606_v7 = vpack.c.bf16 %v3450_v39, %v3448_v42  ;;  %v10608_v5 = vpack.c.bf16 %v3455_v6, %v3453_v44 }
0x1116   : > { %10583 = vmatpush1.bf16.msra.mxu1 %v10582_v41  ;;  %v3459_v41 = vld [vmem:[#allocation10 + $0x1b8] sm:$0xff] }
0x1117   : > { %10585 = vmatprep.subr.bf16.mxu1 %v10584_v38  ;;  %v10610_v38 = vpack.c.bf16 %v3454_v8, %v3452_v12  ;;  %v10612_v62 = vpack.c.bf16 %v3459_v41, %v3457_v9 }
0x111a   : > { %10587 = vmatpush1.bf16.msra.mxu1 %v10586_v13  ;;  %v3463_v13 = vld [vmem:[#allocation10 + $0x1d8] sm:$0xff] }
0x111b   : > { %10589 = vmatprep.subr.bf16.mxu1 %v10588_v0  ;;  %v10614_v0 = vpack.c.bf16 %v3458_v10, %v3456_v45  ;;  %v10616_v14 = vpack.c.bf16 %v3463_v13, %v3461_v49 }
0x111e   : > { %10591 = vmatpush1.bf16.msra.mxu1 %v10590_v20  ;;  %v3465_v20 = vld [vmem:[#allocation10 + $0x1e8] sm:$0xff] }
0x111f   : > { %10593 = vmatprep.subr.bf16.mxu1 %v10592_v40  ;;  %v3467_v40 = vld [vmem:[#allocation10 + $0x1f8] sm:$0xff] }
0x1120   : > { %v10620_v53 = vpack.c.bf16 %v3467_v40, %v3465_v20 }
0x1122   : > { %10595 = vmatpush1.bf16.msra.mxu1 %v10594_v22 }
0x1123   : > { %10597 = vmatprep.subr.bf16.mxu1 %v10596_v23 }
0x1126   : > { %10599 = vmatpush1.bf16.msra.mxu1 %v10598_v56 }
0x1127   : > { %10601 = vmatprep.subr.bf16.mxu1 %v10600_v35 }
0x112a   : > { %10603 = vmatpush1.bf16.msra.mxu1 %v10602_v57 }
0x112b   : > { %10605 = vmatprep.subr.bf16.mxu1 %v10604_v11 }
0x112e   : > { %10607 = vmatpush1.bf16.msra.mxu1 %v10606_v7 }
0x112f   : > { %10609 = vmatprep.subr.bf16.mxu1 %v10608_v5 }
0x1132   : > { %10611 = vmatpush1.bf16.msra.mxu1 %v10610_v38 }
0x1133   : > { %10613 = vmatprep.subr.bf16.mxu1 %v10612_v62 }
0x1136   : > { %10615 = vmatpush1.bf16.msra.mxu1 %v10614_v0 }
0x1137   : > { %10617 = vmatprep.subr.bf16.mxu1 %v10616_v14 }
0x113a   : > { %10619 = vmatpush1.bf16.msra.mxu1 %v10618_v50 }
0x113b   : > { %10621 = vmatprep.subr.bf16.mxu1 %v10620_v53 }
0x113e   : > { %10623 = vmatpush1.bf16.msra.mxu1 %v10622_v52 }
0x11d2   : > { %v9913_v22 = vpop.f32.mrb[6].mxu0 }
0x11d3   : > { %v12504_v23 = vpack.i.bf16 %v13644_v24, %v9913_v22  ;;  %v3131_v26 = vpop.f32.mrb[7].mxu0  ;;  %v12486_v24 = vpop.permute.xlu1 %12485 }
0x11d4   : > { %v12489_v27 = vpack.i.bf16 %v13646_v25, %v3131_v26  ;;  %v9927_v29 = vpop.f32.mrb[38].mxu1  ;;  %v12488_v25 = vunpack.i.h.bf16 %v12486_v24  ;;  %v12487_v36 = vunpack.i.l.bf16 %v12486_v24  ;;  %v3635_v26 = vld [vmem:[%s16949_s9 + $0x48] sm:$0xff]  ;;  %v3628_v24 = vld [vmem:[%s16949_s9 + $0x10] sm:$0xff] }
0x11d5   : > { %v12509_v31 = vpack.i.bf16 %v13691_v17, %v9927_v29  ;;  %v3333_v56 = vpop.f32.mrb[39].mxu1  ;;  %v3626_v29 = vld [vmem:[%s16949_s9] sm:$0xff] }
0x11d6   : > { %v12494_v35 = vpack.i.bf16 %v13693_v19, %v3333_v56  ;;  %12490 = vrot.lane.b32.xlu0 %v12489_v27, %s13076_s26  ;;  %v3390_v55 = vsel %vm1740_vm1, %v13598_v59, %v12488_v25  ;;  %v3398_v48 = vsel %vm1740_vm1, %v13735_v34, %v12487_v36  ;;  %v3636_v25 = vld [vmem:[%s16949_s9 + $0x50] sm:$0xff]  ;;  %v3643_v36 = vld [vmem:[%s16949_s9 + $0x88] sm:$0xff] }
0x11d8   : > { %12495 = vrot.lane.b32.xlu1 %v12494_v35, %s13075_s30 }
0x11da   : > { %12500 = vrot.lane.b32.xlu0 %v12499_v4, %s13077_s18 }
0x11dc   : > { %12505 = vrot.lane.b32.xlu1 %v12504_v23, %s13076_s26 }
0x11de   : > { %12510 = vrot.lane.b32.xlu0 %v12509_v31, %s13075_s30  ;;  %v3634_v31 = vld [vmem:[%s16949_s9 + $0x40] sm:$0xff] }
0x11df   : > { %v10626_v35 = vpack.c.bf16 %v3634_v31, %v3626_v29  ;;  %v3700_v29 = vld [vmem:[%s16949_s9 + $0x250] sm:$0xff]  ;;  %v3707_v31 = vld [vmem:[%s16949_s9 + $0x288] sm:$0xff] }
0x1248   : > { %v12491_v17 = vpop.permute.xlu0 %12490 }
0x1249   : > { %v12493_v51 = vunpack.i.h.bf16 %v12491_v17  ;;  %v12492_v19 = vunpack.i.l.bf16 %v12491_v17  ;;  %v10690_v17 = vpack.c.bf16 %v3636_v25, %v3628_v24  ;;  %v3717_v24 = vld [vmem:[%s16949_s9 + $0x2d8] sm:$0xff] }
0x124a   : > { %v12496_v37 = vpop.permute.xlu1 %12495 }
0x124b   : > { %v12498_v3 = vunpack.i.h.bf16 %v12496_v37  ;;  %v12497_v4 = vunpack.i.l.bf16 %v12496_v37  ;;  %v3400_v57 = vsel %vm3392_vm4, %v3398_v48, %v12492_v19  ;;  %v3393_v11 = vsel %vm3392_vm4, %v3390_v55, %v12493_v51  ;;  %v3651_v51 = vld [vmem:[%s16949_s9 + $0xc8] sm:$0xff]  ;;  %v3645_v19 = vld [vmem:[%s16949_s9 + $0x98] sm:$0xff] }
0x124c   : > { %v12501_v42 = vpop.permute.xlu0 %12500  ;;  %v3653_v55 = vld [vmem:[%s16949_s9 + $0xd8] sm:$0xff]  ;;  %v10628_v37 = vpack.c.bf16 %v3651_v51, %v3643_v36  ;;  %v3706_v51 = vld [vmem:[%s16949_s9 + $0x280] sm:$0xff] }
0x124d   : > { %v12503_v39 = vunpack.i.h.bf16 %v12501_v42  ;;  %v12502_v44 = vunpack.i.l.bf16 %v12501_v42  ;;  %v3402_v6 = vsel %vm3395_vm5, %v3400_v57, %v12497_v4  ;;  %v3396_v7 = vsel %vm3395_vm5, %v3393_v11, %v12498_v3  ;;  %v3642_v3 = vld [vmem:[%s16949_s9 + $0x80] sm:$0xff]  ;;  %v3644_v57 = vld [vmem:[%s16949_s9 + $0x90] sm:$0xff] }
0x124e   : > { %v12506_v5 = vpop.permute.xlu1 %12505  ;;  %3544 = vmatprep.mubr.f32.mxu1 %v3402_v6  ;;  %v10692_v48 = vpack.c.bf16 %v3653_v55, %v3645_v19  ;;  %v3650_v4 = vld [vmem:[%s16949_s9 + $0xc0] sm:$0xff]  ;;  %v3652_v42 = vld [vmem:[%s16949_s9 + $0xd0] sm:$0xff] }
0x124f   : > { %v12508_v59 = vunpack.i.h.bf16 %v12506_v5  ;;  %v12507_v12 = vunpack.i.l.bf16 %v12506_v5  ;;  %3545 = vmatmul.mubr.f32.vlgmr.msra.gmra.mrb[40].mxu1 %v3396_v7  ;;  %v3399_v34 = vsel %vm1740_vm1, %v13733_v61, %v12502_v44  ;;  %v3391_v8 = vsel %vm1740_vm1, %v13596_v58, %v12503_v39  ;;  %v3468_v61 = vld [vmem:[%s16946_s6] sm:$0x3]  ;;  %v3659_v39 = vld [vmem:[%s16949_s9 + $0x108] sm:$0xff]  ;;  %v3661_v5 = vld [vmem:[%s16949_s9 + $0x118] sm:$0xff] }
0x1250   : > { %v12511_v9 = vpop.permute.xlu0 %12510  ;;  %v3473_v13 = vrot.slane %v3468_v61, %v13518_v33  ;;  %v3477_v58 = vrot.slane %v3468_v61, %v13651_v43  ;;  %v10630_v11 = vpack.c.bf16 %v3650_v4, %v3642_v3  ;;  %v3667_v44 = vld [vmem:[%s16949_s9 + $0x148] sm:$0xff]  ;;  %v10694_v6 = vpack.c.bf16 %v3652_v42, %v3644_v57  ;;  %v3714_v19 = vld [vmem:[%s16949_s9 + $0x2c0] sm:$0xff]  ;;  %v3708_v55 = vld [vmem:[%s16949_s9 + $0x290] sm:$0xff] }
0x1251   : > { %v12513_v41 = vunpack.i.h.bf16 %v12511_v9  ;;  %v12512_v38 = vunpack.i.l.bf16 %v12511_v9  ;;  %v3401_v62 = vsel %vm3392_vm4, %v3399_v34, %v12507_v12  ;;  %v3394_v45 = vsel %vm3392_vm4, %v3391_v8, %v12508_v59  ;;  %v3669_v59 = vld [vmem:[%s16949_s9 + $0x158] sm:$0xff]  ;;  %v3658_v12 = vld [vmem:[%s16949_s9 + $0x100] sm:$0xff]  ;;  %v3660_v9 = vld [vmem:[%s16949_s9 + $0x110] sm:$0xff] }
0x1252   : > { %v10632_v7 = vpack.c.bf16 %v3667_v44, %v3659_v39  ;;  %v10696_v34 = vpack.c.bf16 %v3669_v59, %v3661_v5  ;;  %v3666_v8 = vld [vmem:[%s16949_s9 + $0x140] sm:$0xff]  ;;  %v3723_v3 = vld [vmem:[%s16949_s9 + $0x308] sm:$0xff]  ;;  %v3725_v57 = vld [vmem:[%s16949_s9 + $0x318] sm:$0xff]  ;;  %v10646_v42 = vpack.c.bf16 %v3714_v19, %v3706_v51 }
0x1253   : > { %v3403_v10 = vsel %vm3395_vm5, %v3401_v62, %v12512_v38  ;;  %v3397_v49 = vsel %vm3395_vm5, %v3394_v45, %v12513_v41  ;;  %v3668_v41 = vld [vmem:[%s16949_s9 + $0x150] sm:$0xff]  ;;  %v10634_v38 = vpack.c.bf16 %v3666_v8, %v3658_v12  ;;  %v3675_v62 = vld [vmem:[%s16949_s9 + $0x188] sm:$0xff] }
0x1254   : > { %3550 = vmatprep.mubr.f32.mxu1 %v3403_v10  ;;  %v3683_v45 = vld [vmem:[%s16949_s9 + $0x1c8] sm:$0xff]  ;;  %v3677_v10 = vld [vmem:[%s16949_s9 + $0x198] sm:$0xff]  ;;  %v3724_v5 = vld [vmem:[%s16949_s9 + $0x310] sm:$0xff] }
0x1255   : > { %3551 = vmatmul.mubr.f32.gmra.mrb[42].mxu1 %v3397_v49  ;;  %v10698_v49 = vpack.c.bf16 %v3668_v41, %v3660_v9  ;;  %v10636_v61 = vpack.c.bf16 %v3683_v45, %v3675_v62  ;;  %v3731_v4 = vld [vmem:[%s16949_s9 + $0x348] sm:$0xff]  ;;  %v3732_v12 = vld [vmem:[%s16949_s9 + $0x350] sm:$0xff]  ;;  %v3741_v9 = vld [vmem:[%s16949_s9 + $0x398] sm:$0xff] }
0x1256   : > { %v10648_v44 = vpack.c.bf16 %v3731_v4, %v3723_v3  ;;  %v3747_v8 = vld [vmem:[%s16949_s9 + $0x3c8] sm:$0xff]  ;;  %v3749_v41 = vld [vmem:[%s16949_s9 + $0x3d8] sm:$0xff]  ;;  %v10714_v62 = vpack.c.bf16 %v3732_v12, %v3724_v5  ;;  %v3780_v51 = vld [vmem:[%s16949_s9 + $0x4d0] sm:$0xff] }
0x1257   : > { %v3787_v19 = vld [vmem:[%s16949_s9 + $0x508] sm:$0xff] }
0x1322   : > { %v3546_v0 = vpop.f32.mrb[40].mxu1 }
0x1323   : > { %v3547_v14 = vadd.f32 %v3546_v0, %v3473_v13  ;;  %v3548_v54 = vpop.f32.mrb[41].mxu1  ;;  %v3682_v0 = vld [vmem:[%s16949_s9 + $0x1c0] sm:$0xff] }
0x1324   : > { %v3549_v15 = vadd.f32 %v3548_v54, %v3477_v58  ;;  %v3676_v54 = vld [vmem:[%s16949_s9 + $0x190] sm:$0xff] }
0x1325   : > { %v13793_v50 = vadd.f32 %v13496_v18, %v3547_v14 }
0x1326   : > { %v13796_v20 = vadd.f32 %v13494_v16, %v3549_v15  ;;  %v3627_v16 = vld [vmem:[%s16949_s9 + $0x8] sm:$0xff]  ;;  %v3684_v15 = vld [vmem:[%s16949_s9 + $0x1d0] sm:$0xff] }
0x1327   : > { %v10624_v27 = vpack.c.bf16 %v3635_v26, %v3627_v16  ;;  %v3690_v26 = vld [vmem:[%s16949_s9 + $0x200] sm:$0xff] }
0x1328   : > { %v3552_v40 = vpop.f32.mrb[42].mxu1  ;;  %v3563_v53 = vadd.f32 %v13796_v20, %v13793_v50 }
0x1329   : > { %v3553_v63 = vadd.f32 %v3552_v40, %v3473_v13  ;;  %v3554_v21 = vpop.f32.mrb[43].mxu1  ;;  %10625 = vmatprep.subr.bf16.mxu0 %v10624_v27  ;;  %v3685_v13 = vld [vmem:[%s16949_s9 + $0x1d8] sm:$0xff]  ;;  %v3691_v40 = vld [vmem:[%s16949_s9 + $0x208] sm:$0xff]  ;;  %v3692_v27 = vld [vmem:[%s16949_s9 + $0x210] sm:$0xff] }
0x132a   : > { %v3555_v52 = vadd.f32 %v3554_v21, %v3477_v58  ;;  %3564 = vadd.xlane.f32.xlu1 %v3563_v53  ;;  %10627 = vmatpush1.bf16.msra.mxu0 %v10626_v35  ;;  %v3674_v58 = vld [vmem:[%s16949_s9 + $0x180] sm:$0xff]  ;;  %v10700_v14 = vpack.c.bf16 %v3685_v13, %v3677_v10  ;;  %v3699_v53 = vld [vmem:[%s16949_s9 + $0x248] sm:$0xff]  ;;  %v3701_v21 = vld [vmem:[%s16949_s9 + $0x258] sm:$0xff]  ;;  %v10706_v36 = vpack.c.bf16 %v3700_v29, %v3692_v27 }
0x132b   : > { %v13801_v22 = vadd.f32 %v13502_v30, %v3553_v63  ;;  %v3629_v30 = vld [vmem:[%s16949_s9 + $0x18] sm:$0xff]  ;;  %10629 = vmatprep.subr.bf16.mxu0 %v10628_v37  ;;  %v10640_v16 = vpack.c.bf16 %v3699_v53, %v3691_v40  ;;  %v3738_v10 = vld [vmem:[%s16949_s9 + $0x380] sm:$0xff]  ;;  %v10716_v13 = vpack.c.bf16 %v3749_v41, %v3741_v9  ;;  %v3779_v27 = vld [vmem:[%s16949_s9 + $0x4c8] sm:$0xff] }
0x132c   : > { %v13804_v23 = vadd.f32 %v13500_v28, %v3555_v52  ;;  %v3637_v28 = vld [vmem:[%s16949_s9 + $0x58] sm:$0xff]  ;;  %v10638_v52 = vpack.c.bf16 %v3682_v0, %v3674_v58  ;;  %v3748_v58 = vld [vmem:[%s16949_s9 + $0x3d0] sm:$0xff]  ;;  %v3755_v0 = vld [vmem:[%s16949_s9 + $0x408] sm:$0xff] }
0x132d   : > { %v10688_v56 = vpack.c.bf16 %v3637_v28, %v3629_v30  ;;  %v3693_v63 = vld [vmem:[%s16949_s9 + $0x218] sm:$0xff]  ;;  %v3698_v30 = vld [vmem:[%s16949_s9 + $0x240] sm:$0xff] }
0x132e   : > { %v3566_v18 = vadd.f32 %v13804_v23, %v13801_v22  ;;  %10631 = vmatpush1.bf16.msra.mxu0 %v10630_v11  ;;  %v10704_v28 = vpack.c.bf16 %v3701_v21, %v3693_v63  ;;  %v3709_v35 = vld [vmem:[%s16949_s9 + $0x298] sm:$0xff]  ;;  %v10642_v25 = vpack.c.bf16 %v3698_v30, %v3690_v26  ;;  %v3754_v21 = vld [vmem:[%s16949_s9 + $0x400] sm:$0xff]  ;;  %v3764_v26 = vld [vmem:[%s16949_s9 + $0x450] sm:$0xff] }
0x132f   : > { %10689 = vmatprep.subr.bf16.mxu1 %v10688_v56  ;;  %10633 = vmatprep.subr.bf16.mxu0 %v10632_v7  ;;  %v3715_v56 = vld [vmem:[%s16949_s9 + $0x2c8] sm:$0xff]  ;;  %v10708_v37 = vpack.c.bf16 %v3717_v24, %v3709_v35  ;;  %v3733_v11 = vld [vmem:[%s16949_s9 + $0x358] sm:$0xff]  ;;  %v3730_v7 = vld [vmem:[%s16949_s9 + $0x340] sm:$0xff] }
0x1330   : > { %3567 = vadd.xlane.f32.xlu0 %v3566_v18  ;;  %10691 = vmatpush1.bf16.msra.mxu1 %v10690_v17  ;;  %v10702_v18 = vpack.c.bf16 %v3684_v15, %v3676_v54  ;;  %v10644_v17 = vpack.c.bf16 %v3715_v56, %v3707_v31  ;;  %v10712_v59 = vpack.c.bf16 %v3733_v11, %v3725_v57  ;;  %v3757_v54 = vld [vmem:[%s16949_s9 + $0x418] sm:$0xff]  ;;  %v3771_v30 = vld [vmem:[%s16949_s9 + $0x488] sm:$0xff]  ;;  %v3770_v24 = vld [vmem:[%s16949_s9 + $0x480] sm:$0xff] }
0x1331   : > { %10693 = vmatprep.subr.bf16.mxu1 %v10692_v48  ;;  %v3716_v48 = vld [vmem:[%s16949_s9 + $0x2d0] sm:$0xff]  ;;  %v3765_v15 = vld [vmem:[%s16949_s9 + $0x458] sm:$0xff]  ;;  %v10660_v35 = vpack.c.bf16 %v3779_v27, %v3771_v30  ;;  %v3786_v11 = vld [vmem:[%s16949_s9 + $0x500] sm:$0xff] }
0x1332   : > { %10635 = vmatpush1.bf16.msra.mxu0 %v10634_v38  ;;  %v10710_v39 = vpack.c.bf16 %v3716_v48, %v3708_v55  ;;  %v3781_v29 = vld [vmem:[%s16949_s9 + $0x4d8] sm:$0xff]  ;;  %v3795_v55 = vld [vmem:[%s16949_s9 + $0x548] sm:$0xff]  ;;  %v3818_v27 = vld [vmem:[%s16949_s9 + $0x600] sm:$0xff] }
0x1333   : > { %10637 = vmatprep.subr.bf16.mxu0 %v10636_v61  ;;  %v3740_v61 = vld [vmem:[%s16949_s9 + $0x390] sm:$0xff]  ;;  %v3797_v48 = vld [vmem:[%s16949_s9 + $0x558] sm:$0xff]  ;;  %v10664_v57 = vpack.c.bf16 %v3795_v55, %v3787_v19  ;;  %v3834_v55 = vld [vmem:[%s16949_s9 + $0x680] sm:$0xff] }
0x1334   : > { %10695 = vmatpush1.bf16.msra.mxu1 %v10694_v6  ;;  %v3722_v6 = vld [vmem:[%s16949_s9 + $0x300] sm:$0xff]  ;;  %v10718_v53 = vpack.c.bf16 %v3748_v58, %v3740_v61  ;;  %v3829_v30 = vld [vmem:[%s16949_s9 + $0x658] sm:$0xff] }
0x1335   : > { %10697 = vmatprep.subr.bf16.mxu1 %v10696_v34  ;;  %v3739_v34 = vld [vmem:[%s16949_s9 + $0x388] sm:$0xff]  ;;  %v10650_v38 = vpack.c.bf16 %v3730_v7, %v3722_v6  ;;  %v3796_v6 = vld [vmem:[%s16949_s9 + $0x550] sm:$0xff]  ;;  %v3845_v19 = vld [vmem:[%s16949_s9 + $0x6d8] sm:$0xff] }
0x1336   : > { %10639 = vmatpush1.bf16.msra.mxu0 %v10638_v52  ;;  %v10652_v45 = vpack.c.bf16 %v3747_v8, %v3739_v34  ;;  %v3762_v52 = vld [vmem:[%s16949_s9 + $0x440] sm:$0xff] }
0x1337   : > { %10641 = vmatprep.subr.bf16.mxu0 %v10640_v16  ;;  %v10720_v16 = vpack.c.bf16 %v3765_v15, %v3757_v54  ;;  %v10658_v31 = vpack.c.bf16 %v3762_v52, %v3754_v21  ;;  %v3810_v54 = vld [vmem:[%s16949_s9 + $0x5c0] sm:$0xff]  ;;  %v3819_v52 = vld [vmem:[%s16949_s9 + $0x608] sm:$0xff] }
0x1338   : > { %10699 = vmatpush1.bf16.msra.mxu1 %v10698_v49  ;;  %v3746_v49 = vld [vmem:[%s16949_s9 + $0x3c0] sm:$0xff] }
0x1339   : > { %10701 = vmatprep.subr.bf16.mxu1 %v10700_v14  ;;  %v3763_v14 = vld [vmem:[%s16949_s9 + $0x448] sm:$0xff]  ;;  %v10654_v40 = vpack.c.bf16 %v3746_v49, %v3738_v10 }
0x133a   : > { %10643 = vmatpush1.bf16.msra.mxu0 %v10642_v25  ;;  %v10656_v63 = vpack.c.bf16 %v3763_v14, %v3755_v0  ;;  %v3778_v25 = vld [vmem:[%s16949_s9 + $0x4c0] sm:$0xff]  ;;  %v3813_v0 = vld [vmem:[%s16949_s9 + $0x5d8] sm:$0xff] }
0x133b   : > { %10645 = vmatprep.subr.bf16.mxu0 %v10644_v17  ;;  %v10662_v3 = vpack.c.bf16 %v3778_v25, %v3770_v24  ;;  %v3802_v14 = vld [vmem:[%s16949_s9 + $0x580] sm:$0xff]  ;;  %v3835_v25 = vld [vmem:[%s16949_s9 + $0x688] sm:$0xff] }
0x133c   : > { %10703 = vmatpush1.bf16.msra.mxu1 %v10702_v18  ;;  %v3756_v18 = vld [vmem:[%s16949_s9 + $0x410] sm:$0xff] }
0x133d   : > { %10705 = vmatprep.subr.bf16.mxu1 %v10704_v28  ;;  %v3773_v28 = vld [vmem:[%s16949_s9 + $0x498] sm:$0xff]  ;;  %v10722_v56 = vpack.c.bf16 %v3764_v26, %v3756_v18  ;;  %v3827_v18 = vld [vmem:[%s16949_s9 + $0x648] sm:$0xff] }
0x133e   : > { %10647 = vmatpush1.bf16.msra.mxu0 %v10646_v42  ;;  %v10724_v17 = vpack.c.bf16 %v3781_v29, %v3773_v28  ;;  %v3794_v42 = vld [vmem:[%s16949_s9 + $0x540] sm:$0xff]  ;;  %v10672_v26 = vpack.c.bf16 %v3827_v18, %v3819_v52  ;;  %v3641_v52 = vld [vmem:[%s16949_s9 + $0x78] sm:$0xff] }
0x133f   : > { %10649 = vmatprep.subr.bf16.mxu0 %v10648_v44  ;;  %v3788_v44 = vld [vmem:[%s16949_s9 + $0x510] sm:$0xff]  ;;  %v10666_v7 = vpack.c.bf16 %v3794_v42, %v3786_v11  ;;  %v3826_v28 = vld [vmem:[%s16949_s9 + $0x640] sm:$0xff]  ;;  %v3851_v42 = vld [vmem:[%s16949_s9 + $0x708] sm:$0xff] }
0x1340   : > { %10707 = vmatpush1.bf16.msra.mxu1 %v10706_v36  ;;  %v3772_v36 = vld [vmem:[%s16949_s9 + $0x490] sm:$0xff]  ;;  %v10730_v5 = vpack.c.bf16 %v3796_v6, %v3788_v44  ;;  %v3853_v44 = vld [vmem:[%s16949_s9 + $0x718] sm:$0xff] }
0x1341   : > { %10709 = vmatprep.subr.bf16.mxu1 %v10708_v37  ;;  %v3789_v37 = vld [vmem:[%s16949_s9 + $0x518] sm:$0xff]  ;;  %v10726_v4 = vpack.c.bf16 %v3780_v51, %v3772_v36  ;;  %v3843_v36 = vld [vmem:[%s16949_s9 + $0x6c8] sm:$0xff] }
0x1342   : > { %10651 = vmatpush1.bf16.msra.mxu0 %v10650_v38  ;;  %v10676_v51 = vpack.c.bf16 %v3843_v36, %v3835_v25 }
0x1343   : > { %10653 = vmatprep.subr.bf16.mxu0 %v10652_v45 }
0x1344   : > { %10711 = vmatpush1.bf16.msra.mxu1 %v10710_v39  ;;  %v10728_v39 = vpack.c.bf16 %v3797_v48, %v3789_v37  ;;  %v3842_v37 = vld [vmem:[%s16949_s9 + $0x6c0] sm:$0xff] }
0x1345   : > { %10713 = vmatprep.subr.bf16.mxu1 %v10712_v59 }
0x1346   : > { %10655 = vmatpush1.bf16.msra.mxu0 %v10654_v40  ;;  %v10670_v40 = vpack.c.bf16 %v3810_v54, %v3802_v14  ;;  %v3868_v14 = vld [vmem:[%s16949_s9 + $0x790] sm:$0xff] }
0x1347   : > { %10657 = vmatprep.subr.bf16.mxu0 %v10656_v63  ;;  %v3812_v63 = vld [vmem:[%s16949_s9 + $0x5d0] sm:$0xff] }
0x1348   : > { %10715 = vmatpush1.bf16.msra.mxu1 %v10714_v62  ;;  %v3876_v54 = vld [vmem:[%s16949_s9 + $0x7d0] sm:$0xff] }
0x1349   : > { %10717 = vmatprep.subr.bf16.mxu1 %v10716_v13  ;;  %v3803_v13 = vld [vmem:[%s16949_s9 + $0x588] sm:$0xff] }
0x134a   : > { %10659 = vmatpush1.bf16.msra.mxu0 %v10658_v31  ;;  %v10674_v31 = vpack.c.bf16 %v3826_v28, %v3818_v27 }
0x134b   : > { %10661 = vmatprep.subr.bf16.mxu0 %v10660_v35  ;;  %v3828_v35 = vld [vmem:[%s16949_s9 + $0x650] sm:$0xff] }
0x134c   : > { %10719 = vmatpush1.bf16.msra.mxu1 %v10718_v53  ;;  %v3804_v53 = vld [vmem:[%s16949_s9 + $0x590] sm:$0xff] }
0x134d   : > { %10721 = vmatprep.subr.bf16.mxu1 %v10720_v16  ;;  %v10734_v21 = vpack.c.bf16 %v3812_v63, %v3804_v53  ;;  %v3821_v16 = vld [vmem:[%s16949_s9 + $0x618] sm:$0xff]  ;;  %v3639_v53 = vld [vmem:[%s16949_s9 + $0x68] sm:$0xff] }
0x134e   : > { %10663 = vmatpush1.bf16.msra.mxu0 %v10662_v3  ;;  %v10736_v29 = vpack.c.bf16 %v3829_v30, %v3821_v16  ;;  %v10678_v3 = vpack.c.bf16 %v3842_v37, %v3834_v55  ;;  %v3633_v63 = vld [vmem:[%s16949_s9 + $0x38] sm:$0xff]  ;;  %v3630_v55 = vld [vmem:[%s16949_s9 + $0x20] sm:$0xff] }
0x134f   : > { %10665 = vmatprep.subr.bf16.mxu0 %v10664_v57  ;;  %v3844_v57 = vld [vmem:[%s16949_s9 + $0x6d0] sm:$0xff]  ;;  %v10816_v18 = vpack.c.bf16 %v3641_v52, %v3633_v63  ;;  %v3638_v37 = vld [vmem:[%s16949_s9 + $0x60] sm:$0xff]  ;;  %v3679_v63 = vld [vmem:[%s16949_s9 + $0x1a8] sm:$0xff] }
0x1350   : > { %10723 = vmatpush1.bf16.msra.mxu1 %v10722_v56  ;;  %v3820_v56 = vld [vmem:[%s16949_s9 + $0x610] sm:$0xff]  ;;  %v3687_v52 = vld [vmem:[%s16949_s9 + $0x1e8] sm:$0xff] }
0x1351   : > { %10725 = vmatprep.subr.bf16.mxu1 %v10724_v17  ;;  %v10738_v24 = vpack.c.bf16 %v3828_v35, %v3820_v56  ;;  %v3837_v17 = vld [vmem:[%s16949_s9 + $0x698] sm:$0xff] }
0x1352   : > { %10667 = vmatpush1.bf16.msra.mxu0 %v10666_v7  ;;  %v10740_v48 = vpack.c.bf16 %v3845_v19, %v3837_v17  ;;  %v3861_v7 = vld [vmem:[%s16949_s9 + $0x758] sm:$0xff] }
0x1353   : > { %v3562_v56 = vld [vmem:[#allocation13] sm:$0x3] }
0x1354   : > { %10727 = vmatpush1.bf16.msra.mxu1 %v10726_v4  ;;  %v3836_v4 = vld [vmem:[%s16949_s9 + $0x690] sm:$0xff]  ;;  %v3615_v19 = vrot.slane %v3562_v56, %v13518_v33 }
0x1355   : > { %10729 = vmatprep.subr.bf16.mxu1 %v10728_v39  ;;  %v10742_v11 = vpack.c.bf16 %v3844_v57, %v3836_v4  ;;  %v3859_v39 = vld [vmem:[%s16949_s9 + $0x748] sm:$0xff] }
0x1356   : > { %v10680_v6 = vpack.c.bf16 %v3859_v39, %v3851_v42  ;;  %v3655_v57 = vld [vmem:[%s16949_s9 + $0xe8] sm:$0xff]  ;;  %v3657_v42 = vld [vmem:[%s16949_s9 + $0xf8] sm:$0xff] }
0x1358   : > { %10731 = vmatpush1.bf16.msra.mxu1 %v10730_v5  ;;  %v3850_v5 = vld [vmem:[%s16949_s9 + $0x700] sm:$0xff] }
0x13b7   : > { %v3565_v59 = vpop.xlane.xlu1 %3564 }
0x13b8   : > { %v3570_v12 = vmul.f32 0.00390625, %v3565_v59  ;;  %v3858_v59 = vld [vmem:[%s16949_s9 + $0x740] sm:$0xff] }
0x13ba   : > { %v14073_v34 = vsub.f32 %v13793_v50, %v3570_v12  ;;  %v14076_v8 = vsub.f32 %v13796_v20, %v3570_v12  ;;  %v10744_v12 = vpack.c.bf16 %v3861_v7, %v3853_v44 }
0x13bc   : > { %v3576_v9 = vmul.f32 %v14073_v34, %v14073_v34  ;;  %v3577_v41 = vmul.f32 %v14076_v8, %v14076_v8 }
0x13bd   : > { %v3568_v38 = vpop.xlane.xlu0 %3567 }
0x13be   : > { %v3571_v62 = vmul.f32 0.00390625, %v3568_v38  ;;  %v3580_v45 = vadd.f32 %v3577_v41, %v3576_v9  ;;  %v10682_v9 = vpack.c.bf16 %v3858_v59, %v3850_v5  ;;  %v3852_v41 = vld [vmem:[%s16949_s9 + $0x710] sm:$0xff]  ;;  %v3646_v5 = vld [vmem:[%s16949_s9 + $0xa0] sm:$0xff] }
0x13bf   : > { %v3860_v38 = vld [vmem:[%s16949_s9 + $0x750] sm:$0xff]  ;;  %v3654_v59 = vld [vmem:[%s16949_s9 + $0xe0] sm:$0xff] }
0x13c0   : > { %v14083_v10 = vsub.f32 %v13801_v22, %v3571_v62  ;;  %v14086_v49 = vsub.f32 %v13804_v23, %v3571_v62  ;;  %3581 = vadd.xlane.f32.xlu0 %v3580_v45  ;;  %v3811_v22 = vld [vmem:[%s16949_s9 + $0x5c8] sm:$0xff]  ;;  %v3805_v23 = vld [vmem:[%s16949_s9 + $0x598] sm:$0xff]  ;;  %v10746_v62 = vpack.c.bf16 %v3860_v38, %v3852_v41  ;;  %v3648_v38 = vld [vmem:[%s16949_s9 + $0xb0] sm:$0xff] }
0x13c1   : > { %v10668_v58 = vpack.c.bf16 %v3811_v22, %v3803_v13  ;;  %v10732_v15 = vpack.c.bf16 %v3813_v0, %v3805_v23  ;;  %v3867_v45 = vld [vmem:[%s16949_s9 + $0x788] sm:$0xff]  ;;  %v3877_v13 = vld [vmem:[%s16949_s9 + $0x7d8] sm:$0xff]  ;;  %v3866_v22 = vld [vmem:[%s16949_s9 + $0x780] sm:$0xff] }
0x13c2   : > { %v3578_v50 = vmul.f32 %v14083_v10, %v14083_v10  ;;  %v3579_v20 = vmul.f32 %v14086_v49, %v14086_v49  ;;  %v3874_v23 = vld [vmem:[%s16949_s9 + $0x7c0] sm:$0xff] }
0x13c3   : > { %10669 = vmatprep.subr.bf16.mxu0 %v10668_v58  ;;  %10733 = vmatprep.subr.bf16.mxu1 %v10732_v15  ;;  %v10686_v0 = vpack.c.bf16 %v3874_v23, %v3866_v22  ;;  %v10750_v15 = vpack.c.bf16 %v3876_v54, %v3868_v14  ;;  %v3665_v23 = vld [vmem:[%s16949_s9 + $0x138] sm:$0xff]  ;;  %v3670_v14 = vld [vmem:[%s16949_s9 + $0x160] sm:$0xff] }
0x13c4   : > { %v3583_v61 = vadd.f32 %v3579_v20, %v3578_v50  ;;  %10671 = vmatpush1.bf16.msra.mxu0 %v10670_v40  ;;  %10735 = vmatpush1.bf16.msra.mxu1 %v10734_v21  ;;  %v3875_v50 = vld [vmem:[%s16949_s9 + $0x7c8] sm:$0xff]  ;;  %v3869_v20 = vld [vmem:[%s16949_s9 + $0x798] sm:$0xff] }
0x13c5   : > { %10673 = vmatprep.subr.bf16.mxu0 %v10672_v26  ;;  %10737 = vmatprep.subr.bf16.mxu1 %v10736_v29  ;;  %v10748_v58 = vpack.c.bf16 %v3877_v13, %v3869_v20  ;;  %v3631_v40 = vld [vmem:[%s16949_s9 + $0x28] sm:$0xff]  ;;  %v10758_v20 = vpack.c.bf16 %v3654_v59, %v3646_v5  ;;  %v3710_v59 = vld [vmem:[%s16949_s9 + $0x2a0] sm:$0xff] }
0x13c6   : > { %3584 = vadd.xlane.f32.xlu1 %v3583_v61  ;;  %v10684_v61 = vpack.c.bf16 %v3875_v50, %v3867_v45  ;;  %v10752_v21 = vpack.c.bf16 %v3639_v53, %v3631_v40  ;;  %v3664_v40 = vld [vmem:[%s16949_s9 + $0x130] sm:$0xff] }
0x13c7   : > { %v3672_v53 = vld [vmem:[%s16949_s9 + $0x170] sm:$0xff] }
0x13c8   : > { %10675 = vmatpush1.bf16.msra.mxu0 %v10674_v31  ;;  %10739 = vmatpush1.bf16.msra.mxu1 %v10738_v24  ;;  %v3561_v31 = vld [vmem:[#allocation11] sm:$0x3] }
0x13c9   : > { %10677 = vmatprep.subr.bf16.mxu0 %v10676_v51  ;;  %10741 = vmatprep.subr.bf16.mxu1 %v10740_v48  ;;  %v3604_v35 = vrot.slane %v3561_v31, %v13651_v43  ;;  %v3600_v24 = vrot.slane %v3561_v31, %v13518_v33  ;;  %v3619_v51 = vrot.slane %v3562_v56, %v13651_v43  ;;  %v3632_v48 = vld [vmem:[%s16949_s9 + $0x30] sm:$0xff] }
0x13ca   : > { %v10764_v31 = vpack.c.bf16 %v3687_v52, %v3679_v63  ;;  %v3745_v63 = vld [vmem:[%s16949_s9 + $0x3b8] sm:$0xff] }
0x13cc   : > { %10679 = vmatpush1.bf16.msra.mxu0 %v10678_v3  ;;  %10743 = vmatpush1.bf16.msra.mxu1 %v10742_v11  ;;  %v3649_v11 = vld [vmem:[%s16949_s9 + $0xb8] sm:$0xff] }
0x13cd   : > { %10681 = vmatprep.subr.bf16.mxu0 %v10680_v6  ;;  %10745 = vmatprep.subr.bf16.mxu1 %v10744_v12  ;;  %v10754_v6 = vpack.c.bf16 %v3638_v37, %v3630_v55  ;;  %v10820_v41 = vpack.c.bf16 %v3657_v42, %v3649_v11  ;;  %v3694_v37 = vld [vmem:[%s16949_s9 + $0x220] sm:$0xff]  ;;  %v3719_v11 = vld [vmem:[%s16949_s9 + $0x2e8] sm:$0xff]  ;;  %v3713_v42 = vld [vmem:[%s16949_s9 + $0x2b8] sm:$0xff] }
0x13d0   : > { %10683 = vmatpush1.bf16.msra.mxu0 %v10682_v9  ;;  %10747 = vmatpush1.bf16.msra.mxu1 %v10746_v62  ;;  %v3656_v62 = vld [vmem:[%s16949_s9 + $0xf0] sm:$0xff] }
0x13d1   : > { %10685 = vmatprep.subr.bf16.mxu0 %v10684_v61  ;;  %10749 = vmatprep.subr.bf16.mxu1 %v10748_v58  ;;  %v10822_v61 = vpack.c.bf16 %v3656_v62, %v3648_v38  ;;  %v3673_v58 = vld [vmem:[%s16949_s9 + $0x178] sm:$0xff]  ;;  %v3712_v38 = vld [vmem:[%s16949_s9 + $0x2b0] sm:$0xff] }
0x13d2   : > { %v3720_v62 = vld [vmem:[%s16949_s9 + $0x2f0] sm:$0xff] }
0x13d4   : > { %10687 = vmatpush1.bf16.msra.mxu0 %v10686_v0  ;;  %10751 = vmatpush1.bf16.msra.mxu1 %v10750_v15  ;;  %v3662_v0 = vld [vmem:[%s16949_s9 + $0x120] sm:$0xff] }
0x13d5   : > { %10753 = vmatprep.subr.bf16.mxu0 %v10752_v21  ;;  %10817 = vmatprep.subr.bf16.mxu1 %v10816_v18  ;;  %v3681_v18 = vld [vmem:[%s16949_s9 + $0x1b8] sm:$0xff] }
0x144d   : > { %v3582_v16 = vpop.xlane.xlu0 %3581 }
0x144e   : > { %v3586_v26 = vmul.f32 0.00390625, %v3582_v16  ;;  %v3689_v16 = vld [vmem:[%s16949_s9 + $0x1f8] sm:$0xff] }
0x144f   : > { %v10828_v56 = vpack.c.bf16 %v3689_v16, %v3681_v18  ;;  %v3742_v16 = vld [vmem:[%s16949_s9 + $0x3a0] sm:$0xff] }
0x1450   : > { %v3588_v30 = vadd.f32 1e-05, %v3586_v26  ;;  %v10824_v26 = vpack.c.bf16 %v3673_v58, %v3665_v23 }
0x1452   : > { %12668 = vrsqrt.f32 %v3588_v30  ;;  %v10762_v30 = vpack.c.bf16 %v3670_v14, %v3662_v0  ;;  %v3728_v0 = vld [vmem:[%s16949_s9 + $0x330] sm:$0xff] }
0x1453   : > { %v3585_v27 = vpop.xlane.xlu1 %3584  ;;  %v3736_v14 = vld [vmem:[%s16949_s9 + $0x370] sm:$0xff] }
0x1454   : > { %v3587_v28 = vmul.f32 0.00390625, %v3585_v27  ;;  %v10826_v27 = vpack.c.bf16 %v3672_v53, %v3664_v40  ;;  %v3743_v40 = vld [vmem:[%s16949_s9 + $0x3a8] sm:$0xff]  ;;  %v10842_v18 = vpack.c.bf16 %v3736_v14, %v3728_v0  ;;  %v3809_v0 = vld [vmem:[%s16949_s9 + $0x5b8] sm:$0xff] }
0x1455   : > { %v3751_v53 = vld [vmem:[%s16949_s9 + $0x3e8] sm:$0xff]  ;;  %v3817_v14 = vld [vmem:[%s16949_s9 + $0x5f8] sm:$0xff] }
0x1456   : > { %v3589_v29 = vadd.f32 1e-05, %v3587_v28  ;;  %v3678_v28 = vld [vmem:[%s16949_s9 + $0x1a0] sm:$0xff] }
0x1458   : > { %12670 = vrsqrt.f32 %v3589_v29  ;;  %v3686_v29 = vld [vmem:[%s16949_s9 + $0x1e0] sm:$0xff] }
0x145c   : > { %v12669_v25 = vpop.eup %12668 }
0x145d   : > { %v3592_v36 = vmul.f32 %v12669_v25, %v14073_v34  ;;  %v3593_v17 = vmul.f32 %v12669_v25, %v14076_v8  ;;  %v3640_v34 = vld [vmem:[%s16949_s9 + $0x70] sm:$0xff]  ;;  %v3647_v8 = vld [vmem:[%s16949_s9 + $0xa8] sm:$0xff] }
0x145e   : > { %v10818_v7 = vpack.c.bf16 %v3640_v34, %v3632_v48  ;;  %v10756_v9 = vpack.c.bf16 %v3655_v57, %v3647_v8  ;;  %v3695_v25 = vld [vmem:[%s16949_s9 + $0x228] sm:$0xff]  ;;  %v3702_v48 = vld [vmem:[%s16949_s9 + $0x260] sm:$0xff] }
0x145f   : > { %v3608_v3 = vmul.f32 %v3604_v35, %v3593_v17  ;;  %v3607_v4 = vmul.f32 %v3600_v24, %v3592_v36  ;;  %v3703_v36 = vld [vmem:[%s16949_s9 + $0x268] sm:$0xff]  ;;  %v3697_v17 = vld [vmem:[%s16949_s9 + $0x238] sm:$0xff] }
0x1460   : > { %v10768_v34 = vpack.c.bf16 %v3703_v36, %v3695_v25  ;;  %v3711_v57 = vld [vmem:[%s16949_s9 + $0x2a8] sm:$0xff] }
0x1461   : > { %v14254_v39 = vadd.f32 %v3619_v51, %v3608_v3  ;;  %v14256_v44 = vadd.f32 %v3615_v19, %v3607_v4  ;;  %v3696_v3 = vld [vmem:[%s16949_s9 + $0x230] sm:$0xff] }
0x1462   : > { %v12671_v12 = vpop.eup %12670  ;;  %v3704_v4 = vld [vmem:[%s16949_s9 + $0x270] sm:$0xff] }
0x1463   : > { %v3594_v45 = vmul.f32 %v12671_v12, %v14083_v10  ;;  %v3595_v50 = vmul.f32 %v12671_v12, %v14086_v49  ;;  %3988 = vmatprep.mubr.f32.mxu0 %v14254_v39  ;;  %4065 = vmatprep.mubr.f32.mxu1 %v14254_v39  ;;  %v3663_v10 = vld [vmem:[%s16949_s9 + $0x128] sm:$0xff]  ;;  %v10834_v5 = vpack.c.bf16 %v3704_v4, %v3696_v3  ;;  %v3718_v12 = vld [vmem:[%s16949_s9 + $0x2e0] sm:$0xff]  ;;  %v3777_v3 = vld [vmem:[%s16949_s9 + $0x4b8] sm:$0xff] }
0x1464   : > { %3989 = vmatmul.mubr.f32.vlgmr.msra.gmra.mrb[8].mxu0 %v14256_v44  ;;  %4066 = vmatmul.mubr.f32.vlgmr.msra.gmra.mrb[44].mxu1 %v14256_v44  ;;  %v3671_v49 = vld [vmem:[%s16949_s9 + $0x168] sm:$0xff]  ;;  %v3785_v4 = vld [vmem:[%s16949_s9 + $0x4f8] sm:$0xff] }
0x1465   : > { %10755 = vmatpush1.bf16.msra.mxu0 %v10754_v6  ;;  %10819 = vmatpush1.bf16.msra.mxu1 %v10818_v7  ;;  %v3610_v13 = vmul.f32 %v3604_v35, %v3595_v50  ;;  %v3609_v22 = vmul.f32 %v3600_v24, %v3594_v45  ;;  %v10760_v21 = vpack.c.bf16 %v3671_v49, %v3663_v10  ;;  %v3680_v35 = vld [vmem:[%s16949_s9 + $0x1b0] sm:$0xff]  ;;  %v3721_v6 = vld [vmem:[%s16949_s9 + $0x2f8] sm:$0xff]  ;;  %v3727_v45 = vld [vmem:[%s16949_s9 + $0x328] sm:$0xff] }
0x1466   : > { %10757 = vmatprep.subr.bf16.mxu0 %v10756_v9  ;;  %10821 = vmatprep.subr.bf16.mxu1 %v10820_v41  ;;  %v3688_v24 = vld [vmem:[%s16949_s9 + $0x1f0] sm:$0xff]  ;;  %v10770_v7 = vpack.c.bf16 %v3702_v48, %v3694_v37  ;;  %v10772_v9 = vpack.c.bf16 %v3719_v11, %v3711_v57  ;;  %v10836_v41 = vpack.c.bf16 %v3721_v6, %v3713_v42  ;;  %v3735_v50 = vld [vmem:[%s16949_s9 + $0x368] sm:$0xff]  ;;  %v3726_v10 = vld [vmem:[%s16949_s9 + $0x320] sm:$0xff] }
0x1467   : > { %v14294_v54 = vadd.f32 %v3619_v51, %v3610_v13  ;;  %v14296_v15 = vadd.f32 %v3615_v19, %v3609_v22  ;;  %v3705_v51 = vld [vmem:[%s16949_s9 + $0x278] sm:$0xff]  ;;  %v10766_v19 = vpack.c.bf16 %v3686_v29, %v3678_v28  ;;  %v10830_v55 = vpack.c.bf16 %v3688_v24, %v3680_v35  ;;  %v3734_v49 = vld [vmem:[%s16949_s9 + $0x360] sm:$0xff]  ;;  %v3744_v28 = vld [vmem:[%s16949_s9 + $0x3b0] sm:$0xff] }
0x1468   : > { %v10832_v8 = vpack.c.bf16 %v3705_v51, %v3697_v17  ;;  %v10774_v13 = vpack.c.bf16 %v3718_v12, %v3710_v59  ;;  %v10838_v22 = vpack.c.bf16 %v3720_v62, %v3712_v38  ;;  %v10776_v23 = vpack.c.bf16 %v3735_v50, %v3727_v45  ;;  %v3752_v29 = vld [vmem:[%s16949_s9 + $0x3f0] sm:$0xff]  ;;  %v3761_v35 = vld [vmem:[%s16949_s9 + $0x438] sm:$0xff]  ;;  %v3758_v17 = vld [vmem:[%s16949_s9 + $0x420] sm:$0xff] }
0x1469   : > { %10759 = vmatpush1.bf16.msra.mxu0 %v10758_v20  ;;  %10823 = vmatpush1.bf16.msra.mxu1 %v10822_v61  ;;  %v3729_v20 = vld [vmem:[%s16949_s9 + $0x338] sm:$0xff]  ;;  %v10778_v52 = vpack.c.bf16 %v3734_v49, %v3726_v10  ;;  %v10846_v36 = vpack.c.bf16 %v3752_v29, %v3744_v28  ;;  %v3766_v51 = vld [vmem:[%s16949_s9 + $0x460] sm:$0xff]  ;;  %v3760_v37 = vld [vmem:[%s16949_s9 + $0x430] sm:$0xff] }
0x146a   : > { %3994 = vmatprep.mubr.f32.mxu0 %v14294_v54  ;;  %4071 = vmatprep.mubr.f32.mxu1 %v14294_v54  ;;  %v3737_v61 = vld [vmem:[%s16949_s9 + $0x378] sm:$0xff]  ;;  %v3768_v48 = vld [vmem:[%s16949_s9 + $0x470] sm:$0xff]  ;;  %v10786_v57 = vpack.c.bf16 %v3766_v51, %v3758_v17  ;;  %v3774_v42 = vld [vmem:[%s16949_s9 + $0x4a0] sm:$0xff] }
0x146b   : > { %3995 = vmatmul.mubr.f32.gmra.mrb[10].mxu0 %v14296_v15  ;;  %4072 = vmatmul.mubr.f32.gmra.mrb[46].mxu1 %v14296_v15  ;;  %v10840_v58 = vpack.c.bf16 %v3737_v61, %v3729_v20  ;;  %v3769_v24 = vld [vmem:[%s16949_s9 + $0x478] sm:$0xff]  ;;  %v10850_v11 = vpack.c.bf16 %v3768_v48, %v3760_v37  ;;  %v3782_v6 = vld [vmem:[%s16949_s9 + $0x4e0] sm:$0xff]  ;;  %v3776_v59 = vld [vmem:[%s16949_s9 + $0x4b0] sm:$0xff] }
0x146c   : > { %10761 = vmatprep.subr.bf16.mxu0 %v10760_v21  ;;  %4142 = vmatprep.mubr.f32.mxu0 %v14254_v39  ;;  %v3753_v21 = vld [vmem:[%s16949_s9 + $0x3f8] sm:$0xff]  ;;  %v3784_v12 = vld [vmem:[%s16949_s9 + $0x4f0] sm:$0xff]  ;;  %v10790_v45 = vpack.c.bf16 %v3782_v6, %v3774_v42  ;;  %v3790_v20 = vld [vmem:[%s16949_s9 + $0x520] sm:$0xff] }
0x146d   : > { %10825 = vmatprep.subr.bf16.mxu1 %v10824_v26  ;;  %4219 = vmatprep.mubr.f32.mxu1 %v14254_v39  ;;  %v3750_v26 = vld [vmem:[%s16949_s9 + $0x3e0] sm:$0xff]  ;;  %v3793_v38 = vld [vmem:[%s16949_s9 + $0x538] sm:$0xff]  ;;  %v10854_v50 = vpack.c.bf16 %v3784_v12, %v3776_v59  ;;  %v3792_v10 = vld [vmem:[%s16949_s9 + $0x530] sm:$0xff] }
0x146e   : > { %10763 = vmatpush1.bf16.msra.mxu0 %v10762_v30  ;;  %10827 = vmatpush1.bf16.msra.mxu1 %v10826_v27  ;;  %v10780_v30 = vpack.c.bf16 %v3751_v53, %v3743_v40  ;;  %v10844_v27 = vpack.c.bf16 %v3753_v21, %v3745_v63  ;;  %v10782_v25 = vpack.c.bf16 %v3750_v26, %v3742_v16  ;;  %v3801_v62 = vld [vmem:[%s16949_s9 + $0x578] sm:$0xff]  ;;  %v3798_v61 = vld [vmem:[%s16949_s9 + $0x560] sm:$0xff]  ;;  %v3800_v49 = vld [vmem:[%s16949_s9 + $0x570] sm:$0xff] }
0x146f   : > { %10765 = vmatprep.subr.bf16.mxu0 %v10764_v31  ;;  %10829 = vmatprep.subr.bf16.mxu1 %v10828_v56  ;;  %v3759_v31 = vld [vmem:[%s16949_s9 + $0x428] sm:$0xff]  ;;  %v10794_v40 = vpack.c.bf16 %v3798_v61, %v3790_v20  ;;  %v10858_v53 = vpack.c.bf16 %v3800_v49, %v3792_v10  ;;  %v3806_v63 = vld [vmem:[%s16949_s9 + $0x5a0] sm:$0xff]  ;;  %v3808_v16 = vld [vmem:[%s16949_s9 + $0x5b0] sm:$0xff] }
0x1470   : > { %v3767_v56 = vld [vmem:[%s16949_s9 + $0x468] sm:$0xff]  ;;  %v3814_v21 = vld [vmem:[%s16949_s9 + $0x5e0] sm:$0xff]  ;;  %v3816_v26 = vld [vmem:[%s16949_s9 + $0x5f0] sm:$0xff] }
0x1471   : > { %v3825_v28 = vld [vmem:[%s16949_s9 + $0x638] sm:$0xff]  ;;  %v3824_v17 = vld [vmem:[%s16949_s9 + $0x630] sm:$0xff] }
0x1472   : > { %10767 = vmatpush1.bf16.msra.mxu0 %v10766_v19  ;;  %10831 = vmatpush1.bf16.msra.mxu1 %v10830_v55  ;;  %v10784_v19 = vpack.c.bf16 %v3767_v56, %v3759_v31  ;;  %v10848_v55 = vpack.c.bf16 %v3769_v24, %v3761_v35  ;;  %v3833_v29 = vld [vmem:[%s16949_s9 + $0x678] sm:$0xff]  ;;  %v10798_v31 = vpack.c.bf16 %v3814_v21, %v3806_v63  ;;  %v3822_v35 = vld [vmem:[%s16949_s9 + $0x620] sm:$0xff]  ;;  %v3832_v51 = vld [vmem:[%s16949_s9 + $0x670] sm:$0xff] }
0x1473   : > { %10769 = vmatprep.subr.bf16.mxu0 %v10768_v34  ;;  %10833 = vmatprep.subr.bf16.mxu1 %v10832_v8  ;;  %v3775_v34 = vld [vmem:[%s16949_s9 + $0x4a8] sm:$0xff]  ;;  %v10862_v56 = vpack.c.bf16 %v3816_v26, %v3808_v16  ;;  %v3830_v24 = vld [vmem:[%s16949_s9 + $0x660] sm:$0xff]  ;;  %v3841_v37 = vld [vmem:[%s16949_s9 + $0x6b8] sm:$0xff] }
0x1474   : > { %v3783_v8 = vld [vmem:[%s16949_s9 + $0x4e8] sm:$0xff]  ;;  %v3849_v48 = vld [vmem:[%s16949_s9 + $0x6f8] sm:$0xff]  ;;  %v3840_v42 = vld [vmem:[%s16949_s9 + $0x6b0] sm:$0xff] }
0x1475   : > { %v3848_v6 = vld [vmem:[%s16949_s9 + $0x6f0] sm:$0xff]  ;;  %v3857_v59 = vld [vmem:[%s16949_s9 + $0x738] sm:$0xff] }
0x1476   : > { %10771 = vmatpush1.bf16.msra.mxu0 %v10770_v7  ;;  %10835 = vmatpush1.bf16.msra.mxu1 %v10834_v5  ;;  %v10788_v7 = vpack.c.bf16 %v3783_v8, %v3775_v34  ;;  %v10852_v5 = vpack.c.bf16 %v3785_v4, %v3777_v3  ;;  %v10802_v34 = vpack.c.bf16 %v3830_v24, %v3822_v35  ;;  %v3838_v3 = vld [vmem:[%s16949_s9 + $0x6a0] sm:$0xff]  ;;  %v3865_v12 = vld [vmem:[%s16949_s9 + $0x778] sm:$0xff]  ;;  %v3856_v20 = vld [vmem:[%s16949_s9 + $0x730] sm:$0xff] }
0x1477   : > { %10773 = vmatprep.subr.bf16.mxu0 %v10772_v9  ;;  %10837 = vmatprep.subr.bf16.mxu1 %v10836_v41  ;;  %v3791_v9 = vld [vmem:[%s16949_s9 + $0x528] sm:$0xff]  ;;  %v10866_v8 = vpack.c.bf16 %v3832_v51, %v3824_v17  ;;  %v3846_v4 = vld [vmem:[%s16949_s9 + $0x6e0] sm:$0xff]  ;;  %v3864_v61 = vld [vmem:[%s16949_s9 + $0x770] sm:$0xff] }
0x1478   : > { %v3799_v41 = vld [vmem:[%s16949_s9 + $0x568] sm:$0xff]  ;;  %v3873_v10 = vld [vmem:[%s16949_s9 + $0x7b8] sm:$0xff]  ;;  %v3872_v63 = vld [vmem:[%s16949_s9 + $0x7b0] sm:$0xff] }
0x1479   : > { %v3881_v49 = vld [vmem:[%s16949_s9 + $0x7f8] sm:$0xff]  ;;  %v3880_v21 = vld [vmem:[%s16949_s9 + $0x7f0] sm:$0xff] }
0x147a   : > { %10775 = vmatpush1.bf16.msra.mxu0 %v10774_v13  ;;  %10839 = vmatpush1.bf16.msra.mxu1 %v10838_v22  ;;  %v10792_v13 = vpack.c.bf16 %v3799_v41, %v3791_v9  ;;  %v10856_v22 = vpack.c.bf16 %v3801_v62, %v3793_v38  ;;  %v10806_v9 = vpack.c.bf16 %v3846_v4, %v3838_v3  ;;  %v3854_v38 = vld [vmem:[%s16949_s9 + $0x720] sm:$0xff]  ;;  %v4259_v17 = vld [vmem:[#allocation14 + $0x58] sm:$0xff] }
0x147b   : > { %10777 = vmatprep.subr.bf16.mxu0 %v10776_v23  ;;  %10841 = vmatprep.subr.bf16.mxu1 %v10840_v58  ;;  %v3807_v23 = vld [vmem:[%s16949_s9 + $0x5a8] sm:$0xff]  ;;  %v10870_v41 = vpack.c.bf16 %v3848_v6, %v3840_v42  ;;  %v3862_v62 = vld [vmem:[%s16949_s9 + $0x760] sm:$0xff]  ;;  %v10878_v26 = vpack.c.bf16 %v3880_v21, %v3872_v63  ;;  %v4267_v42 = vld [vmem:[#allocation14 + $0x98] sm:$0xff] }
0x147c   : > { %v3815_v58 = vld [vmem:[%s16949_s9 + $0x5e8] sm:$0xff]  ;;  %v4252_v24 = vld [vmem:[#allocation14 + $0x20] sm:$0xff]  ;;  %v4283_v63 = vld [vmem:[#allocation14 + $0x118] sm:$0xff] }
0x147d   : > { %v4260_v4 = vld [vmem:[#allocation14 + $0x60] sm:$0xff] }
0x147e   : > { %10779 = vmatpush1.bf16.msra.mxu0 %v10778_v52  ;;  %10843 = vmatpush1.bf16.msra.mxu1 %v10842_v18  ;;  %v10796_v52 = vpack.c.bf16 %v3815_v58, %v3807_v23  ;;  %v10860_v18 = vpack.c.bf16 %v3817_v14, %v3809_v0  ;;  %v10810_v23 = vpack.c.bf16 %v3862_v62, %v3854_v38  ;;  %v3870_v0 = vld [vmem:[%s16949_s9 + $0x7a0] sm:$0xff] }
0x147f   : > { %10781 = vmatprep.subr.bf16.mxu0 %v10780_v30  ;;  %10845 = vmatprep.subr.bf16.mxu1 %v10844_v27  ;;  %v3823_v30 = vld [vmem:[%s16949_s9 + $0x628] sm:$0xff]  ;;  %v10874_v58 = vpack.c.bf16 %v3864_v61, %v3856_v20  ;;  %v4268_v62 = vld [vmem:[#allocation14 + $0xa0] sm:$0xff]  ;;  %v4275_v20 = vld [vmem:[#allocation14 + $0xd8] sm:$0xff] }
0x1480   : > { %v3831_v27 = vld [vmem:[%s16949_s9 + $0x668] sm:$0xff] }
0x1482   : > { %10783 = vmatpush1.bf16.msra.mxu0 %v10782_v25  ;;  %10847 = vmatpush1.bf16.msra.mxu1 %v10846_v36  ;;  %v10800_v25 = vpack.c.bf16 %v3831_v27, %v3823_v30  ;;  %v10864_v36 = vpack.c.bf16 %v3833_v29, %v3825_v28  ;;  %v4248_v27 = vld [vmem:[#allocation14] sm:$0xff]  ;;  %v4250_v28 = vld [vmem:[#allocation14 + $0x10] sm:$0xff]  ;;  %v4253_v29 = vld [vmem:[#allocation14 + $0x28] sm:$0xff] }
0x1483   : > { %10785 = vmatprep.subr.bf16.mxu0 %v10784_v19  ;;  %10849 = vmatprep.subr.bf16.mxu1 %v10848_v55  ;;  %v3839_v19 = vld [vmem:[%s16949_s9 + $0x6a8] sm:$0xff] }
0x1484   : > { %v3847_v55 = vld [vmem:[%s16949_s9 + $0x6e8] sm:$0xff] }
0x1486   : > { %10787 = vmatpush1.bf16.msra.mxu0 %v10786_v57  ;;  %10851 = vmatpush1.bf16.msra.mxu1 %v10850_v11  ;;  %v10804_v57 = vpack.c.bf16 %v3847_v55, %v3839_v19  ;;  %v10868_v11 = vpack.c.bf16 %v3849_v48, %v3841_v37  ;;  %v4256_v55 = vld [vmem:[#allocation14 + $0x40] sm:$0xff]  ;;  %v4258_v37 = vld [vmem:[#allocation14 + $0x50] sm:$0xff]  ;;  %v4261_v48 = vld [vmem:[#allocation14 + $0x68] sm:$0xff] }
0x1487   : > { %10789 = vmatprep.subr.bf16.mxu0 %v10788_v7  ;;  %10853 = vmatprep.subr.bf16.mxu1 %v10852_v5  ;;  %v3855_v7 = vld [vmem:[%s16949_s9 + $0x728] sm:$0xff] }
0x1488   : > { %v3863_v5 = vld [vmem:[%s16949_s9 + $0x768] sm:$0xff] }
0x148a   : > { %10791 = vmatpush1.bf16.msra.mxu0 %v10790_v45  ;;  %10855 = vmatpush1.bf16.msra.mxu1 %v10854_v50  ;;  %v10808_v45 = vpack.c.bf16 %v3863_v5, %v3855_v7  ;;  %v10872_v50 = vpack.c.bf16 %v3865_v12, %v3857_v59  ;;  %v4264_v5 = vld [vmem:[#allocation14 + $0x80] sm:$0xff]  ;;  %v4266_v59 = vld [vmem:[#allocation14 + $0x90] sm:$0xff]  ;;  %v4269_v12 = vld [vmem:[#allocation14 + $0xa8] sm:$0xff] }
0x148b   : > { %10793 = vmatprep.subr.bf16.mxu0 %v10792_v13  ;;  %10857 = vmatprep.subr.bf16.mxu1 %v10856_v22  ;;  %v3871_v13 = vld [vmem:[%s16949_s9 + $0x7a8] sm:$0xff] }
0x148c   : > { %v3879_v22 = vld [vmem:[%s16949_s9 + $0x7e8] sm:$0xff] }
0x148d   : > { %v10812_v14 = vpack.c.bf16 %v3879_v22, %v3871_v13  ;;  %v4272_v22 = vld [vmem:[#allocation14 + $0xc0] sm:$0xff] }
0x148e   : > { %10795 = vmatpush1.bf16.msra.mxu0 %v10794_v40  ;;  %10859 = vmatpush1.bf16.msra.mxu1 %v10858_v53  ;;  %v10876_v40 = vpack.c.bf16 %v3881_v49, %v3873_v10  ;;  %v3878_v53 = vld [vmem:[%s16949_s9 + $0x7e0] sm:$0xff]  ;;  %v4274_v10 = vld [vmem:[#allocation14 + $0xd0] sm:$0xff] }
0x148f   : > { %10797 = vmatprep.subr.bf16.mxu0 %v10796_v52  ;;  %10861 = vmatprep.subr.bf16.mxu1 %v10860_v18  ;;  %v4249_v52 = vld [vmem:[#allocation14 + $0x8] sm:$0xff]  ;;  %v4251_v18 = vld [vmem:[#allocation14 + $0x18] sm:$0xff]  ;;  %v10814_v16 = vpack.c.bf16 %v3878_v53, %v3870_v0 }
0x1490   : > { %v10880_v30 = vpack.c.bf16 %v4251_v18, %v4249_v52  ;;  %v4277_v49 = vld [vmem:[#allocation14 + $0xe8] sm:$0xff]  ;;  %v4280_v18 = vld [vmem:[#allocation14 + $0x100] sm:$0xff] }
0x1491   : > { %v4281_v53 = vld [vmem:[#allocation14 + $0x108] sm:$0xff] }
0x1492   : > { %10799 = vmatpush1.bf16.msra.mxu0 %v10798_v31  ;;  %10863 = vmatpush1.bf16.msra.mxu1 %v10862_v56  ;;  %v4255_v31 = vld [vmem:[#allocation14 + $0x38] sm:$0xff]  ;;  %v10882_v56 = vpack.c.bf16 %v4250_v28, %v4248_v27  ;;  %v10912_v52 = vpack.c.bf16 %v4283_v63, %v4281_v53  ;;  %v14631_v53 = vld [vmem:[%s16950_s10] sm:$0xff] }
0x1493   : > { %10801 = vmatprep.subr.bf16.mxu0 %v10800_v25  ;;  %10865 = vmatprep.subr.bf16.mxu1 %v10864_v36  ;;  %v10884_v35 = vpack.c.bf16 %v4255_v31, %v4253_v29  ;;  %v4254_v25 = vld [vmem:[#allocation14 + $0x30] sm:$0xff]  ;;  %v4257_v36 = vld [vmem:[#allocation14 + $0x48] sm:$0xff]  ;;  %v4284_v29 = vld [vmem:[#allocation14 + $0x120] sm:$0xff]  ;;  %v3887_v63 = vrot.slane %v14631_v53, %v13518_v33 }
0x1494   : > { %v10886_v51 = vpack.c.bf16 %v4254_v25, %v4252_v24  ;;  %v10888_v19 = vpack.c.bf16 %v4259_v17, %v4257_v36  ;;  %v4286_v31 = vld [vmem:[#allocation14 + $0x130] sm:$0xff]  ;;  %v4288_v36 = vld [vmem:[#allocation14 + $0x140] sm:$0xff] }
0x1495   : > { %v10918_v24 = vpack.c.bf16 %v4286_v31, %v4284_v29  ;;  %v4290_v17 = vld [vmem:[#allocation14 + $0x150] sm:$0xff]  ;;  %v4317_v31 = vld [vmem:[#allocation14 + $0x228] sm:$0xff] }
0x1496   : > { %10803 = vmatpush1.bf16.msra.mxu0 %v10802_v34  ;;  %10867 = vmatpush1.bf16.msra.mxu1 %v10866_v8  ;;  %v4263_v34 = vld [vmem:[#allocation14 + $0x78] sm:$0xff]  ;;  %v10890_v8 = vpack.c.bf16 %v4258_v37, %v4256_v55  ;;  %v10922_v55 = vpack.c.bf16 %v4290_v17, %v4288_v36  ;;  %v14641_v36 = vrot.slane %v14631_v53, %v13538_v47 }
0x1497   : > { %10805 = vmatprep.subr.bf16.mxu0 %v10804_v57  ;;  %10869 = vmatprep.subr.bf16.mxu1 %v10868_v11  ;;  %v10892_v3 = vpack.c.bf16 %v4263_v34, %v4261_v48  ;;  %v4262_v57 = vld [vmem:[#allocation14 + $0x70] sm:$0xff]  ;;  %v4265_v11 = vld [vmem:[#allocation14 + $0x88] sm:$0xff]  ;;  %v4292_v48 = vld [vmem:[#allocation14 + $0x160] sm:$0xff] }
0x1498   : > { %v10894_v6 = vpack.c.bf16 %v4262_v57, %v4260_v4  ;;  %v10896_v7 = vpack.c.bf16 %v4267_v42, %v4265_v11  ;;  %v4294_v34 = vld [vmem:[#allocation14 + $0x170] sm:$0xff]  ;;  %v4296_v11 = vld [vmem:[#allocation14 + $0x180] sm:$0xff] }
0x1499   : > { %v10926_v4 = vpack.c.bf16 %v4294_v34, %v4292_v48  ;;  %v4298_v42 = vld [vmem:[#allocation14 + $0x190] sm:$0xff] }
0x149a   : > { %10807 = vmatpush1.bf16.msra.mxu0 %v10806_v9  ;;  %10871 = vmatpush1.bf16.msra.mxu1 %v10870_v41  ;;  %v4271_v9 = vld [vmem:[#allocation14 + $0xb8] sm:$0xff]  ;;  %v10898_v41 = vpack.c.bf16 %v4266_v59, %v4264_v5  ;;  %v10930_v5 = vpack.c.bf16 %v4298_v42, %v4296_v11 }
0x149b   : > { %10809 = vmatprep.subr.bf16.mxu0 %v10808_v45  ;;  %10873 = vmatprep.subr.bf16.mxu1 %v10872_v50  ;;  %v10900_v38 = vpack.c.bf16 %v4271_v9, %v4269_v12  ;;  %v4270_v45 = vld [vmem:[#allocation14 + $0xb0] sm:$0xff]  ;;  %v4273_v50 = vld [vmem:[#allocation14 + $0xc8] sm:$0xff]  ;;  %v4300_v12 = vld [vmem:[#allocation14 + $0x1a0] sm:$0xff] }
0x149c   : > { %v10902_v61 = vpack.c.bf16 %v4270_v45, %v4268_v62  ;;  %v10904_v13 = vpack.c.bf16 %v4275_v20, %v4273_v50  ;;  %v4302_v9 = vld [vmem:[#allocation14 + $0x1b0] sm:$0xff]  ;;  %v4304_v50 = vld [vmem:[#allocation14 + $0x1c0] sm:$0xff] }
0x149d   : > { %v10934_v62 = vpack.c.bf16 %v4302_v9, %v4300_v12  ;;  %v4306_v20 = vld [vmem:[#allocation14 + $0x1d0] sm:$0xff]  ;;  %v4327_v12 = vld [vmem:[#allocation14 + $0x278] sm:$0xff] }
0x149e   : > { %10811 = vmatpush1.bf16.msra.mxu0 %v10810_v23  ;;  %10875 = vmatpush1.bf16.msra.mxu1 %v10874_v58  ;;  %v4279_v23 = vld [vmem:[#allocation14 + $0xf8] sm:$0xff]  ;;  %v10906_v58 = vpack.c.bf16 %v4274_v10, %v4272_v22  ;;  %v10938_v22 = vpack.c.bf16 %v4306_v20, %v4304_v50  ;;  %v4324_v50 = vld [vmem:[#allocation14 + $0x260] sm:$0xff]  ;;  %v4326_v20 = vld [vmem:[#allocation14 + $0x270] sm:$0xff] }
0x149f   : > { %10813 = vmatprep.subr.bf16.mxu0 %v10812_v14  ;;  %10877 = vmatprep.subr.bf16.mxu1 %v10876_v40  ;;  %v10908_v0 = vpack.c.bf16 %v4279_v23, %v4277_v49  ;;  %v4276_v14 = vld [vmem:[#allocation14 + $0xe0] sm:$0xff]  ;;  %v4278_v40 = vld [vmem:[#allocation14 + $0xf0] sm:$0xff] }
0x14a0   : > { %v10910_v21 = vpack.c.bf16 %v4278_v40, %v4276_v14  ;;  %v4308_v49 = vld [vmem:[#allocation14 + $0x1e0] sm:$0xff]  ;;  %v4310_v23 = vld [vmem:[#allocation14 + $0x1f0] sm:$0xff] }
0x14a1   : > { %v10942_v14 = vpack.c.bf16 %v4310_v23, %v4308_v49  ;;  %v4328_v49 = vld [vmem:[#allocation14 + $0x280] sm:$0xff]  ;;  %v4330_v23 = vld [vmem:[#allocation14 + $0x290] sm:$0xff] }
0x14a2   : > { %10815 = vmatpush1.bf16.msra.mxu0 %v10814_v16  ;;  %10879 = vmatpush1.bf16.msra.mxu1 %v10878_v26  ;;  %v4282_v16 = vld [vmem:[#allocation14 + $0x110] sm:$0xff]  ;;  %v4285_v26 = vld [vmem:[#allocation14 + $0x128] sm:$0xff] }
0x14a3   : > { %10881 = vmatprep.subr.bf16.mxu0 %v10880_v30  ;;  %v4287_v30 = vld [vmem:[#allocation14 + $0x138] sm:$0xff]  ;;  %v10914_v27 = vpack.c.bf16 %v4282_v16, %v4280_v18 }
0x14a4   : > { %v10916_v28 = vpack.c.bf16 %v4287_v30, %v4285_v26 }
0x14a5   : > { %4143 = vmatmul.mubr.f32.vlgmr.msra.gmra.mrb[12].mxu0 %v14256_v44  ;;  %4220 = vmatmul.mubr.f32.vlgmr.msra.gmra.mrb[48].mxu1 %v14256_v44 }
0x14a6   : > { %4148 = vmatprep.mubr.f32.mxu0 %v14294_v54  ;;  %4225 = vmatprep.mubr.f32.mxu1 %v14294_v54 }
0x14a7   : > { %10883 = vmatpush1.bf16.msra.mxu0 %v10882_v56  ;;  %v4289_v56 = vld [vmem:[#allocation14 + $0x148] sm:$0xff] }
0x14a8   : > { %10885 = vmatprep.subr.bf16.mxu0 %v10884_v35  ;;  %v4291_v35 = vld [vmem:[#allocation14 + $0x158] sm:$0xff] }
0x14a9   : > { %4149 = vmatmul.mubr.f32.gmra.mrb[14].mxu0 %v14296_v15  ;;  %4226 = vmatmul.mubr.f32.gmra.mrb[50].mxu1 %v14296_v15  ;;  %v10920_v25 = vpack.c.bf16 %v4291_v35, %v4289_v56  ;;  %v4319_v56 = vld [vmem:[#allocation14 + $0x238] sm:$0xff] }
0x14aa   : > { %v10948_v17 = vpack.c.bf16 %v4319_v56, %v4317_v31  ;;  %v4343_v31 = vld [vmem:[#allocation14 + $0x2f8] sm:$0xff] }
0x14ab   : > { %10887 = vmatpush1.bf16.msra.mxu0 %v10886_v51  ;;  %v4293_v51 = vld [vmem:[#allocation14 + $0x168] sm:$0xff] }
0x14ac   : > { %10889 = vmatprep.subr.bf16.mxu0 %v10888_v19  ;;  %v4295_v19 = vld [vmem:[#allocation14 + $0x178] sm:$0xff] }
0x14ad   : > { %v10924_v37 = vpack.c.bf16 %v4295_v19, %v4293_v51  ;;  %v4316_v51 = vld [vmem:[#allocation14 + $0x220] sm:$0xff]  ;;  %v4318_v19 = vld [vmem:[#allocation14 + $0x230] sm:$0xff] }
0x14af   : > { %10891 = vmatpush1.bf16.msra.mxu0 %v10890_v8  ;;  %v4297_v8 = vld [vmem:[#allocation14 + $0x188] sm:$0xff] }
0x14b0   : > { %10893 = vmatprep.subr.bf16.mxu0 %v10892_v3  ;;  %v4299_v3 = vld [vmem:[#allocation14 + $0x198] sm:$0xff] }
0x14b1   : > { %v10928_v57 = vpack.c.bf16 %v4299_v3, %v4297_v8 }
0x14b3   : > { %10895 = vmatpush1.bf16.msra.mxu0 %v10894_v6  ;;  %v4301_v6 = vld [vmem:[#allocation14 + $0x1a8] sm:$0xff] }
0x14b4   : > { %10897 = vmatprep.subr.bf16.mxu0 %v10896_v7  ;;  %v4303_v7 = vld [vmem:[#allocation14 + $0x1b8] sm:$0xff] }
0x14b5   : > { %v10932_v59 = vpack.c.bf16 %v4303_v7, %v4301_v6  ;;  %v4320_v7 = vld [vmem:[#allocation14 + $0x240] sm:$0xff] }
0x14b7   : > { %10899 = vmatpush1.bf16.msra.mxu0 %v10898_v41  ;;  %v4305_v41 = vld [vmem:[#allocation14 + $0x1c8] sm:$0xff] }
0x14b8   : > { %10901 = vmatprep.subr.bf16.mxu0 %v10900_v38  ;;  %v4307_v38 = vld [vmem:[#allocation14 + $0x1d8] sm:$0xff] }
0x14b9   : > { %v10936_v45 = vpack.c.bf16 %v4307_v38, %v4305_v41 }
0x14bb   : > { %10903 = vmatpush1.bf16.msra.mxu0 %v10902_v61  ;;  %v4309_v61 = vld [vmem:[#allocation14 + $0x1e8] sm:$0xff] }
0x14bc   : > { %10905 = vmatprep.subr.bf16.mxu0 %v10904_v13  ;;  %v4311_v13 = vld [vmem:[#allocation14 + $0x1f8] sm:$0xff] }
0x14bd   : > { %v10940_v10 = vpack.c.bf16 %v4311_v13, %v4309_v61  ;;  %v4329_v61 = vld [vmem:[#allocation14 + $0x288] sm:$0xff]  ;;  %v4331_v13 = vld [vmem:[#allocation14 + $0x298] sm:$0xff] }
0x14bf   : > { %10907 = vmatpush1.bf16.msra.mxu0 %v10906_v58  ;;  %v4313_v58 = vld [vmem:[#allocation14 + $0x208] sm:$0xff] }
0x14c0   : > { %10909 = vmatprep.subr.bf16.mxu0 %v10908_v0  ;;  %v4315_v0 = vld [vmem:[#allocation14 + $0x218] sm:$0xff] }
0x14c1   : > { %v10944_v40 = vpack.c.bf16 %v4315_v0, %v4313_v58  ;;  %v4333_v58 = vld [vmem:[#allocation14 + $0x2a8] sm:$0xff]  ;;  %v4335_v0 = vld [vmem:[#allocation14 + $0x2b8] sm:$0xff] }
0x14c3   : > { %10911 = vmatpush1.bf16.msra.mxu0 %v10910_v21  ;;  %v3891_v21 = vrot.slane %v14631_v53, %v13651_v43 }
0x14c4   : > { %10913 = vmatprep.subr.bf16.mxu0 %v10912_v52 }
0x14c7   : > { %10915 = vmatpush1.bf16.msra.mxu0 %v10914_v27  ;;  %v4312_v27 = vld [vmem:[#allocation14 + $0x200] sm:$0xff] }
0x14c8   : > { %10917 = vmatprep.subr.bf16.mxu0 %v10916_v28  ;;  %v4314_v28 = vld [vmem:[#allocation14 + $0x210] sm:$0xff] }
0x14cb   : > { %10919 = vmatpush1.bf16.msra.mxu0 %v10918_v24  ;;  %v10946_v24 = vpack.c.bf16 %v4314_v28, %v4312_v27  ;;  %v4336_v27 = vld [vmem:[#allocation14 + $0x2c0] sm:$0xff]  ;;  %v4338_v28 = vld [vmem:[#allocation14 + $0x2d0] sm:$0xff] }
0x14cc   : > { %10921 = vmatprep.subr.bf16.mxu0 %v10920_v25  ;;  %v10970_v56 = vpack.c.bf16 %v4338_v28, %v4336_v27  ;;  %v4368_v28 = vld [vmem:[#allocation14 + $0x3c0] sm:$0xff] }
0x14cf   : > { %10923 = vmatpush1.bf16.msra.mxu0 %v10922_v55  ;;  %v4321_v55 = vld [vmem:[#allocation14 + $0x248] sm:$0xff] }
0x14d0   : > { %10925 = vmatprep.subr.bf16.mxu0 %v10924_v37  ;;  %v4323_v37 = vld [vmem:[#allocation14 + $0x258] sm:$0xff] }
0x14d1   : > { %v10952_v6 = vpack.c.bf16 %v4323_v37, %v4321_v55  ;;  %v4344_v37 = vld [vmem:[#allocation14 + $0x300] sm:$0xff] }
0x14d3   : > { %10927 = vmatpush1.bf16.msra.mxu0 %v10926_v4 }
0x14d4   : > { %10929 = vmatprep.subr.bf16.mxu0 %v10928_v57  ;;  %v10950_v57 = vpack.c.bf16 %v4318_v19, %v4316_v51  ;;  %v4347_v51 = vld [vmem:[#allocation14 + $0x318] sm:$0xff] }
0x14d7   : > { %10931 = vmatpush1.bf16.msra.mxu0 %v10930_v5  ;;  %v4322_v5 = vld [vmem:[#allocation14 + $0x250] sm:$0xff] }
0x14d8   : > { %10933 = vmatprep.subr.bf16.mxu0 %v10932_v59  ;;  %v4325_v59 = vld [vmem:[#allocation14 + $0x268] sm:$0xff]  ;;  %v10954_v38 = vpack.c.bf16 %v4322_v5, %v4320_v7  ;;  %v4355_v5 = vld [vmem:[#allocation14 + $0x358] sm:$0xff] }
0x14d9   : > { %v4353_v7 = vld [vmem:[#allocation14 + $0x348] sm:$0xff] }
0x14db   : > { %10935 = vmatpush1.bf16.msra.mxu0 %v10934_v62 }
0x14dc   : > { %10937 = vmatprep.subr.bf16.mxu0 %v10936_v45  ;;  %v10956_v45 = vpack.c.bf16 %v4327_v12, %v4325_v59  ;;  %v10984_v12 = vpack.c.bf16 %v4355_v5, %v4353_v7  ;;  %v14659_v7 = vrot.slane %v14631_v53, %v13566_v2 }
0x14df   : > { %10939 = vmatpush1.bf16.msra.mxu0 %v10938_v22  ;;  %v10958_v22 = vpack.c.bf16 %v4326_v20, %v4324_v50  ;;  %v4356_v20 = vld [vmem:[#allocation14 + $0x360] sm:$0xff] }
0x14e0   : > { %10941 = vmatprep.subr.bf16.mxu0 %v10940_v10  ;;  %v10960_v10 = vpack.c.bf16 %v4331_v13, %v4329_v61  ;;  %v4358_v61 = vld [vmem:[#allocation14 + $0x370] sm:$0xff]  ;;  %v4361_v13 = vld [vmem:[#allocation14 + $0x388] sm:$0xff] }
0x14e3   : > { %10943 = vmatpush1.bf16.msra.mxu0 %v10942_v14  ;;  %v10962_v14 = vpack.c.bf16 %v4330_v23, %v4328_v49  ;;  %v4360_v23 = vld [vmem:[#allocation14 + $0x380] sm:$0xff] }
0x14e4   : > { %10945 = vmatprep.subr.bf16.mxu0 %v10944_v40  ;;  %v10964_v40 = vpack.c.bf16 %v4335_v0, %v4333_v58  ;;  %v4362_v58 = vld [vmem:[#allocation14 + $0x390] sm:$0xff]  ;;  %v4365_v0 = vld [vmem:[#allocation14 + $0x3a8] sm:$0xff] }
0x1537   : > { %v3990_v52 = vpop.f32.mrb[8].mxu0  ;;  %v14637_v18 = vpop.f32.mrb[44].mxu1 }
0x1538   : > { %v3991_v16 = vadd.f32 %v3990_v52, %v3887_v63  ;;  %v3992_v26 = vpop.f32.mrb[9].mxu0  ;;  %v4069_v30 = vpop.f32.mrb[45].mxu1  ;;  %v4337_v52 = vld [vmem:[#allocation14 + $0x2c8] sm:$0xff] }
0x1539   : > { %v3993_v29 = vadd.f32 %v3992_v26, %v3891_v21  ;;  %v4070_v11 = vadd.f32 %v4069_v30, %v14641_v36 }
0x153a   : > { %v4232_v25 = vmax.f32 %v3991_v16, 0.0  ;;  %v4339_v16 = vld [vmem:[#allocation14 + $0x2d8] sm:$0xff] }
0x153b   : > { %v4233_v35 = vmax.f32 %v3993_v29, 0.0  ;;  %v4235_v62 = vmax.f32 %v4070_v11, 0.0  ;;  %v10968_v30 = vpack.c.bf16 %v4339_v16, %v4337_v52  ;;  %v4341_v29 = vld [vmem:[#allocation14 + $0x2e8] sm:$0xff]  ;;  %v4366_v52 = vld [vmem:[#allocation14 + $0x3b0] sm:$0xff] }
0x153c   : > { %v4369_v16 = vld [vmem:[#allocation14 + $0x3c8] sm:$0xff] }
0x153d   : > { %4580 = vmatprep.mubr.f32.mxu0 %v4233_v35  ;;  %v10972_v35 = vpack.c.bf16 %v4343_v31, %v4341_v29  ;;  %v4370_v29 = vld [vmem:[#allocation14 + $0x3d0] sm:$0xff]  ;;  %v4373_v31 = vld [vmem:[#allocation14 + $0x3e8] sm:$0xff] }
0x153e   : > { %v3996_v48 = vpop.f32.mrb[10].mxu0  ;;  %v14643_v34 = vpop.f32.mrb[46].mxu1  ;;  %4581 = vmatmul.mubr.f32.vlgmr.msra.gmra.mrb[16].mxu0 %v4232_v25  ;;  %v4342_v25 = vld [vmem:[#allocation14 + $0x2f0] sm:$0xff] }
0x153f   : > { %v3997_v8 = vadd.f32 %v3996_v48, %v3887_v63  ;;  %v3998_v3 = vpop.f32.mrb[11].mxu0  ;;  %v14645_v4 = vpop.f32.mrb[47].mxu1  ;;  %10947 = vmatpush1.bf16.msra.mxu0 %v10946_v24  ;;  %v4332_v63 = vld [vmem:[#allocation14 + $0x2a0] sm:$0xff]  ;;  %v4346_v48 = vld [vmem:[#allocation14 + $0x310] sm:$0xff] }
0x1540   : > { %v3999_v42 = vadd.f32 %v3998_v3, %v3891_v21  ;;  %10949 = vmatprep.subr.bf16.mxu0 %v10948_v17  ;;  %v4334_v21 = vld [vmem:[#allocation14 + $0x2b0] sm:$0xff]  ;;  %v4340_v24 = vld [vmem:[#allocation14 + $0x2e0] sm:$0xff]  ;;  %v4345_v17 = vld [vmem:[#allocation14 + $0x308] sm:$0xff] }
0x1541   : > { %v4240_v41 = vmax.f32 %v3997_v8, 0.0  ;;  %v10966_v26 = vpack.c.bf16 %v4334_v21, %v4332_v63  ;;  %v10974_v19 = vpack.c.bf16 %v4342_v25, %v4340_v24  ;;  %v10976_v55 = vpack.c.bf16 %v4347_v51, %v4345_v17  ;;  %v4349_v8 = vld [vmem:[#allocation14 + $0x328] sm:$0xff]  ;;  %v4351_v3 = vld [vmem:[#allocation14 + $0x338] sm:$0xff]  ;;  %v4364_v21 = vld [vmem:[#allocation14 + $0x3a0] sm:$0xff] }
0x1542   : > { %v4241_v9 = vmax.f32 %v3999_v42, 0.0  ;;  %v10980_v11 = vpack.c.bf16 %v4351_v3, %v4349_v8  ;;  %v4348_v42 = vld [vmem:[#allocation14 + $0x320] sm:$0xff]  ;;  %v3895_v24 = vrot.slane %v14631_v53, %v13535_v46  ;;  %v4374_v51 = vld [vmem:[#allocation14 + $0x3f0] sm:$0xff] }
0x1543   : > { %10951 = vmatpush1.bf16.msra.mxu0 %v10950_v57  ;;  %v10978_v57 = vpack.c.bf16 %v4346_v48, %v4344_v37  ;;  %v4372_v17 = vld [vmem:[#allocation14 + $0x3e0] sm:$0xff] }
0x1544   : > { %4586 = vmatprep.mubr.f32.mxu0 %v4241_v9  ;;  %10953 = vmatprep.subr.bf16.mxu0 %v10952_v6  ;;  %v4350_v6 = vld [vmem:[#allocation14 + $0x330] sm:$0xff]  ;;  %v4352_v9 = vld [vmem:[#allocation14 + $0x340] sm:$0xff]  ;;  %v11006_v37 = vpack.c.bf16 %v4374_v51, %v4372_v17  ;;  %v4068_v48 = vadd.f32 %v14637_v18, %v3895_v24  ;;  %v4383_v18 = vld [vmem:[#allocation14 + $0x438] sm:$0xff] }
0x1545   : > { %4587 = vmatmul.mubr.f32.gmra.mrb[18].mxu0 %v4240_v41  ;;  %v10982_v59 = vpack.c.bf16 %v4350_v6, %v4348_v42  ;;  %v4354_v41 = vld [vmem:[#allocation14 + $0x350] sm:$0xff]  ;;  %v4076_v6 = vadd.f32 %v14645_v4, %v14641_v36  ;;  %v4380_v4 = vld [vmem:[#allocation14 + $0x420] sm:$0xff] }
0x1546   : > { %4657 = vmatprep.mubr.f32.mxu0 %v4235_v62  ;;  %v4359_v62 = vld [vmem:[#allocation14 + $0x378] sm:$0xff]  ;;  %v4378_v42 = vld [vmem:[#allocation14 + $0x410] sm:$0xff] }
0x1547   : > { %10955 = vmatpush1.bf16.msra.mxu0 %v10954_v38  ;;  %v4357_v38 = vld [vmem:[#allocation14 + $0x368] sm:$0xff] }
0x1548   : > { %10957 = vmatprep.subr.bf16.mxu0 %v10956_v45  ;;  %v10986_v45 = vpack.c.bf16 %v4354_v41, %v4352_v9  ;;  %v10988_v50 = vpack.c.bf16 %v4359_v62, %v4357_v38  ;;  %v4234_v41 = vmax.f32 %v4068_v48, 0.0  ;;  %v4074_v38 = vadd.f32 %v14643_v34, %v3895_v24  ;;  %v4397_v24 = vld [vmem:[#allocation14 + $0x4a8] sm:$0xff]  ;;  %v4403_v48 = vld [vmem:[#allocation14 + $0x4d8] sm:$0xff] }
0x154b   : > { %10959 = vmatpush1.bf16.msra.mxu0 %v10958_v22  ;;  %v4363_v22 = vld [vmem:[#allocation14 + $0x398] sm:$0xff] }
0x154c   : > { %10961 = vmatprep.subr.bf16.mxu0 %v10960_v10  ;;  %v10990_v10 = vpack.c.bf16 %v4358_v61, %v4356_v20  ;;  %v10992_v49 = vpack.c.bf16 %v4363_v22, %v4361_v13  ;;  %v4243_v20 = vmax.f32 %v4076_v6, 0.0  ;;  %v4402_v6 = vld [vmem:[#allocation14 + $0x4d0] sm:$0xff] }
0x154f   : > { %10963 = vmatpush1.bf16.msra.mxu0 %v10962_v14  ;;  %v4367_v14 = vld [vmem:[#allocation14 + $0x3b8] sm:$0xff] }
0x1550   : > { %10965 = vmatprep.subr.bf16.mxu0 %v10964_v40  ;;  %v10994_v40 = vpack.c.bf16 %v4362_v58, %v4360_v23  ;;  %v10996_v63 = vpack.c.bf16 %v4367_v14, %v4365_v0  ;;  %v4242_v23 = vmax.f32 %v4074_v38, 0.0  ;;  %v4384_v0 = vld [vmem:[#allocation14 + $0x440] sm:$0xff]  ;;  %v4386_v14 = vld [vmem:[#allocation14 + $0x450] sm:$0xff] }
0x1551   : > { %v4406_v38 = vld [vmem:[#allocation14 + $0x4f0] sm:$0xff] }
0x1553   : > { %10967 = vmatpush1.bf16.msra.mxu0 %v10966_v26  ;;  %v4371_v26 = vld [vmem:[#allocation14 + $0x3d8] sm:$0xff] }
0x1554   : > { %10969 = vmatprep.subr.bf16.mxu0 %v10968_v30  ;;  %v10998_v30 = vpack.c.bf16 %v4366_v52, %v4364_v21  ;;  %v11000_v27 = vpack.c.bf16 %v4371_v26, %v4369_v16  ;;  %v4391_v21 = vld [vmem:[#allocation14 + $0x478] sm:$0xff]  ;;  %v11018_v52 = vpack.c.bf16 %v4386_v14, %v4384_v0  ;;  %v4388_v26 = vld [vmem:[#allocation14 + $0x460] sm:$0xff]  ;;  %v4414_v14 = vld [vmem:[#allocation14 + $0x530] sm:$0xff] }
0x1555   : > { %v4412_v0 = vld [vmem:[#allocation14 + $0x520] sm:$0xff] }
0x1557   : > { %10971 = vmatpush1.bf16.msra.mxu0 %v10970_v56  ;;  %v4375_v56 = vld [vmem:[#allocation14 + $0x3f8] sm:$0xff] }
0x1558   : > { %10973 = vmatprep.subr.bf16.mxu0 %v10972_v35  ;;  %v11002_v35 = vpack.c.bf16 %v4370_v29, %v4368_v28  ;;  %v11004_v25 = vpack.c.bf16 %v4375_v56, %v4373_v31  ;;  %v4395_v28 = vld [vmem:[#allocation14 + $0x498] sm:$0xff]  ;;  %v4392_v56 = vld [vmem:[#allocation14 + $0x480] sm:$0xff] }
0x155b   : > { %10975 = vmatpush1.bf16.msra.mxu0 %v10974_v19  ;;  %v4377_v19 = vld [vmem:[#allocation14 + $0x408] sm:$0xff] }
0x155c   : > { %10977 = vmatprep.subr.bf16.mxu0 %v10976_v55  ;;  %v4379_v55 = vld [vmem:[#allocation14 + $0x418] sm:$0xff] }
0x155f   : > { %10979 = vmatpush1.bf16.msra.mxu0 %v10978_v57  ;;  %v11008_v57 = vpack.c.bf16 %v4379_v55, %v4377_v19  ;;  %v4396_v19 = vld [vmem:[#allocation14 + $0x4a0] sm:$0xff]  ;;  %v4398_v55 = vld [vmem:[#allocation14 + $0x4b0] sm:$0xff] }
0x1560   : > { %10981 = vmatprep.subr.bf16.mxu0 %v10980_v11  ;;  %v4376_v11 = vld [vmem:[#allocation14 + $0x400] sm:$0xff] }
0x1561   : > { %v11010_v9 = vpack.c.bf16 %v4378_v42, %v4376_v11  ;;  %v4400_v42 = vld [vmem:[#allocation14 + $0x4c0] sm:$0xff] }
0x1563   : > { %10983 = vmatpush1.bf16.msra.mxu0 %v10982_v59 }
0x1564   : > { %10985 = vmatprep.subr.bf16.mxu0 %v10984_v12  ;;  %v4381_v12 = vld [vmem:[#allocation14 + $0x428] sm:$0xff] }
0x1565   : > { %v11012_v36 = vpack.c.bf16 %v4383_v18, %v4381_v12  ;;  %v4407_v12 = vld [vmem:[#allocation14 + $0x4f8] sm:$0xff]  ;;  %v11034_v18 = vpack.c.bf16 %v4402_v6, %v4400_v42  ;;  %v4430_v42 = vld [vmem:[#allocation14 + $0x5b0] sm:$0xff]  ;;  %v4433_v6 = vld [vmem:[#allocation14 + $0x5c8] sm:$0xff] }
0x1567   : > { %10987 = vmatpush1.bf16.msra.mxu0 %v10986_v45 }
0x1568   : > { %10989 = vmatprep.subr.bf16.mxu0 %v10988_v50  ;;  %v4382_v50 = vld [vmem:[#allocation14 + $0x430] sm:$0xff] }
0x1569   : > { %v11014_v34 = vpack.c.bf16 %v4382_v50, %v4380_v4  ;;  %v4411_v4 = vld [vmem:[#allocation14 + $0x518] sm:$0xff] }
0x156b   : > { %10991 = vmatpush1.bf16.msra.mxu0 %v10990_v10  ;;  %v4385_v10 = vld [vmem:[#allocation14 + $0x448] sm:$0xff] }
0x156c   : > { %10993 = vmatprep.subr.bf16.mxu0 %v10992_v49  ;;  %v4387_v49 = vld [vmem:[#allocation14 + $0x458] sm:$0xff] }
0x156d   : > { %v11016_v58 = vpack.c.bf16 %v4387_v49, %v4385_v10  ;;  %v4410_v10 = vld [vmem:[#allocation14 + $0x510] sm:$0xff]  ;;  %v4413_v49 = vld [vmem:[#allocation14 + $0x528] sm:$0xff] }
0x156f   : > { %10995 = vmatpush1.bf16.msra.mxu0 %v10994_v40 }
0x1570   : > { %10997 = vmatprep.subr.bf16.mxu0 %v10996_v63  ;;  %v4389_v63 = vld [vmem:[#allocation14 + $0x468] sm:$0xff] }
0x1571   : > { %v11020_v16 = vpack.c.bf16 %v4391_v21, %v4389_v63  ;;  %v4419_v63 = vld [vmem:[#allocation14 + $0x558] sm:$0xff]  ;;  %v11046_v21 = vpack.c.bf16 %v4414_v14, %v4412_v0 }
0x1573   : > { %10999 = vmatpush1.bf16.msra.mxu0 %v10998_v30  ;;  %v4390_v30 = vld [vmem:[#allocation14 + $0x470] sm:$0xff] }
0x1574   : > { %11001 = vmatprep.subr.bf16.mxu0 %v11000_v27  ;;  %v4393_v27 = vld [vmem:[#allocation14 + $0x488] sm:$0xff]  ;;  %v11022_v29 = vpack.c.bf16 %v4390_v30, %v4388_v26  ;;  %v4418_v26 = vld [vmem:[#allocation14 + $0x550] sm:$0xff] }
0x1575   : > { %v11024_v31 = vpack.c.bf16 %v4395_v28, %v4393_v27  ;;  %v4421_v30 = vld [vmem:[#allocation14 + $0x568] sm:$0xff]  ;;  %v4423_v27 = vld [vmem:[#allocation14 + $0x578] sm:$0xff] }
0x1577   : > { %11003 = vmatpush1.bf16.msra.mxu0 %v11002_v35  ;;  %v4394_v35 = vld [vmem:[#allocation14 + $0x490] sm:$0xff] }
0x1578   : > { %v14651_v8 = vpop.f32.mrb[12].mxu0  ;;  %v14653_v3 = vpop.f32.mrb[48].mxu1  ;;  %11005 = vmatprep.subr.bf16.mxu0 %v11004_v25  ;;  %v4399_v25 = vld [vmem:[#allocation14 + $0x4b8] sm:$0xff]  ;;  %v11026_v17 = vpack.c.bf16 %v4394_v35, %v4392_v56  ;;  %v4422_v56 = vld [vmem:[#allocation14 + $0x570] sm:$0xff]  ;;  %v4425_v35 = vld [vmem:[#allocation14 + $0x588] sm:$0xff] }
0x1579   : > { %v4146_v5 = vpop.f32.mrb[13].mxu0  ;;  %v14661_v59 = vpop.f32.mrb[49].mxu1  ;;  %v11028_v51 = vpack.c.bf16 %v4399_v25, %v4397_v24  ;;  %v4427_v24 = vld [vmem:[#allocation14 + $0x598] sm:$0xff] }
0x157a   : > { %v4147_v61 = vadd.f32 %v4146_v5, %v14659_v7  ;;  %v4405_v5 = vld [vmem:[#allocation14 + $0x4e8] sm:$0xff] }
0x157b   : > { %11007 = vmatpush1.bf16.msra.mxu0 %v11006_v37  ;;  %v4401_v37 = vld [vmem:[#allocation14 + $0x4c8] sm:$0xff] }
0x157c   : > { %v14664_v62 = vpop.f32.mrb[14].mxu0  ;;  %v14666_v45 = vpop.f32.mrb[50].mxu1  ;;  %11009 = vmatprep.subr.bf16.mxu0 %v11008_v57  ;;  %v4237_v40 = vmax.f32 %v4147_v61, 0.0  ;;  %v11030_v57 = vpack.c.bf16 %v4398_v55, %v4396_v19  ;;  %v11032_v11 = vpack.c.bf16 %v4403_v48, %v4401_v37  ;;  %v4408_v61 = vld [vmem:[#allocation14 + $0x500] sm:$0xff]  ;;  %v4426_v19 = vld [vmem:[#allocation14 + $0x590] sm:$0xff]  ;;  %v4429_v55 = vld [vmem:[#allocation14 + $0x5a8] sm:$0xff] }
0x157d   : > { %v14669_v13 = vpop.f32.mrb[15].mxu0  ;;  %v14671_v22 = vpop.f32.mrb[51].mxu1  ;;  %v4431_v37 = vld [vmem:[#allocation14 + $0x5b8] sm:$0xff] }
0x157e   : > { %4658 = vmatmul.mubr.f32.vlgmr.msra.gmra.mrb[16].mxu0 %v4234_v41  ;;  %v4404_v41 = vld [vmem:[#allocation14 + $0x4e0] sm:$0xff] }
0x157f   : > { %4663 = vmatprep.mubr.f32.mxu0 %v4243_v20  ;;  %11011 = vmatpush1.bf16.msra.mxu0 %v11010_v9  ;;  %v11036_v9 = vpack.c.bf16 %v4407_v12, %v4405_v5  ;;  %v11038_v50 = vpack.c.bf16 %v4406_v38, %v4404_v41  ;;  %v4435_v5 = vld [vmem:[#allocation14 + $0x5d8] sm:$0xff]  ;;  %v4434_v41 = vld [vmem:[#allocation14 + $0x5d0] sm:$0xff]  ;;  %v4437_v38 = vld [vmem:[#allocation14 + $0x5e8] sm:$0xff] }
0x1580   : > { %11013 = vmatprep.subr.bf16.mxu0 %v11012_v36  ;;  %v4409_v36 = vld [vmem:[#allocation14 + $0x508] sm:$0xff] }
0x1581   : > { %v11040_v20 = vpack.c.bf16 %v4411_v4, %v4409_v36  ;;  %v4439_v36 = vld [vmem:[#allocation14 + $0x5f8] sm:$0xff] }
0x1582   : > { %4664 = vmatmul.mubr.f32.gmra.mrb[18].mxu0 %v4242_v23  ;;  %v11042_v23 = vpack.c.bf16 %v4410_v10, %v4408_v61  ;;  %v4436_v61 = vld [vmem:[#allocation14 + $0x5e0] sm:$0xff]  ;;  %v4438_v10 = vld [vmem:[#allocation14 + $0x5f0] sm:$0xff] }
0x1583   : > { %11015 = vmatpush1.bf16.msra.mxu0 %v11014_v34  ;;  %4734 = vmatprep.mubr.f32.mxu0 %v4237_v40  ;;  %v4415_v34 = vld [vmem:[#allocation14 + $0x538] sm:$0xff]  ;;  %v4417_v40 = vld [vmem:[#allocation14 + $0x548] sm:$0xff] }
0x1584   : > { %11017 = vmatprep.subr.bf16.mxu0 %v11016_v58  ;;  %v11044_v58 = vpack.c.bf16 %v4415_v34, %v4413_v49  ;;  %v14676_v49 = vsub.s32 7, %v13515_v32  ;;  %v4441_v34 = vld [vmem:[#allocation14 + $0x608] sm:$0xff] }
0x1587   : > { %11019 = vmatpush1.bf16.msra.mxu0 %v11018_v52  ;;  %v11048_v52 = vpack.c.bf16 %v4419_v63, %v4417_v40  ;;  %v4440_v40 = vld [vmem:[#allocation14 + $0x600] sm:$0xff]  ;;  %v4442_v63 = vld [vmem:[#allocation14 + $0x610] sm:$0xff] }
0x1588   : > { %11021 = vmatprep.subr.bf16.mxu0 %v11020_v16  ;;  %v4416_v16 = vld [vmem:[#allocation14 + $0x540] sm:$0xff] }
0x1589   : > { %v11050_v28 = vpack.c.bf16 %v4418_v26, %v4416_v16  ;;  %v4445_v16 = vld [vmem:[#allocation14 + $0x628] sm:$0xff]  ;;  %v4447_v26 = vld [vmem:[#allocation14 + $0x638] sm:$0xff] }
0x158b   : > { %11023 = vmatpush1.bf16.msra.mxu0 %v11022_v29  ;;  %v11052_v29 = vpack.c.bf16 %v4423_v27, %v4421_v30  ;;  %v11074_v30 = vpack.c.bf16 %v4442_v63, %v4440_v40  ;;  %v4471_v40 = vld [vmem:[#allocation14 + $0x6f8] sm:$0xff] }
0x158c   : > { %11025 = vmatprep.subr.bf16.mxu0 %v11024_v31  ;;  %v4420_v31 = vld [vmem:[#allocation14 + $0x560] sm:$0xff] }
0x158d   : > { %v11054_v25 = vpack.c.bf16 %v4422_v56, %v4420_v31  ;;  %v4446_v31 = vld [vmem:[#allocation14 + $0x630] sm:$0xff] }
0x158f   : > { %11027 = vmatpush1.bf16.msra.mxu0 %v11026_v17  ;;  %v11056_v17 = vpack.c.bf16 %v4427_v24, %v4425_v35  ;;  %v4449_v24 = vld [vmem:[#allocation14 + $0x648] sm:$0xff] }
0x1590   : > { %11029 = vmatprep.subr.bf16.mxu0 %v11028_v51  ;;  %v4424_v51 = vld [vmem:[#allocation14 + $0x580] sm:$0xff] }
0x1591   : > { %v11058_v48 = vpack.c.bf16 %v4426_v19, %v4424_v51  ;;  %v4448_v51 = vld [vmem:[#allocation14 + $0x640] sm:$0xff]  ;;  %v4450_v19 = vld [vmem:[#allocation14 + $0x650] sm:$0xff] }
0x1593   : > { %11031 = vmatpush1.bf16.msra.mxu0 %v11030_v57  ;;  %v11060_v57 = vpack.c.bf16 %v4431_v37, %v4429_v55  ;;  %v4453_v55 = vld [vmem:[#allocation14 + $0x668] sm:$0xff]  ;;  %v4455_v37 = vld [vmem:[#allocation14 + $0x678] sm:$0xff] }
0x1594   : > { %11033 = vmatprep.subr.bf16.mxu0 %v11032_v11  ;;  %v4428_v11 = vld [vmem:[#allocation14 + $0x5a0] sm:$0xff] }
0x1595   : > { %v11062_v12 = vpack.c.bf16 %v4430_v42, %v4428_v11  ;;  %v4454_v11 = vld [vmem:[#allocation14 + $0x670] sm:$0xff]  ;;  %v4457_v42 = vld [vmem:[#allocation14 + $0x688] sm:$0xff] }
0x1597   : > { %11035 = vmatpush1.bf16.msra.mxu0 %v11034_v18  ;;  %v11064_v18 = vpack.c.bf16 %v4435_v5, %v4433_v6  ;;  %v4459_v6 = vld [vmem:[#allocation14 + $0x698] sm:$0xff] }
0x1598   : > { %11037 = vmatprep.subr.bf16.mxu0 %v11036_v9  ;;  %v4432_v9 = vld [vmem:[#allocation14 + $0x5c0] sm:$0xff] }
0x1599   : > { %v11066_v4 = vpack.c.bf16 %v4434_v41, %v4432_v9  ;;  %v4458_v9 = vld [vmem:[#allocation14 + $0x690] sm:$0xff]  ;;  %v4461_v41 = vld [vmem:[#allocation14 + $0x6a8] sm:$0xff] }
0x159b   : > { %11039 = vmatpush1.bf16.msra.mxu0 %v11038_v50  ;;  %v3903_v50 = vrot.slane %v14631_v53, %v13563_v1 }
0x159c   : > { %11041 = vmatprep.subr.bf16.mxu0 %v11040_v20  ;;  %v11068_v20 = vpack.c.bf16 %v4439_v36, %v4437_v38  ;;  %v4463_v38 = vld [vmem:[#allocation14 + $0x6b8] sm:$0xff] }
0x159d   : > { %v4145_v0 = vadd.f32 %v14651_v8, %v3903_v50  ;;  %v11076_v8 = vpack.c.bf16 %v4447_v26, %v4445_v16  ;;  %v4468_v16 = vld [vmem:[#allocation14 + $0x6e0] sm:$0xff]  ;;  %v4470_v26 = vld [vmem:[#allocation14 + $0x6f0] sm:$0xff] }
0x159f   : > { %11043 = vmatpush1.bf16.msra.mxu0 %v11042_v23  ;;  %v4443_v23 = vld [vmem:[#allocation14 + $0x618] sm:$0xff]  ;;  %v4236_v27 = vmax.f32 %v4145_v0, 0.0  ;;  %v4466_v0 = vld [vmem:[#allocation14 + $0x6d0] sm:$0xff] }
0x15a0   : > { %11045 = vmatprep.subr.bf16.mxu0 %v11044_v58  ;;  %v11070_v58 = vpack.c.bf16 %v4438_v10, %v4436_v61  ;;  %v11072_v14 = vpack.c.bf16 %v4443_v23, %v4441_v34  ;;  %v4465_v61 = vld [vmem:[#allocation14 + $0x6c8] sm:$0xff]  ;;  %v4467_v10 = vld [vmem:[#allocation14 + $0x6d8] sm:$0xff] }
0x15a1   : > { %v11096_v23 = vpack.c.bf16 %v4467_v10, %v4465_v61  ;;  %v4492_v61 = vld [vmem:[#allocation14 + $0x7a0] sm:$0xff]  ;;  %v4494_v10 = vld [vmem:[#allocation14 + $0x7b0] sm:$0xff] }
0x15a3   : > { %11047 = vmatpush1.bf16.msra.mxu0 %v11046_v21  ;;  %v14681_v21 = vrot.slane %v14631_v53, %v14676_v49 }
0x15a4   : > { %11049 = vmatprep.subr.bf16.mxu0 %v11048_v52  ;;  %v4153_v52 = vadd.f32 %v14669_v13, %v14659_v7 }
0x15a5   : > { %v4224_v56 = vadd.f32 %v14661_v59, %v14681_v21  ;;  %v11084_v59 = vpack.c.bf16 %v4455_v37, %v4453_v55  ;;  %v4480_v55 = vld [vmem:[#allocation14 + $0x740] sm:$0xff]  ;;  %v4482_v37 = vld [vmem:[#allocation14 + $0x750] sm:$0xff] }
0x15a6   : > { %v4245_v35 = vmax.f32 %v4153_v52, 0.0 }
0x15a7   : > { %11051 = vmatpush1.bf16.msra.mxu0 %v11050_v28  ;;  %v4151_v28 = vadd.f32 %v14664_v62, %v3903_v50  ;;  %v4239_v62 = vmax.f32 %v4224_v56, 0.0  ;;  %v4460_v50 = vld [vmem:[#allocation14 + $0x6a0] sm:$0xff]  ;;  %v4477_v56 = vld [vmem:[#allocation14 + $0x728] sm:$0xff] }
0x15a8   : > { %11053 = vmatprep.subr.bf16.mxu0 %v11052_v29  ;;  %v4444_v29 = vld [vmem:[#allocation14 + $0x620] sm:$0xff] }
0x15a9   : > { %v11078_v7 = vpack.c.bf16 %v4446_v31, %v4444_v29  ;;  %v4244_v13 = vmax.f32 %v4151_v28, 0.0  ;;  %v11102_v28 = vpack.c.bf16 %v4470_v26, %v4468_v16  ;;  %v4472_v29 = vld [vmem:[#allocation14 + $0x700] sm:$0xff]  ;;  %v4474_v31 = vld [vmem:[#allocation14 + $0x710] sm:$0xff]  ;;  %v4503_v16 = vld [vmem:[#allocation14 + $0x7f8] sm:$0xff] }
0x15ab   : > { %11055 = vmatpush1.bf16.msra.mxu0 %v11054_v25  ;;  %v4451_v25 = vld [vmem:[#allocation14 + $0x658] sm:$0xff] }
0x15ac   : > { %11057 = vmatprep.subr.bf16.mxu0 %v11056_v17  ;;  %v11080_v17 = vpack.c.bf16 %v4451_v25, %v4449_v24  ;;  %v11106_v24 = vpack.c.bf16 %v4474_v31, %v4472_v29  ;;  %v4230_v31 = vadd.f32 %v14671_v22, %v14681_v21 }
0x15af   : > { %11059 = vmatpush1.bf16.msra.mxu0 %v11058_v48  ;;  %v11082_v48 = vpack.c.bf16 %v4450_v19, %v4448_v51  ;;  %v4483_v51 = vld [vmem:[#allocation14 + $0x758] sm:$0xff] }
0x15b0   : > { %11061 = vmatprep.subr.bf16.mxu0 %v11060_v57  ;;  %v4452_v57 = vld [vmem:[#allocation14 + $0x660] sm:$0xff] }
0x15b1   : > { %v11086_v5 = vpack.c.bf16 %v4454_v11, %v4452_v57  ;;  %v11114_v57 = vpack.c.bf16 %v4482_v37, %v4480_v55 }
0x15b3   : > { %11063 = vmatpush1.bf16.msra.mxu0 %v11062_v12  ;;  %v11088_v12 = vpack.c.bf16 %v4459_v6, %v4457_v42  ;;  %v4484_v42 = vld [vmem:[#allocation14 + $0x760] sm:$0xff]  ;;  %v4486_v6 = vld [vmem:[#allocation14 + $0x770] sm:$0xff] }
0x15b4   : > { %11065 = vmatprep.subr.bf16.mxu0 %v11064_v18  ;;  %v4456_v18 = vld [vmem:[#allocation14 + $0x680] sm:$0xff] }
0x15b5   : > { %v11090_v36 = vpack.c.bf16 %v4458_v9, %v4456_v18  ;;  %v11118_v18 = vpack.c.bf16 %v4486_v6, %v4484_v42  ;;  %v4893_v42 = vld [vmem:[#allocation7 + $0x600] sm:$0xff] }
0x15b7   : > { %11067 = vmatpush1.bf16.msra.mxu0 %v11066_v4  ;;  %v11092_v4 = vpack.c.bf16 %v4463_v38, %v4461_v41  ;;  %v4488_v41 = vld [vmem:[#allocation14 + $0x780] sm:$0xff]  ;;  %v4490_v38 = vld [vmem:[#allocation14 + $0x790] sm:$0xff] }
0x15b8   : > { %11069 = vmatprep.subr.bf16.mxu0 %v11068_v20  ;;  %v4462_v20 = vld [vmem:[#allocation14 + $0x6b0] sm:$0xff] }
0x15b9   : > { %v11094_v34 = vpack.c.bf16 %v4462_v20, %v4460_v50  ;;  %v11122_v50 = vpack.c.bf16 %v4490_v38, %v4488_v41  ;;  %v4905_v38 = vld [vmem:[#allocation7 + $0x660] sm:$0xff] }
0x15bb   : > { %11071 = vmatpush1.bf16.msra.mxu0 %v11070_v58  ;;  %v4464_v58 = vld [vmem:[#allocation14 + $0x6c0] sm:$0xff] }
0x15bc   : > { %11073 = vmatprep.subr.bf16.mxu0 %v11072_v14  ;;  %v4469_v14 = vld [vmem:[#allocation14 + $0x6e8] sm:$0xff]  ;;  %v11098_v63 = vpack.c.bf16 %v4466_v0, %v4464_v58  ;;  %v11126_v58 = vpack.c.bf16 %v4494_v10, %v4492_v61  ;;  %v14689_v0 = vsub.s32 6, %v13515_v32  ;;  %v4923_v61 = vld [vmem:[#allocation7 + $0x6f0] sm:$0xff]  ;;  %v4930_v10 = vld [vmem:[#allocation7 + $0x728] sm:$0xff] }
0x15bd   : > { %v11100_v52 = vpack.c.bf16 %v4471_v40, %v4469_v14  ;;  %v4496_v40 = vld [vmem:[#allocation14 + $0x7c0] sm:$0xff] }
0x15be   : > { %4735 = vmatmul.mubr.f32.vlgmr.msra.gmra.mrb[16].mxu0 %v4236_v27  ;;  %v4475_v27 = vld [vmem:[#allocation14 + $0x718] sm:$0xff] }
0x15bf   : > { %4740 = vmatprep.mubr.f32.mxu0 %v4245_v35  ;;  %11075 = vmatpush1.bf16.msra.mxu0 %v11074_v30  ;;  %v4473_v30 = vld [vmem:[#allocation14 + $0x708] sm:$0xff]  ;;  %v4479_v35 = vld [vmem:[#allocation14 + $0x738] sm:$0xff] }
0x15c0   : > { %11077 = vmatprep.subr.bf16.mxu0 %v11076_v8  ;;  %v11104_v8 = vpack.c.bf16 %v4475_v27, %v4473_v30  ;;  %v11108_v25 = vpack.c.bf16 %v4479_v35, %v4477_v56  ;;  %v3911_v30 = vrot.slane %v14631_v53, %v14689_v0 }
0x15c2   : > { %4741 = vmatmul.mubr.f32.gmra.mrb[18].mxu0 %v4244_v13  ;;  %v4478_v13 = vld [vmem:[#allocation14 + $0x730] sm:$0xff]  ;;  %v4222_v32 = vadd.f32 %v14653_v3, %v3911_v30  ;;  %v4228_v35 = vadd.f32 %v14666_v45, %v3911_v30 }
0x15c3   : > { %11079 = vmatpush1.bf16.msra.mxu0 %v11078_v7  ;;  %4811 = vmatprep.mubr.f32.mxu0 %v4239_v62  ;;  %v4476_v7 = vld [vmem:[#allocation14 + $0x720] sm:$0xff]  ;;  %v4941_v30 = vld [vmem:[#allocation7 + $0x780] sm:$0xff] }
0x15c4   : > { %11081 = vmatprep.subr.bf16.mxu0 %v11080_v17  ;;  %v4481_v17 = vld [vmem:[#allocation14 + $0x748] sm:$0xff]  ;;  %v11110_v19 = vpack.c.bf16 %v4478_v13, %v4476_v7  ;;  %v4238_v56 = vmax.f32 %v4222_v32, 0.0  ;;  %v4246_v53 = vmax.f32 %v4228_v35, 0.0  ;;  %v4966_v35 = vld [vmem:[#allocation7 + $0x848] sm:$0xff] }
0x15c5   : > { %v11112_v62 = vpack.c.bf16 %v4483_v51, %v4481_v17 }
0x15c7   : > { %11083 = vmatpush1.bf16.msra.mxu0 %v11082_v48  ;;  %v4485_v48 = vld [vmem:[#allocation14 + $0x768] sm:$0xff] }
0x15c8   : > { %11085 = vmatprep.subr.bf16.mxu0 %v11084_v59  ;;  %v4487_v59 = vld [vmem:[#allocation14 + $0x778] sm:$0xff] }
0x15c9   : > { %v11116_v11 = vpack.c.bf16 %v4487_v59, %v4485_v48 }
0x15cb   : > { %11087 = vmatpush1.bf16.msra.mxu0 %v11086_v5  ;;  %v4489_v5 = vld [vmem:[#allocation14 + $0x788] sm:$0xff] }
0x15cc   : > { %11089 = vmatprep.subr.bf16.mxu0 %v11088_v12  ;;  %v4491_v12 = vld [vmem:[#allocation14 + $0x798] sm:$0xff] }
0x15cd   : > { %v11120_v9 = vpack.c.bf16 %v4491_v12, %v4489_v5  ;;  %v4899_v5 = vld [vmem:[#allocation7 + $0x630] sm:$0xff]  ;;  %v4906_v12 = vld [vmem:[#allocation7 + $0x668] sm:$0xff] }
0x15cf   : > { %11091 = vmatpush1.bf16.msra.mxu0 %v11090_v36  ;;  %v4493_v36 = vld [vmem:[#allocation14 + $0x7a8] sm:$0xff] }
0x15d0   : > { %11093 = vmatprep.subr.bf16.mxu0 %v11092_v4  ;;  %v4495_v4 = vld [vmem:[#allocation14 + $0x7b8] sm:$0xff] }
0x15d1   : > { %v11124_v20 = vpack.c.bf16 %v4495_v4, %v4493_v36  ;;  %v4918_v36 = vld [vmem:[#allocation7 + $0x6c8] sm:$0xff] }
0x15d3   : > { %11095 = vmatpush1.bf16.msra.mxu0 %v11094_v34  ;;  %v4497_v34 = vld [vmem:[#allocation14 + $0x7c8] sm:$0xff] }
0x15d4   : > { %11097 = vmatprep.subr.bf16.mxu0 %v11096_v23  ;;  %v4499_v23 = vld [vmem:[#allocation14 + $0x7d8] sm:$0xff] }
0x15d5   : > { %v11128_v14 = vpack.c.bf16 %v4499_v23, %v4497_v34  ;;  %v4936_v34 = vld [vmem:[#allocation7 + $0x758] sm:$0xff] }
0x15d7   : > { %11099 = vmatpush1.bf16.msra.mxu0 %v11098_v63  ;;  %v4498_v63 = vld [vmem:[#allocation14 + $0x7d0] sm:$0xff] }
0x15d8   : > { %11101 = vmatprep.subr.bf16.mxu0 %v11100_v52  ;;  %v4501_v52 = vld [vmem:[#allocation14 + $0x7e8] sm:$0xff]  ;;  %v11130_v26 = vpack.c.bf16 %v4498_v63, %v4496_v40  ;;  %v4935_v40 = vld [vmem:[#allocation7 + $0x750] sm:$0xff]  ;;  %v4942_v63 = vld [vmem:[#allocation7 + $0x788] sm:$0xff] }
0x15d9   : > { %v11132_v27 = vpack.c.bf16 %v4503_v16, %v4501_v52  ;;  %v4948_v52 = vld [vmem:[#allocation7 + $0x7b8] sm:$0xff] }
0x15db   : > { %11103 = vmatpush1.bf16.msra.mxu0 %v11102_v28  ;;  %v4500_v28 = vld [vmem:[#allocation14 + $0x7e0] sm:$0xff] }
0x15dc   : > { %11105 = vmatprep.subr.bf16.mxu0 %v11104_v8  ;;  %v4502_v8 = vld [vmem:[#allocation14 + $0x7f0] sm:$0xff] }
0x15dd   : > { %v11134_v29 = vpack.c.bf16 %v4502_v8, %v4500_v28  ;;  %v4954_v28 = vld [vmem:[#allocation7 + $0x7e8] sm:$0xff]  ;;  %v4960_v8 = vld [vmem:[#allocation7 + $0x818] sm:$0xff] }
0x15de   : > { %v11156_v32 = vpack.c.bf16 %v4960_v8, %v4954_v28  ;;  %v5025_v8 = vld [vmem:[#allocation7 + $0xa20] sm:$0xff] }
0x15df   : > { %11107 = vmatpush1.bf16.msra.mxu0 %v11106_v24  ;;  %v4247_v24 = vmax.f32 %v4230_v31, 0.0  ;;  %v4953_v31 = vld [vmem:[#allocation7 + $0x7e0] sm:$0xff] }
0x15e0   : > { %11109 = vmatprep.subr.bf16.mxu0 %v11108_v25  ;;  %v4504_v25 = vld [vmem:[%s16952_s12] sm:$0x3] }
0x15e1   : > { %v4509_v7 = vrot.slane %v4504_v25, %v13518_v33  ;;  %v4513_v3 = vrot.slane %v4504_v25, %v13651_v43 }
0x15e3   : > { %11111 = vmatpush1.bf16.msra.mxu0 %v11110_v19 }
0x15e4   : > { %11113 = vmatprep.subr.bf16.mxu0 %v11112_v62 }
0x15e7   : > { %11115 = vmatpush1.bf16.msra.mxu0 %v11114_v57 }
0x15e8   : > { %11117 = vmatprep.subr.bf16.mxu0 %v11116_v11  ;;  %v4900_v11 = vld [vmem:[#allocation7 + $0x638] sm:$0xff] }
0x15eb   : > { %11119 = vmatpush1.bf16.msra.mxu0 %v11118_v18  ;;  %v4912_v18 = vld [vmem:[#allocation7 + $0x698] sm:$0xff] }
0x15ec   : > { %11121 = vmatprep.subr.bf16.mxu0 %v11120_v9  ;;  %v11138_v9 = vpack.c.bf16 %v4899_v5, %v4893_v42  ;;  %v11140_v41 = vpack.c.bf16 %v4912_v18, %v4906_v12  ;;  %v5002_v42 = vld [vmem:[#allocation7 + $0x968] sm:$0xff]  ;;  %v5001_v18 = vld [vmem:[#allocation7 + $0x960] sm:$0xff] }
0x15ef   : > { %11123 = vmatpush1.bf16.msra.mxu0 %v11122_v50 }
0x15f0   : > { %11125 = vmatprep.subr.bf16.mxu0 %v11124_v20  ;;  %v4917_v20 = vld [vmem:[#allocation7 + $0x6c0] sm:$0xff] }
0x15f1   : > { %v11146_v23 = vpack.c.bf16 %v4923_v61, %v4917_v20 }
0x15f3   : > { %11127 = vmatpush1.bf16.msra.mxu0 %v11126_v58  ;;  %v11148_v58 = vpack.c.bf16 %v4936_v34, %v4930_v10 }
0x15f4   : > { %11129 = vmatprep.subr.bf16.mxu0 %v11128_v14  ;;  %v4929_v14 = vld [vmem:[#allocation7 + $0x720] sm:$0xff] }
0x15f5   : > { %v11150_v16 = vpack.c.bf16 %v4935_v40, %v4929_v14 }
0x15f7   : > { %11131 = vmatpush1.bf16.msra.mxu0 %v11130_v26  ;;  %v11152_v26 = vpack.c.bf16 %v4948_v52, %v4942_v63 }
0x15f8   : > { %11133 = vmatprep.subr.bf16.mxu0 %v11132_v27  ;;  %v4947_v27 = vld [vmem:[#allocation7 + $0x7b0] sm:$0xff] }
0x15fb   : > { %11135 = vmatpush1.bf16.msra.mxu0 %v11134_v29  ;;  %v11154_v29 = vpack.c.bf16 %v4947_v27, %v4941_v30  ;;  %v5026_v30 = vld [vmem:[#allocation7 + $0xa28] sm:$0xff]  ;;  %v5032_v27 = vld [vmem:[#allocation7 + $0xa58] sm:$0xff] }
0x15fc   : > { %v11180_v28 = vpack.c.bf16 %v5032_v27, %v5026_v30  ;;  %v4908_v27 = vld [vmem:[#allocation7 + $0x678] sm:$0xff] }
0x15fe   : > { %4812 = vmatmul.mubr.f32.vlgmr.msra.gmra.mrb[16].mxu0 %v4238_v56  ;;  %v4959_v56 = vld [vmem:[#allocation7 + $0x810] sm:$0xff] }
0x15ff   : > { %4817 = vmatprep.mubr.f32.mxu0 %v4247_v24  ;;  %v4972_v24 = vld [vmem:[#allocation7 + $0x878] sm:$0xff] }
0x1600   : > { %v11160_v25 = vpack.c.bf16 %v4972_v24, %v4966_v35  ;;  %v5043_v35 = vld [vmem:[#allocation7 + $0xab0] sm:$0xff] }
0x1602   : > { %4818 = vmatmul.mubr.f32.gmra.mrb[18].mxu0 %v4246_v53  ;;  %v11158_v53 = vpack.c.bf16 %v4959_v56, %v4953_v31  ;;  %v5037_v56 = vld [vmem:[#allocation7 + $0xa80] sm:$0xff] }
0x1603   : > { %v11186_v24 = vpack.c.bf16 %v5043_v35, %v5037_v56  ;;  %v4913_v56 = vld [vmem:[#allocation7 + $0x6a0] sm:$0xff] }
0x16d1   : > { %v4813_v13 = vpop.f32.mrb[16].mxu0 }
0x16d2   : > { %v12244_v17 = vadd.f32 %v4813_v13, %v4509_v7  ;;  %v4815_v22 = vpop.f32.mrb[17].mxu0  ;;  %v4978_v13 = vld [vmem:[#allocation7 + $0x8a8] sm:$0xff] }
0x16d3   : > { %v12245_v21 = vadd.f32 %v4815_v22, %v4513_v3 }
0x16d4   : > { %v14703_v51 = vadd.f32 %v12244_v17, %v14256_v44  ;;  %v4984_v17 = vld [vmem:[#allocation7 + $0x8d8] sm:$0xff] }
0x16d5   : > { %v14706_v45 = vadd.f32 %v12245_v21, %v14254_v39  ;;  %v4819_v19 = vpop.f32.mrb[18].mxu0  ;;  %v4894_v39 = vld [vmem:[#allocation7 + $0x608] sm:$0xff]  ;;  %v11164_v21 = vpack.c.bf16 %v4984_v17, %v4978_v13  ;;  %v5055_v13 = vld [vmem:[#allocation7 + $0xb10] sm:$0xff] }
0x16d6   : > { %v12246_v62 = vadd.f32 %v4819_v19, %v4509_v7  ;;  %v4821_v55 = vpop.f32.mrb[19].mxu0  ;;  %v11136_v6 = vpack.c.bf16 %v4900_v11, %v4894_v39  ;;  %v4965_v7 = vld [vmem:[#allocation7 + $0x840] sm:$0xff]  ;;  %v4995_v11 = vld [vmem:[#allocation7 + $0x930] sm:$0xff] }
0x16d7   : > { %v12247_v37 = vadd.f32 %v4821_v55, %v4513_v3  ;;  %v4830_v48 = vadd.f32 %v14706_v45, %v14703_v51  ;;  %v4971_v3 = vld [vmem:[#allocation7 + $0x870] sm:$0xff]  ;;  %v4977_v19 = vld [vmem:[#allocation7 + $0x8a0] sm:$0xff]  ;;  %v4990_v55 = vld [vmem:[#allocation7 + $0x908] sm:$0xff] }
0x16d8   : > { %v14711_v59 = vadd.f32 %v12246_v62, %v14296_v15  ;;  %v4911_v15 = vld [vmem:[#allocation7 + $0x690] sm:$0xff]  ;;  %11137 = vmatprep.subr.bf16.mxu1 %v11136_v6  ;;  %v11162_v22 = vpack.c.bf16 %v4971_v3, %v4965_v7  ;;  %v4989_v39 = vld [vmem:[#allocation7 + $0x900] sm:$0xff]  ;;  %v5008_v6 = vld [vmem:[#allocation7 + $0x998] sm:$0xff] }
0x16d9   : > { %v14714_v57 = vadd.f32 %v12247_v37, %v14294_v54  ;;  %4831 = vadd.xlane.f32.xlu0 %v4830_v48  ;;  %v4924_v54 = vld [vmem:[#allocation7 + $0x6f8] sm:$0xff]  ;;  %11139 = vmatpush1.bf16.msra.mxu1 %v11138_v9  ;;  %v11142_v4 = vpack.c.bf16 %v4911_v15, %v4905_v38  ;;  %v4983_v62 = vld [vmem:[#allocation7 + $0x8d0] sm:$0xff]  ;;  %v11170_v5 = vpack.c.bf16 %v4995_v11, %v4989_v39  ;;  %v5049_v3 = vld [vmem:[#allocation7 + $0xae0] sm:$0xff] }
0x16da   : > { %11141 = vmatprep.subr.bf16.mxu1 %v11140_v41  ;;  %v11144_v50 = vpack.c.bf16 %v4924_v54, %v4918_v36  ;;  %v4996_v37 = vld [vmem:[#allocation7 + $0x938] sm:$0xff]  ;;  %v11166_v48 = vpack.c.bf16 %v4983_v62, %v4977_v19  ;;  %v11172_v12 = vpack.c.bf16 %v5008_v6, %v5002_v42  ;;  %v5007_v9 = vld [vmem:[#allocation7 + $0x990] sm:$0xff]  ;;  %v5014_v41 = vld [vmem:[#allocation7 + $0x9c8] sm:$0xff]  ;;  %v11190_v17 = vpack.c.bf16 %v5055_v13, %v5049_v3 }
0x16db   : > { %v4833_v44 = vadd.f32 %v14714_v57, %v14711_v59  ;;  %v5020_v38 = vld [vmem:[#allocation7 + $0x9f8] sm:$0xff]  ;;  %v11174_v15 = vpack.c.bf16 %v5007_v9, %v5001_v18  ;;  %v5013_v54 = vld [vmem:[#allocation7 + $0x9c0] sm:$0xff]  ;;  %v5079_v42 = vld [vmem:[#allocation7 + $0xbd0] sm:$0xff] }
0x16dc   : > { %v11176_v36 = vpack.c.bf16 %v5020_v38, %v5014_v41  ;;  %v5061_v62 = vld [vmem:[#allocation7 + $0xb40] sm:$0xff] }
0x16dd   : > { %4834 = vadd.xlane.f32.xlu1 %v4833_v44  ;;  %11143 = vmatpush1.bf16.msra.mxu1 %v11142_v4  ;;  %v11168_v44 = vpack.c.bf16 %v4996_v37, %v4990_v55  ;;  %v5019_v4 = vld [vmem:[#allocation7 + $0x9f0] sm:$0xff]  ;;  %v5073_v39 = vld [vmem:[#allocation7 + $0xba0] sm:$0xff] }
0x16de   : > { %11145 = vmatprep.subr.bf16.mxu1 %v11144_v50  ;;  %v11178_v50 = vpack.c.bf16 %v5019_v4, %v5013_v54  ;;  %v5067_v55 = vld [vmem:[#allocation7 + $0xb70] sm:$0xff]  ;;  %v11198_v6 = vpack.c.bf16 %v5079_v42, %v5073_v39  ;;  %v4828_v4 = vld [vmem:[%s17028_s15] sm:$0x3] }
0x16df   : > { %v11194_v37 = vpack.c.bf16 %v5067_v55, %v5061_v62  ;;  %v4931_v55 = vld [vmem:[#allocation7 + $0x730] sm:$0xff] }
0x16e0   : > { %v4943_v42 = vld [vmem:[#allocation7 + $0x790] sm:$0xff] }
0x16e1   : > { %11147 = vmatpush1.bf16.msra.mxu1 %v11146_v23 }
0x16e2   : > { %11149 = vmatprep.subr.bf16.mxu1 %v11148_v58 }
0x16e5   : > { %11151 = vmatpush1.bf16.msra.mxu1 %v11150_v16 }
0x16e6   : > { %11153 = vmatprep.subr.bf16.mxu1 %v11152_v26 }
0x16e9   : > { %11155 = vmatpush1.bf16.msra.mxu1 %v11154_v29  ;;  %v5031_v29 = vld [vmem:[#allocation7 + $0xa50] sm:$0xff] }
0x16ea   : > { %11157 = vmatprep.subr.bf16.mxu1 %v11156_v32  ;;  %v5044_v32 = vld [vmem:[#allocation7 + $0xab8] sm:$0xff] }
0x16ed   : > { %11159 = vmatpush1.bf16.msra.mxu1 %v11158_v53  ;;  %v5050_v53 = vld [vmem:[#allocation7 + $0xae8] sm:$0xff] }
0x16ee   : > { %11161 = vmatprep.subr.bf16.mxu1 %v11160_v25  ;;  %v5056_v25 = vld [vmem:[#allocation7 + $0xb18] sm:$0xff] }
0x16ef   : > { %v11188_v7 = vpack.c.bf16 %v5056_v25, %v5050_v53  ;;  %v4920_v53 = vld [vmem:[#allocation7 + $0x6d8] sm:$0xff]  ;;  %v4926_v25 = vld [vmem:[#allocation7 + $0x708] sm:$0xff] }
0x16f1   : > { %11163 = vmatpush1.bf16.msra.mxu1 %v11162_v22  ;;  %v5062_v22 = vld [vmem:[#allocation7 + $0xb48] sm:$0xff] }
0x16f2   : > { %11165 = vmatprep.subr.bf16.mxu1 %v11164_v21  ;;  %v5068_v21 = vld [vmem:[#allocation7 + $0xb78] sm:$0xff] }
0x16f3   : > { %v11192_v19 = vpack.c.bf16 %v5068_v21, %v5062_v22  ;;  %v4932_v22 = vld [vmem:[#allocation7 + $0x738] sm:$0xff]  ;;  %v4938_v21 = vld [vmem:[#allocation7 + $0x768] sm:$0xff] }
0x16f4   : > { %v11212_v62 = vpack.c.bf16 %v4938_v21, %v4932_v22  ;;  %v5027_v21 = vld [vmem:[#allocation7 + $0xa30] sm:$0xff] }
0x16f5   : > { %11167 = vmatpush1.bf16.msra.mxu1 %v11166_v48  ;;  %v5074_v48 = vld [vmem:[#allocation7 + $0xba8] sm:$0xff] }
0x16f6   : > { %11169 = vmatprep.subr.bf16.mxu1 %v11168_v44  ;;  %v5080_v44 = vld [vmem:[#allocation7 + $0xbd8] sm:$0xff] }
0x16f7   : > { %v11196_v11 = vpack.c.bf16 %v5080_v44, %v5074_v48  ;;  %v4944_v48 = vld [vmem:[#allocation7 + $0x798] sm:$0xff]  ;;  %v4950_v44 = vld [vmem:[#allocation7 + $0x7c8] sm:$0xff] }
0x16f9   : > { %11171 = vmatpush1.bf16.msra.mxu1 %v11170_v5  ;;  %v4896_v5 = vld [vmem:[#allocation7 + $0x618] sm:$0xff] }
0x16fa   : > { %11173 = vmatprep.subr.bf16.mxu1 %v11172_v12  ;;  %v4902_v12 = vld [vmem:[#allocation7 + $0x648] sm:$0xff] }
0x16fb   : > { %v11200_v18 = vpack.c.bf16 %v4902_v12, %v4896_v5  ;;  %v4956_v5 = vld [vmem:[#allocation7 + $0x7f8] sm:$0xff]  ;;  %v4962_v12 = vld [vmem:[#allocation7 + $0x828] sm:$0xff] }
0x16fd   : > { %11175 = vmatpush1.bf16.msra.mxu1 %v11174_v15 }
0x16fe   : > { %11177 = vmatprep.subr.bf16.mxu1 %v11176_v36 }
0x1701   : > { %11179 = vmatpush1.bf16.msra.mxu1 %v11178_v50  ;;  %v4829_v50 = vld [vmem:[%s17029_s7] sm:$0x3] }
0x1702   : > { %11181 = vmatprep.subr.bf16.mxu1 %v11180_v28  ;;  %v4914_v28 = vld [vmem:[#allocation7 + $0x6a8] sm:$0xff] }
0x1766   : > { %v4832_v20 = vpop.xlane.xlu0 %4831 }
0x1767   : > { %v4836_v61 = vmul.f32 0.00390625, %v4832_v20  ;;  %v4866_v20 = vrot.slane %v4828_v4, %v13518_v33 }
0x1769   : > { %v14719_v10 = vsub.f32 %v14703_v51, %v4836_v61  ;;  %v14722_v34 = vsub.f32 %v14706_v45, %v4836_v61  ;;  %v4870_v61 = vrot.slane %v4828_v4, %v13651_v43 }
0x176a   : > { %v4835_v23 = vpop.xlane.xlu1 %4834 }
0x176b   : > { %v4837_v58 = vmul.f32 0.00390625, %v4835_v23  ;;  %v4842_v14 = vmul.f32 %v14719_v10, %v14719_v10  ;;  %v4843_v40 = vmul.f32 %v14722_v34, %v14722_v34 }
0x176d   : > { %v14729_v63 = vsub.f32 %v14711_v59, %v4837_v58  ;;  %v14732_v52 = vsub.f32 %v14714_v57, %v4837_v58  ;;  %v4846_v16 = vadd.f32 %v4843_v40, %v4842_v14  ;;  %v11182_v59 = vpack.c.bf16 %v5031_v29, %v5025_v8  ;;  %v5038_v57 = vld [vmem:[#allocation7 + $0xa88] sm:$0xff] }
0x176e   : > { %v11184_v31 = vpack.c.bf16 %v5044_v32, %v5038_v57  ;;  %v4881_v40 = vrot.slane %v4829_v50, %v13518_v33  ;;  %v11204_v32 = vpack.c.bf16 %v4914_v28, %v4908_v27  ;;  %v4991_v27 = vld [vmem:[#allocation7 + $0x910] sm:$0xff]  ;;  %v4997_v28 = vld [vmem:[#allocation7 + $0x940] sm:$0xff] }
0x176f   : > { %4847 = vadd.xlane.f32.xlu0 %v4846_v16  ;;  %v4844_v51 = vmul.f32 %v14729_v63, %v14729_v63  ;;  %v4845_v45 = vmul.f32 %v14732_v52, %v14732_v52  ;;  %11183 = vmatpush1.bf16.msra.mxu1 %v11182_v59  ;;  %v4885_v16 = vrot.slane %v4829_v50, %v13651_v43  ;;  %v4967_v50 = vld [vmem:[#allocation7 + $0x850] sm:$0xff] }
0x1770   : > { %11185 = vmatprep.subr.bf16.mxu1 %v11184_v31  ;;  %v4907_v31 = vld [vmem:[#allocation7 + $0x670] sm:$0xff] }
0x1771   : > { %v4849_v26 = vadd.f32 %v4845_v45, %v4844_v51  ;;  %v4895_v51 = vld [vmem:[#allocation7 + $0x610] sm:$0xff]  ;;  %v4901_v45 = vld [vmem:[#allocation7 + $0x640] sm:$0xff]  ;;  %v11206_v13 = vpack.c.bf16 %v4913_v56, %v4907_v31  ;;  %v5016_v56 = vld [vmem:[#allocation7 + $0x9d8] sm:$0xff] }
0x1772   : > { %v11202_v29 = vpack.c.bf16 %v4901_v45, %v4895_v51  ;;  %v4992_v51 = vld [vmem:[#allocation7 + $0x918] sm:$0xff]  ;;  %v4998_v45 = vld [vmem:[#allocation7 + $0x948] sm:$0xff]  ;;  %v5009_v31 = vld [vmem:[#allocation7 + $0x9a0] sm:$0xff] }
0x1773   : > { %4850 = vadd.xlane.f32.xlu1 %v4849_v26  ;;  %11187 = vmatpush1.bf16.msra.mxu1 %v11186_v24 }
0x1774   : > { %11189 = vmatprep.subr.bf16.mxu1 %v11188_v7 }
0x1777   : > { %11191 = vmatpush1.bf16.msra.mxu1 %v11190_v17  ;;  %v4925_v17 = vld [vmem:[#allocation7 + $0x700] sm:$0xff] }
0x1778   : > { %11193 = vmatprep.subr.bf16.mxu1 %v11192_v19 }
0x177b   : > { %11195 = vmatpush1.bf16.msra.mxu1 %v11194_v37  ;;  %v4937_v37 = vld [vmem:[#allocation7 + $0x760] sm:$0xff] }
0x177c   : > { %11197 = vmatprep.subr.bf16.mxu1 %v11196_v11  ;;  %v11214_v39 = vpack.c.bf16 %v4937_v37, %v4931_v55  ;;  %v11216_v11 = vpack.c.bf16 %v4950_v44, %v4944_v48  ;;  %v5046_v55 = vld [vmem:[#allocation7 + $0xac8] sm:$0xff]  ;;  %v5039_v44 = vld [vmem:[#allocation7 + $0xa90] sm:$0xff] }
0x177f   : > { %11199 = vmatpush1.bf16.msra.mxu1 %v11198_v6  ;;  %v4949_v6 = vld [vmem:[#allocation7 + $0x7c0] sm:$0xff] }
0x1780   : > { %11201 = vmatprep.subr.bf16.mxu1 %v11200_v18  ;;  %v11218_v18 = vpack.c.bf16 %v4949_v6, %v4943_v42  ;;  %v5058_v42 = vld [vmem:[#allocation7 + $0xb28] sm:$0xff] }
0x17fc   : > { %v4848_v9 = vpop.xlane.xlu0 %4847 }
0x17fd   : > { %v4852_v41 = vmul.f32 0.00390625, %v4848_v9  ;;  %v11220_v9 = vpack.c.bf16 %v4962_v12, %v4956_v5  ;;  %v5051_v12 = vld [vmem:[#allocation7 + $0xaf0] sm:$0xff] }
0x17ff   : > { %v4854_v38 = vadd.f32 1e-05, %v4852_v41  ;;  %v4955_v41 = vld [vmem:[#allocation7 + $0x7f0] sm:$0xff] }
0x1800   : > { %v4851_v15 = vpop.xlane.xlu1 %4850 }
0x1801   : > { %12672 = vrsqrt.f32 %v4854_v38  ;;  %v4853_v36 = vmul.f32 0.00390625, %v4851_v15  ;;  %v4961_v38 = vld [vmem:[#allocation7 + $0x820] sm:$0xff]  ;;  %v4968_v15 = vld [vmem:[#allocation7 + $0x858] sm:$0xff] }
0x1803   : > { %v4855_v54 = vadd.f32 1e-05, %v4853_v36  ;;  %v4974_v36 = vld [vmem:[#allocation7 + $0x888] sm:$0xff] }
0x1804   : > { %v11224_v4 = vpack.c.bf16 %v4974_v36, %v4968_v15  ;;  %v5063_v36 = vld [vmem:[#allocation7 + $0xb50] sm:$0xff] }
0x1805   : > { %12674 = vrsqrt.f32 %v4855_v54  ;;  %v11222_v54 = vpack.c.bf16 %v4961_v38, %v4955_v41  ;;  %v5070_v41 = vld [vmem:[#allocation7 + $0xb88] sm:$0xff] }
0x180b   : > { %v12673_v23 = vpop.eup %12672 }
0x180c   : > { %v4858_v58 = vmul.f32 %v12673_v23, %v14719_v10  ;;  %v4859_v14 = vmul.f32 %v12673_v23, %v14722_v34  ;;  %v4986_v23 = vld [vmem:[#allocation7 + $0x8e8] sm:$0xff] }
0x180e   : > { %v4874_v26 = vmul.f32 %v4870_v61, %v4859_v14  ;;  %v4873_v30 = vmul.f32 %v4866_v20, %v4858_v58 }
0x180f   : > { %v12675_v8 = vpop.eup %12674 }
0x1810   : > { %v14750_v59 = vadd.f32 %v4885_v16, %v4874_v26  ;;  %v14752_v57 = vadd.f32 %v4881_v40, %v4873_v30  ;;  %v4861_v10 = vmul.f32 %v12675_v8, %v14732_v52  ;;  %v4860_v34 = vmul.f32 %v12675_v8, %v14729_v63  ;;  %v4919_v63 = vld [vmem:[#allocation7 + $0x6d0] sm:$0xff]  ;;  %v5004_v8 = vld [vmem:[#allocation7 + $0x978] sm:$0xff] }
0x1811   : > { %v11208_v52 = vpack.c.bf16 %v4926_v25, %v4920_v53  ;;  %v11210_v19 = vpack.c.bf16 %v4925_v17, %v4919_v63  ;;  %v11232_v30 = vpack.c.bf16 %v4998_v45, %v4992_v51  ;;  %v5015_v25 = vld [vmem:[#allocation7 + $0x9d0] sm:$0xff]  ;;  %v5034_v63 = vld [vmem:[#allocation7 + $0xa68] sm:$0xff]  ;;  %v4897_v45 = vld [vmem:[#allocation7 + $0x620] sm:$0xff] }
0x1812   : > { %5182 = vmatprep.mubr.f32.mxu1 %v14750_v59  ;;  %v4876_v35 = vmul.f32 %v4870_v61, %v4861_v10  ;;  %v4875_v24 = vmul.f32 %v4866_v20, %v4860_v34  ;;  %v4973_v20 = vld [vmem:[#allocation7 + $0x880] sm:$0xff]  ;;  %v4980_v61 = vld [vmem:[#allocation7 + $0x8b8] sm:$0xff]  ;;  %v11234_v10 = vpack.c.bf16 %v4997_v28, %v4991_v27 }
0x1813   : > { %5183 = vmatmul.mubr.f32.vlgmr.msra.gmra.mrb[52].mxu1 %v14752_v57  ;;  %v11226_v58 = vpack.c.bf16 %v4973_v20, %v4967_v50  ;;  %v11228_v14 = vpack.c.bf16 %v4986_v23, %v4980_v61  ;;  %v5082_v50 = vld [vmem:[#allocation7 + $0xbe8] sm:$0xff]  ;;  %v5075_v23 = vld [vmem:[#allocation7 + $0xbb0] sm:$0xff]  ;;  %v4916_v27 = vld [vmem:[#allocation7 + $0x6b8] sm:$0xff] }
0x1814   : > { %11203 = vmatpush1.bf16.msra.mxu1 %v11202_v29  ;;  %v14758_v7 = vadd.f32 %v4885_v16, %v4876_v35  ;;  %v14760_v3 = vadd.f32 %v4881_v40, %v4875_v24  ;;  %v4979_v40 = vld [vmem:[#allocation7 + $0x8b0] sm:$0xff]  ;;  %v4985_v16 = vld [vmem:[#allocation7 + $0x8e0] sm:$0xff]  ;;  %v5010_v29 = vld [vmem:[#allocation7 + $0x9a8] sm:$0xff] }
0x1815   : > { %11205 = vmatprep.subr.bf16.mxu1 %v11204_v32  ;;  %v11230_v26 = vpack.c.bf16 %v4985_v16, %v4979_v40  ;;  %v11236_v34 = vpack.c.bf16 %v5010_v29, %v5004_v8  ;;  %v5003_v32 = vld [vmem:[#allocation7 + $0x970] sm:$0xff]  ;;  %v5022_v35 = vld [vmem:[#allocation7 + $0xa08] sm:$0xff]  ;;  %v4904_v40 = vld [vmem:[#allocation7 + $0x658] sm:$0xff] }
0x1816   : > { %5188 = vmatprep.mubr.f32.mxu1 %v14758_v7  ;;  %v11238_v24 = vpack.c.bf16 %v5009_v31, %v5003_v32  ;;  %v11240_v53 = vpack.c.bf16 %v5022_v35, %v5016_v56  ;;  %v4909_v29 = vld [vmem:[#allocation7 + $0x680] sm:$0xff]  ;;  %v4928_v32 = vld [vmem:[#allocation7 + $0x718] sm:$0xff] }
0x1817   : > { %5189 = vmatmul.mubr.f32.gmra.mrb[54].mxu1 %v14760_v3  ;;  %v4921_v35 = vld [vmem:[#allocation7 + $0x6e0] sm:$0xff] }
0x1818   : > { %11207 = vmatpush1.bf16.msra.mxu1 %v11206_v13  ;;  %5259 = vmatprep.mubr.f32.mxu1 %v14750_v59  ;;  %v5021_v13 = vld [vmem:[#allocation7 + $0xa00] sm:$0xff] }
0x1819   : > { %11209 = vmatprep.subr.bf16.mxu1 %v11208_v52  ;;  %v5028_v52 = vld [vmem:[#allocation7 + $0xa38] sm:$0xff]  ;;  %v11242_v17 = vpack.c.bf16 %v5021_v13, %v5015_v25 }
0x181a   : > { %v11244_v22 = vpack.c.bf16 %v5034_v63, %v5028_v52  ;;  %v4940_v25 = vld [vmem:[#allocation7 + $0x778] sm:$0xff]  ;;  %v4933_v63 = vld [vmem:[#allocation7 + $0x740] sm:$0xff] }
0x181c   : > { %11211 = vmatpush1.bf16.msra.mxu1 %v11210_v19  ;;  %v5033_v19 = vld [vmem:[#allocation7 + $0xa60] sm:$0xff] }
0x181d   : > { %11213 = vmatprep.subr.bf16.mxu1 %v11212_v62  ;;  %v5040_v62 = vld [vmem:[#allocation7 + $0xa98] sm:$0xff]  ;;  %v11246_v37 = vpack.c.bf16 %v5033_v19, %v5027_v21 }
0x181e   : > { %v11248_v48 = vpack.c.bf16 %v5046_v55, %v5040_v62  ;;  %v4952_v21 = vld [vmem:[#allocation7 + $0x7d8] sm:$0xff]  ;;  %v4945_v55 = vld [vmem:[#allocation7 + $0x7a0] sm:$0xff] }
0x1820   : > { %11215 = vmatpush1.bf16.msra.mxu1 %v11214_v39  ;;  %v5045_v39 = vld [vmem:[#allocation7 + $0xac0] sm:$0xff] }
0x1821   : > { %11217 = vmatprep.subr.bf16.mxu1 %v11216_v11  ;;  %v5052_v11 = vld [vmem:[#allocation7 + $0xaf8] sm:$0xff]  ;;  %v11250_v6 = vpack.c.bf16 %v5045_v39, %v5039_v44 }
0x1822   : > { %v11252_v5 = vpack.c.bf16 %v5058_v42, %v5052_v11  ;;  %v4964_v44 = vld [vmem:[#allocation7 + $0x838] sm:$0xff]  ;;  %v4957_v42 = vld [vmem:[#allocation7 + $0x800] sm:$0xff] }
0x1824   : > { %11219 = vmatpush1.bf16.msra.mxu1 %v11218_v18  ;;  %v5057_v18 = vld [vmem:[#allocation7 + $0xb20] sm:$0xff] }
0x1825   : > { %11221 = vmatprep.subr.bf16.mxu1 %v11220_v9  ;;  %v5064_v9 = vld [vmem:[#allocation7 + $0xb58] sm:$0xff]  ;;  %v11254_v38 = vpack.c.bf16 %v5057_v18, %v5051_v12 }
0x1826   : > { %v11256_v15 = vpack.c.bf16 %v5070_v41, %v5064_v9  ;;  %v4976_v12 = vld [vmem:[#allocation7 + $0x898] sm:$0xff]  ;;  %v4969_v41 = vld [vmem:[#allocation7 + $0x860] sm:$0xff] }
0x1828   : > { %11223 = vmatpush1.bf16.msra.mxu1 %v11222_v54  ;;  %v5069_v54 = vld [vmem:[#allocation7 + $0xb80] sm:$0xff] }
0x1829   : > { %11225 = vmatprep.subr.bf16.mxu1 %v11224_v4  ;;  %v5076_v4 = vld [vmem:[#allocation7 + $0xbb8] sm:$0xff]  ;;  %v11258_v20 = vpack.c.bf16 %v5069_v54, %v5063_v36 }
0x182a   : > { %v11260_v61 = vpack.c.bf16 %v5082_v50, %v5076_v4  ;;  %v4988_v36 = vld [vmem:[#allocation7 + $0x8f8] sm:$0xff]  ;;  %v4981_v50 = vld [vmem:[#allocation7 + $0x8c0] sm:$0xff] }
0x182c   : > { %11227 = vmatpush1.bf16.msra.mxu1 %v11226_v58  ;;  %v5081_v58 = vld [vmem:[#allocation7 + $0xbe0] sm:$0xff] }
0x182d   : > { %11229 = vmatprep.subr.bf16.mxu1 %v11228_v14  ;;  %v4898_v14 = vld [vmem:[#allocation7 + $0x628] sm:$0xff]  ;;  %v11262_v16 = vpack.c.bf16 %v5081_v58, %v5075_v23  ;;  %v5000_v23 = vld [vmem:[#allocation7 + $0x958] sm:$0xff] }
0x182e   : > { %v11264_v51 = vpack.c.bf16 %v4904_v40, %v4898_v14  ;;  %v4993_v40 = vld [vmem:[#allocation7 + $0x920] sm:$0xff] }
0x1830   : > { %11231 = vmatpush1.bf16.msra.mxu1 %v11230_v26  ;;  %v4903_v26 = vld [vmem:[#allocation7 + $0x650] sm:$0xff] }
0x1831   : > { %11233 = vmatprep.subr.bf16.mxu1 %v11232_v30  ;;  %v4910_v30 = vld [vmem:[#allocation7 + $0x688] sm:$0xff]  ;;  %v11266_v28 = vpack.c.bf16 %v4903_v26, %v4897_v45  ;;  %v5012_v45 = vld [vmem:[#allocation7 + $0x9b8] sm:$0xff] }
0x1832   : > { %v11268_v8 = vpack.c.bf16 %v4916_v27, %v4910_v30  ;;  %v5005_v27 = vld [vmem:[#allocation7 + $0x980] sm:$0xff] }
0x1834   : > { %11235 = vmatpush1.bf16.msra.mxu1 %v11234_v10  ;;  %v4915_v10 = vld [vmem:[#allocation7 + $0x6b0] sm:$0xff] }
0x1835   : > { %11237 = vmatprep.subr.bf16.mxu1 %v11236_v34  ;;  %v4922_v34 = vld [vmem:[#allocation7 + $0x6e8] sm:$0xff]  ;;  %v11270_v31 = vpack.c.bf16 %v4915_v10, %v4909_v29  ;;  %v5024_v29 = vld [vmem:[#allocation7 + $0xa18] sm:$0xff] }
0x1836   : > { %v11272_v56 = vpack.c.bf16 %v4928_v32, %v4922_v34  ;;  %v5017_v32 = vld [vmem:[#allocation7 + $0x9e0] sm:$0xff] }
0x1838   : > { %11239 = vmatpush1.bf16.msra.mxu1 %v11238_v24  ;;  %v4927_v24 = vld [vmem:[#allocation7 + $0x710] sm:$0xff] }
0x1839   : > { %11241 = vmatprep.subr.bf16.mxu1 %v11240_v53  ;;  %v4934_v53 = vld [vmem:[#allocation7 + $0x748] sm:$0xff]  ;;  %v11274_v13 = vpack.c.bf16 %v4927_v24, %v4921_v35  ;;  %v5036_v35 = vld [vmem:[#allocation7 + $0xa78] sm:$0xff] }
0x183a   : > { %v11276_v52 = vpack.c.bf16 %v4940_v25, %v4934_v53  ;;  %v5029_v25 = vld [vmem:[#allocation7 + $0xa40] sm:$0xff] }
0x183c   : > { %11243 = vmatpush1.bf16.msra.mxu1 %v11242_v17  ;;  %v4939_v17 = vld [vmem:[#allocation7 + $0x770] sm:$0xff] }
0x183d   : > { %11245 = vmatprep.subr.bf16.mxu1 %v11244_v22  ;;  %v4946_v22 = vld [vmem:[#allocation7 + $0x7a8] sm:$0xff]  ;;  %v11278_v19 = vpack.c.bf16 %v4939_v17, %v4933_v63  ;;  %v5048_v63 = vld [vmem:[#allocation7 + $0xad8] sm:$0xff] }
0x183e   : > { %v11280_v62 = vpack.c.bf16 %v4952_v21, %v4946_v22  ;;  %v5041_v21 = vld [vmem:[#allocation7 + $0xaa0] sm:$0xff] }
0x1840   : > { %11247 = vmatpush1.bf16.msra.mxu1 %v11246_v37  ;;  %v4951_v37 = vld [vmem:[#allocation7 + $0x7d0] sm:$0xff] }
0x1841   : > { %11249 = vmatprep.subr.bf16.mxu1 %v11248_v48  ;;  %v4958_v48 = vld [vmem:[#allocation7 + $0x808] sm:$0xff]  ;;  %v11282_v39 = vpack.c.bf16 %v4951_v37, %v4945_v55  ;;  %v5060_v55 = vld [vmem:[#allocation7 + $0xb38] sm:$0xff] }
0x1842   : > { %v11284_v11 = vpack.c.bf16 %v4964_v44, %v4958_v48  ;;  %v5053_v44 = vld [vmem:[#allocation7 + $0xb00] sm:$0xff] }
0x1844   : > { %11251 = vmatpush1.bf16.msra.mxu1 %v11250_v6  ;;  %v4963_v6 = vld [vmem:[#allocation7 + $0x830] sm:$0xff] }
0x1845   : > { %11253 = vmatprep.subr.bf16.mxu1 %v11252_v5  ;;  %v4970_v5 = vld [vmem:[#allocation7 + $0x868] sm:$0xff]  ;;  %v11286_v18 = vpack.c.bf16 %v4963_v6, %v4957_v42  ;;  %v5072_v42 = vld [vmem:[#allocation7 + $0xb98] sm:$0xff] }
0x1846   : > { %v11288_v9 = vpack.c.bf16 %v4976_v12, %v4970_v5  ;;  %v5065_v12 = vld [vmem:[#allocation7 + $0xb60] sm:$0xff] }
0x1848   : > { %11255 = vmatpush1.bf16.msra.mxu1 %v11254_v38  ;;  %v4975_v38 = vld [vmem:[#allocation7 + $0x890] sm:$0xff] }
0x1849   : > { %11257 = vmatprep.subr.bf16.mxu1 %v11256_v15  ;;  %v4982_v15 = vld [vmem:[#allocation7 + $0x8c8] sm:$0xff]  ;;  %v11290_v54 = vpack.c.bf16 %v4975_v38, %v4969_v41  ;;  %v5084_v41 = vld [vmem:[#allocation7 + $0xbf8] sm:$0xff] }
0x184a   : > { %v11292_v4 = vpack.c.bf16 %v4988_v36, %v4982_v15  ;;  %v5077_v36 = vld [vmem:[#allocation7 + $0xbc0] sm:$0xff] }
0x184c   : > { %11259 = vmatpush1.bf16.msra.mxu1 %v11258_v20  ;;  %v4987_v20 = vld [vmem:[#allocation7 + $0x8f0] sm:$0xff] }
0x184d   : > { %11261 = vmatprep.subr.bf16.mxu1 %v11260_v61  ;;  %v4994_v61 = vld [vmem:[#allocation7 + $0x928] sm:$0xff]  ;;  %v11294_v58 = vpack.c.bf16 %v4987_v20, %v4981_v50 }
0x184e   : > { %v11296_v14 = vpack.c.bf16 %v5000_v23, %v4994_v61  ;;  %v14772_v50 = vld [vmem:[#allocation8 + $0x6] sm:$0x3f] }
0x184f   : > { %v5091_v20 = vrot.slane %v14772_v50, %v13518_v33 }
0x1850   : > { %11263 = vmatpush1.bf16.msra.mxu1 %v11262_v16  ;;  %v4999_v16 = vld [vmem:[#allocation7 + $0x950] sm:$0xff] }
0x1851   : > { %11265 = vmatprep.subr.bf16.mxu1 %v11264_v51  ;;  %v5006_v51 = vld [vmem:[#allocation7 + $0x988] sm:$0xff]  ;;  %v11298_v26 = vpack.c.bf16 %v4999_v16, %v4993_v40 }
0x1852   : > { %v11300_v30 = vpack.c.bf16 %v5012_v45, %v5006_v51  ;;  %v5099_v45 = vrot.slane %v14772_v50, %v13535_v46 }
0x1853   : > { %5260 = vmatmul.mubr.f32.vlgmr.msra.gmra.mrb[56].mxu1 %v14752_v57 }
0x1854   : > { %5265 = vmatprep.mubr.f32.mxu1 %v14758_v7  ;;  %11267 = vmatpush1.bf16.msra.mxu1 %v11266_v28  ;;  %v5011_v28 = vld [vmem:[#allocation7 + $0x9b0] sm:$0xff] }
0x1855   : > { %11269 = vmatprep.subr.bf16.mxu1 %v11268_v8  ;;  %v5018_v8 = vld [vmem:[#allocation7 + $0x9e8] sm:$0xff]  ;;  %v11302_v10 = vpack.c.bf16 %v5011_v28, %v5005_v27 }
0x1856   : > { %v11304_v34 = vpack.c.bf16 %v5024_v29, %v5018_v8 }
0x1857   : > { %5266 = vmatmul.mubr.f32.gmra.mrb[58].mxu1 %v14760_v3 }
0x1858   : > { %11271 = vmatpush1.bf16.msra.mxu1 %v11270_v31  ;;  %5336 = vmatprep.mubr.f32.mxu1 %v14750_v59  ;;  %v5023_v31 = vld [vmem:[#allocation7 + $0xa10] sm:$0xff] }
0x1859   : > { %11273 = vmatprep.subr.bf16.mxu1 %v11272_v56  ;;  %v5030_v56 = vld [vmem:[#allocation7 + $0xa48] sm:$0xff]  ;;  %v11306_v24 = vpack.c.bf16 %v5023_v31, %v5017_v32 }
0x185a   : > { %v11308_v53 = vpack.c.bf16 %v5036_v35, %v5030_v56 }
0x185c   : > { %11275 = vmatpush1.bf16.msra.mxu1 %v11274_v13  ;;  %v5035_v13 = vld [vmem:[#allocation7 + $0xa70] sm:$0xff] }
0x185d   : > { %11277 = vmatprep.subr.bf16.mxu1 %v11276_v52  ;;  %v5042_v52 = vld [vmem:[#allocation7 + $0xaa8] sm:$0xff]  ;;  %v11310_v17 = vpack.c.bf16 %v5035_v13, %v5029_v25  ;;  %v5111_v13 = vrot.slane %v14772_v50, %v13566_v2 }
0x185e   : > { %v11312_v22 = vpack.c.bf16 %v5048_v63, %v5042_v52 }
0x1860   : > { %11279 = vmatpush1.bf16.msra.mxu1 %v11278_v19  ;;  %v5047_v19 = vld [vmem:[#allocation7 + $0xad0] sm:$0xff] }
0x1861   : > { %11281 = vmatprep.subr.bf16.mxu1 %v11280_v62  ;;  %v5054_v62 = vld [vmem:[#allocation7 + $0xb08] sm:$0xff]  ;;  %v11314_v37 = vpack.c.bf16 %v5047_v19, %v5041_v21 }
0x1862   : > { %v11316_v48 = vpack.c.bf16 %v5060_v55, %v5054_v62 }
0x1864   : > { %11283 = vmatpush1.bf16.msra.mxu1 %v11282_v39  ;;  %v5059_v39 = vld [vmem:[#allocation7 + $0xb30] sm:$0xff] }
0x1865   : > { %11285 = vmatprep.subr.bf16.mxu1 %v11284_v11  ;;  %v5066_v11 = vld [vmem:[#allocation7 + $0xb68] sm:$0xff]  ;;  %v11318_v6 = vpack.c.bf16 %v5059_v39, %v5053_v44 }
0x1866   : > { %v11320_v5 = vpack.c.bf16 %v5072_v42, %v5066_v11 }
0x1868   : > { %11287 = vmatpush1.bf16.msra.mxu1 %v11286_v18  ;;  %v5071_v18 = vld [vmem:[#allocation7 + $0xb90] sm:$0xff] }
0x1869   : > { %11289 = vmatprep.subr.bf16.mxu1 %v11288_v9  ;;  %v5078_v9 = vld [vmem:[#allocation7 + $0xbc8] sm:$0xff]  ;;  %v11322_v38 = vpack.c.bf16 %v5071_v18, %v5065_v12 }
0x186a   : > { %v11324_v15 = vpack.c.bf16 %v5084_v41, %v5078_v9 }
0x186c   : > { %11291 = vmatpush1.bf16.msra.mxu1 %v11290_v54  ;;  %v5083_v54 = vld [vmem:[#allocation7 + $0xbf0] sm:$0xff] }
0x186d   : > { %11293 = vmatprep.subr.bf16.mxu1 %v11292_v4  ;;  %v11326_v4 = vpack.c.bf16 %v5083_v54, %v5077_v36 }
0x1870   : > { %11295 = vmatpush1.bf16.msra.mxu1 %v11294_v58 }
0x1871   : > { %11297 = vmatprep.subr.bf16.mxu1 %v11296_v14 }
0x1874   : > { %11299 = vmatpush1.bf16.msra.mxu1 %v11298_v26 }
0x1875   : > { %11301 = vmatprep.subr.bf16.mxu1 %v11300_v30  ;;  %v5103_v30 = vrot.slane %v14772_v50, %v13538_v47 }
0x1878   : > { %11303 = vmatpush1.bf16.msra.mxu1 %v11302_v10 }
0x1879   : > { %11305 = vmatprep.subr.bf16.mxu1 %v11304_v34 }
0x187c   : > { %11307 = vmatpush1.bf16.msra.mxu1 %v11306_v24 }
0x187d   : > { %11309 = vmatprep.subr.bf16.mxu1 %v11308_v53  ;;  %v5107_v53 = vrot.slane %v14772_v50, %v13563_v1 }
0x1880   : > { %11311 = vmatpush1.bf16.msra.mxu1 %v11310_v17 }
0x1881   : > { %11313 = vmatprep.subr.bf16.mxu1 %v11312_v22 }
0x1884   : > { %11315 = vmatpush1.bf16.msra.mxu1 %v11314_v37 }
0x1885   : > { %11317 = vmatprep.subr.bf16.mxu1 %v11316_v48 }
0x1888   : > { %11319 = vmatpush1.bf16.msra.mxu1 %v11318_v6 }
0x1889   : > { %11321 = vmatprep.subr.bf16.mxu1 %v11320_v5 }
0x188c   : > { %11323 = vmatpush1.bf16.msra.mxu1 %v11322_v38 }
0x188d   : > { %11325 = vmatprep.subr.bf16.mxu1 %v11324_v15 }
0x1890   : > { %11327 = vmatpush1.bf16.msra.mxu1 %v11326_v4 }
0x1893   : > { %5337 = vmatmul.mubr.f32.vlgmr.msra.gmra.mrb[60].mxu1 %v14752_v57 }
0x1894   : > { %5342 = vmatprep.mubr.f32.mxu1 %v14758_v7 }
0x1897   : > { %5343 = vmatmul.mubr.f32.gmra.mrb[62].mxu1 %v14760_v3 }
0x18e6   : > { %v5184_v61 = vpop.f32.mrb[52].mxu1 }
0x18e7   : > { %v14776_v23 = vadd.f32 %v5184_v61, %v5091_v20  ;;  %v14778_v58 = vpop.f32.mrb[53].mxu1 }
0x18e9   : > { %9932 = vmatprep.mubr.msk.f32.mxu1 %vm1740_vm1, %v14776_v23 }
0x18ea   : > { %v5190_v14 = vpop.f32.mrb[54].mxu1 }
0x18eb   : > { %v14782_v40 = vadd.f32 %v5190_v14, %v5091_v20  ;;  %v14784_v16 = vpop.f32.mrb[55].mxu1 }
0x1926   : > { %v5261_v51 = vpop.f32.mrb[56].mxu1 }
0x1927   : > { %v5263_v26 = vpop.f32.mrb[57].mxu1  ;;  %v5262_v28 = vadd.f32 %v5261_v51, %v5099_v45 }
0x1928   : > { %v5264_v10 = vadd.f32 %v5263_v26, %v5103_v30 }
0x192a   : > { %v5267_v27 = vpop.f32.mrb[58].mxu1 }
0x192b   : > { %v5268_v8 = vadd.f32 %v5267_v27, %v5099_v45  ;;  %v5269_v29 = vpop.f32.mrb[59].mxu1 }
0x192c   : > { %v5270_v34 = vadd.f32 %v5269_v29, %v5103_v30 }
0x192d   : > { %v14790_v32 = vpack.i.bf16 %v5268_v8, %v5262_v28  ;;  %v11328_v31 = vpack.c.bf16 %v5268_v8, %v5262_v28 }
0x192e   : > { %v14792_v56 = vpack.c.bf16 %v5270_v34, %v5264_v10  ;;  %v14794_v35 = vpack.i.bf16 %v5270_v34, %v5264_v10 }
0x192f   : > { %12520 = vrot.lane.b32.xlu1 %v14790_v32, %s13076_s26  ;;  %12515 = vrot.lane.b32.xlu0 %v14790_v32, %s13075_s30 }
0x1930   : > { %11330 = vmatprep.subr.msk.bf16.mxu1 %vm13546_vm2, %v11328_v31 }
0x1931   : > { %11333 = vmatpush3.bf16.xpose.msk.msra.mxu1 %vm13546_vm2, %v11328_v31 }
0x1933   : > { %5543 = vrot.lane.b32.xlu0 %v14782_v40, %s13075_s30  ;;  %5541 = vrot.lane.b32.xlu1 %v14776_v23, %s13075_s30 }
0x1937   : > { %5747 = vrot.lane.b32.xlu0 %v14782_v40, %s13076_s26  ;;  %5745 = vrot.lane.b32.xlu1 %v14776_v23, %s13076_s26 }
0x1938   : > { %9933 = vmatmul.mubr.msk.f32.vlgmr.msra.gmra.mrb[64].mxu1 %vm1740_vm1, %v14782_v40 }
0x1966   : > { %v5338_v24 = vpop.f32.mrb[60].mxu1 }
0x1967   : > { %v5340_v25 = vpop.f32.mrb[61].mxu1  ;;  %v5339_v63 = vadd.f32 %v5338_v24, %v5107_v53 }
0x1968   : > { %v5341_v21 = vadd.f32 %v5340_v25, %v5111_v13 }
0x196a   : > { %v5344_v52 = vpop.f32.mrb[62].mxu1 }
0x196b   : > { %v5345_v17 = vadd.f32 %v5344_v52, %v5107_v53  ;;  %v5346_v22 = vpop.f32.mrb[63].mxu1 }
0x196c   : > { %v5347_v19 = vadd.f32 %v5346_v22, %v5111_v13 }
0x196d   : > { %v11334_v62 = vpack.c.bf16 %v5345_v17, %v5339_v63  ;;  %v14818_v55 = vpack.i.bf16 %v5345_v17, %v5339_v63 }
0x196e   : > { %v14820_v37 = vpack.c.bf16 %v5347_v19, %v5341_v21  ;;  %v14822_v48 = vpack.i.bf16 %v5347_v19, %v5341_v21 }
0x196f   : > { %11335 = vmatprep.subr.bf16.mxu0 %v11334_v62 }
0x1970   : > { %11337 = vmatpush3.bf16.msra.mxu0 %v11334_v62 }
0x19a1   : > { %v12521_v44 = vpop.permute.xlu1 %12520  ;;  %v12516_v39 = vpop.permute.xlu0 %12515 }
0x19a2   : > { %v12523_v11 = vunpack.i.h.bf16 %v12521_v44  ;;  %v12522_v42 = vunpack.i.l.bf16 %v12521_v44  ;;  %v12518_v6 = vunpack.i.h.bf16 %v12516_v39  ;;  %v12517_v5 = vunpack.i.l.bf16 %v12516_v39 }
0x19a4   : > { %v11338_v12 = vpack.c.bf16 %v12518_v6, %v12517_v5  ;;  %v11348_v9 = vpack.c.bf16 %v12523_v11, %v12522_v42  ;;  %v5095_v6 = vrot.slane %v14772_v50, %v13651_v43 }
0x19a5   : > { %v5542_v18 = vpop.permute.xlu1 %5541  ;;  %v5544_v41 = vpop.permute.xlu0 %5543 }
0x19a6   : > { %11340 = vmatprep.subr.msk.bf16.mxu1 %vm13546_vm2, %v11338_v12  ;;  %9946 = vmatprep.mubr.msk.f32.mxu1 %vm1740_vm1, %v5542_v18  ;;  %v14869_v5 = vadd.f32 %v14778_v58, %v5095_v6  ;;  %v14879_v18 = vadd.f32 %v14784_v16, %v5095_v6 }
0x19a7   : > { %11343 = vmatpush3.bf16.xpose.msk.msra.mxu1 %vm13546_vm2, %v11338_v12 }
0x19a8   : > { %11350 = vmatprep.subr.msk.bf16.mxu1 %vm13546_vm2, %v11348_v9 }
0x19a9   : > { %v5746_v38 = vpop.permute.xlu1 %5745  ;;  %v5748_v15 = vpop.permute.xlu0 %5747 }
0x19ae   : > { %9947 = vmatmul.mubr.msk.f32.vlgmr.msra.gmra.mrb[66].mxu1 %vm1740_vm1, %v5544_v41 }
0x19af   : > { %11353 = vmatpush3.bf16.xpose.msk.msra.mxu1 %vm13546_vm2, %v11348_v9  ;;  %9960 = vmatprep.mubr.msk.f32.mxu1 %vm1740_vm1, %v5746_v38 }
0x19b6   : > { %9961 = vmatmul.mubr.msk.f32.vlgmr.msra.gmra.mrb[68].mxu1 %vm1740_vm1, %v5748_v15 }
0x1a0b   : > { %v14836_v36 = vpop.f32.mrb[64].mxu1 }
0x1a0c   : > { %v14838_v54 = vpop.f32.mrb[65].mxu1 }
0x1a81   : > { %v14840_v4 = vpop.f32.mrb[66].mxu1 }
0x1a82   : > { %v14842_v20 = vpop.f32.mrb[67].mxu1 }
0x1a89   : > { %v9962_v61 = vpop.f32.mrb[68].mxu1 }
0x1a8a   : > { %v5837_v14 = vmul.f32 0.17677669, %v9962_v61  ;;  %v5827_v51 = vpop.f32.mrb[69].mxu1 }
0x1a8b   : > { %v5836_v45 = vmul.f32 0.17677669, %v5827_v51 }
0x1a8c   : > { %v5841_v26 = vsel %vm1830_vm3, %v5837_v14, -inf }
0x1a8d   : > { %5842 = vmax.xlane.f32.xlu0 %v5841_v26  ;;  %v5838_v30 = vsel %vm1830_vm3, %v5836_v45, -inf }
0x1a8e   : > { %5839 = vmax.xlane.f32.xlu1 %v5838_v30 }
0x1b1a   : > { %v5843_v27 = vpop.xlane.xlu0 %5842 }
0x1b1b   : > { %v5845_v28 = vsub.f32 %v5837_v14, %v5843_v27  ;;  %v5840_v8 = vpop.xlane.xlu1 %5839 }
0x1b1c   : > { %v5844_v29 = vsub.f32 %v5836_v45, %v5840_v8 }
0x1b1d   : > { %v5848_v10 = vmul.f32 1.442695, %v5845_v28 }
0x1b1e   : > { %v5846_v34 = vmul.f32 1.442695, %v5844_v29 }
0x1b1f   : > { %12676 = vpow2.f32 %v5848_v10 }
0x1b20   : > { %12678 = vpow2.f32 %v5846_v34 }
0x1b29   : > { %v12677_v31 = vpop.eup %12676 }
0x1b2a   : > { %v12679_v24 = vpop.eup %12678  ;;  %v5853_v53 = vsel %vm1830_vm3, %v12677_v31, 0.0 }
0x1b2b   : > { %5854 = vadd.xlane.f32.xlu1 %v5853_v53  ;;  %v5850_v25 = vsel %vm1830_vm3, %v12679_v24, 0.0 }
0x1b2c   : > { %5851 = vadd.xlane.f32.xlu0 %v5850_v25 }
0x1b3c   : > { %12530 = vrot.lane.b32.xlu1 %v14790_v32, %s13077_s18 }
0x1b40   : > { %5947 = vrot.lane.b32.xlu1 %v14776_v23, %s13077_s18 }
0x1b42   : > { %12525 = vrot.lane.b32.xlu0 %v14818_v55, %s13076_s26 }
0x1b46   : > { %5949 = vrot.lane.b32.xlu0 %v14782_v40, %s13077_s18 }
0x1bb8   : > { %v5855_v13 = vpop.xlane.xlu1 %5854 }
0x1bb9   : > { %12680 = vrcp.f32 %v5855_v13  ;;  %v5852_v52 = vpop.xlane.xlu0 %5851 }
0x1bba   : > { %12682 = vrcp.f32 %v5852_v52 }
0x1bbc   : > { %v12531_v63 = vpop.permute.xlu1 %12530 }
0x1bbd   : > { %v12526_v17 = vpop.permute.xlu0 %12525  ;;  %v12533_v22 = vunpack.i.h.bf16 %v12531_v63  ;;  %v12532_v21 = vunpack.i.l.bf16 %v12531_v63 }
0x1bbe   : > { %v12528_v19 = vunpack.i.h.bf16 %v12526_v17  ;;  %v12527_v62 = vunpack.i.l.bf16 %v12526_v17 }
0x1bbf   : > { %v11358_v44 = vpack.c.bf16 %v12533_v22, %v12532_v21 }
0x1bc0   : > { %v11354_v32 = vpack.c.bf16 %v12528_v19, %v12527_v62  ;;  %v5948_v42 = vpop.permute.xlu1 %5947 }
0x1bc1   : > { %v5950_v12 = vpop.permute.xlu0 %5949 }
0x1bc2   : > { %11355 = vmatprep.subr.bf16.mxu1 %v11354_v32 }
0x1bc3   : > { %v12681_v23 = vpop.eup %12680  ;;  %11357 = vmatpush3.bf16.msra.mxu1 %v11354_v32 }
0x1bc4   : > { %v12683_v39 = vpop.eup %12682  ;;  %11360 = vmatprep.subr.msk.bf16.mxu1 %vm13546_vm2, %v11358_v44  ;;  %v5859_v11 = vmul.f32 %v12681_v23, %v12677_v31 }
0x1bc5   : > { %v5857_v40 = vmul.f32 %v12683_v39, %v12679_v24 }
0x1bc7   : > { %9967 = vmatprep.mubr.msk.f32.mxu1 %vm1830_vm3, %v5857_v40 }
0x1bc8   : > { %9968 = vmatmul.mubr.msk.f32.vlgmr.msra.gmra.mrb[70].mxu1 %vm1830_vm3, %v5859_v11 }
0x1bc9   : > { %9974 = vmatprep.mubr.msk.f32.mxu1 %vm1740_vm1, %v5948_v42 }
0x1bcc   : > { %11363 = vmatpush3.bf16.xpose.msk.msra.mxu1 %vm13546_vm2, %v11358_v44 }
0x1bcd   : > { %11370 = vmatprep.subr.msk.bf16.mxu1 %vm13546_vm2, %v14792_v56 }
0x1bd3   : > { %9975 = vmatmul.mubr.msk.f32.vlgmr.msra.gmra.mrb[72].mxu1 %vm1740_vm1, %v5950_v12 }
0x1bd4   : > { %11373 = vmatpush3.bf16.xpose.msk.msra.mxu1 %vm13546_vm2, %v14792_v56  ;;  %9988 = vmatprep.mubr.msk.f32.mxu1 %vm1740_vm1, %v14869_v5 }
0x1bd5   : > { %11375 = vmatprep.subr.bf16.mxu1 %v14820_v37 }
0x1bdb   : > { %9989 = vmatmul.mubr.msk.f32.vlgmr.msra.gmra.mrb[74].mxu1 %vm1740_vm1, %v14879_v18 }
0x1bdc   : > { %11377 = vmatpush3.bf16.msra.mxu1 %v14820_v37 }
0x1c9b   : > { %v14884_v50 = vpop.f32.mrb[70].mxu1 }
0x1c9c   : > { %v14886_v58 = vpop.f32.mrb[71].mxu1 }
0x1ca6   : > { %v14888_v9 = vpop.f32.mrb[72].mxu1 }
0x1ca7   : > { %v14890_v56 = vpop.f32.mrb[73].mxu1 }
0x1cae   : > { %v9990_v41 = vpop.f32.mrb[74].mxu1 }
0x1caf   : > { %v6237_v38 = vmul.f32 0.17677669, %v9990_v41  ;;  %v6227_v15 = vpop.f32.mrb[75].mxu1 }
0x1cb0   : > { %v6236_v61 = vmul.f32 0.17677669, %v6227_v15 }
0x1cb1   : > { %v6241_v16 = vsel %vm1830_vm3, %v6237_v38, -inf }
0x1cb2   : > { %6242 = vmax.xlane.f32.xlu0 %v6241_v16  ;;  %v6238_v14 = vsel %vm1830_vm3, %v6236_v61, -inf }
0x1cb3   : > { %6239 = vmax.xlane.f32.xlu1 %v6238_v14 }
0x1d3f   : > { %v6243_v51 = vpop.xlane.xlu0 %6242 }
0x1d40   : > { %v6245_v37 = vsub.f32 %v6237_v38, %v6243_v51  ;;  %v6240_v45 = vpop.xlane.xlu1 %6239 }
0x1d41   : > { %v6244_v26 = vsub.f32 %v6236_v61, %v6240_v45 }
0x1d42   : > { %v6248_v30 = vmul.f32 1.442695, %v6245_v37 }
0x1d43   : > { %v6246_v27 = vmul.f32 1.442695, %v6244_v26 }
0x1d44   : > { %12684 = vpow2.f32 %v6248_v30 }
0x1d45   : > { %12686 = vpow2.f32 %v6246_v27 }
0x1d4e   : > { %v12685_v28 = vpop.eup %12684 }
0x1d4f   : > { %v12687_v8 = vpop.eup %12686  ;;  %v6253_v29 = vsel %vm1830_vm3, %v12685_v28, 0.0 }
0x1d50   : > { %6254 = vadd.xlane.f32.xlu1 %v6253_v29  ;;  %v6250_v10 = vsel %vm1830_vm3, %v12687_v8, 0.0 }
0x1d51   : > { %6251 = vadd.xlane.f32.xlu0 %v6250_v10 }
0x1d61   : > { %12540 = vrot.lane.b32.xlu1 %v14794_v35, %s13076_s26 }
0x1d65   : > { %6341 = vrot.lane.b32.xlu1 %v14869_v5, %s13075_s30 }
0x1d67   : > { %12535 = vrot.lane.b32.xlu0 %v14794_v35, %s13075_s30 }
0x1d69   : > { %6545 = vrot.lane.b32.xlu1 %v14869_v5, %s13076_s26 }
0x1d6b   : > { %6343 = vrot.lane.b32.xlu0 %v14879_v18, %s13075_s30 }
0x1d6f   : > { %6547 = vrot.lane.b32.xlu0 %v14879_v18, %s13076_s26 }
0x1ddd   : > { %v6255_v34 = vpop.xlane.xlu1 %6254 }
0x1dde   : > { %12688 = vrcp.f32 %v6255_v34  ;;  %v6252_v31 = vpop.xlane.xlu0 %6251  ;;  %v14939_v34 = vmul.f32 0.17677669, %v14838_v54 }
0x1ddf   : > { %12690 = vrcp.f32 %v6252_v31  ;;  %v5437_v31 = vmul.f32 0.17677669, %v14836_v36  ;;  %v14957_v36 = vmul.f32 0.17677669, %v14890_v56 }
0x1de1   : > { %v12541_v52 = vpop.permute.xlu1 %12540 }
0x1de2   : > { %v12536_v24 = vpop.permute.xlu0 %12535  ;;  %v12543_v22 = vunpack.i.h.bf16 %v12541_v52  ;;  %v12542_v21 = vunpack.i.l.bf16 %v12541_v52 }
0x1de3   : > { %v12538_v53 = vunpack.i.h.bf16 %v12536_v24  ;;  %v12537_v25 = vunpack.i.l.bf16 %v12536_v24  ;;  %v14943_v24 = vmul.f32 0.17677669, %v14840_v4 }
0x1de4   : > { %v11388_v32 = vpack.c.bf16 %v12543_v22, %v12542_v21 }
0x1de5   : > { %v11378_v13 = vpack.c.bf16 %v12538_v53, %v12537_v25  ;;  %v6342_v44 = vpop.permute.xlu1 %6341  ;;  %v14948_v53 = vmul.f32 0.17677669, %v14842_v20  ;;  %v5637_v54 = vsel %vm1830_vm3, %v14943_v24, -inf }
0x1de6   : > { %v6344_v23 = vpop.permute.xlu0 %6343 }
0x1de7   : > { %11380 = vmatprep.subr.msk.bf16.mxu1 %vm13546_vm2, %v11378_v13  ;;  %v5634_v4 = vsel %vm1830_vm3, %v14948_v53, -inf }
0x1de8   : > { %v12689_v63 = vpop.eup %12688 }
0x1de9   : > { %v12691_v17 = vpop.eup %12690  ;;  %v6259_v62 = vmul.f32 %v12689_v63, %v12685_v28  ;;  %v6546_v39 = vpop.permute.xlu1 %6545 }
0x1dea   : > { %v6257_v19 = vmul.f32 %v12691_v17, %v12687_v8  ;;  %v6548_v40 = vpop.permute.xlu0 %6547 }
0x1dec   : > { %9995 = vmatprep.mubr.msk.f32.mxu1 %vm1830_vm3, %v6257_v19 }
0x1ded   : > { %9996 = vmatmul.mubr.msk.f32.vlgmr.msra.gmra.mrb[76].mxu1 %vm1830_vm3, %v6259_v62 }
0x1dee   : > { %11383 = vmatpush3.bf16.xpose.msk.msra.mxu1 %vm13546_vm2, %v11378_v13  ;;  %10002 = vmatprep.mubr.msk.f32.mxu1 %vm1740_vm1, %v6342_v44 }
0x1def   : > { %11390 = vmatprep.subr.msk.bf16.mxu1 %vm13546_vm2, %v11388_v32 }
0x1df5   : > { %10003 = vmatmul.mubr.msk.f32.vlgmr.msra.gmra.mrb[78].mxu1 %vm1740_vm1, %v6344_v23 }
0x1df6   : > { %11393 = vmatpush3.bf16.xpose.msk.msra.mxu1 %vm13546_vm2, %v11388_v32  ;;  %10016 = vmatprep.mubr.msk.f32.mxu1 %vm1740_vm1, %v6546_v39 }
0x1dfd   : > { %10017 = vmatmul.mubr.msk.f32.vlgmr.msra.gmra.mrb[80].mxu1 %vm1740_vm1, %v6548_v40 }
0x1ec0   : > { %v14922_v11 = vpop.f32.mrb[76].mxu1 }
0x1ec1   : > { %v14924_v42 = vpop.f32.mrb[77].mxu1 }
0x1ec8   : > { %v10004_v6 = vpop.f32.mrb[78].mxu1 }
0x1ec9   : > { %v6423_v12 = vpop.f32.mrb[79].mxu1  ;;  %v14961_v20 = vmul.f32 0.17677669, %v10004_v6 }
0x1eca   : > { %v14965_v13 = vmul.f32 0.17677669, %v6423_v12 }
0x1ecb   : > { %v6437_v56 = vsel %vm1830_vm3, %v14961_v20, -inf }
0x1ecc   : > { %v6434_v52 = vsel %vm1830_vm3, %v14965_v13, -inf }
0x1ed0   : > { %v10018_v41 = vpop.f32.mrb[80].mxu1 }
0x1ed1   : > { %v6637_v38 = vmul.f32 0.17677669, %v10018_v41  ;;  %v6627_v15 = vpop.f32.mrb[81].mxu1 }
0x1ed2   : > { %v6636_v61 = vmul.f32 0.17677669, %v6627_v15 }
0x1ed3   : > { %v6641_v16 = vsel %vm1830_vm3, %v6637_v38, -inf }
0x1ed4   : > { %6642 = vmax.xlane.f32.xlu0 %v6641_v16  ;;  %v6638_v14 = vsel %vm1830_vm3, %v6636_v61, -inf }
0x1ed5   : > { %6639 = vmax.xlane.f32.xlu1 %v6638_v14 }
0x1f61   : > { %v6643_v51 = vpop.xlane.xlu0 %6642 }
0x1f62   : > { %v6645_v37 = vsub.f32 %v6637_v38, %v6643_v51  ;;  %v6640_v45 = vpop.xlane.xlu1 %6639 }
0x1f63   : > { %v6644_v26 = vsub.f32 %v6636_v61, %v6640_v45 }
0x1f64   : > { %v6648_v30 = vmul.f32 1.442695, %v6645_v37 }
0x1f65   : > { %v6646_v27 = vmul.f32 1.442695, %v6644_v26 }
0x1f66   : > { %12692 = vpow2.f32 %v6648_v30 }
0x1f67   : > { %12694 = vpow2.f32 %v6646_v27 }
0x1f70   : > { %v12693_v28 = vpop.eup %12692 }
0x1f71   : > { %v12695_v8 = vpop.eup %12694  ;;  %v6653_v29 = vsel %vm1830_vm3, %v12693_v28, 0.0 }
0x1f72   : > { %6654 = vadd.xlane.f32.xlu1 %v6653_v29  ;;  %v6650_v10 = vsel %vm1830_vm3, %v12695_v8, 0.0 }
0x1f73   : > { %6651 = vadd.xlane.f32.xlu0 %v6650_v10 }
0x1f83   : > { %12550 = vrot.lane.b32.xlu1 %v14794_v35, %s13077_s18  ;;  %v5438_v35 = vsel %vm1830_vm3, %v14939_v34, -inf }
0x1f87   : > { %6747 = vrot.lane.b32.xlu1 %v14869_v5, %s13077_s18  ;;  %v5441_v5 = vsel %vm1830_vm3, %v5437_v31, -inf }
0x1f89   : > { %12545 = vrot.lane.b32.xlu0 %v14822_v48, %s13076_s26 }
0x1f8d   : > { %6749 = vrot.lane.b32.xlu0 %v14879_v18, %s13077_s18  ;;  %v14952_v18 = vmul.f32 0.17677669, %v14888_v9  ;;  %v6040_v9 = vsel %vm1830_vm3, %v14957_v36, -inf }
0x1f8f   : > { %v6043_v25 = vsel %vm1830_vm3, %v14952_v18, -inf }
0x1fab   : > { %5439 = vmax.xlane.f32.xlu1 %v5438_v35 }
0x1fac   : > { %5442 = vmax.xlane.f32.xlu0 %v5441_v5 }
0x1faf   : > { %5638 = vmax.xlane.f32.xlu1 %v5637_v54 }
0x1fb0   : > { %5635 = vmax.xlane.f32.xlu0 %v5634_v4 }
0x1fb3   : > { %6044 = vmax.xlane.f32.xlu1 %v6043_v25 }
0x1fb4   : > { %6041 = vmax.xlane.f32.xlu0 %v6040_v9 }
0x1fb7   : > { %6438 = vmax.xlane.f32.xlu1 %v6437_v56 }
0x1fb8   : > { %6435 = vmax.xlane.f32.xlu0 %v6434_v52 }
0x1fff   : > { %v6655_v63 = vpop.xlane.xlu1 %6654 }
0x2000   : > { %12696 = vrcp.f32 %v6655_v63  ;;  %v6652_v17 = vpop.xlane.xlu0 %6651 }
0x2001   : > { %12698 = vrcp.f32 %v6652_v17 }
0x2003   : > { %v12551_v22 = vpop.permute.xlu1 %12550 }
0x2004   : > { %v12546_v21 = vpop.permute.xlu0 %12545  ;;  %v12553_v19 = vunpack.i.h.bf16 %v12551_v22  ;;  %v12552_v62 = vunpack.i.l.bf16 %v12551_v22 }
0x2005   : > { %v12548_v32 = vunpack.i.h.bf16 %v12546_v21  ;;  %v12547_v44 = vunpack.i.l.bf16 %v12546_v21 }
0x2006   : > { %v11398_v39 = vpack.c.bf16 %v12553_v19, %v12552_v62 }
0x2007   : > { %v11394_v23 = vpack.c.bf16 %v12548_v32, %v12547_v44  ;;  %v6748_v38 = vpop.permute.xlu1 %6747 }
0x2008   : > { %v6750_v15 = vpop.permute.xlu0 %6749 }
0x2009   : > { %11395 = vmatprep.subr.bf16.mxu1 %v11394_v23 }
0x200a   : > { %v12697_v40 = vpop.eup %12696  ;;  %11397 = vmatpush3.bf16.msra.mxu1 %v11394_v23 }
0x200b   : > { %v12699_v6 = vpop.eup %12698  ;;  %11400 = vmatprep.subr.msk.bf16.mxu1 %vm13546_vm2, %v11398_v39  ;;  %v6659_v41 = vmul.f32 %v12697_v40, %v12693_v28 }
0x200c   : > { %v6657_v12 = vmul.f32 %v12699_v6, %v12695_v8 }
0x200e   : > { %10023 = vmatprep.mubr.msk.f32.mxu1 %vm1830_vm3, %v6657_v12 }
0x200f   : > { %10024 = vmatmul.mubr.msk.f32.vlgmr.msra.gmra.mrb[82].mxu1 %vm1830_vm3, %v6659_v41 }
0x2010   : > { %10030 = vmatprep.mubr.msk.f32.mxu1 %vm1740_vm1, %v6748_v38 }
0x2013   : > { %11403 = vmatpush3.bf16.xpose.msk.msra.mxu1 %vm13546_vm2, %v11398_v39 }
0x201a   : > { %10031 = vmatmul.mubr.msk.f32.vlgmr.msra.gmra.mrb[84].mxu1 %vm1740_vm1, %v6750_v15 }
0x2038   : > { %v5440_v61 = vpop.xlane.xlu1 %5439 }
0x2039   : > { %v5443_v16 = vpop.xlane.xlu0 %5442  ;;  %v5444_v45 = vsub.f32 %v14939_v34, %v5440_v61 }
0x203a   : > { %v5445_v37 = vsub.f32 %v5437_v31, %v5443_v16 }
0x203b   : > { %v5446_v10 = vmul.f32 1.442695, %v5444_v45 }
0x203c   : > { %v5639_v14 = vpop.xlane.xlu1 %5638  ;;  %v5448_v27 = vmul.f32 1.442695, %v5445_v37 }
0x203d   : > { %v5636_v51 = vpop.xlane.xlu0 %5635  ;;  %v5641_v28 = vsub.f32 %v14943_v24, %v5639_v14 }
0x203e   : > { %v5640_v35 = vsub.f32 %v14948_v53, %v5636_v51  ;;  %12700 = vpow2.f32 %v5448_v27 }
0x203f   : > { %v5644_v34 = vmul.f32 1.442695, %v5641_v28  ;;  %12702 = vpow2.f32 %v5446_v10 }
0x2040   : > { %v6045_v26 = vpop.xlane.xlu1 %6044  ;;  %v5642_v54 = vmul.f32 1.442695, %v5640_v35 }
0x2041   : > { %v6042_v8 = vpop.xlane.xlu0 %6041  ;;  %v6047_v5 = vsub.f32 %v14952_v18, %v6045_v26  ;;  %12704 = vpow2.f32 %v5644_v34 }
0x2042   : > { %v6046_v24 = vsub.f32 %v14957_v36, %v6042_v8  ;;  %12706 = vpow2.f32 %v5642_v54 }
0x2043   : > { %v6050_v9 = vmul.f32 1.442695, %v6047_v5 }
0x2044   : > { %v6439_v4 = vpop.xlane.xlu1 %6438  ;;  %v6048_v52 = vmul.f32 1.442695, %v6046_v24 }
0x2045   : > { %v6436_v25 = vpop.xlane.xlu0 %6435  ;;  %v6441_v56 = vsub.f32 %v14961_v20, %v6439_v4  ;;  %12708 = vpow2.f32 %v6050_v9 }
0x2046   : > { %v6440_v53 = vsub.f32 %v14965_v13, %v6436_v25  ;;  %12710 = vpow2.f32 %v6048_v52 }
0x2047   : > { %v6444_v21 = vmul.f32 1.442695, %v6441_v56 }
0x2048   : > { %v6442_v19 = vmul.f32 1.442695, %v6440_v53  ;;  %v14997_v62 = vpop.eup %12700 }
0x2049   : > { %v12703_v20 = vpop.eup %12702  ;;  %12712 = vpow2.f32 %v6444_v21  ;;  %v5453_v13 = vsel %vm1830_vm3, %v14997_v62, 0.0 }
0x204a   : > { %12714 = vpow2.f32 %v6442_v19  ;;  %v5450_v23 = vsel %vm1830_vm3, %v12703_v20, 0.0 }
0x204b   : > { %v15002_v44 = vpop.eup %12704 }
0x204c   : > { %v12707_v39 = vpop.eup %12706  ;;  %v5649_v40 = vsel %vm1830_vm3, %v15002_v44, 0.0 }
0x204d   : > { %v5646_v12 = vsel %vm1830_vm3, %v12707_v39, 0.0 }
0x204f   : > { %v15007_v6 = vpop.eup %12708 }
0x2050   : > { %v15010_v41 = vpop.eup %12710  ;;  %v6055_v38 = vsel %vm1830_vm3, %v15007_v6, 0.0 }
0x2051   : > { %v6052_v61 = vsel %vm1830_vm3, %v15010_v41, 0.0 }
0x2053   : > { %v15014_v15 = vpop.eup %12712 }
0x2054   : > { %v15018_v16 = vpop.eup %12714  ;;  %v6449_v14 = vsel %vm1830_vm3, %v15014_v15, 0.0 }
0x2055   : > { %v6446_v51 = vsel %vm1830_vm3, %v15018_v16, 0.0 }
0x20e2   : > { %v14982_v30 = vpop.f32.mrb[82].mxu1 }
0x20e3   : > { %v12594_v60 = vpack.i.bf16 %v14884_v50, %v14982_v30  ;;  %v14987_v29 = vpop.f32.mrb[83].mxu1 }
0x20e4   : > { %v12579_v31 = vpack.i.bf16 %v14886_v58, %v14987_v29 }
0x20ed   : > { %v10032_v63 = vpop.f32.mrb[84].mxu1 }
0x20ee   : > { %v6839_v17 = vmul.f32 0.17677669, %v10032_v63  ;;  %v6829_v22 = vpop.f32.mrb[85].mxu1 }
0x20ef   : > { %v6838_v18 = vmul.f32 0.17677669, %v6829_v22 }
0x20f0   : > { %v6843_v36 = vsel %vm1830_vm3, %v6839_v17, -inf }
0x20f1   : > { %6844 = vmax.xlane.f32.xlu1 %v6843_v36  ;;  %v6840_v32 = vsel %vm1830_vm3, %v6838_v18, -inf }
0x20f2   : > { %6841 = vmax.xlane.f32.xlu0 %v6840_v32 }
0x20f5   : > { %5454 = vadd.xlane.f32.xlu1 %v5453_v13 }
0x20f6   : > { %5451 = vadd.xlane.f32.xlu0 %v5450_v23 }
0x20f9   : > { %5650 = vadd.xlane.f32.xlu1 %v5649_v40 }
0x20fa   : > { %5647 = vadd.xlane.f32.xlu0 %v5646_v12 }
0x20fd   : > { %6056 = vadd.xlane.f32.xlu1 %v6055_v38 }
0x20fe   : > { %6053 = vadd.xlane.f32.xlu0 %v6052_v61 }
0x2101   : > { %6450 = vadd.xlane.f32.xlu1 %v6449_v14 }
0x2102   : > { %6447 = vadd.xlane.f32.xlu0 %v6446_v51 }
0x2112   : > { %12560 = vrot.lane.b32.xlu1 %v14818_v55, %s13077_s18 }
0x2118   : > { %12555 = vrot.lane.b32.xlu0 %v14818_v55, %s13075_s30 }
0x217e   : > { %v6845_v37 = vpop.xlane.xlu1 %6844 }
0x217f   : > { %v6847_v45 = vsub.f32 %v6839_v17, %v6845_v37  ;;  %v6842_v26 = vpop.xlane.xlu0 %6841 }
0x2180   : > { %v6846_v27 = vsub.f32 %v6838_v18, %v6842_v26 }
0x2181   : > { %v6850_v28 = vmul.f32 1.442695, %v6847_v45 }
0x2182   : > { %v6848_v8 = vmul.f32 1.442695, %v6846_v27  ;;  %v5455_v10 = vpop.xlane.xlu1 %5454 }
0x2183   : > { %12716 = vpow2.f32 %v6850_v28  ;;  %v5452_v35 = vpop.xlane.xlu0 %5451 }
0x2184   : > { %12718 = vpow2.f32 %v6848_v8 }
0x2185   : > { %12720 = vrcp.f32 %v5455_v10 }
0x2186   : > { %12722 = vrcp.f32 %v5452_v35  ;;  %v5651_v34 = vpop.xlane.xlu1 %5650 }
0x2187   : > { %v5648_v5 = vpop.xlane.xlu0 %5647 }
0x2188   : > { %12724 = vrcp.f32 %v5648_v5 }
0x2189   : > { %12726 = vrcp.f32 %v5651_v34 }
0x218a   : > { %v6057_v54 = vpop.xlane.xlu1 %6056 }
0x218b   : > { %v6054_v24 = vpop.xlane.xlu0 %6053 }
0x218c   : > { %12728 = vrcp.f32 %v6054_v24 }
0x218d   : > { %v15028_v4 = vpop.eup %12716  ;;  %12730 = vrcp.f32 %v6057_v54 }
0x218e   : > { %v15030_v55 = vpop.eup %12718  ;;  %v6451_v25 = vpop.xlane.xlu1 %6450  ;;  %v6855_v9 = vsel %vm1830_vm3, %v15028_v4, 0.0 }
0x218f   : > { %v12721_v56 = vpop.eup %12720  ;;  %v6448_v52 = vpop.xlane.xlu0 %6447  ;;  %6856 = vadd.xlane.f32.xlu1 %v6855_v9  ;;  %v6852_v53 = vsel %vm1830_vm3, %v15030_v55, 0.0 }
0x2190   : > { %v12723_v63 = vpop.eup %12722  ;;  %6853 = vadd.xlane.f32.xlu0 %v6852_v53  ;;  %v5459_v21 = vmul.f32 %v12721_v56, %v14997_v62  ;;  %12732 = vrcp.f32 %v6448_v52  ;;  %v7013_v52 = vld [vmem:[#allocation10 + $0x218] sm:$0xff]  ;;  %v7010_v53 = vld [vmem:[#allocation10 + $0x200] sm:$0xff] }
0x2191   : > { %v5457_v17 = vmul.f32 %v12723_v63, %v12703_v20  ;;  %12734 = vrcp.f32 %v6451_v25  ;;  %v7012_v63 = vld [vmem:[#allocation10 + $0x210] sm:$0xff] }
0x2192   : > { %v12725_v22 = vpop.eup %12724  ;;  %v12561_v18 = vpop.permute.xlu1 %12560 }
0x2193   : > { %9939 = vmatprep.mubr.msk.f32.mxu0 %vm1830_vm3, %v5457_v17  ;;  %v12556_v19 = vpop.permute.xlu0 %12555  ;;  %v5653_v36 = vmul.f32 %v12725_v22, %v12707_v39  ;;  %v12563_v32 = vunpack.i.h.bf16 %v12561_v18  ;;  %v12562_v13 = vunpack.i.l.bf16 %v12561_v18  ;;  %v12727_v38 = vpop.eup %12726  ;;  %v7015_v17 = vld [vmem:[#allocation10 + $0x228] sm:$0xff]  ;;  %v7017_v22 = vld [vmem:[#allocation10 + $0x238] sm:$0xff] }
0x2194   : > { %9940 = vmatmul.mubr.msk.f32.vlgmr.msra.gmra.mrb[20].mxu0 %vm1830_vm3, %v5459_v21  ;;  %v12558_v23 = vunpack.i.h.bf16 %v12556_v19  ;;  %v12557_v40 = vunpack.i.l.bf16 %v12556_v19  ;;  %v5655_v62 = vmul.f32 %v12727_v38, %v15002_v44  ;;  %v11410_v21 = vpack.c.bf16 %v7012_v63, %v7010_v53  ;;  %v7014_v19 = vld [vmem:[#allocation10 + $0x220] sm:$0xff]  ;;  %v7020_v38 = vld [vmem:[#allocation10 + $0x250] sm:$0xff] }
0x2195   : > { %9953 = vmatprep.mubr.msk.f32.mxu0 %vm1830_vm3, %v5653_v36  ;;  %v11364_v61 = vpack.c.bf16 %v12563_v32, %v12562_v13  ;;  %v11412_v18 = vpack.c.bf16 %v7017_v22, %v7015_v17  ;;  %v7016_v36 = vld [vmem:[#allocation10 + $0x230] sm:$0xff]  ;;  %v7019_v32 = vld [vmem:[#allocation10 + $0x248] sm:$0xff]  ;;  %v7021_v13 = vld [vmem:[#allocation10 + $0x258] sm:$0xff] }
0x2196   : > { %v11344_v12 = vpack.c.bf16 %v12558_v23, %v12557_v40  ;;  %v12729_v20 = vpop.eup %12728  ;;  %v11414_v23 = vpack.c.bf16 %v7016_v36, %v7014_v19  ;;  %v11416_v40 = vpack.c.bf16 %v7021_v13, %v7019_v32  ;;  %v7038_v63 = vld [vmem:[#allocation10 + $0x2e0] sm:$0xff]  ;;  %v7040_v17 = vld [vmem:[#allocation10 + $0x2f0] sm:$0xff]  ;;  %v7043_v22 = vld [vmem:[#allocation10 + $0x308] sm:$0xff] }
0x2197   : > { %v12731_v14 = vpop.eup %12730  ;;  %v6059_v39 = vmul.f32 %v12729_v20, %v15010_v41  ;;  %v7023_v20 = vld [vmem:[#allocation10 + $0x268] sm:$0xff]  ;;  %v7042_v36 = vld [vmem:[#allocation10 + $0x300] sm:$0xff]  ;;  %v7044_v32 = vld [vmem:[#allocation10 + $0x310] sm:$0xff] }
0x2198   : > { %11345 = vmatprep.subr.bf16.mxu0 %v11344_v12  ;;  %v6061_v37 = vmul.f32 %v12731_v14, %v15007_v6  ;;  %v7047_v13 = vld [vmem:[#allocation10 + $0x328] sm:$0xff] }
0x2199   : > { %11347 = vmatpush3.bf16.msra.mxu0 %v11344_v12  ;;  %v7018_v12 = vld [vmem:[#allocation10 + $0x240] sm:$0xff] }
0x219a   : > { %11365 = vmatprep.subr.bf16.mxu0 %v11364_v61  ;;  %v12733_v51 = vpop.eup %12732 }
0x219b   : > { %v6453_v45 = vmul.f32 %v12733_v51, %v15018_v16  ;;  %v12735_v35 = vpop.eup %12734  ;;  %v7024_v51 = vld [vmem:[#allocation10 + $0x270] sm:$0xff] }
0x219c   : > { %9954 = vmatmul.mubr.msk.f32.vlgmr.msra.gmra.mrb[22].mxu0 %vm1830_vm3, %v5655_v62  ;;  %v6455_v58 = vmul.f32 %v12735_v35, %v15014_v15  ;;  %v11418_v62 = vpack.c.bf16 %v7020_v38, %v7018_v12  ;;  %v7032_v35 = vld [vmem:[#allocation10 + $0x2b0] sm:$0xff]  ;;  %v7046_v38 = vld [vmem:[#allocation10 + $0x320] sm:$0xff] }
0x219d   : > { %11367 = vmatpush3.bf16.msra.mxu0 %v11364_v61  ;;  %9981 = vmatprep.mubr.msk.f32.mxu0 %vm1830_vm3, %v6059_v39  ;;  %v7025_v61 = vld [vmem:[#allocation10 + $0x278] sm:$0xff]  ;;  %v7022_v39 = vld [vmem:[#allocation10 + $0x260] sm:$0xff] }
0x219e   : > { %v11420_v14 = vpack.c.bf16 %v7025_v61, %v7023_v20  ;;  %v7048_v20 = vld [vmem:[#allocation10 + $0x330] sm:$0xff]  ;;  %v7051_v61 = vld [vmem:[#allocation10 + $0x348] sm:$0xff] }
0x21a0   : > { %12565 = vrot.lane.b32.xlu1 %v14822_v48, %s13075_s30  ;;  %9982 = vmatmul.mubr.msk.f32.vlgmr.msra.gmra.mrb[24].mxu0 %vm1830_vm3, %v6061_v37  ;;  %v7027_v37 = vld [vmem:[#allocation10 + $0x288] sm:$0xff] }
0x21a1   : > { %10009 = vmatprep.mubr.msk.f32.mxu0 %vm1830_vm3, %v6453_v45  ;;  %v7029_v45 = vld [vmem:[#allocation10 + $0x298] sm:$0xff] }
0x21a6   : > { %12570 = vrot.lane.b32.xlu0 %v14822_v48, %s13077_s18 }
0x21aa   : > { %12580 = vrot.lane.b32.xlu0 %v12579_v31, %s13076_s26 }
0x221c   : > { %v6857_v44 = vpop.xlane.xlu1 %6856 }
0x221d   : > { %12736 = vrcp.f32 %v6857_v44  ;;  %v6854_v6 = vpop.xlane.xlu0 %6853  ;;  %v11422_v44 = vpack.c.bf16 %v7024_v51, %v7022_v39  ;;  %v7050_v51 = vld [vmem:[#allocation10 + $0x340] sm:$0xff] }
0x221e   : > { %12738 = vrcp.f32 %v6854_v6  ;;  %v11424_v6 = vpack.c.bf16 %v7029_v45, %v7027_v37  ;;  %v7052_v37 = vld [vmem:[#allocation10 + $0x350] sm:$0xff]  ;;  %v7055_v45 = vld [vmem:[#allocation10 + $0x368] sm:$0xff] }
0x2220   : > { %v12566_v41 = vpop.permute.xlu1 %12565 }
0x2221   : > { %v12568_v16 = vunpack.i.h.bf16 %v12566_v41  ;;  %v12567_v26 = vunpack.i.l.bf16 %v12566_v41  ;;  %v12571_v27 = vpop.permute.xlu0 %12570  ;;  %v7026_v41 = vld [vmem:[#allocation10 + $0x280] sm:$0xff] }
0x2222   : > { %v12573_v28 = vunpack.i.h.bf16 %v12571_v27  ;;  %v12572_v8 = vunpack.i.l.bf16 %v12571_v27  ;;  %v7033_v27 = vld [vmem:[#allocation10 + $0x2b8] sm:$0xff] }
0x2223   : > { %v11384_v10 = vpack.c.bf16 %v12568_v16, %v12567_v26  ;;  %v7028_v16 = vld [vmem:[#allocation10 + $0x290] sm:$0xff]  ;;  %v7031_v26 = vld [vmem:[#allocation10 + $0x2a8] sm:$0xff] }
0x2224   : > { %v11404_v34 = vpack.c.bf16 %v12573_v28, %v12572_v8  ;;  %v11426_v28 = vpack.c.bf16 %v7028_v16, %v7026_v41  ;;  %v11428_v8 = vpack.c.bf16 %v7033_v27, %v7031_v26  ;;  %v7054_v16 = vld [vmem:[#allocation10 + $0x360] sm:$0xff]  ;;  %v7056_v26 = vld [vmem:[#allocation10 + $0x370] sm:$0xff]  ;;  %v7059_v27 = vld [vmem:[#allocation10 + $0x388] sm:$0xff] }
0x2225   : > { %11385 = vmatprep.subr.bf16.mxu0 %v11384_v10 }
0x2226   : > { %11387 = vmatpush3.bf16.msra.mxu0 %v11384_v10  ;;  %v7030_v10 = vld [vmem:[#allocation10 + $0x2a0] sm:$0xff] }
0x2227   : > { %v12737_v48 = vpop.eup %12736  ;;  %11405 = vmatprep.subr.bf16.mxu0 %v11404_v34 }
0x2228   : > { %v12739_v29 = vpop.eup %12738  ;;  %v6861_v5 = vmul.f32 %v12737_v48, %v15028_v4  ;;  %v7037_v48 = vld [vmem:[#allocation10 + $0x2d8] sm:$0xff] }
0x2229   : > { %10010 = vmatmul.mubr.msk.f32.vlgmr.msra.gmra.mrb[26].mxu0 %vm1830_vm3, %v6455_v58  ;;  %v6859_v31 = vmul.f32 %v12739_v29, %v15030_v55  ;;  %v7011_v55 = vld [vmem:[#allocation10 + $0x208] sm:$0xff]  ;;  %v11430_v58 = vpack.c.bf16 %v7032_v35, %v7030_v10  ;;  %v7058_v35 = vld [vmem:[#allocation10 + $0x380] sm:$0xff] }
0x222a   : > { %11407 = vmatpush3.bf16.msra.mxu0 %v11404_v34  ;;  %v11408_v4 = vpack.c.bf16 %v7013_v52, %v7011_v55  ;;  %v7035_v34 = vld [vmem:[#allocation10 + $0x2c8] sm:$0xff]  ;;  %v7041_v52 = vld [vmem:[#allocation10 + $0x2f8] sm:$0xff] }
0x222b   : > { %10037 = vmatprep.mubr.msk.f32.mxu0 %vm1830_vm3, %v6859_v31  ;;  %v11432_v29 = vpack.c.bf16 %v7037_v48, %v7035_v34  ;;  %v7034_v31 = vld [vmem:[#allocation10 + $0x2c0] sm:$0xff]  ;;  %v7039_v55 = vld [vmem:[#allocation10 + $0x2e8] sm:$0xff]  ;;  %v7060_v34 = vld [vmem:[#allocation10 + $0x390] sm:$0xff] }
0x222c   : > { %11409 = vmatprep.subr.bf16.mxu0 %v11408_v4  ;;  %v11436_v4 = vpack.c.bf16 %v7041_v52, %v7039_v55  ;;  %v7063_v48 = vld [vmem:[#allocation10 + $0x3a8] sm:$0xff]  ;;  %v7064_v55 = vld [vmem:[#allocation10 + $0x3b0] sm:$0xff] }
0x222d   : > { %10038 = vmatmul.mubr.msk.f32.vlgmr.msra.gmra.mrb[28].mxu0 %vm1830_vm3, %v6861_v5  ;;  %v7036_v5 = vld [vmem:[#allocation10 + $0x2d0] sm:$0xff] }
0x222e   : > { %11411 = vmatpush1.bf16.msra.mxu0 %v11410_v21  ;;  %v11434_v53 = vpack.c.bf16 %v7036_v5, %v7034_v31  ;;  %v7045_v21 = vld [vmem:[#allocation10 + $0x318] sm:$0xff]  ;;  %v7062_v5 = vld [vmem:[#allocation10 + $0x3a0] sm:$0xff] }
0x222f   : > { %11413 = vmatprep.subr.bf16.mxu0 %v11412_v18  ;;  %v11438_v18 = vpack.c.bf16 %v7040_v17, %v7038_v63  ;;  %v11440_v19 = vpack.c.bf16 %v7045_v21, %v7043_v22  ;;  %v11462_v52 = vpack.c.bf16 %v7064_v55, %v7062_v5  ;;  %v7066_v17 = vld [vmem:[#allocation10 + $0x3c0] sm:$0xff]  ;;  %v7068_v22 = vld [vmem:[#allocation10 + $0x3d0] sm:$0xff] }
0x2230   : > { %v11466_v21 = vpack.c.bf16 %v7068_v22, %v7066_v17 }
0x2232   : > { %11415 = vmatpush1.bf16.msra.mxu0 %v11414_v23  ;;  %v7049_v23 = vld [vmem:[#allocation10 + $0x338] sm:$0xff] }
0x2233   : > { %11417 = vmatprep.subr.bf16.mxu0 %v11416_v40  ;;  %v11442_v40 = vpack.c.bf16 %v7044_v32, %v7042_v36  ;;  %v11444_v12 = vpack.c.bf16 %v7049_v23, %v7047_v13  ;;  %v7070_v32 = vld [vmem:[#allocation10 + $0x3e0] sm:$0xff]  ;;  %v7072_v13 = vld [vmem:[#allocation10 + $0x3f0] sm:$0xff] }
0x2234   : > { %v11470_v23 = vpack.c.bf16 %v7072_v13, %v7070_v32 }
0x2236   : > { %11419 = vmatpush1.bf16.msra.mxu0 %v11418_v62  ;;  %v7053_v62 = vld [vmem:[#allocation10 + $0x358] sm:$0xff] }
0x2237   : > { %11421 = vmatprep.subr.bf16.mxu0 %v11420_v14  ;;  %v11446_v14 = vpack.c.bf16 %v7048_v20, %v7046_v38  ;;  %v11448_v39 = vpack.c.bf16 %v7053_v62, %v7051_v61 }
0x223a   : > { %11423 = vmatpush1.bf16.msra.mxu0 %v11422_v44  ;;  %v7057_v44 = vld [vmem:[#allocation10 + $0x378] sm:$0xff] }
0x223b   : > { %11425 = vmatprep.subr.bf16.mxu0 %v11424_v6  ;;  %v11450_v6 = vpack.c.bf16 %v7052_v37, %v7050_v51  ;;  %v11452_v41 = vpack.c.bf16 %v7057_v44, %v7055_v45 }
0x223e   : > { %11427 = vmatpush1.bf16.msra.mxu0 %v11426_v28  ;;  %v7061_v28 = vld [vmem:[#allocation10 + $0x398] sm:$0xff] }
0x223f   : > { %11429 = vmatprep.subr.bf16.mxu0 %v11428_v8  ;;  %v11454_v8 = vpack.c.bf16 %v7056_v26, %v7054_v16  ;;  %v11456_v10 = vpack.c.bf16 %v7061_v28, %v7059_v27 }
0x2242   : > { %11431 = vmatpush1.bf16.msra.mxu0 %v11430_v58  ;;  %v7065_v58 = vld [vmem:[#allocation10 + $0x3b8] sm:$0xff] }
0x2243   : > { %11433 = vmatprep.subr.bf16.mxu0 %v11432_v29  ;;  %v11458_v29 = vpack.c.bf16 %v7060_v34, %v7058_v35  ;;  %v11460_v31 = vpack.c.bf16 %v7065_v58, %v7063_v48 }
0x2246   : > { %11435 = vmatpush1.bf16.msra.mxu0 %v11434_v53  ;;  %v7067_v53 = vld [vmem:[#allocation10 + $0x3c8] sm:$0xff] }
0x2247   : > { %11437 = vmatprep.subr.bf16.mxu0 %v11436_v4  ;;  %v7069_v4 = vld [vmem:[#allocation10 + $0x3d8] sm:$0xff] }
0x2248   : > { %v11464_v63 = vpack.c.bf16 %v7069_v4, %v7067_v53  ;;  %v9419_v53 = vld [vmem:[%s16946_s6 + $0x2] sm:$0x3] }
0x2249   : > { %v7080_v4 = vrot.slane %v9419_v53, %v13518_v33 }
0x224a   : > { %11439 = vmatpush1.bf16.msra.mxu0 %v11438_v18  ;;  %v7071_v18 = vld [vmem:[#allocation10 + $0x3e8] sm:$0xff] }
0x224b   : > { %11441 = vmatprep.subr.bf16.mxu0 %v11440_v19  ;;  %v7073_v19 = vld [vmem:[#allocation10 + $0x3f8] sm:$0xff] }
0x224c   : > { %v11468_v36 = vpack.c.bf16 %v7073_v19, %v7071_v18 }
0x224e   : > { %11443 = vmatpush1.bf16.msra.mxu0 %v11442_v40 }
0x224f   : > { %11445 = vmatprep.subr.bf16.mxu0 %v11444_v12 }
0x2252   : > { %11447 = vmatpush1.bf16.msra.mxu0 %v11446_v14 }
0x2253   : > { %11449 = vmatprep.subr.bf16.mxu0 %v11448_v39 }
0x2256   : > { %11451 = vmatpush1.bf16.msra.mxu0 %v11450_v6 }
0x2257   : > { %11453 = vmatprep.subr.bf16.mxu0 %v11452_v41 }
0x225a   : > { %11455 = vmatpush1.bf16.msra.mxu0 %v11454_v8 }
0x225b   : > { %11457 = vmatprep.subr.bf16.mxu0 %v11456_v10 }
0x225e   : > { %11459 = vmatpush1.bf16.msra.mxu0 %v11458_v29 }
0x225f   : > { %11461 = vmatprep.subr.bf16.mxu0 %v11460_v31 }
0x2262   : > { %11463 = vmatpush1.bf16.msra.mxu0 %v11462_v52 }
0x2263   : > { %11465 = vmatprep.subr.bf16.mxu0 %v11464_v63 }
0x2266   : > { %11467 = vmatpush1.bf16.msra.mxu0 %v11466_v21 }
0x2267   : > { %v15062_v54 = vpop.f32.mrb[20].mxu0  ;;  %11469 = vmatprep.subr.bf16.mxu0 %v11468_v36 }
0x2268   : > { %v15064_v24 = vpop.f32.mrb[21].mxu0 }
0x226a   : > { %11471 = vmatpush1.bf16.msra.mxu0 %v11470_v23 }
0x226f   : > { %v15066_v25 = vpop.f32.mrb[22].mxu0 }
0x2270   : > { %v15068_v15 = vpop.f32.mrb[23].mxu0 }
0x2273   : > { %v15070_v9 = vpop.f32.mrb[24].mxu0 }
0x2274   : > { %v15072_v56 = vpop.f32.mrb[25].mxu0 }
0x22fc   : > { %v10011_v40 = vpop.f32.mrb[26].mxu0 }
0x22fd   : > { %v12589_v12 = vpack.i.bf16 %v15066_v25, %v10011_v40  ;;  %v6536_v38 = vpop.f32.mrb[27].mxu0  ;;  %v12581_v25 = vpop.permute.xlu0 %12580 }
0x22fe   : > { %v12574_v20 = vpack.i.bf16 %v15068_v15, %v6536_v38  ;;  %v12583_v44 = vunpack.i.h.bf16 %v12581_v25  ;;  %v12582_v6 = vunpack.i.l.bf16 %v12581_v25  ;;  %v9429_v38 = vld [vmem:[%s16949_s9 + $0x848] sm:$0xff]  ;;  %v9422_v25 = vld [vmem:[%s16949_s9 + $0x810] sm:$0xff] }
0x22ff   : > { %12590 = vrot.lane.b32.xlu0 %v12589_v12, %s13077_s18 }
0x2300   : > { %12575 = vrot.lane.b32.xlu1 %v12574_v20, %s13077_s18  ;;  %v10039_v61 = vpop.f32.mrb[28].mxu0  ;;  %s16889_s18 = scalar_lea.hbm %s17034_s27, %s9687_s20 }
0x2301   : > { %v12599_v62 = vpack.i.bf16 %v15070_v9, %v10039_v61  ;;  %v6940_v14 = vpop.f32.mrb[29].mxu0  ;;  %v9420_v61 = vld [vmem:[%s16949_s9 + $0x800] sm:$0xff] }
0x2302   : > { %v12584_v39 = vpack.i.bf16 %v15072_v56, %v6940_v14 }
0x2303   : > { %12600 = vrot.lane.b32.xlu0 %v12599_v62, %s13075_s30  ;;  %v9428_v62 = vld [vmem:[%s16949_s9 + $0x840] sm:$0xff] }
0x2304   : > { %12585 = vrot.lane.b32.xlu1 %v12584_v39, %s13075_s30  ;;  %v11474_v39 = vpack.c.bf16 %v9428_v62, %v9420_v61  ;;  %v9494_v61 = vld [vmem:[%s16949_s9 + $0xa50] sm:$0xff]  ;;  %v9501_v62 = vld [vmem:[%s16949_s9 + $0xa88] sm:$0xff]  ;;  %s17035_s30 = smov %s17034_s27 }
0x2308   : > { %12595 = vrot.lane.b32.xlu1 %v12594_v60, %s13076_s26 }
0x2371   : > { %v12591_v51 = vpop.permute.xlu0 %12590 }
0x2372   : > { %v12576_v15 = vpop.permute.xlu1 %12575  ;;  %v12593_v27 = vunpack.i.h.bf16 %v12591_v51  ;;  %v12592_v28 = vunpack.i.l.bf16 %v12591_v51  ;;  %v9437_v51 = vld [vmem:[%s16949_s9 + $0x888] sm:$0xff] }
0x2373   : > { %v12578_v37 = vunpack.i.h.bf16 %v12576_v15  ;;  %v12577_v45 = vunpack.i.l.bf16 %v12576_v15  ;;  %v9430_v15 = vld [vmem:[%s16949_s9 + $0x850] sm:$0xff] }
0x2374   : > { %v7004_v58 = vsel %vm1740_vm1, %v14922_v11, %v12592_v28  ;;  %v6998_v29 = vsel %vm1740_vm1, %v15062_v54, %v12593_v27  ;;  %v7084_v11 = vrot.slane %v9419_v53, %v13651_v43  ;;  %v9446_v28 = vld [vmem:[%s16949_s9 + $0x8d0] sm:$0xff] }
0x2375   : > { %v6997_v9 = vsel %vm1740_vm1, %v15064_v24, %v12578_v37  ;;  %v7003_v56 = vsel %vm1740_vm1, %v14924_v42, %v12577_v45  ;;  %v12601_v60 = vpop.permute.xlu0 %12600  ;;  %v11538_v37 = vpack.c.bf16 %v9430_v15, %v9422_v25  ;;  %v9445_v45 = vld [vmem:[%s16949_s9 + $0x8c8] sm:$0xff]  ;;  %v9511_v25 = vld [vmem:[%s16949_s9 + $0xad8] sm:$0xff] }
0x2376   : > { %v12586_v41 = vpop.permute.xlu1 %12585  ;;  %v7005_v50 = vsel %vm3392_vm4, %v7003_v56, %v12582_v6  ;;  %v6999_v30 = vsel %vm3392_vm4, %v6997_v9, %v12583_v44  ;;  %v12603_v34 = vunpack.i.h.bf16 %v12601_v60  ;;  %v12602_v48 = vunpack.i.l.bf16 %v12601_v60  ;;  %v9439_v9 = vld [vmem:[%s16949_s9 + $0x898] sm:$0xff] }
0x2377   : > { %v12588_v16 = vunpack.i.h.bf16 %v12586_v41  ;;  %v12587_v26 = vunpack.i.l.bf16 %v12586_v41  ;;  %v9447_v56 = vld [vmem:[%s16949_s9 + $0x8d8] sm:$0xff]  ;;  %v11476_v44 = vpack.c.bf16 %v9445_v45, %v9437_v51  ;;  %v9436_v41 = vld [vmem:[%s16949_s9 + $0x880] sm:$0xff] }
0x2378   : > { %v11540_v6 = vpack.c.bf16 %v9447_v56, %v9439_v9  ;;  %v9500_v45 = vld [vmem:[%s16949_s9 + $0xa80] sm:$0xff]  ;;  %v9502_v56 = vld [vmem:[%s16949_s9 + $0xa90] sm:$0xff] }
0x2379   : > { %v7007_v8 = vsel %vm3395_vm5, %v7005_v50, %v12587_v26  ;;  %v7001_v10 = vsel %vm3395_vm5, %v6999_v30, %v12588_v16  ;;  %v9444_v16 = vld [vmem:[%s16949_s9 + $0x8c0] sm:$0xff]  ;;  %v9438_v26 = vld [vmem:[%s16949_s9 + $0x890] sm:$0xff]  ;;  %v9453_v50 = vld [vmem:[%s16949_s9 + $0x908] sm:$0xff] }
0x237a   : > { %v12596_v24 = vpop.permute.xlu1 %12595  ;;  %7151 = vmatprep.mubr.f32.mxu0 %v7007_v8  ;;  %v11478_v27 = vpack.c.bf16 %v9444_v16, %v9436_v41  ;;  %v9461_v30 = vld [vmem:[%s16949_s9 + $0x948] sm:$0xff]  ;;  %v11542_v60 = vpack.c.bf16 %v9446_v28, %v9438_v26  ;;  %v9508_v9 = vld [vmem:[%s16949_s9 + $0xac0] sm:$0xff]  ;;  %v9519_v26 = vld [vmem:[%s16949_s9 + $0xb18] sm:$0xff] }
0x237b   : > { %v12598_v35 = vunpack.i.h.bf16 %v12596_v24  ;;  %v12597_v42 = vunpack.i.l.bf16 %v12596_v24  ;;  %7152 = vmatmul.mubr.f32.vlgmr.msra.gmra.mrb[30].mxu0 %v7001_v10  ;;  %v11480_v8 = vpack.c.bf16 %v9461_v30, %v9453_v50  ;;  %v9455_v10 = vld [vmem:[%s16949_s9 + $0x918] sm:$0xff]  ;;  %v9517_v41 = vld [vmem:[%s16949_s9 + $0xb08] sm:$0xff]  ;;  %v11494_v28 = vpack.c.bf16 %v9508_v9, %v9500_v45  ;;  %v9574_v45 = vld [vmem:[%s16949_s9 + $0xcd0] sm:$0xff] }
0x237c   : > { %v9463_v24 = vld [vmem:[%s16949_s9 + $0x958] sm:$0xff]  ;;  %v9525_v16 = vld [vmem:[%s16949_s9 + $0xb48] sm:$0xff] }
0x237d   : > { %v7006_v31 = vsel %vm3392_vm4, %v7004_v58, %v12597_v42  ;;  %v7000_v5 = vsel %vm3392_vm4, %v6998_v29, %v12598_v35  ;;  %v9452_v35 = vld [vmem:[%s16949_s9 + $0x900] sm:$0xff]  ;;  %v11544_v42 = vpack.c.bf16 %v9463_v24, %v9455_v10  ;;  %v9462_v58 = vld [vmem:[%s16949_s9 + $0x950] sm:$0xff]  ;;  %v11496_v30 = vpack.c.bf16 %v9525_v16, %v9517_v41  ;;  %v9581_v9 = vld [vmem:[%s16949_s9 + $0xd08] sm:$0xff] }
0x237e   : > { %v7008_v55 = vsel %vm3395_vm5, %v7006_v31, %v12602_v48  ;;  %v7002_v52 = vsel %vm3395_vm5, %v7000_v5, %v12603_v34  ;;  %v9460_v34 = vld [vmem:[%s16949_s9 + $0x940] sm:$0xff]  ;;  %v9454_v48 = vld [vmem:[%s16949_s9 + $0x910] sm:$0xff]  ;;  %v9469_v31 = vld [vmem:[%s16949_s9 + $0x988] sm:$0xff] }
0x237f   : > { %7157 = vmatprep.mubr.f32.mxu0 %v7008_v55  ;;  %v11482_v29 = vpack.c.bf16 %v9460_v34, %v9452_v35  ;;  %v9477_v5 = vld [vmem:[%s16949_s9 + $0x9c8] sm:$0xff]  ;;  %v9471_v55 = vld [vmem:[%s16949_s9 + $0x998] sm:$0xff]  ;;  %v9518_v10 = vld [vmem:[%s16949_s9 + $0xb10] sm:$0xff] }
0x2380   : > { %7158 = vmatmul.mubr.f32.gmra.mrb[32].mxu0 %v7002_v52  ;;  %v11546_v52 = vpack.c.bf16 %v9462_v58, %v9454_v48  ;;  %v11484_v53 = vpack.c.bf16 %v9477_v5, %v9469_v31  ;;  %v9526_v35 = vld [vmem:[%s16949_s9 + $0xb50] sm:$0xff]  ;;  %v9541_v34 = vld [vmem:[%s16949_s9 + $0xbc8] sm:$0xff]  ;;  %v9535_v48 = vld [vmem:[%s16949_s9 + $0xb98] sm:$0xff] }
0x2381   : > { %v9543_v58 = vld [vmem:[%s16949_s9 + $0xbd8] sm:$0xff]  ;;  %v11562_v31 = vpack.c.bf16 %v9526_v35, %v9518_v10 }
0x244e   : > { %v7153_v63 = vpop.f32.mrb[30].mxu0 }
0x244f   : > { %v7154_v54 = vadd.f32 %v7153_v63, %v7080_v4  ;;  %v7155_v17 = vpop.f32.mrb[31].mxu0  ;;  %v9476_v63 = vld [vmem:[%s16949_s9 + $0x9c0] sm:$0xff] }
0x2450   : > { %v7156_v22 = vadd.f32 %v7155_v17, %v7084_v11  ;;  %v9470_v17 = vld [vmem:[%s16949_s9 + $0x990] sm:$0xff] }
0x2451   : > { %v15108_v21 = vadd.f32 %v7154_v54, %v14752_v57 }
0x2452   : > { %v15111_v18 = vadd.f32 %v7156_v22, %v14750_v59  ;;  %v9421_v59 = vld [vmem:[%s16949_s9 + $0x808] sm:$0xff]  ;;  %v9478_v22 = vld [vmem:[%s16949_s9 + $0x9d0] sm:$0xff] }
0x2453   : > { %v7159_v19 = vpop.f32.mrb[32].mxu0  ;;  %v11472_v20 = vpack.c.bf16 %v9429_v38, %v9421_v59  ;;  %v9484_v38 = vld [vmem:[%s16949_s9 + $0xa00] sm:$0xff] }
0x2454   : > { %v7160_v36 = vadd.f32 %v7159_v19, %v7080_v4  ;;  %v7161_v32 = vpop.f32.mrb[33].mxu0  ;;  %v7172_v13 = vadd.f32 %v15111_v18, %v15108_v21  ;;  %v9479_v4 = vld [vmem:[%s16949_s9 + $0x9d8] sm:$0xff]  ;;  %v9485_v19 = vld [vmem:[%s16949_s9 + $0xa08] sm:$0xff] }
0x2455   : > { %v7162_v23 = vadd.f32 %v7161_v32, %v7084_v11  ;;  %11473 = vmatprep.subr.bf16.mxu1 %v11472_v20  ;;  %v9468_v11 = vld [vmem:[%s16949_s9 + $0x980] sm:$0xff]  ;;  %v11548_v54 = vpack.c.bf16 %v9479_v4, %v9471_v55  ;;  %v9487_v32 = vld [vmem:[%s16949_s9 + $0xa18] sm:$0xff]  ;;  %v9486_v20 = vld [vmem:[%s16949_s9 + $0xa10] sm:$0xff]  ;;  %v11564_v4 = vpack.c.bf16 %v9543_v58, %v9535_v48 }
0x2456   : > { %v15116_v40 = vadd.f32 %v7160_v36, %v14760_v3  ;;  %7173 = vadd.xlane.f32.xlu1 %v7172_v13  ;;  %v9423_v3 = vld [vmem:[%s16949_s9 + $0x818] sm:$0xff]  ;;  %11475 = vmatpush1.bf16.msra.mxu1 %v11474_v39  ;;  %v9493_v36 = vld [vmem:[%s16949_s9 + $0xa48] sm:$0xff]  ;;  %v11554_v51 = vpack.c.bf16 %v9494_v61, %v9486_v20  ;;  %v9532_v55 = vld [vmem:[%s16949_s9 + $0xb80] sm:$0xff] }
0x2457   : > { %v15119_v12 = vadd.f32 %v7162_v23, %v14758_v7  ;;  %v9431_v7 = vld [vmem:[%s16949_s9 + $0x858] sm:$0xff]  ;;  %11477 = vmatprep.subr.bf16.mxu1 %v11476_v44  ;;  %v11486_v23 = vpack.c.bf16 %v9476_v63, %v9468_v11  ;;  %v11488_v59 = vpack.c.bf16 %v9493_v36, %v9485_v19  ;;  %v9542_v11 = vld [vmem:[%s16949_s9 + $0xbd0] sm:$0xff]  ;;  %v9549_v63 = vld [vmem:[%s16949_s9 + $0xc08] sm:$0xff] }
0x2458   : > { %v11536_v14 = vpack.c.bf16 %v9431_v7, %v9423_v3  ;;  %v9495_v13 = vld [vmem:[%s16949_s9 + $0xa58] sm:$0xff]  ;;  %v9492_v3 = vld [vmem:[%s16949_s9 + $0xa40] sm:$0xff]  ;;  %v9573_v20 = vld [vmem:[%s16949_s9 + $0xcc8] sm:$0xff] }
0x2459   : > { %v7175_v57 = vadd.f32 %v15119_v12, %v15116_v40  ;;  %v11552_v7 = vpack.c.bf16 %v9495_v13, %v9487_v32  ;;  %v9503_v39 = vld [vmem:[%s16949_s9 + $0xa98] sm:$0xff]  ;;  %v11490_v15 = vpack.c.bf16 %v9492_v3, %v9484_v38  ;;  %v9548_v13 = vld [vmem:[%s16949_s9 + $0xc00] sm:$0xff]  ;;  %v9558_v38 = vld [vmem:[%s16949_s9 + $0xc50] sm:$0xff] }
0x245a   : > { %11537 = vmatprep.subr.bf16.mxu0 %v11536_v14  ;;  %11479 = vmatpush1.bf16.msra.mxu1 %v11478_v27  ;;  %v9509_v14 = vld [vmem:[%s16949_s9 + $0xac8] sm:$0xff]  ;;  %v11556_v44 = vpack.c.bf16 %v9511_v25, %v9503_v39  ;;  %v9527_v27 = vld [vmem:[%s16949_s9 + $0xb58] sm:$0xff]  ;;  %v9564_v25 = vld [vmem:[%s16949_s9 + $0xc80] sm:$0xff] }
0x245b   : > { %7176 = vadd.xlane.f32.xlu0 %v7175_v57  ;;  %11539 = vmatpush1.bf16.msra.mxu0 %v11538_v37  ;;  %v11550_v57 = vpack.c.bf16 %v9478_v22, %v9470_v17  ;;  %v11492_v37 = vpack.c.bf16 %v9509_v14, %v9501_v62  ;;  %v11560_v24 = vpack.c.bf16 %v9527_v27, %v9519_v26  ;;  %v9551_v17 = vld [vmem:[%s16949_s9 + $0xc18] sm:$0xff]  ;;  %v9565_v3 = vld [vmem:[%s16949_s9 + $0xc88] sm:$0xff]  ;;  %v9580_v27 = vld [vmem:[%s16949_s9 + $0xd00] sm:$0xff] }
0x245c   : > { %11541 = vmatprep.subr.bf16.mxu0 %v11540_v6  ;;  %11481 = vmatprep.subr.bf16.mxu1 %v11480_v8  ;;  %v9510_v6 = vld [vmem:[%s16949_s9 + $0xad0] sm:$0xff]  ;;  %v9524_v8 = vld [vmem:[%s16949_s9 + $0xb40] sm:$0xff]  ;;  %v9559_v22 = vld [vmem:[%s16949_s9 + $0xc58] sm:$0xff]  ;;  %v11508_v39 = vpack.c.bf16 %v9573_v20, %v9565_v3 }
0x245d   : > { %v11558_v50 = vpack.c.bf16 %v9510_v6, %v9502_v56  ;;  %v9575_v61 = vld [vmem:[%s16949_s9 + $0xcd8] sm:$0xff]  ;;  %v9589_v56 = vld [vmem:[%s16949_s9 + $0xd48] sm:$0xff]  ;;  %v9612_v20 = vld [vmem:[%s16949_s9 + $0xe00] sm:$0xff] }
0x245e   : > { %11483 = vmatpush1.bf16.msra.mxu1 %v11482_v29  ;;  %v9591_v6 = vld [vmem:[%s16949_s9 + $0xd58] sm:$0xff]  ;;  %v11512_v26 = vpack.c.bf16 %v9589_v56, %v9581_v9  ;;  %v9628_v56 = vld [vmem:[%s16949_s9 + $0xe80] sm:$0xff] }
0x245f   : > { %11543 = vmatpush1.bf16.msra.mxu0 %v11542_v60  ;;  %11485 = vmatprep.subr.bf16.mxu1 %v11484_v53  ;;  %v9516_v60 = vld [vmem:[%s16949_s9 + $0xb00] sm:$0xff]  ;;  %v9534_v53 = vld [vmem:[%s16949_s9 + $0xb90] sm:$0xff]  ;;  %v9623_v3 = vld [vmem:[%s16949_s9 + $0xe58] sm:$0xff] }
0x2460   : > { %11545 = vmatprep.subr.bf16.mxu0 %v11544_v42  ;;  %v9533_v42 = vld [vmem:[%s16949_s9 + $0xb88] sm:$0xff]  ;;  %v11498_v29 = vpack.c.bf16 %v9524_v8, %v9516_v60  ;;  %v11566_v36 = vpack.c.bf16 %v9542_v11, %v9534_v53  ;;  %v9590_v60 = vld [vmem:[%s16949_s9 + $0xd50] sm:$0xff]  ;;  %v9639_v9 = vld [vmem:[%s16949_s9 + $0xed8] sm:$0xff] }
0x2461   : > { %v11500_v5 = vpack.c.bf16 %v9541_v34, %v9533_v42 }
0x2462   : > { %11487 = vmatpush1.bf16.msra.mxu1 %v11486_v23  ;;  %v9556_v23 = vld [vmem:[%s16949_s9 + $0xc40] sm:$0xff] }
0x2463   : > { %11547 = vmatpush1.bf16.msra.mxu0 %v11546_v52  ;;  %11489 = vmatprep.subr.bf16.mxu1 %v11488_v59  ;;  %v9540_v52 = vld [vmem:[%s16949_s9 + $0xbc0] sm:$0xff]  ;;  %v11568_v59 = vpack.c.bf16 %v9559_v22, %v9551_v17  ;;  %v11506_v62 = vpack.c.bf16 %v9556_v23, %v9548_v13  ;;  %v9613_v23 = vld [vmem:[%s16949_s9 + $0xe08] sm:$0xff] }
0x2464   : > { %11549 = vmatprep.subr.bf16.mxu0 %v11548_v54  ;;  %v9557_v54 = vld [vmem:[%s16949_s9 + $0xc48] sm:$0xff]  ;;  %v11502_v19 = vpack.c.bf16 %v9540_v52, %v9532_v55  ;;  %v9604_v17 = vld [vmem:[%s16949_s9 + $0xdc0] sm:$0xff] }
0x2465   : > { %v11504_v32 = vpack.c.bf16 %v9557_v54, %v9549_v63  ;;  %v9607_v63 = vld [vmem:[%s16949_s9 + $0xdd8] sm:$0xff]  ;;  %v9596_v54 = vld [vmem:[%s16949_s9 + $0xd80] sm:$0xff] }
0x2466   : > { %11491 = vmatpush1.bf16.msra.mxu1 %v11490_v15  ;;  %v9572_v15 = vld [vmem:[%s16949_s9 + $0xcc0] sm:$0xff] }
0x2467   : > { %11551 = vmatpush1.bf16.msra.mxu0 %v11550_v57  ;;  %11493 = vmatprep.subr.bf16.mxu1 %v11492_v37  ;;  %v9550_v57 = vld [vmem:[%s16949_s9 + $0xc10] sm:$0xff]  ;;  %v11510_v41 = vpack.c.bf16 %v9572_v15, %v9564_v25  ;;  %v9629_v15 = vld [vmem:[%s16949_s9 + $0xe88] sm:$0xff] }
0x2468   : > { %11553 = vmatprep.subr.bf16.mxu0 %v11552_v7  ;;  %v9567_v7 = vld [vmem:[%s16949_s9 + $0xc98] sm:$0xff]  ;;  %v11570_v14 = vpack.c.bf16 %v9558_v38, %v9550_v57  ;;  %v9621_v57 = vld [vmem:[%s16949_s9 + $0xe48] sm:$0xff] }
0x2469   : > { %v11572_v37 = vpack.c.bf16 %v9575_v61, %v9567_v7  ;;  %v11520_v38 = vpack.c.bf16 %v9621_v57, %v9613_v23  ;;  %v9620_v7 = vld [vmem:[%s16949_s9 + $0xe40] sm:$0xff]  ;;  %v9435_v23 = vld [vmem:[%s16949_s9 + $0x878] sm:$0xff] }
0x246a   : > { %11495 = vmatpush1.bf16.msra.mxu1 %v11494_v28  ;;  %v9588_v28 = vld [vmem:[%s16949_s9 + $0xd40] sm:$0xff] }
0x246b   : > { %11555 = vmatpush1.bf16.msra.mxu0 %v11554_v51  ;;  %11497 = vmatprep.subr.bf16.mxu1 %v11496_v30  ;;  %v9566_v51 = vld [vmem:[%s16949_s9 + $0xc90] sm:$0xff]  ;;  %v11514_v8 = vpack.c.bf16 %v9588_v28, %v9580_v27  ;;  %v9645_v28 = vld [vmem:[%s16949_s9 + $0xf08] sm:$0xff] }
0x246c   : > { %11557 = vmatprep.subr.bf16.mxu0 %v11556_v44  ;;  %v9583_v44 = vld [vmem:[%s16949_s9 + $0xd18] sm:$0xff]  ;;  %v11574_v16 = vpack.c.bf16 %v9574_v45, %v9566_v51  ;;  %v9582_v30 = vld [vmem:[%s16949_s9 + $0xd10] sm:$0xff]  ;;  %v9637_v51 = vld [vmem:[%s16949_s9 + $0xec8] sm:$0xff] }
0x246d   : > { %v11578_v10 = vpack.c.bf16 %v9590_v60, %v9582_v30  ;;  %v11524_v45 = vpack.c.bf16 %v9637_v51, %v9629_v15  ;;  %v9647_v30 = vld [vmem:[%s16949_s9 + $0xf18] sm:$0xff] }
0x246e   : > { %11499 = vmatpush1.bf16.msra.mxu1 %v11498_v29 }
0x246f   : > { %11559 = vmatpush1.bf16.msra.mxu0 %v11558_v50  ;;  %11501 = vmatprep.subr.bf16.mxu1 %v11500_v5  ;;  %v11576_v50 = vpack.c.bf16 %v9591_v6, %v9583_v44  ;;  %v9636_v44 = vld [vmem:[%s16949_s9 + $0xec0] sm:$0xff] }
0x2470   : > { %11561 = vmatprep.subr.bf16.mxu0 %v11560_v24 }
0x2472   : > { %11503 = vmatpush1.bf16.msra.mxu1 %v11502_v19  ;;  %v11518_v19 = vpack.c.bf16 %v9604_v17, %v9596_v54  ;;  %v9662_v54 = vld [vmem:[%s16949_s9 + $0xf90] sm:$0xff] }
0x2473   : > { %11563 = vmatpush1.bf16.msra.mxu0 %v11562_v31  ;;  %11505 = vmatprep.subr.bf16.mxu1 %v11504_v32  ;;  %v9606_v32 = vld [vmem:[%s16949_s9 + $0xdd0] sm:$0xff] }
0x2474   : > { %11565 = vmatprep.subr.bf16.mxu0 %v11564_v4  ;;  %v9597_v4 = vld [vmem:[%s16949_s9 + $0xd88] sm:$0xff]  ;;  %v9670_v17 = vld [vmem:[%s16949_s9 + $0xfd0] sm:$0xff] }
0x2476   : > { %11507 = vmatpush1.bf16.msra.mxu1 %v11506_v62  ;;  %v11522_v62 = vpack.c.bf16 %v9620_v7, %v9612_v20 }
0x2477   : > { %11567 = vmatpush1.bf16.msra.mxu0 %v11566_v36  ;;  %11509 = vmatprep.subr.bf16.mxu1 %v11508_v39  ;;  %v9598_v36 = vld [vmem:[%s16949_s9 + $0xd90] sm:$0xff] }
0x2478   : > { %11569 = vmatprep.subr.bf16.mxu0 %v11568_v59  ;;  %v11582_v13 = vpack.c.bf16 %v9606_v32, %v9598_v36  ;;  %v9615_v59 = vld [vmem:[%s16949_s9 + $0xe18] sm:$0xff]  ;;  %v9622_v39 = vld [vmem:[%s16949_s9 + $0xe50] sm:$0xff]  ;;  %v9433_v36 = vld [vmem:[%s16949_s9 + $0x868] sm:$0xff] }
0x2479   : > { %v11584_v61 = vpack.c.bf16 %v9623_v3, %v9615_v59  ;;  %v9427_v32 = vld [vmem:[%s16949_s9 + $0x838] sm:$0xff] }
0x247a   : > { %11511 = vmatpush1.bf16.msra.mxu1 %v11510_v41  ;;  %v11526_v41 = vpack.c.bf16 %v9636_v44, %v9628_v56  ;;  %v11664_v57 = vpack.c.bf16 %v9435_v23, %v9427_v32  ;;  %v9424_v56 = vld [vmem:[%s16949_s9 + $0x820] sm:$0xff]  ;;  %v9473_v32 = vld [vmem:[%s16949_s9 + $0x9a8] sm:$0xff]  ;;  %v9475_v23 = vld [vmem:[%s16949_s9 + $0x9b8] sm:$0xff] }
0x247b   : > { %11571 = vmatpush1.bf16.msra.mxu0 %v11570_v14  ;;  %11513 = vmatprep.subr.bf16.mxu1 %v11512_v26  ;;  %v9614_v14 = vld [vmem:[%s16949_s9 + $0xe10] sm:$0xff]  ;;  %v9432_v44 = vld [vmem:[%s16949_s9 + $0x860] sm:$0xff] }
0x247c   : > { %11573 = vmatprep.subr.bf16.mxu0 %v11572_v37  ;;  %v11586_v25 = vpack.c.bf16 %v9622_v39, %v9614_v14  ;;  %v9631_v37 = vld [vmem:[%s16949_s9 + $0xe98] sm:$0xff]  ;;  %v9638_v26 = vld [vmem:[%s16949_s9 + $0xed0] sm:$0xff] }
0x247d   : > { %v11588_v6 = vpack.c.bf16 %v9639_v9, %v9631_v37  ;;  %v7171_v14 = vld [vmem:[#allocation13 + $0x2] sm:$0x3] }
0x247e   : > { %11515 = vmatpush1.bf16.msra.mxu1 %v11514_v8  ;;  %v9655_v8 = vld [vmem:[%s16949_s9 + $0xf58] sm:$0xff]  ;;  %v7223_v9 = vrot.slane %v7171_v14, %v13518_v33 }
0x247f   : > { %11575 = vmatpush1.bf16.msra.mxu0 %v11574_v16  ;;  %v9630_v16 = vld [vmem:[%s16949_s9 + $0xe90] sm:$0xff] }
0x2480   : > { %11577 = vmatprep.subr.bf16.mxu0 %v11576_v50  ;;  %v11590_v27 = vpack.c.bf16 %v9638_v26, %v9630_v16  ;;  %v9653_v50 = vld [vmem:[%s16949_s9 + $0xf48] sm:$0xff] }
0x2481   : > { %v11528_v60 = vpack.c.bf16 %v9653_v50, %v9645_v28  ;;  %v9449_v26 = vld [vmem:[%s16949_s9 + $0x8e8] sm:$0xff]  ;;  %v9451_v28 = vld [vmem:[%s16949_s9 + $0x8f8] sm:$0xff] }
0x2483   : > { %11579 = vmatpush1.bf16.msra.mxu0 %v11578_v10  ;;  %v9644_v10 = vld [vmem:[%s16949_s9 + $0xf00] sm:$0xff] }
0x24e3   : > { %v7174_v24 = vpop.xlane.xlu1 %7173 }
0x24e4   : > { %v7178_v35 = vmul.f32 0.00390625, %v7174_v24  ;;  %v9652_v24 = vld [vmem:[%s16949_s9 + $0xf40] sm:$0xff] }
0x24e6   : > { %v15388_v42 = vsub.f32 %v15108_v21, %v7178_v35  ;;  %v15391_v34 = vsub.f32 %v15111_v18, %v7178_v35  ;;  %v11592_v35 = vpack.c.bf16 %v9655_v8, %v9647_v30  ;;  %v11602_v8 = vpack.c.bf16 %v9432_v44, %v9424_v56  ;;  %v9488_v44 = vld [vmem:[%s16949_s9 + $0xa20] sm:$0xff] }
0x24e8   : > { %v7184_v48 = vmul.f32 %v15388_v42, %v15388_v42  ;;  %v7185_v58 = vmul.f32 %v15391_v34, %v15391_v34  ;;  %v7177_v29 = vpop.xlane.xlu0 %7176 }
0x24e9   : > { %v7179_v31 = vmul.f32 0.00390625, %v7177_v29  ;;  %v9654_v29 = vld [vmem:[%s16949_s9 + $0xf50] sm:$0xff] }
0x24ea   : > { %v7188_v5 = vadd.f32 %v7185_v58, %v7184_v48  ;;  %v11530_v48 = vpack.c.bf16 %v9652_v24, %v9644_v10  ;;  %v9646_v58 = vld [vmem:[%s16949_s9 + $0xf10] sm:$0xff]  ;;  %v9440_v24 = vld [vmem:[%s16949_s9 + $0x8a0] sm:$0xff] }
0x24eb   : > { %v15398_v55 = vsub.f32 %v15116_v40, %v7179_v31  ;;  %v15401_v52 = vsub.f32 %v15119_v12, %v7179_v31  ;;  %v9605_v40 = vld [vmem:[%s16949_s9 + $0xdc8] sm:$0xff]  ;;  %v9599_v12 = vld [vmem:[%s16949_s9 + $0xd98] sm:$0xff]  ;;  %v11594_v31 = vpack.c.bf16 %v9654_v29, %v9646_v58 }
0x24ec   : > { %7189 = vadd.xlane.f32.xlu0 %v7188_v5  ;;  %v11516_v11 = vpack.c.bf16 %v9605_v40, %v9597_v4  ;;  %v11580_v22 = vpack.c.bf16 %v9607_v63, %v9599_v12  ;;  %v9661_v5 = vld [vmem:[%s16949_s9 + $0xf88] sm:$0xff]  ;;  %v9671_v4 = vld [vmem:[%s16949_s9 + $0xfd8] sm:$0xff]  ;;  %v9660_v40 = vld [vmem:[%s16949_s9 + $0xf80] sm:$0xff] }
0x24ed   : > { %v7186_v21 = vmul.f32 %v15398_v55, %v15398_v55  ;;  %v7187_v18 = vmul.f32 %v15401_v52, %v15401_v52  ;;  %v9668_v12 = vld [vmem:[%s16949_s9 + $0xfc0] sm:$0xff] }
0x24ee   : > { %11517 = vmatprep.subr.bf16.mxu1 %v11516_v11  ;;  %11581 = vmatprep.subr.bf16.mxu0 %v11580_v22  ;;  %v11534_v63 = vpack.c.bf16 %v9668_v12, %v9660_v40  ;;  %v11598_v22 = vpack.c.bf16 %v9670_v17, %v9662_v54  ;;  %v9464_v54 = vld [vmem:[%s16949_s9 + $0x960] sm:$0xff] }
0x24ef   : > { %v7191_v53 = vadd.f32 %v7187_v18, %v7186_v21  ;;  %11519 = vmatpush1.bf16.msra.mxu1 %v11518_v19  ;;  %11583 = vmatpush1.bf16.msra.mxu0 %v11582_v13  ;;  %v9669_v21 = vld [vmem:[%s16949_s9 + $0xfc8] sm:$0xff]  ;;  %v9663_v18 = vld [vmem:[%s16949_s9 + $0xf98] sm:$0xff] }
0x24f0   : > { %11521 = vmatprep.subr.bf16.mxu1 %v11520_v38  ;;  %11585 = vmatprep.subr.bf16.mxu0 %v11584_v61  ;;  %v11596_v11 = vpack.c.bf16 %v9671_v4, %v9663_v18  ;;  %v9425_v19 = vld [vmem:[%s16949_s9 + $0x828] sm:$0xff]  ;;  %v9459_v4 = vld [vmem:[%s16949_s9 + $0x938] sm:$0xff] }
0x24f1   : > { %7192 = vadd.xlane.f32.xlu1 %v7191_v53  ;;  %v11532_v53 = vpack.c.bf16 %v9669_v21, %v9661_v5  ;;  %v11600_v13 = vpack.c.bf16 %v9433_v36, %v9425_v19  ;;  %v9442_v5 = vld [vmem:[%s16949_s9 + $0x8b0] sm:$0xff]  ;;  %v9457_v18 = vld [vmem:[%s16949_s9 + $0x928] sm:$0xff] }
0x24f2   : > { %v9450_v21 = vld [vmem:[%s16949_s9 + $0x8f0] sm:$0xff] }
0x24f3   : > { %11523 = vmatpush1.bf16.msra.mxu1 %v11522_v62  ;;  %11587 = vmatpush1.bf16.msra.mxu0 %v11586_v25  ;;  %v7169_v62 = vld [vmem:[#allocation11 + $0x2] sm:$0x3]  ;;  %v11670_v12 = vpack.c.bf16 %v9450_v21, %v9442_v5  ;;  %v9521_v5 = vld [vmem:[%s16949_s9 + $0xb28] sm:$0xff] }
0x24f4   : > { %11525 = vmatprep.subr.bf16.mxu1 %v11524_v45  ;;  %11589 = vmatprep.subr.bf16.mxu0 %v11588_v6  ;;  %v7212_v39 = vrot.slane %v7169_v62, %v13651_v43  ;;  %v7208_v25 = vrot.slane %v7169_v62, %v13518_v33  ;;  %v7227_v45 = vrot.slane %v7171_v14, %v13651_v43  ;;  %v9426_v6 = vld [vmem:[%s16949_s9 + $0x830] sm:$0xff]  ;;  %v9529_v21 = vld [vmem:[%s16949_s9 + $0xb68] sm:$0xff] }
0x24f5   : > { %v9458_v19 = vld [vmem:[%s16949_s9 + $0x930] sm:$0xff] }
0x24f6   : > { %v9466_v36 = vld [vmem:[%s16949_s9 + $0x970] sm:$0xff] }
0x24f7   : > { %11527 = vmatpush1.bf16.msra.mxu1 %v11526_v41  ;;  %11591 = vmatpush1.bf16.msra.mxu0 %v11590_v27  ;;  %v9443_v27 = vld [vmem:[%s16949_s9 + $0x8b8] sm:$0xff] }
0x24f8   : > { %11529 = vmatprep.subr.bf16.mxu1 %v11528_v60  ;;  %11593 = vmatprep.subr.bf16.mxu0 %v11592_v35  ;;  %v11668_v29 = vpack.c.bf16 %v9451_v28, %v9443_v27  ;;  %v9513_v27 = vld [vmem:[%s16949_s9 + $0xae8] sm:$0xff]  ;;  %v9507_v28 = vld [vmem:[%s16949_s9 + $0xab8] sm:$0xff] }
0x24fb   : > { %11531 = vmatpush1.bf16.msra.mxu1 %v11530_v48  ;;  %11595 = vmatpush1.bf16.msra.mxu0 %v11594_v31  ;;  %v9448_v31 = vld [vmem:[%s16949_s9 + $0x8e0] sm:$0xff] }
0x24fc   : > { %11533 = vmatprep.subr.bf16.mxu1 %v11532_v53  ;;  %11597 = vmatprep.subr.bf16.mxu0 %v11596_v11  ;;  %v9465_v53 = vld [vmem:[%s16949_s9 + $0x968] sm:$0xff]  ;;  %v11606_v40 = vpack.c.bf16 %v9448_v31, %v9440_v24  ;;  %v9467_v11 = vld [vmem:[%s16949_s9 + $0x978] sm:$0xff]  ;;  %v9504_v24 = vld [vmem:[%s16949_s9 + $0xaa0] sm:$0xff] }
0x24fd   : > { %v9514_v31 = vld [vmem:[%s16949_s9 + $0xaf0] sm:$0xff] }
0x24ff   : > { %11535 = vmatpush1.bf16.msra.mxu1 %v11534_v63  ;;  %11599 = vmatpush1.bf16.msra.mxu0 %v11598_v22  ;;  %v9456_v63 = vld [vmem:[%s16949_s9 + $0x920] sm:$0xff] }
0x2500   : > { %11601 = vmatprep.subr.bf16.mxu1 %v11600_v13  ;;  %11665 = vmatprep.subr.bf16.mxu0 %v11664_v57  ;;  %v9481_v13 = vld [vmem:[%s16949_s9 + $0x9e8] sm:$0xff]  ;;  %v9483_v57 = vld [vmem:[%s16949_s9 + $0x9f8] sm:$0xff] }
0x2501   : > { %v11612_v62 = vpack.c.bf16 %v9481_v13, %v9473_v32  ;;  %v11676_v14 = vpack.c.bf16 %v9483_v57, %v9475_v23  ;;  %v9539_v32 = vld [vmem:[%s16949_s9 + $0xbb8] sm:$0xff] }
0x2502   : > { %v9547_v13 = vld [vmem:[%s16949_s9 + $0xbf8] sm:$0xff] }
0x2579   : > { %v7190_v59 = vpop.xlane.xlu0 %7189 }
0x257a   : > { %v7194_v38 = vmul.f32 0.00390625, %v7190_v59  ;;  %v11608_v59 = vpack.c.bf16 %v9465_v53, %v9457_v18 }
0x257c   : > { %v7196_v3 = vadd.f32 1e-05, %v7194_v38  ;;  %v11672_v38 = vpack.c.bf16 %v9467_v11, %v9459_v4  ;;  %v9520_v4 = vld [vmem:[%s16949_s9 + $0xb20] sm:$0xff] }
0x257e   : > { %12740 = vrsqrt.f32 %v7196_v3  ;;  %v7193_v20 = vpop.xlane.xlu1 %7192  ;;  %v11610_v3 = vpack.c.bf16 %v9464_v54, %v9456_v63  ;;  %v9522_v63 = vld [vmem:[%s16949_s9 + $0xb30] sm:$0xff] }
0x257f   : > { %v7195_v7 = vmul.f32 0.00390625, %v7193_v20  ;;  %v11674_v20 = vpack.c.bf16 %v9466_v36, %v9458_v19  ;;  %v9530_v54 = vld [vmem:[%s16949_s9 + $0xb70] sm:$0xff]  ;;  %v9537_v19 = vld [vmem:[%s16949_s9 + $0xba8] sm:$0xff] }
0x2580   : > { %v9545_v36 = vld [vmem:[%s16949_s9 + $0xbe8] sm:$0xff]  ;;  %v11690_v57 = vpack.c.bf16 %v9530_v54, %v9522_v63  ;;  %v9603_v63 = vld [vmem:[%s16949_s9 + $0xdb8] sm:$0xff] }
0x2581   : > { %v7197_v61 = vadd.f32 1e-05, %v7195_v7  ;;  %v9472_v7 = vld [vmem:[%s16949_s9 + $0x9a0] sm:$0xff]  ;;  %v9611_v54 = vld [vmem:[%s16949_s9 + $0xdf8] sm:$0xff] }
0x2583   : > { %12742 = vrsqrt.f32 %v7197_v61  ;;  %v9480_v61 = vld [vmem:[%s16949_s9 + $0x9e0] sm:$0xff] }
0x2588   : > { %v12741_v15 = vpop.eup %12740 }
0x2589   : > { %v7200_v51 = vmul.f32 %v12741_v15, %v15388_v42  ;;  %v7201_v37 = vmul.f32 %v12741_v15, %v15391_v34  ;;  %v9434_v42 = vld [vmem:[%s16949_s9 + $0x870] sm:$0xff]  ;;  %v9441_v34 = vld [vmem:[%s16949_s9 + $0x8a8] sm:$0xff] }
0x258a   : > { %v11666_v10 = vpack.c.bf16 %v9434_v42, %v9426_v6  ;;  %v11604_v58 = vpack.c.bf16 %v9449_v26, %v9441_v34  ;;  %v9489_v15 = vld [vmem:[%s16949_s9 + $0xa28] sm:$0xff]  ;;  %v9496_v6 = vld [vmem:[%s16949_s9 + $0xa60] sm:$0xff] }
0x258b   : > { %v7216_v41 = vmul.f32 %v7212_v39, %v7201_v37  ;;  %v7215_v16 = vmul.f32 %v7208_v25, %v7200_v51  ;;  %v9497_v51 = vld [vmem:[%s16949_s9 + $0xa68] sm:$0xff]  ;;  %v9491_v37 = vld [vmem:[%s16949_s9 + $0xa38] sm:$0xff] }
0x258c   : > { %v11616_v42 = vpack.c.bf16 %v9497_v51, %v9489_v15  ;;  %v9505_v26 = vld [vmem:[%s16949_s9 + $0xaa8] sm:$0xff] }
0x258d   : > { %v12743_v50 = vpop.eup %12742  ;;  %v15569_v30 = vadd.f32 %v7227_v45, %v7216_v41  ;;  %v15571_v60 = vadd.f32 %v7223_v9, %v7215_v16  ;;  %v9490_v41 = vld [vmem:[%s16949_s9 + $0xa30] sm:$0xff] }
0x258e   : > { %v7202_v35 = vmul.f32 %v12743_v50, %v15398_v55  ;;  %v7203_v48 = vmul.f32 %v12743_v50, %v15401_v52  ;;  %v9498_v16 = vld [vmem:[%s16949_s9 + $0xa70] sm:$0xff]  ;;  %v9515_v50 = vld [vmem:[%s16949_s9 + $0xaf8] sm:$0xff] }
0x258f   : > { %7598 = vmatprep.mubr.f32.mxu1 %v15569_v30  ;;  %7675 = vmatprep.mubr.f32.mxu0 %v15569_v30 }
0x2590   : > { %7599 = vmatmul.mubr.f32.vlgmr.msra.gmra.mrb[86].mxu1 %v15571_v60  ;;  %7676 = vmatmul.mubr.f32.vlgmr.msra.gmra.mrb[34].mxu0 %v15571_v60  ;;  %v7218_v55 = vmul.f32 %v7212_v39, %v7203_v48  ;;  %v7217_v52 = vmul.f32 %v7208_v25, %v7202_v35  ;;  %v9474_v39 = vld [vmem:[%s16949_s9 + $0x9b0] sm:$0xff]  ;;  %v9512_v35 = vld [vmem:[%s16949_s9 + $0xae0] sm:$0xff]  ;;  %v11620_v48 = vpack.c.bf16 %v9513_v27, %v9505_v26 }
0x2591   : > { %11603 = vmatpush1.bf16.msra.mxu1 %v11602_v8  ;;  %11667 = vmatpush1.bf16.msra.mxu0 %v11666_v10  ;;  %v9482_v25 = vld [vmem:[%s16949_s9 + $0x9f0] sm:$0xff]  ;;  %v11618_v8 = vpack.c.bf16 %v9496_v6, %v9488_v44  ;;  %v11682_v10 = vpack.c.bf16 %v9498_v16, %v9490_v41  ;;  %v11622_v18 = vpack.c.bf16 %v9512_v35, %v9504_v24  ;;  %v9571_v41 = vld [vmem:[%s16949_s9 + $0xcb8] sm:$0xff] }
0x2592   : > { %11605 = vmatprep.subr.bf16.mxu1 %v11604_v58  ;;  %11669 = vmatprep.subr.bf16.mxu0 %v11668_v29  ;;  %v15609_v17 = vadd.f32 %v7227_v45, %v7218_v55  ;;  %v15611_v22 = vadd.f32 %v7223_v9, %v7217_v52  ;;  %v9499_v45 = vld [vmem:[%s16949_s9 + $0xa78] sm:$0xff]  ;;  %v11614_v9 = vpack.c.bf16 %v9480_v61, %v9472_v7  ;;  %v9506_v29 = vld [vmem:[%s16949_s9 + $0xab0] sm:$0xff] }
0x2593   : > { %v11678_v56 = vpack.c.bf16 %v9482_v25, %v9474_v39  ;;  %v11680_v34 = vpack.c.bf16 %v9499_v45, %v9491_v37  ;;  %v11684_v58 = vpack.c.bf16 %v9515_v50, %v9507_v28  ;;  %v9523_v55 = vld [vmem:[%s16949_s9 + $0xb38] sm:$0xff]  ;;  %v11686_v53 = vpack.c.bf16 %v9514_v31, %v9506_v29  ;;  %v9538_v7 = vld [vmem:[%s16949_s9 + $0xbb0] sm:$0xff]  ;;  %v9552_v37 = vld [vmem:[%s16949_s9 + $0xc20] sm:$0xff] }
0x2594   : > { %7604 = vmatprep.mubr.f32.mxu1 %v15609_v17  ;;  %7681 = vmatprep.mubr.f32.mxu0 %v15609_v17  ;;  %v9531_v52 = vld [vmem:[%s16949_s9 + $0xb78] sm:$0xff]  ;;  %v9546_v61 = vld [vmem:[%s16949_s9 + $0xbf0] sm:$0xff]  ;;  %v9560_v45 = vld [vmem:[%s16949_s9 + $0xc60] sm:$0xff] }
0x2595   : > { %11607 = vmatpush1.bf16.msra.mxu1 %v11606_v40  ;;  %11671 = vmatpush1.bf16.msra.mxu0 %v11670_v12  ;;  %v9528_v40 = vld [vmem:[%s16949_s9 + $0xb60] sm:$0xff]  ;;  %v11624_v12 = vpack.c.bf16 %v9529_v21, %v9521_v5  ;;  %v11688_v11 = vpack.c.bf16 %v9531_v52, %v9523_v55  ;;  %v9555_v39 = vld [vmem:[%s16949_s9 + $0xc38] sm:$0xff]  ;;  %v11694_v51 = vpack.c.bf16 %v9546_v61, %v9538_v7  ;;  %v9554_v44 = vld [vmem:[%s16949_s9 + $0xc30] sm:$0xff] }
0x2596   : > { %7605 = vmatmul.mubr.f32.gmra.mrb[88].mxu1 %v15611_v22  ;;  %7682 = vmatmul.mubr.f32.gmra.mrb[36].mxu0 %v15611_v22  ;;  %v11626_v23 = vpack.c.bf16 %v9528_v40, %v9520_v4  ;;  %v9563_v25 = vld [vmem:[%s16949_s9 + $0xc78] sm:$0xff]  ;;  %v9562_v6 = vld [vmem:[%s16949_s9 + $0xc70] sm:$0xff]  ;;  %v11634_v26 = vpack.c.bf16 %v9560_v45, %v9552_v37  ;;  %v9568_v28 = vld [vmem:[%s16949_s9 + $0xca0] sm:$0xff] }
0x2597   : > { %7752 = vmatprep.mubr.f32.mxu1 %v15569_v30  ;;  %7829 = vmatprep.mubr.f32.mxu0 %v15569_v30  ;;  %v9579_v16 = vld [vmem:[%s16949_s9 + $0xcf8] sm:$0xff]  ;;  %v11698_v27 = vpack.c.bf16 %v9562_v6, %v9554_v44  ;;  %v9576_v50 = vld [vmem:[%s16949_s9 + $0xce0] sm:$0xff]  ;;  %v9570_v24 = vld [vmem:[%s16949_s9 + $0xcb0] sm:$0xff] }
0x2598   : > { %11609 = vmatprep.subr.bf16.mxu1 %v11608_v59  ;;  %11673 = vmatprep.subr.bf16.mxu0 %v11672_v38  ;;  %v9536_v59 = vld [vmem:[%s16949_s9 + $0xba0] sm:$0xff]  ;;  %v9578_v35 = vld [vmem:[%s16949_s9 + $0xcf0] sm:$0xff]  ;;  %v9587_v29 = vld [vmem:[%s16949_s9 + $0xd38] sm:$0xff]  ;;  %v11638_v5 = vpack.c.bf16 %v9576_v50, %v9568_v28 }
0x2599   : > { %11611 = vmatpush1.bf16.msra.mxu1 %v11610_v3  ;;  %11675 = vmatpush1.bf16.msra.mxu0 %v11674_v20  ;;  %v9544_v38 = vld [vmem:[%s16949_s9 + $0xbe0] sm:$0xff]  ;;  %v11628_v3 = vpack.c.bf16 %v9545_v36, %v9537_v19  ;;  %v11692_v20 = vpack.c.bf16 %v9547_v13, %v9539_v32  ;;  %v9595_v31 = vld [vmem:[%s16949_s9 + $0xd78] sm:$0xff]  ;;  %v11702_v21 = vpack.c.bf16 %v9578_v35, %v9570_v24  ;;  %v9586_v4 = vld [vmem:[%s16949_s9 + $0xd30] sm:$0xff] }
0x259a   : > { %11613 = vmatprep.subr.bf16.mxu1 %v11612_v62  ;;  %11677 = vmatprep.subr.bf16.mxu0 %v11676_v14  ;;  %v9553_v62 = vld [vmem:[%s16949_s9 + $0xc28] sm:$0xff]  ;;  %v11630_v15 = vpack.c.bf16 %v9544_v38, %v9536_v59  ;;  %v9584_v55 = vld [vmem:[%s16949_s9 + $0xd20] sm:$0xff]  ;;  %v9594_v40 = vld [vmem:[%s16949_s9 + $0xd70] sm:$0xff] }
0x259b   : > { %v9561_v14 = vld [vmem:[%s16949_s9 + $0xc68] sm:$0xff]  ;;  %v9592_v52 = vld [vmem:[%s16949_s9 + $0xd60] sm:$0xff]  ;;  %v11706_v36 = vpack.c.bf16 %v9594_v40, %v9586_v4  ;;  %v9602_v59 = vld [vmem:[%s16949_s9 + $0xdb0] sm:$0xff] }
0x259c   : > { %v11642_v19 = vpack.c.bf16 %v9592_v52, %v9584_v55  ;;  %v9600_v32 = vld [vmem:[%s16949_s9 + $0xda0] sm:$0xff]  ;;  %v9610_v38 = vld [vmem:[%s16949_s9 + $0xdf0] sm:$0xff]  ;;  %v9619_v7 = vld [vmem:[%s16949_s9 + $0xe38] sm:$0xff] }
0x259d   : > { %11615 = vmatpush1.bf16.msra.mxu1 %v11614_v9  ;;  %11679 = vmatpush1.bf16.msra.mxu0 %v11678_v56  ;;  %v11632_v9 = vpack.c.bf16 %v9561_v14, %v9553_v62  ;;  %v11696_v56 = vpack.c.bf16 %v9563_v25, %v9555_v39  ;;  %v9608_v13 = vld [vmem:[%s16949_s9 + $0xde0] sm:$0xff]  ;;  %v9627_v61 = vld [vmem:[%s16949_s9 + $0xe78] sm:$0xff]  ;;  %v11710_v14 = vpack.c.bf16 %v9610_v38, %v9602_v59  ;;  %v9618_v37 = vld [vmem:[%s16949_s9 + $0xe30] sm:$0xff] }
0x259e   : > { %11617 = vmatprep.subr.bf16.mxu1 %v11616_v42  ;;  %11681 = vmatprep.subr.bf16.mxu0 %v11680_v34  ;;  %v9569_v42 = vld [vmem:[%s16949_s9 + $0xca8] sm:$0xff]  ;;  %v11646_v62 = vpack.c.bf16 %v9608_v13, %v9600_v32  ;;  %v9616_v39 = vld [vmem:[%s16949_s9 + $0xe20] sm:$0xff]  ;;  %v9626_v45 = vld [vmem:[%s16949_s9 + $0xe70] sm:$0xff] }
0x259f   : > { %v9577_v34 = vld [vmem:[%s16949_s9 + $0xce8] sm:$0xff]  ;;  %v9624_v25 = vld [vmem:[%s16949_s9 + $0xe60] sm:$0xff]  ;;  %v9635_v44 = vld [vmem:[%s16949_s9 + $0xeb8] sm:$0xff] }
0x25a0   : > { %v9643_v6 = vld [vmem:[%s16949_s9 + $0xef8] sm:$0xff]  ;;  %v9634_v28 = vld [vmem:[%s16949_s9 + $0xeb0] sm:$0xff] }
0x25a1   : > { %11619 = vmatpush1.bf16.msra.mxu1 %v11618_v8  ;;  %11683 = vmatpush1.bf16.msra.mxu0 %v11682_v10  ;;  %v11636_v8 = vpack.c.bf16 %v9577_v34, %v9569_v42  ;;  %v11700_v10 = vpack.c.bf16 %v9579_v16, %v9571_v41  ;;  %v11650_v42 = vpack.c.bf16 %v9624_v25, %v9616_v39  ;;  %v9632_v41 = vld [vmem:[%s16949_s9 + $0xea0] sm:$0xff]  ;;  %v9642_v50 = vld [vmem:[%s16949_s9 + $0xef0] sm:$0xff]  ;;  %v9651_v24 = vld [vmem:[%s16949_s9 + $0xf38] sm:$0xff] }
0x25a2   : > { %11621 = vmatprep.subr.bf16.mxu1 %v11620_v48  ;;  %11685 = vmatprep.subr.bf16.mxu0 %v11684_v58  ;;  %v9585_v48 = vld [vmem:[%s16949_s9 + $0xd28] sm:$0xff]  ;;  %v11714_v34 = vpack.c.bf16 %v9626_v45, %v9618_v37  ;;  %v9640_v16 = vld [vmem:[%s16949_s9 + $0xee0] sm:$0xff]  ;;  %v9659_v35 = vld [vmem:[%s16949_s9 + $0xf78] sm:$0xff] }
0x25a3   : > { %v9593_v58 = vld [vmem:[%s16949_s9 + $0xd68] sm:$0xff]  ;;  %v9650_v55 = vld [vmem:[%s16949_s9 + $0xf30] sm:$0xff]  ;;  %v9667_v4 = vld [vmem:[%s16949_s9 + $0xfb8] sm:$0xff] }
0x25a4   : > { %v9658_v52 = vld [vmem:[%s16949_s9 + $0xf70] sm:$0xff]  ;;  %v9675_v40 = vld [vmem:[%s16949_s9 + $0xff8] sm:$0xff] }
0x25a5   : > { %11623 = vmatpush1.bf16.msra.mxu1 %v11622_v18  ;;  %11687 = vmatpush1.bf16.msra.mxu0 %v11686_v53  ;;  %v11640_v18 = vpack.c.bf16 %v9593_v58, %v9585_v48  ;;  %v11704_v53 = vpack.c.bf16 %v9595_v31, %v9587_v29  ;;  %v11654_v48 = vpack.c.bf16 %v9640_v16, %v9632_v41  ;;  %v9648_v29 = vld [vmem:[%s16949_s9 + $0xf20] sm:$0xff]  ;;  %v9666_v32 = vld [vmem:[%s16949_s9 + $0xfb0] sm:$0xff] }
0x25a6   : > { %11625 = vmatprep.subr.bf16.mxu1 %v11624_v12  ;;  %11689 = vmatprep.subr.bf16.mxu0 %v11688_v11  ;;  %v9601_v12 = vld [vmem:[%s16949_s9 + $0xda8] sm:$0xff]  ;;  %v11718_v58 = vpack.c.bf16 %v9642_v50, %v9634_v28  ;;  %v9656_v31 = vld [vmem:[%s16949_s9 + $0xf60] sm:$0xff]  ;;  %v9674_v13 = vld [vmem:[%s16949_s9 + $0xff0] sm:$0xff] }
0x25a7   : > { %v9609_v11 = vld [vmem:[%s16949_s9 + $0xde8] sm:$0xff]  ;;  %v11726_v38 = vpack.c.bf16 %v9674_v13, %v9666_v32  ;;  %v7863_v25 = vld [vmem:[#allocation14 + $0x820] sm:$0xff]  ;;  %v7870_v37 = vld [vmem:[#allocation14 + $0x858] sm:$0xff] }
0x25a8   : > { %v7871_v16 = vld [vmem:[#allocation14 + $0x860] sm:$0xff]  ;;  %v7878_v28 = vld [vmem:[#allocation14 + $0x898] sm:$0xff] }
0x25a9   : > { %11627 = vmatpush1.bf16.msra.mxu1 %v11626_v23  ;;  %11691 = vmatpush1.bf16.msra.mxu0 %v11690_v57  ;;  %v11644_v23 = vpack.c.bf16 %v9609_v11, %v9601_v12  ;;  %v11708_v57 = vpack.c.bf16 %v9611_v54, %v9603_v63  ;;  %v11658_v12 = vpack.c.bf16 %v9656_v31, %v9648_v29  ;;  %v9664_v63 = vld [vmem:[%s16949_s9 + $0xfa0] sm:$0xff]  ;;  %v7894_v32 = vld [vmem:[#allocation14 + $0x918] sm:$0xff] }
0x25aa   : > { %11629 = vmatprep.subr.bf16.mxu1 %v11628_v3  ;;  %11693 = vmatprep.subr.bf16.mxu0 %v11692_v20  ;;  %v9617_v3 = vld [vmem:[%s16949_s9 + $0xe28] sm:$0xff]  ;;  %v11722_v11 = vpack.c.bf16 %v9658_v52, %v9650_v55  ;;  %v7879_v31 = vld [vmem:[#allocation14 + $0x8a0] sm:$0xff]  ;;  %v7886_v55 = vld [vmem:[#allocation14 + $0x8d8] sm:$0xff] }
0x25ab   : > { %v9625_v20 = vld [vmem:[%s16949_s9 + $0xe68] sm:$0xff] }
0x25ad   : > { %11631 = vmatpush1.bf16.msra.mxu1 %v11630_v15  ;;  %11695 = vmatpush1.bf16.msra.mxu0 %v11694_v51  ;;  %v11648_v15 = vpack.c.bf16 %v9625_v20, %v9617_v3  ;;  %v11712_v51 = vpack.c.bf16 %v9627_v61, %v9619_v7  ;;  %v7859_v20 = vld [vmem:[#allocation14 + $0x800] sm:$0xff]  ;;  %v7861_v7 = vld [vmem:[#allocation14 + $0x810] sm:$0xff]  ;;  %v7864_v61 = vld [vmem:[#allocation14 + $0x828] sm:$0xff] }
0x25ae   : > { %11633 = vmatprep.subr.bf16.mxu1 %v11632_v9  ;;  %11697 = vmatprep.subr.bf16.mxu0 %v11696_v56  ;;  %v9633_v9 = vld [vmem:[%s16949_s9 + $0xea8] sm:$0xff] }
0x25af   : > { %v9641_v56 = vld [vmem:[%s16949_s9 + $0xee8] sm:$0xff] }
0x25b1   : > { %11635 = vmatpush1.bf16.msra.mxu1 %v11634_v26  ;;  %11699 = vmatpush1.bf16.msra.mxu0 %v11698_v27  ;;  %v11652_v26 = vpack.c.bf16 %v9641_v56, %v9633_v9  ;;  %v11716_v27 = vpack.c.bf16 %v9643_v6, %v9635_v44  ;;  %v7867_v56 = vld [vmem:[#allocation14 + $0x840] sm:$0xff]  ;;  %v7869_v44 = vld [vmem:[#allocation14 + $0x850] sm:$0xff]  ;;  %v7872_v6 = vld [vmem:[#allocation14 + $0x868] sm:$0xff] }
0x25b2   : > { %11637 = vmatprep.subr.bf16.mxu1 %v11636_v8  ;;  %11701 = vmatprep.subr.bf16.mxu0 %v11700_v10  ;;  %v9649_v8 = vld [vmem:[%s16949_s9 + $0xf28] sm:$0xff] }
0x25b3   : > { %v9657_v10 = vld [vmem:[%s16949_s9 + $0xf68] sm:$0xff] }
0x25b5   : > { %11639 = vmatpush1.bf16.msra.mxu1 %v11638_v5  ;;  %11703 = vmatpush1.bf16.msra.mxu0 %v11702_v21  ;;  %v11656_v5 = vpack.c.bf16 %v9657_v10, %v9649_v8  ;;  %v11720_v21 = vpack.c.bf16 %v9659_v35, %v9651_v24  ;;  %v7875_v10 = vld [vmem:[#allocation14 + $0x880] sm:$0xff]  ;;  %v7877_v24 = vld [vmem:[#allocation14 + $0x890] sm:$0xff]  ;;  %v7880_v35 = vld [vmem:[#allocation14 + $0x8a8] sm:$0xff] }
0x25b6   : > { %11641 = vmatprep.subr.bf16.mxu1 %v11640_v18  ;;  %11705 = vmatprep.subr.bf16.mxu0 %v11704_v53  ;;  %v9665_v18 = vld [vmem:[%s16949_s9 + $0xfa8] sm:$0xff] }
0x25b7   : > { %v9673_v53 = vld [vmem:[%s16949_s9 + $0xfe8] sm:$0xff] }
0x25b8   : > { %v11660_v54 = vpack.c.bf16 %v9673_v53, %v9665_v18  ;;  %v7883_v53 = vld [vmem:[#allocation14 + $0x8c0] sm:$0xff] }
0x25b9   : > { %11643 = vmatpush1.bf16.msra.mxu1 %v11642_v19  ;;  %11707 = vmatpush1.bf16.msra.mxu0 %v11706_v36  ;;  %v11724_v19 = vpack.c.bf16 %v9675_v40, %v9667_v4  ;;  %v9672_v36 = vld [vmem:[%s16949_s9 + $0xfe0] sm:$0xff]  ;;  %v7885_v4 = vld [vmem:[#allocation14 + $0x8d0] sm:$0xff] }
0x25ba   : > { %11645 = vmatprep.subr.bf16.mxu1 %v11644_v23  ;;  %11709 = vmatprep.subr.bf16.mxu0 %v11708_v57  ;;  %v7860_v23 = vld [vmem:[#allocation14 + $0x808] sm:$0xff]  ;;  %v7862_v57 = vld [vmem:[#allocation14 + $0x818] sm:$0xff]  ;;  %v11662_v59 = vpack.c.bf16 %v9672_v36, %v9664_v63 }
0x25bb   : > { %v11728_v3 = vpack.c.bf16 %v7862_v57, %v7860_v23  ;;  %v7888_v40 = vld [vmem:[#allocation14 + $0x8e8] sm:$0xff]  ;;  %v7891_v57 = vld [vmem:[#allocation14 + $0x900] sm:$0xff] }
0x25bc   : > { %v7892_v36 = vld [vmem:[#allocation14 + $0x908] sm:$0xff] }
0x25bd   : > { %11647 = vmatpush1.bf16.msra.mxu1 %v11646_v62  ;;  %11711 = vmatpush1.bf16.msra.mxu0 %v11710_v14  ;;  %v7866_v62 = vld [vmem:[#allocation14 + $0x838] sm:$0xff]  ;;  %v11730_v14 = vpack.c.bf16 %v7861_v7, %v7859_v20  ;;  %v11760_v23 = vpack.c.bf16 %v7894_v32, %v7892_v36  ;;  %v15946_v36 = vld [vmem:[%s16950_s10 + $0x8] sm:$0xff] }
0x25be   : > { %11649 = vmatprep.subr.bf16.mxu1 %v11648_v15  ;;  %11713 = vmatprep.subr.bf16.mxu0 %v11712_v51  ;;  %v11732_v39 = vpack.c.bf16 %v7866_v62, %v7864_v61  ;;  %v7865_v15 = vld [vmem:[#allocation14 + $0x830] sm:$0xff]  ;;  %v7868_v51 = vld [vmem:[#allocation14 + $0x848] sm:$0xff]  ;;  %v7895_v61 = vld [vmem:[#allocation14 + $0x920] sm:$0xff]  ;;  %v7497_v32 = vrot.slane %v15946_v36, %v13518_v33 }
0x25bf   : > { %v11734_v45 = vpack.c.bf16 %v7865_v15, %v7863_v25  ;;  %v11736_v9 = vpack.c.bf16 %v7870_v37, %v7868_v51  ;;  %v7897_v62 = vld [vmem:[#allocation14 + $0x930] sm:$0xff]  ;;  %v7899_v51 = vld [vmem:[#allocation14 + $0x940] sm:$0xff] }
0x25c0   : > { %v11766_v25 = vpack.c.bf16 %v7897_v62, %v7895_v61  ;;  %v7901_v37 = vld [vmem:[#allocation14 + $0x950] sm:$0xff]  ;;  %v7928_v62 = vld [vmem:[#allocation14 + $0xa28] sm:$0xff] }
0x25c1   : > { %11651 = vmatpush1.bf16.msra.mxu1 %v11650_v42  ;;  %11715 = vmatpush1.bf16.msra.mxu0 %v11714_v34  ;;  %v7874_v42 = vld [vmem:[#allocation14 + $0x878] sm:$0xff]  ;;  %v11738_v34 = vpack.c.bf16 %v7869_v44, %v7867_v56  ;;  %v11770_v56 = vpack.c.bf16 %v7901_v37, %v7899_v51 }
0x25c2   : > { %11653 = vmatprep.subr.bf16.mxu1 %v11652_v26  ;;  %11717 = vmatprep.subr.bf16.mxu0 %v11716_v27  ;;  %v11740_v41 = vpack.c.bf16 %v7874_v42, %v7872_v6  ;;  %v7873_v26 = vld [vmem:[#allocation14 + $0x870] sm:$0xff]  ;;  %v7876_v27 = vld [vmem:[#allocation14 + $0x888] sm:$0xff]  ;;  %v7903_v6 = vld [vmem:[#allocation14 + $0x960] sm:$0xff] }
0x25c3   : > { %v11742_v50 = vpack.c.bf16 %v7873_v26, %v7871_v16  ;;  %v11744_v8 = vpack.c.bf16 %v7878_v28, %v7876_v27  ;;  %v7905_v42 = vld [vmem:[#allocation14 + $0x970] sm:$0xff]  ;;  %v7907_v27 = vld [vmem:[#allocation14 + $0x980] sm:$0xff] }
0x25c4   : > { %v11774_v16 = vpack.c.bf16 %v7905_v42, %v7903_v6  ;;  %v7909_v28 = vld [vmem:[#allocation14 + $0x990] sm:$0xff]  ;;  %v7932_v6 = vld [vmem:[#allocation14 + $0xa48] sm:$0xff]  ;;  %v7934_v42 = vld [vmem:[#allocation14 + $0xa58] sm:$0xff] }
0x25c5   : > { %11655 = vmatpush1.bf16.msra.mxu1 %v11654_v48  ;;  %11719 = vmatpush1.bf16.msra.mxu0 %v11718_v58  ;;  %v7882_v48 = vld [vmem:[#allocation14 + $0x8b8] sm:$0xff]  ;;  %v11746_v58 = vpack.c.bf16 %v7877_v24, %v7875_v10  ;;  %v11778_v10 = vpack.c.bf16 %v7909_v28, %v7907_v27 }
0x25c6   : > { %11657 = vmatprep.subr.bf16.mxu1 %v11656_v5  ;;  %11721 = vmatprep.subr.bf16.mxu0 %v11720_v21  ;;  %v11748_v29 = vpack.c.bf16 %v7882_v48, %v7880_v35  ;;  %v7881_v5 = vld [vmem:[#allocation14 + $0x8b0] sm:$0xff]  ;;  %v7884_v21 = vld [vmem:[#allocation14 + $0x8c8] sm:$0xff]  ;;  %v7911_v35 = vld [vmem:[#allocation14 + $0x9a0] sm:$0xff] }
0x25c7   : > { %v11750_v52 = vpack.c.bf16 %v7881_v5, %v7879_v31  ;;  %v11752_v18 = vpack.c.bf16 %v7886_v55, %v7884_v21  ;;  %v7913_v48 = vld [vmem:[#allocation14 + $0x9b0] sm:$0xff]  ;;  %v7915_v21 = vld [vmem:[#allocation14 + $0x9c0] sm:$0xff] }
0x25c8   : > { %v11782_v31 = vpack.c.bf16 %v7913_v48, %v7911_v35  ;;  %v7917_v55 = vld [vmem:[#allocation14 + $0x9d0] sm:$0xff]  ;;  %v7936_v35 = vld [vmem:[#allocation14 + $0xa68] sm:$0xff]  ;;  %v7938_v48 = vld [vmem:[#allocation14 + $0xa78] sm:$0xff] }
0x25c9   : > { %11659 = vmatpush1.bf16.msra.mxu1 %v11658_v12  ;;  %11723 = vmatpush1.bf16.msra.mxu0 %v11722_v11  ;;  %v7890_v12 = vld [vmem:[#allocation14 + $0x8f8] sm:$0xff]  ;;  %v11754_v11 = vpack.c.bf16 %v7885_v4, %v7883_v53  ;;  %v11786_v53 = vpack.c.bf16 %v7917_v55, %v7915_v21  ;;  %v7935_v21 = vld [vmem:[#allocation14 + $0xa60] sm:$0xff]  ;;  %v7937_v55 = vld [vmem:[#allocation14 + $0xa70] sm:$0xff] }
0x25ca   : > { %11661 = vmatprep.subr.bf16.mxu1 %v11660_v54  ;;  %11725 = vmatprep.subr.bf16.mxu0 %v11724_v19  ;;  %v11756_v63 = vpack.c.bf16 %v7890_v12, %v7888_v40  ;;  %v7887_v54 = vld [vmem:[#allocation14 + $0x8e0] sm:$0xff]  ;;  %v7889_v19 = vld [vmem:[#allocation14 + $0x8f0] sm:$0xff] }
0x25cb   : > { %v11758_v13 = vpack.c.bf16 %v7889_v19, %v7887_v54  ;;  %v7919_v40 = vld [vmem:[#allocation14 + $0x9e0] sm:$0xff]  ;;  %v7921_v12 = vld [vmem:[#allocation14 + $0x9f0] sm:$0xff] }
0x25cc   : > { %v11790_v54 = vpack.c.bf16 %v7921_v12, %v7919_v40  ;;  %v7939_v40 = vld [vmem:[#allocation14 + $0xa80] sm:$0xff]  ;;  %v7941_v12 = vld [vmem:[#allocation14 + $0xa90] sm:$0xff] }
0x25cd   : > { %11663 = vmatpush1.bf16.msra.mxu1 %v11662_v59  ;;  %11727 = vmatpush1.bf16.msra.mxu0 %v11726_v38  ;;  %v7893_v59 = vld [vmem:[#allocation14 + $0x910] sm:$0xff]  ;;  %v7896_v38 = vld [vmem:[#allocation14 + $0x928] sm:$0xff] }
0x25ce   : > { %11729 = vmatprep.subr.bf16.mxu1 %v11728_v3  ;;  %v7898_v3 = vld [vmem:[#allocation14 + $0x938] sm:$0xff]  ;;  %v11762_v20 = vpack.c.bf16 %v7893_v59, %v7891_v57 }
0x25cf   : > { %v11764_v7 = vpack.c.bf16 %v7898_v3, %v7896_v38 }
0x25d0   : > { %7753 = vmatmul.mubr.f32.vlgmr.msra.gmra.mrb[90].mxu1 %v15571_v60  ;;  %7830 = vmatmul.mubr.f32.vlgmr.msra.gmra.mrb[38].mxu0 %v15571_v60 }
0x25d1   : > { %7758 = vmatprep.mubr.f32.mxu1 %v15609_v17  ;;  %7835 = vmatprep.mubr.f32.mxu0 %v15609_v17 }
0x25d2   : > { %11731 = vmatpush1.bf16.msra.mxu1 %v11730_v14  ;;  %v7900_v14 = vld [vmem:[#allocation14 + $0x948] sm:$0xff] }
0x25d3   : > { %11733 = vmatprep.subr.bf16.mxu1 %v11732_v39  ;;  %v7902_v39 = vld [vmem:[#allocation14 + $0x958] sm:$0xff] }
0x25d4   : > { %7759 = vmatmul.mubr.f32.gmra.mrb[92].mxu1 %v15611_v22  ;;  %7836 = vmatmul.mubr.f32.gmra.mrb[40].mxu0 %v15611_v22  ;;  %v11768_v15 = vpack.c.bf16 %v7902_v39, %v7900_v14  ;;  %v7930_v14 = vld [vmem:[#allocation14 + $0xa38] sm:$0xff] }
0x25d5   : > { %v11796_v37 = vpack.c.bf16 %v7930_v14, %v7928_v62  ;;  %v7954_v62 = vld [vmem:[#allocation14 + $0xaf8] sm:$0xff] }
0x25d6   : > { %11735 = vmatpush1.bf16.msra.mxu1 %v11734_v45  ;;  %v7904_v45 = vld [vmem:[#allocation14 + $0x968] sm:$0xff] }
0x25d7   : > { %11737 = vmatprep.subr.bf16.mxu1 %v11736_v9  ;;  %v7906_v9 = vld [vmem:[#allocation14 + $0x978] sm:$0xff] }
0x25d8   : > { %v11772_v44 = vpack.c.bf16 %v7906_v9, %v7904_v45  ;;  %v7927_v45 = vld [vmem:[#allocation14 + $0xa20] sm:$0xff]  ;;  %v7929_v9 = vld [vmem:[#allocation14 + $0xa30] sm:$0xff] }
0x25d9   : > { %v11798_v28 = vpack.c.bf16 %v7929_v9, %v7927_v45  ;;  %v7958_v45 = vld [vmem:[#allocation14 + $0xb18] sm:$0xff] }
0x25da   : > { %11739 = vmatpush1.bf16.msra.mxu1 %v11738_v34  ;;  %v7908_v34 = vld [vmem:[#allocation14 + $0x988] sm:$0xff] }
0x25db   : > { %11741 = vmatprep.subr.bf16.mxu1 %v11740_v41  ;;  %v7910_v41 = vld [vmem:[#allocation14 + $0x998] sm:$0xff] }
0x25dc   : > { %v11776_v26 = vpack.c.bf16 %v7910_v41, %v7908_v34 }
0x25de   : > { %11743 = vmatpush1.bf16.msra.mxu1 %v11742_v50  ;;  %v7912_v50 = vld [vmem:[#allocation14 + $0x9a8] sm:$0xff] }
0x25df   : > { %11745 = vmatprep.subr.bf16.mxu1 %v11744_v8  ;;  %v7914_v8 = vld [vmem:[#allocation14 + $0x9b8] sm:$0xff] }
0x25e0   : > { %v11780_v24 = vpack.c.bf16 %v7914_v8, %v7912_v50  ;;  %v11800_v50 = vpack.c.bf16 %v7934_v42, %v7932_v6  ;;  %v7931_v8 = vld [vmem:[#allocation14 + $0xa40] sm:$0xff]  ;;  %v7957_v42 = vld [vmem:[#allocation14 + $0xb10] sm:$0xff] }
0x25e1   : > { %v7955_v6 = vld [vmem:[#allocation14 + $0xb00] sm:$0xff] }
0x25e2   : > { %11747 = vmatpush1.bf16.msra.mxu1 %v11746_v58  ;;  %v7916_v58 = vld [vmem:[#allocation14 + $0x9c8] sm:$0xff] }
0x25e3   : > { %11749 = vmatprep.subr.bf16.mxu1 %v11748_v29  ;;  %v7918_v29 = vld [vmem:[#allocation14 + $0x9d8] sm:$0xff] }
0x25e4   : > { %v11784_v5 = vpack.c.bf16 %v7918_v29, %v7916_v58 }
0x25e6   : > { %11751 = vmatpush1.bf16.msra.mxu1 %v11750_v52  ;;  %v7920_v52 = vld [vmem:[#allocation14 + $0x9e8] sm:$0xff] }
0x25e7   : > { %11753 = vmatprep.subr.bf16.mxu1 %v11752_v18  ;;  %v7922_v18 = vld [vmem:[#allocation14 + $0x9f8] sm:$0xff] }
0x25e8   : > { %v11788_v4 = vpack.c.bf16 %v7922_v18, %v7920_v52  ;;  %v7940_v52 = vld [vmem:[#allocation14 + $0xa88] sm:$0xff]  ;;  %v7942_v18 = vld [vmem:[#allocation14 + $0xa98] sm:$0xff] }
0x25ea   : > { %11755 = vmatpush1.bf16.msra.mxu1 %v11754_v11  ;;  %v7924_v11 = vld [vmem:[#allocation14 + $0xa08] sm:$0xff] }
0x25eb   : > { %11757 = vmatprep.subr.bf16.mxu1 %v11756_v63  ;;  %v7926_v63 = vld [vmem:[#allocation14 + $0xa18] sm:$0xff] }
0x25ec   : > { %v11792_v19 = vpack.c.bf16 %v7926_v63, %v7924_v11  ;;  %v7944_v11 = vld [vmem:[#allocation14 + $0xaa8] sm:$0xff]  ;;  %v7946_v63 = vld [vmem:[#allocation14 + $0xab8] sm:$0xff] }
0x25ee   : > { %11759 = vmatpush1.bf16.msra.mxu1 %v11758_v13  ;;  %v7501_v13 = vrot.slane %v15946_v36, %v13651_v43 }
0x25ef   : > { %11761 = vmatprep.subr.bf16.mxu1 %v11760_v23 }
0x25f2   : > { %11763 = vmatpush1.bf16.msra.mxu1 %v11762_v20  ;;  %v7923_v20 = vld [vmem:[#allocation14 + $0xa00] sm:$0xff] }
0x25f3   : > { %11765 = vmatprep.subr.bf16.mxu1 %v11764_v7  ;;  %v7925_v7 = vld [vmem:[#allocation14 + $0xa10] sm:$0xff] }
0x25f6   : > { %11767 = vmatpush1.bf16.msra.mxu1 %v11766_v25  ;;  %v15956_v25 = vrot.slane %v15946_v36, %v13538_v47 }
0x25f7   : > { %11769 = vmatprep.subr.bf16.mxu1 %v11768_v15  ;;  %v11794_v15 = vpack.c.bf16 %v7925_v7, %v7923_v20  ;;  %v7947_v20 = vld [vmem:[#allocation14 + $0xac0] sm:$0xff]  ;;  %v7949_v7 = vld [vmem:[#allocation14 + $0xad0] sm:$0xff] }
0x25f8   : > { %v11818_v14 = vpack.c.bf16 %v7949_v7, %v7947_v20  ;;  %v7979_v7 = vld [vmem:[#allocation14 + $0xbc0] sm:$0xff] }
0x25fa   : > { %11771 = vmatpush1.bf16.msra.mxu1 %v11770_v56 }
0x25fb   : > { %11773 = vmatprep.subr.bf16.mxu1 %v11772_v44 }
0x25fe   : > { %11775 = vmatpush1.bf16.msra.mxu1 %v11774_v16 }
0x25ff   : > { %11777 = vmatprep.subr.bf16.mxu1 %v11776_v26 }
0x2602   : > { %11779 = vmatpush1.bf16.msra.mxu1 %v11778_v10  ;;  %v7933_v10 = vld [vmem:[#allocation14 + $0xa50] sm:$0xff] }
0x2603   : > { %11781 = vmatprep.subr.bf16.mxu1 %v11780_v24 }
0x2606   : > { %11783 = vmatpush1.bf16.msra.mxu1 %v11782_v31  ;;  %v11802_v31 = vpack.c.bf16 %v7933_v10, %v7931_v8  ;;  %v7964_v8 = vld [vmem:[#allocation14 + $0xb48] sm:$0xff]  ;;  %v7966_v10 = vld [vmem:[#allocation14 + $0xb58] sm:$0xff] }
0x2607   : > { %11785 = vmatprep.subr.bf16.mxu1 %v11784_v5  ;;  %v11804_v5 = vpack.c.bf16 %v7938_v48, %v7936_v35  ;;  %v11832_v35 = vpack.c.bf16 %v7966_v10, %v7964_v8  ;;  %v7963_v48 = vld [vmem:[#allocation14 + $0xb40] sm:$0xff]  ;;  %v7989_v8 = vld [vmem:[#allocation14 + $0xc10] sm:$0xff] }
0x260a   : > { %11787 = vmatpush1.bf16.msra.mxu1 %v11786_v53  ;;  %v11806_v53 = vpack.c.bf16 %v7937_v55, %v7935_v21  ;;  %v7967_v55 = vld [vmem:[#allocation14 + $0xb60] sm:$0xff] }
0x260b   : > { %11789 = vmatprep.subr.bf16.mxu1 %v11788_v4  ;;  %v11808_v4 = vpack.c.bf16 %v7942_v18, %v7940_v52  ;;  %v7969_v52 = vld [vmem:[#allocation14 + $0xb70] sm:$0xff]  ;;  %v7972_v18 = vld [vmem:[#allocation14 + $0xb88] sm:$0xff] }
0x260e   : > { %11791 = vmatpush1.bf16.msra.mxu1 %v11790_v54  ;;  %v11810_v54 = vpack.c.bf16 %v7941_v12, %v7939_v40  ;;  %v7971_v12 = vld [vmem:[#allocation14 + $0xb80] sm:$0xff] }
0x260f   : > { %11793 = vmatprep.subr.bf16.mxu1 %v11792_v19  ;;  %v11812_v19 = vpack.c.bf16 %v7946_v63, %v7944_v11  ;;  %v7973_v11 = vld [vmem:[#allocation14 + $0xb90] sm:$0xff]  ;;  %v7976_v63 = vld [vmem:[#allocation14 + $0xba8] sm:$0xff] }
0x2663   : > { %v7600_v23 = vpop.f32.mrb[86].mxu1  ;;  %v15952_v57 = vpop.f32.mrb[34].mxu0 }
0x2664   : > { %v7601_v59 = vadd.f32 %v7600_v23, %v7497_v32  ;;  %v7602_v38 = vpop.f32.mrb[87].mxu1  ;;  %v7679_v3 = vpop.f32.mrb[35].mxu0  ;;  %v7948_v23 = vld [vmem:[#allocation14 + $0xac8] sm:$0xff] }
0x2665   : > { %v7603_v61 = vadd.f32 %v7602_v38, %v7501_v13  ;;  %v7680_v26 = vadd.f32 %v7679_v3, %v15956_v25 }
0x2666   : > { %v7842_v51 = vmax.f32 %v7601_v59, 0.0  ;;  %v7950_v59 = vld [vmem:[#allocation14 + $0xad8] sm:$0xff] }
0x2667   : > { %v7843_v39 = vmax.f32 %v7603_v61, 0.0  ;;  %v7845_v29 = vmax.f32 %v7680_v26, 0.0  ;;  %v11816_v3 = vpack.c.bf16 %v7950_v59, %v7948_v23  ;;  %v7952_v61 = vld [vmem:[#allocation14 + $0xae8] sm:$0xff]  ;;  %v11826_v26 = vpack.c.bf16 %v7957_v42, %v7955_v6  ;;  %v7977_v23 = vld [vmem:[#allocation14 + $0xbb0] sm:$0xff] }
0x2668   : > { %v7980_v59 = vld [vmem:[#allocation14 + $0xbc8] sm:$0xff] }
0x2669   : > { %v7606_v56 = vpop.f32.mrb[88].mxu1  ;;  %v15958_v44 = vpop.f32.mrb[36].mxu0  ;;  %8192 = vmatprep.mubr.f32.mxu1 %v7843_v39  ;;  %v11820_v39 = vpack.c.bf16 %v7954_v62, %v7952_v61  ;;  %v7981_v61 = vld [vmem:[#allocation14 + $0xbd0] sm:$0xff]  ;;  %v7984_v62 = vld [vmem:[#allocation14 + $0xbe8] sm:$0xff] }
0x266a   : > { %v7607_v34 = vadd.f32 %v7606_v56, %v7497_v32  ;;  %v7608_v41 = vpop.f32.mrb[89].mxu1  ;;  %v15960_v16 = vpop.f32.mrb[37].mxu0  ;;  %8193 = vmatmul.mubr.f32.vlgmr.msra.gmra.mrb[94].mxu1 %v7842_v51  ;;  %v7943_v32 = vld [vmem:[#allocation14 + $0xaa0] sm:$0xff]  ;;  %v7953_v51 = vld [vmem:[#allocation14 + $0xaf0] sm:$0xff] }
0x266b   : > { %v7609_v27 = vadd.f32 %v7608_v41, %v7501_v13  ;;  %11795 = vmatpush1.bf16.msra.mxu1 %v11794_v15  ;;  %v7945_v13 = vld [vmem:[#allocation14 + $0xab0] sm:$0xff]  ;;  %v7951_v15 = vld [vmem:[#allocation14 + $0xae0] sm:$0xff]  ;;  %v7962_v41 = vld [vmem:[#allocation14 + $0xb38] sm:$0xff]  ;;  %v7686_v10 = vadd.f32 %v15960_v16, %v15956_v25 }
0x266c   : > { %11797 = vmatprep.subr.bf16.mxu1 %v11796_v37  ;;  %v7850_v58 = vmax.f32 %v7607_v34, 0.0  ;;  %v11814_v38 = vpack.c.bf16 %v7945_v13, %v7943_v32  ;;  %v7956_v37 = vld [vmem:[#allocation14 + $0xb08] sm:$0xff]  ;;  %v11822_v9 = vpack.c.bf16 %v7953_v51, %v7951_v15  ;;  %v7975_v13 = vld [vmem:[#allocation14 + $0xba0] sm:$0xff]  ;;  %v7505_v15 = vrot.slane %v15946_v36, %v13535_v46 }
0x266d   : > { %v7851_v24 = vmax.f32 %v7609_v27, 0.0  ;;  %v11824_v56 = vpack.c.bf16 %v7958_v45, %v7956_v37  ;;  %v7960_v34 = vld [vmem:[#allocation14 + $0xb28] sm:$0xff]  ;;  %v7983_v37 = vld [vmem:[#allocation14 + $0xbe0] sm:$0xff]  ;;  %v7985_v45 = vld [vmem:[#allocation14 + $0xbf0] sm:$0xff] }
0x266e   : > { %v11828_v27 = vpack.c.bf16 %v7962_v41, %v7960_v34  ;;  %v11854_v34 = vpack.c.bf16 %v7985_v45, %v7983_v37  ;;  %v7678_v41 = vadd.f32 %v15952_v57, %v7505_v15  ;;  %v7991_v16 = vld [vmem:[#allocation14 + $0xc20] sm:$0xff] }
0x266f   : > { %8198 = vmatprep.mubr.f32.mxu1 %v7851_v24  ;;  %11799 = vmatpush1.bf16.msra.mxu1 %v11798_v28  ;;  %v7959_v28 = vld [vmem:[#allocation14 + $0xb20] sm:$0xff] }
0x2670   : > { %8199 = vmatmul.mubr.f32.gmra.mrb[96].mxu1 %v7850_v58  ;;  %11801 = vmatprep.subr.bf16.mxu1 %v11800_v50  ;;  %v7961_v50 = vld [vmem:[#allocation14 + $0xb30] sm:$0xff] }
0x2671   : > { %8269 = vmatprep.mubr.f32.mxu1 %v7845_v29  ;;  %v11830_v24 = vpack.c.bf16 %v7961_v50, %v7959_v28  ;;  %v7965_v58 = vld [vmem:[#allocation14 + $0xb50] sm:$0xff]  ;;  %v7968_v29 = vld [vmem:[#allocation14 + $0xb68] sm:$0xff]  ;;  %v7987_v50 = vld [vmem:[#allocation14 + $0xc00] sm:$0xff] }
0x2672   : > { %v11858_v57 = vpack.c.bf16 %v7989_v8, %v7987_v50  ;;  %v8011_v50 = vld [vmem:[#allocation14 + $0xcc0] sm:$0xff]  ;;  %v8013_v8 = vld [vmem:[#allocation14 + $0xcd0] sm:$0xff] }
0x2673   : > { %11803 = vmatpush1.bf16.msra.mxu1 %v11802_v31  ;;  %v7970_v31 = vld [vmem:[#allocation14 + $0xb78] sm:$0xff] }
0x2674   : > { %11805 = vmatprep.subr.bf16.mxu1 %v11804_v5  ;;  %v11834_v5 = vpack.c.bf16 %v7965_v58, %v7963_v48  ;;  %v11836_v21 = vpack.c.bf16 %v7970_v31, %v7968_v29  ;;  %v7994_v48 = vld [vmem:[#allocation14 + $0xc38] sm:$0xff]  ;;  %v7844_v31 = vmax.f32 %v7678_v41, 0.0 }
0x2675   : > { %v8014_v41 = vld [vmem:[#allocation14 + $0xcd8] sm:$0xff] }
0x2677   : > { %11807 = vmatpush1.bf16.msra.mxu1 %v11806_v53  ;;  %v7974_v53 = vld [vmem:[#allocation14 + $0xb98] sm:$0xff] }
0x2678   : > { %11809 = vmatprep.subr.bf16.mxu1 %v11808_v4  ;;  %v11838_v4 = vpack.c.bf16 %v7969_v52, %v7967_v55  ;;  %v11840_v40 = vpack.c.bf16 %v7974_v53, %v7972_v18  ;;  %v7993_v52 = vld [vmem:[#allocation14 + $0xc30] sm:$0xff]  ;;  %v7853_v18 = vmax.f32 %v7686_v10, 0.0  ;;  %v8016_v10 = vld [vmem:[#allocation14 + $0xce8] sm:$0xff] }
0x267b   : > { %11811 = vmatpush1.bf16.msra.mxu1 %v11810_v54  ;;  %v7978_v54 = vld [vmem:[#allocation14 + $0xbb8] sm:$0xff] }
0x267c   : > { %11813 = vmatprep.subr.bf16.mxu1 %v11812_v19  ;;  %v11842_v19 = vpack.c.bf16 %v7973_v11, %v7971_v12  ;;  %v11844_v32 = vpack.c.bf16 %v7978_v54, %v7976_v63  ;;  %v11862_v12 = vpack.c.bf16 %v7993_v52, %v7991_v16  ;;  %v7995_v63 = vld [vmem:[#allocation14 + $0xc40] sm:$0xff]  ;;  %v7997_v54 = vld [vmem:[#allocation14 + $0xc50] sm:$0xff]  ;;  %v8022_v16 = vld [vmem:[#allocation14 + $0xd18] sm:$0xff] }
0x267f   : > { %11815 = vmatpush1.bf16.msra.mxu1 %v11814_v38  ;;  %v7982_v38 = vld [vmem:[#allocation14 + $0xbd8] sm:$0xff] }
0x2680   : > { %11817 = vmatprep.subr.bf16.mxu1 %v11816_v3  ;;  %v11846_v3 = vpack.c.bf16 %v7977_v23, %v7975_v13  ;;  %v11848_v20 = vpack.c.bf16 %v7982_v38, %v7980_v59  ;;  %v8002_v13 = vld [vmem:[#allocation14 + $0xc78] sm:$0xff]  ;;  %v11866_v23 = vpack.c.bf16 %v7997_v54, %v7995_v63  ;;  %v7999_v38 = vld [vmem:[#allocation14 + $0xc60] sm:$0xff]  ;;  %v8025_v54 = vld [vmem:[#allocation14 + $0xd30] sm:$0xff] }
0x2681   : > { %v8023_v63 = vld [vmem:[#allocation14 + $0xd20] sm:$0xff] }
0x2683   : > { %11819 = vmatpush1.bf16.msra.mxu1 %v11818_v14  ;;  %v7986_v14 = vld [vmem:[#allocation14 + $0xbf8] sm:$0xff] }
0x2684   : > { %11821 = vmatprep.subr.bf16.mxu1 %v11820_v39  ;;  %v11850_v39 = vpack.c.bf16 %v7981_v61, %v7979_v7  ;;  %v11852_v51 = vpack.c.bf16 %v7986_v14, %v7984_v62  ;;  %v8006_v7 = vld [vmem:[#allocation14 + $0xc98] sm:$0xff]  ;;  %v8003_v14 = vld [vmem:[#allocation14 + $0xc80] sm:$0xff] }
0x2687   : > { %11823 = vmatpush1.bf16.msra.mxu1 %v11822_v9  ;;  %v7988_v9 = vld [vmem:[#allocation14 + $0xc08] sm:$0xff] }
0x2688   : > { %11825 = vmatprep.subr.bf16.mxu1 %v11824_v56  ;;  %v7990_v56 = vld [vmem:[#allocation14 + $0xc18] sm:$0xff] }
0x2689   : > { %v11856_v28 = vpack.c.bf16 %v7990_v56, %v7988_v9  ;;  %v8007_v9 = vld [vmem:[#allocation14 + $0xca0] sm:$0xff]  ;;  %v8009_v56 = vld [vmem:[#allocation14 + $0xcb0] sm:$0xff] }
0x268b   : > { %11827 = vmatpush1.bf16.msra.mxu1 %v11826_v26 }
0x268c   : > { %11829 = vmatprep.subr.bf16.mxu1 %v11828_v27 }
0x268f   : > { %11831 = vmatpush1.bf16.msra.mxu1 %v11830_v24  ;;  %v15976_v24 = vrot.slane %v15946_v36, %v13566_v2 }
0x2690   : > { %11833 = vmatprep.subr.bf16.mxu1 %v11832_v35  ;;  %v7992_v35 = vld [vmem:[#allocation14 + $0xc28] sm:$0xff] }
0x2691   : > { %v11860_v25 = vpack.c.bf16 %v7994_v48, %v7992_v35  ;;  %v8018_v35 = vld [vmem:[#allocation14 + $0xcf8] sm:$0xff]  ;;  %v11882_v48 = vpack.c.bf16 %v8013_v8, %v8011_v50  ;;  %v8041_v50 = vld [vmem:[#allocation14 + $0xdb0] sm:$0xff]  ;;  %v8044_v8 = vld [vmem:[#allocation14 + $0xdc8] sm:$0xff] }
0x2693   : > { %11835 = vmatpush1.bf16.msra.mxu1 %v11834_v5  ;;  %v7684_v5 = vadd.f32 %v15958_v44, %v7505_v15  ;;  %v8008_v15 = vld [vmem:[#allocation14 + $0xca8] sm:$0xff] }
0x2694   : > { %11837 = vmatprep.subr.bf16.mxu1 %v11836_v21 }
0x2695   : > { %v7852_v11 = vmax.f32 %v7684_v5, 0.0  ;;  %v8017_v5 = vld [vmem:[#allocation14 + $0xcf0] sm:$0xff] }
0x2697   : > { %11839 = vmatpush1.bf16.msra.mxu1 %v11838_v4  ;;  %v7996_v4 = vld [vmem:[#allocation14 + $0xc48] sm:$0xff] }
0x2698   : > { %11841 = vmatprep.subr.bf16.mxu1 %v11840_v40  ;;  %v7998_v40 = vld [vmem:[#allocation14 + $0xc58] sm:$0xff] }
0x2699   : > { %v11864_v44 = vpack.c.bf16 %v7998_v40, %v7996_v4  ;;  %v8021_v4 = vld [vmem:[#allocation14 + $0xd10] sm:$0xff]  ;;  %v8024_v40 = vld [vmem:[#allocation14 + $0xd28] sm:$0xff] }
0x269b   : > { %11843 = vmatpush1.bf16.msra.mxu1 %v11842_v19 }
0x269c   : > { %11845 = vmatprep.subr.bf16.mxu1 %v11844_v32  ;;  %v8000_v32 = vld [vmem:[#allocation14 + $0xc68] sm:$0xff] }
0x269d   : > { %v11868_v59 = vpack.c.bf16 %v8002_v13, %v8000_v32  ;;  %v8030_v32 = vld [vmem:[#allocation14 + $0xd58] sm:$0xff]  ;;  %v11894_v13 = vpack.c.bf16 %v8025_v54, %v8023_v63  ;;  %v8051_v54 = vld [vmem:[#allocation14 + $0xe00] sm:$0xff] }
0x269f   : > { %11847 = vmatpush1.bf16.msra.mxu1 %v11846_v3  ;;  %v8001_v3 = vld [vmem:[#allocation14 + $0xc70] sm:$0xff] }
0x26a0   : > { %11849 = vmatprep.subr.bf16.mxu1 %v11848_v20  ;;  %v8004_v20 = vld [vmem:[#allocation14 + $0xc88] sm:$0xff]  ;;  %v11870_v61 = vpack.c.bf16 %v8001_v3, %v7999_v38  ;;  %v8029_v38 = vld [vmem:[#allocation14 + $0xd50] sm:$0xff] }
0x26a1   : > { %v11872_v62 = vpack.c.bf16 %v8006_v7, %v8004_v20  ;;  %v8032_v3 = vld [vmem:[#allocation14 + $0xd68] sm:$0xff]  ;;  %v8034_v20 = vld [vmem:[#allocation14 + $0xd78] sm:$0xff] }
0x26a3   : > { %v15965_v6 = vpop.f32.mrb[90].mxu1  ;;  %v15967_v42 = vpop.f32.mrb[38].mxu0  ;;  %11851 = vmatpush1.bf16.msra.mxu1 %v11850_v39  ;;  %v8005_v39 = vld [vmem:[#allocation14 + $0xc90] sm:$0xff] }
0x26a4   : > { %v7756_v26 = vpop.f32.mrb[91].mxu1  ;;  %v15970_v27 = vpop.f32.mrb[39].mxu0  ;;  %11853 = vmatprep.subr.bf16.mxu1 %v11852_v51  ;;  %v8010_v51 = vld [vmem:[#allocation14 + $0xcb8] sm:$0xff]  ;;  %v11874_v37 = vpack.c.bf16 %v8005_v39, %v8003_v14  ;;  %v8033_v14 = vld [vmem:[#allocation14 + $0xd70] sm:$0xff]  ;;  %v8036_v39 = vld [vmem:[#allocation14 + $0xd88] sm:$0xff] }
0x26a5   : > { %v7757_v53 = vadd.f32 %v7756_v26, %v15976_v24  ;;  %v11876_v45 = vpack.c.bf16 %v8010_v51, %v8008_v15  ;;  %v11878_v26 = vpack.c.bf16 %v8009_v56, %v8007_v9  ;;  %v8038_v15 = vld [vmem:[#allocation14 + $0xd98] sm:$0xff]  ;;  %v8037_v9 = vld [vmem:[#allocation14 + $0xd90] sm:$0xff]  ;;  %v8040_v56 = vld [vmem:[#allocation14 + $0xda8] sm:$0xff] }
0x26a7   : > { %v15978_v58 = vpop.f32.mrb[92].mxu1  ;;  %v15980_v29 = vpop.f32.mrb[40].mxu0  ;;  %11855 = vmatpush1.bf16.msra.mxu1 %v11854_v34  ;;  %v7847_v19 = vmax.f32 %v7757_v53, 0.0  ;;  %v8012_v34 = vld [vmem:[#allocation14 + $0xcc8] sm:$0xff]  ;;  %v8019_v53 = vld [vmem:[#allocation14 + $0xd00] sm:$0xff] }
0x26a8   : > { %v15983_v21 = vpop.f32.mrb[93].mxu1  ;;  %v15985_v55 = vpop.f32.mrb[41].mxu0  ;;  %11857 = vmatprep.subr.bf16.mxu1 %v11856_v28  ;;  %v11880_v28 = vpack.c.bf16 %v8014_v41, %v8012_v34  ;;  %v8042_v34 = vld [vmem:[#allocation14 + $0xdb8] sm:$0xff] }
0x26aa   : > { %8270 = vmatmul.mubr.f32.vlgmr.msra.gmra.mrb[94].mxu1 %v7844_v31  ;;  %v8015_v31 = vld [vmem:[#allocation14 + $0xce0] sm:$0xff] }
0x26ab   : > { %8275 = vmatprep.mubr.f32.mxu1 %v7853_v18  ;;  %11859 = vmatpush1.bf16.msra.mxu1 %v11858_v57  ;;  %v11884_v57 = vpack.c.bf16 %v8018_v35, %v8016_v10  ;;  %v11886_v52 = vpack.c.bf16 %v8017_v5, %v8015_v31  ;;  %v8046_v10 = vld [vmem:[#allocation14 + $0xdd8] sm:$0xff]  ;;  %v8045_v31 = vld [vmem:[#allocation14 + $0xdd0] sm:$0xff]  ;;  %v8048_v5 = vld [vmem:[#allocation14 + $0xde8] sm:$0xff] }
0x26ac   : > { %11861 = vmatprep.subr.bf16.mxu1 %v11860_v25  ;;  %v8020_v25 = vld [vmem:[#allocation14 + $0xd08] sm:$0xff] }
0x26ad   : > { %v11888_v18 = vpack.c.bf16 %v8022_v16, %v8020_v25  ;;  %v8050_v25 = vld [vmem:[#allocation14 + $0xdf8] sm:$0xff] }
0x26ae   : > { %8276 = vmatmul.mubr.f32.gmra.mrb[96].mxu1 %v7852_v11  ;;  %v11890_v11 = vpack.c.bf16 %v8021_v4, %v8019_v53  ;;  %v8047_v53 = vld [vmem:[#allocation14 + $0xde0] sm:$0xff]  ;;  %v8049_v4 = vld [vmem:[#allocation14 + $0xdf0] sm:$0xff] }
0x26af   : > { %11863 = vmatpush1.bf16.msra.mxu1 %v11862_v12  ;;  %8346 = vmatprep.mubr.f32.mxu1 %v7847_v19  ;;  %v8026_v12 = vld [vmem:[#allocation14 + $0xd38] sm:$0xff]  ;;  %v8028_v19 = vld [vmem:[#allocation14 + $0xd48] sm:$0xff] }
0x26b0   : > { %11865 = vmatprep.subr.bf16.mxu1 %v11864_v44  ;;  %v11892_v44 = vpack.c.bf16 %v8026_v12, %v8024_v40  ;;  %v8052_v40 = vld [vmem:[#allocation14 + $0xe08] sm:$0xff]  ;;  %v8054_v12 = vld [vmem:[#allocation14 + $0xe18] sm:$0xff] }
0x26b1   : > { %v11920_v63 = vpack.c.bf16 %v8054_v12, %v8052_v40  ;;  %v8075_v12 = vld [vmem:[#allocation14 + $0xec0] sm:$0xff] }
0x26b3   : > { %11867 = vmatpush1.bf16.msra.mxu1 %v11866_v23  ;;  %v11896_v23 = vpack.c.bf16 %v8030_v32, %v8028_v19  ;;  %v8053_v19 = vld [vmem:[#allocation14 + $0xe10] sm:$0xff]  ;;  %v15993_v32 = vrot.slane %v15946_v36, %v14676_v49 }
0x26b4   : > { %11869 = vmatprep.subr.bf16.mxu1 %v11868_v59  ;;  %v8027_v59 = vld [vmem:[#allocation14 + $0xd40] sm:$0xff] }
0x26b5   : > { %v11898_v7 = vpack.c.bf16 %v8029_v38, %v8027_v59  ;;  %v8058_v59 = vld [vmem:[#allocation14 + $0xe38] sm:$0xff]  ;;  %v11922_v38 = vpack.c.bf16 %v8053_v19, %v8051_v54 }
0x26b7   : > { %11871 = vmatpush1.bf16.msra.mxu1 %v11870_v61  ;;  %v11900_v61 = vpack.c.bf16 %v8034_v20, %v8032_v3 }
0x26b8   : > { %11873 = vmatprep.subr.bf16.mxu1 %v11872_v62  ;;  %v8031_v62 = vld [vmem:[#allocation14 + $0xd60] sm:$0xff] }
0x26b9   : > { %v11902_v51 = vpack.c.bf16 %v8033_v14, %v8031_v62  ;;  %v7834_v62 = vadd.f32 %v15970_v27, %v15993_v32 }
0x26bb   : > { %11875 = vmatpush1.bf16.msra.mxu1 %v11874_v37  ;;  %v11904_v37 = vpack.c.bf16 %v8038_v15, %v8036_v39  ;;  %v8060_v39 = vld [vmem:[#allocation14 + $0xe48] sm:$0xff]  ;;  %v8062_v15 = vld [vmem:[#allocation14 + $0xe58] sm:$0xff] }
0x26bc   : > { %11877 = vmatprep.subr.bf16.mxu1 %v11876_v45  ;;  %v8035_v45 = vld [vmem:[#allocation14 + $0xd80] sm:$0xff] }
0x26bd   : > { %v11906_v41 = vpack.c.bf16 %v8037_v9, %v8035_v45  ;;  %v8061_v45 = vld [vmem:[#allocation14 + $0xe50] sm:$0xff]  ;;  %v8064_v9 = vld [vmem:[#allocation14 + $0xe68] sm:$0xff] }
0x26bf   : > { %11879 = vmatpush1.bf16.msra.mxu1 %v11878_v26  ;;  %v11908_v26 = vpack.c.bf16 %v8042_v34, %v8040_v56  ;;  %v8066_v56 = vld [vmem:[#allocation14 + $0xe78] sm:$0xff] }
0x26c0   : > { %11881 = vmatprep.subr.bf16.mxu1 %v11880_v28  ;;  %v8039_v28 = vld [vmem:[#allocation14 + $0xda0] sm:$0xff]  ;;  %v11932_v27 = vpack.c.bf16 %v8066_v56, %v8064_v9  ;;  %v8093_v9 = vld [vmem:[#allocation14 + $0xf50] sm:$0xff]  ;;  %v8096_v56 = vld [vmem:[#allocation14 + $0xf68] sm:$0xff] }
0x26c1   : > { %v11910_v35 = vpack.c.bf16 %v8041_v50, %v8039_v28  ;;  %v8068_v28 = vld [vmem:[#allocation14 + $0xe88] sm:$0xff]  ;;  %v8070_v50 = vld [vmem:[#allocation14 + $0xe98] sm:$0xff] }
0x26c3   : > { %11883 = vmatpush1.bf16.msra.mxu1 %v11882_v48  ;;  %v11912_v48 = vpack.c.bf16 %v8046_v10, %v8044_v8  ;;  %v11936_v10 = vpack.c.bf16 %v8070_v50, %v8068_v28  ;;  %v8097_v28 = vld [vmem:[#allocation14 + $0xf70] sm:$0xff]  ;;  %v8100_v50 = vld [vmem:[#allocation14 + $0xf88] sm:$0xff] }
0x26c4   : > { %11885 = vmatprep.subr.bf16.mxu1 %v11884_v57  ;;  %v8043_v57 = vld [vmem:[#allocation14 + $0xdc0] sm:$0xff] }
0x26c5   : > { %v11914_v16 = vpack.c.bf16 %v8045_v31, %v8043_v57  ;;  %v8072_v57 = vld [vmem:[#allocation14 + $0xea8] sm:$0xff]  ;;  %v8074_v31 = vld [vmem:[#allocation14 + $0xeb8] sm:$0xff] }
0x26c7   : > { %11887 = vmatpush1.bf16.msra.mxu1 %v11886_v52  ;;  %v7513_v52 = vrot.slane %v15946_v36, %v13563_v1 }
0x26c8   : > { %11889 = vmatprep.subr.bf16.mxu1 %v11888_v18  ;;  %v11916_v18 = vpack.c.bf16 %v8050_v25, %v8048_v5  ;;  %v11940_v25 = vpack.c.bf16 %v8074_v31, %v8072_v57  ;;  %v8101_v57 = vld [vmem:[#allocation14 + $0xf90] sm:$0xff]  ;;  %v8104_v31 = vld [vmem:[#allocation14 + $0xfa8] sm:$0xff] }
0x26c9   : > { %v7761_v20 = vadd.f32 %v15978_v58, %v7513_v52  ;;  %v7849_v58 = vmax.f32 %v7834_v62, 0.0  ;;  %v8090_v62 = vld [vmem:[#allocation14 + $0xf38] sm:$0xff] }
0x26cb   : > { %11891 = vmatpush1.bf16.msra.mxu1 %v11890_v11  ;;  %v11918_v11 = vpack.c.bf16 %v8049_v4, %v8047_v53  ;;  %v8078_v53 = vld [vmem:[#allocation14 + $0xed8] sm:$0xff] }
0x26cc   : > { %11893 = vmatprep.subr.bf16.mxu1 %v11892_v44  ;;  %v7755_v44 = vadd.f32 %v15965_v6, %v7513_v52  ;;  %v8073_v52 = vld [vmem:[#allocation14 + $0xeb0] sm:$0xff] }
0x26ce   : > { %v7846_v3 = vmax.f32 %v7755_v44, 0.0  ;;  %v8080_v44 = vld [vmem:[#allocation14 + $0xee8] sm:$0xff] }
0x26cf   : > { %11895 = vmatpush1.bf16.msra.mxu1 %v11894_v13  ;;  %v7763_v13 = vadd.f32 %v15983_v21, %v15976_v24  ;;  %v7854_v21 = vmax.f32 %v7761_v20, 0.0 }
0x26d0   : > { %11897 = vmatprep.subr.bf16.mxu1 %v11896_v23  ;;  %v8056_v23 = vld [vmem:[#allocation14 + $0xe28] sm:$0xff] }
0x26d1   : > { %v11924_v6 = vpack.c.bf16 %v8058_v59, %v8056_v23  ;;  %v7855_v14 = vmax.f32 %v7763_v13, 0.0  ;;  %v8079_v13 = vld [vmem:[#allocation14 + $0xee0] sm:$0xff]  ;;  %v8081_v23 = vld [vmem:[#allocation14 + $0xef0] sm:$0xff]  ;;  %v8084_v59 = vld [vmem:[#allocation14 + $0xf08] sm:$0xff] }
0x26d3   : > { %11899 = vmatpush1.bf16.msra.mxu1 %v11898_v7  ;;  %v8055_v7 = vld [vmem:[#allocation14 + $0xe20] sm:$0xff] }
0x26d4   : > { %11901 = vmatprep.subr.bf16.mxu1 %v11900_v61  ;;  %v8057_v61 = vld [vmem:[#allocation14 + $0xe30] sm:$0xff] }
0x26d5   : > { %v11926_v24 = vpack.c.bf16 %v8057_v61, %v8055_v7  ;;  %v8085_v7 = vld [vmem:[#allocation14 + $0xf10] sm:$0xff]  ;;  %v8088_v61 = vld [vmem:[#allocation14 + $0xf28] sm:$0xff] }
0x26d7   : > { %11903 = vmatpush1.bf16.msra.mxu1 %v11902_v51  ;;  %v11928_v51 = vpack.c.bf16 %v8062_v15, %v8060_v39  ;;  %v11956_v39 = vpack.c.bf16 %v8090_v62, %v8088_v61  ;;  %v8087_v15 = vld [vmem:[#allocation14 + $0xf20] sm:$0xff] }
0x26d8   : > { %11905 = vmatprep.subr.bf16.mxu1 %v11904_v37  ;;  %v8059_v37 = vld [vmem:[#allocation14 + $0xe40] sm:$0xff] }
0x26d9   : > { %v11930_v34 = vpack.c.bf16 %v8061_v45, %v8059_v37 }
0x26db   : > { %11907 = vmatpush1.bf16.msra.mxu1 %v11906_v41  ;;  %v8063_v41 = vld [vmem:[#allocation14 + $0xe60] sm:$0xff] }
0x26dc   : > { %11909 = vmatprep.subr.bf16.mxu1 %v11908_v26  ;;  %v8065_v26 = vld [vmem:[#allocation14 + $0xe70] sm:$0xff] }
0x26dd   : > { %v11934_v8 = vpack.c.bf16 %v8065_v26, %v8063_v41  ;;  %v8095_v26 = vld [vmem:[#allocation14 + $0xf60] sm:$0xff] }
0x26df   : > { %11911 = vmatpush1.bf16.msra.mxu1 %v11910_v35  ;;  %v8067_v35 = vld [vmem:[#allocation14 + $0xe80] sm:$0xff] }
0x26e0   : > { %11913 = vmatprep.subr.bf16.mxu1 %v11912_v48  ;;  %v8069_v48 = vld [vmem:[#allocation14 + $0xe90] sm:$0xff] }
0x26e1   : > { %v11938_v5 = vpack.c.bf16 %v8069_v48, %v8067_v35  ;;  %v8099_v48 = vld [vmem:[#allocation14 + $0xf80] sm:$0xff] }
0x26e3   : > { %11915 = vmatpush1.bf16.msra.mxu1 %v11914_v16  ;;  %v8071_v16 = vld [vmem:[#allocation14 + $0xea0] sm:$0xff] }
0x26e4   : > { %11917 = vmatprep.subr.bf16.mxu1 %v11916_v18  ;;  %v8076_v18 = vld [vmem:[#allocation14 + $0xec8] sm:$0xff]  ;;  %v11942_v4 = vpack.c.bf16 %v8073_v52, %v8071_v16  ;;  %v8103_v52 = vld [vmem:[#allocation14 + $0xfa0] sm:$0xff] }
0x26e5   : > { %v11944_v40 = vpack.c.bf16 %v8078_v53, %v8076_v18  ;;  %v8105_v18 = vld [vmem:[#allocation14 + $0xfb0] sm:$0xff]  ;;  %v8108_v53 = vld [vmem:[#allocation14 + $0xfc8] sm:$0xff] }
0x26e7   : > { %11919 = vmatpush1.bf16.msra.mxu1 %v11918_v11  ;;  %v8077_v11 = vld [vmem:[#allocation14 + $0xed0] sm:$0xff] }
0x26e8   : > { %11921 = vmatprep.subr.bf16.mxu1 %v11920_v63  ;;  %v8082_v63 = vld [vmem:[#allocation14 + $0xef8] sm:$0xff]  ;;  %v11946_v54 = vpack.c.bf16 %v8077_v11, %v8075_v12  ;;  %v8107_v11 = vld [vmem:[#allocation14 + $0xfc0] sm:$0xff] }
0x26e9   : > { %v11948_v19 = vpack.c.bf16 %v8082_v63, %v8080_v44  ;;  %v8109_v44 = vld [vmem:[#allocation14 + $0xfd0] sm:$0xff]  ;;  %v8112_v63 = vld [vmem:[#allocation14 + $0xfe8] sm:$0xff] }
0x26ea   : > { %8347 = vmatmul.mubr.f32.vlgmr.msra.gmra.mrb[94].mxu1 %v7846_v3  ;;  %v11950_v3 = vpack.c.bf16 %v8081_v23, %v8079_v13  ;;  %v7521_v13 = vrot.slane %v15946_v36, %v14689_v0 }
0x26eb   : > { %8352 = vmatprep.mubr.f32.mxu1 %v7855_v14  ;;  %11923 = vmatpush1.bf16.msra.mxu1 %v11922_v38  ;;  %v8086_v38 = vld [vmem:[#allocation14 + $0xf18] sm:$0xff] }
0x26ec   : > { %11925 = vmatprep.subr.bf16.mxu1 %v11924_v6  ;;  %v11952_v20 = vpack.c.bf16 %v8086_v38, %v8084_v59  ;;  %v8083_v6 = vld [vmem:[#allocation14 + $0xf00] sm:$0xff]  ;;  %v8113_v38 = vld [vmem:[#allocation14 + $0xff0] sm:$0xff]  ;;  %v7838_v61 = vadd.f32 %v15980_v29, %v7521_v13 }
0x26ed   : > { %v11954_v14 = vpack.c.bf16 %v8085_v7, %v8083_v6  ;;  %v8111_v59 = vld [vmem:[#allocation14 + $0xfe0] sm:$0xff]  ;;  %v7840_v6 = vadd.f32 %v15985_v55, %v15993_v32 }
0x26ee   : > { %8353 = vmatmul.mubr.f32.gmra.mrb[96].mxu1 %v7854_v21  ;;  %v8092_v21 = vld [vmem:[#allocation14 + $0xf48] sm:$0xff]  ;;  %v7856_v36 = vmax.f32 %v7838_v61, 0.0 }
0x26ef   : > { %11927 = vmatpush1.bf16.msra.mxu1 %v11926_v24  ;;  %8423 = vmatprep.mubr.f32.mxu1 %v7849_v58  ;;  %v8089_v24 = vld [vmem:[#allocation14 + $0xf30] sm:$0xff]  ;;  %v8091_v58 = vld [vmem:[#allocation14 + $0xf40] sm:$0xff]  ;;  %v7857_v62 = vmax.f32 %v7840_v6, 0.0 }
0x26f0   : > { %11929 = vmatprep.subr.bf16.mxu1 %v11928_v51  ;;  %v8094_v51 = vld [vmem:[#allocation14 + $0xf58] sm:$0xff]  ;;  %v11958_v37 = vpack.c.bf16 %v8089_v24, %v8087_v15  ;;  %v8594_v6 = vld [vmem:[%s17030_s19 + $0x2c0] sm:$0xff]  ;;  %v8611_v61 = vld [vmem:[%s17030_s19 + $0x348] sm:$0xff] }
0x26f1   : > { %v11960_v45 = vpack.c.bf16 %v8094_v51, %v8092_v21 }
0x26f3   : > { %11931 = vmatpush1.bf16.msra.mxu1 %v11930_v34  ;;  %v8098_v34 = vld [vmem:[#allocation14 + $0xf78] sm:$0xff] }
0x26f4   : > { %11933 = vmatprep.subr.bf16.mxu1 %v11932_v27  ;;  %v11962_v27 = vpack.c.bf16 %v8093_v9, %v8091_v58  ;;  %v11964_v41 = vpack.c.bf16 %v8098_v34, %v8096_v56 }
0x26f7   : > { %11935 = vmatpush1.bf16.msra.mxu1 %v11934_v8  ;;  %v8102_v8 = vld [vmem:[#allocation14 + $0xf98] sm:$0xff] }
0x26f8   : > { %11937 = vmatprep.subr.bf16.mxu1 %v11936_v10  ;;  %v11966_v10 = vpack.c.bf16 %v8097_v28, %v8095_v26  ;;  %v11968_v35 = vpack.c.bf16 %v8102_v8, %v8100_v50  ;;  %v8523_v26 = vld [vmem:[%s17030_s19 + $0x88] sm:$0xff] }
0x26f9   : > { %v8531_v28 = vld [vmem:[%s17030_s19 + $0xc8] sm:$0xff] }
0x26fa   : > { %v11988_v8 = vpack.c.bf16 %v8531_v28, %v8523_v26  ;;  %v8650_v26 = vld [vmem:[%s17030_s19 + $0x480] sm:$0xff] }
0x26fb   : > { %11939 = vmatpush1.bf16.msra.mxu1 %v11938_v5  ;;  %v8106_v5 = vld [vmem:[#allocation14 + $0xfb8] sm:$0xff]  ;;  %v8658_v28 = vld [vmem:[%s17030_s19 + $0x4c0] sm:$0xff] }
0x26fc   : > { %11941 = vmatprep.subr.bf16.mxu1 %v11940_v25  ;;  %v11970_v25 = vpack.c.bf16 %v8101_v57, %v8099_v48  ;;  %v11972_v16 = vpack.c.bf16 %v8106_v5, %v8104_v31  ;;  %v8539_v48 = vld [vmem:[%s17030_s19 + $0x108] sm:$0xff] }
0x26fd   : > { %v8547_v57 = vld [vmem:[%s17030_s19 + $0x148] sm:$0xff] }
0x26fe   : > { %v11992_v5 = vpack.c.bf16 %v8547_v57, %v8539_v48  ;;  %v8666_v48 = vld [vmem:[%s17030_s19 + $0x500] sm:$0xff] }
0x26ff   : > { %11943 = vmatpush1.bf16.msra.mxu1 %v11942_v4  ;;  %v8110_v4 = vld [vmem:[#allocation14 + $0xfd8] sm:$0xff]  ;;  %v8674_v57 = vld [vmem:[%s17030_s19 + $0x540] sm:$0xff] }
0x2700   : > { %11945 = vmatprep.subr.bf16.mxu1 %v11944_v40  ;;  %v11974_v40 = vpack.c.bf16 %v8105_v18, %v8103_v52  ;;  %v11976_v12 = vpack.c.bf16 %v8110_v4, %v8108_v53  ;;  %v8555_v52 = vld [vmem:[%s17030_s19 + $0x188] sm:$0xff] }
0x2701   : > { %v8563_v18 = vld [vmem:[%s17030_s19 + $0x1c8] sm:$0xff] }
0x2702   : > { %v11996_v4 = vpack.c.bf16 %v8563_v18, %v8555_v52 }
0x2703   : > { %11947 = vmatpush1.bf16.msra.mxu1 %v11946_v54  ;;  %v8114_v54 = vld [vmem:[#allocation14 + $0xff8] sm:$0xff] }
0x2704   : > { %11949 = vmatprep.subr.bf16.mxu1 %v11948_v19  ;;  %v11978_v19 = vpack.c.bf16 %v8109_v44, %v8107_v11  ;;  %v11980_v23 = vpack.c.bf16 %v8114_v54, %v8112_v63  ;;  %v8571_v11 = vld [vmem:[%s17030_s19 + $0x208] sm:$0xff] }
0x2705   : > { %v8579_v44 = vld [vmem:[%s17030_s19 + $0x248] sm:$0xff] }
0x2706   : > { %v12000_v54 = vpack.c.bf16 %v8579_v44, %v8571_v11 }
0x2707   : > { %11951 = vmatpush1.bf16.msra.mxu1 %v11950_v3  ;;  %v11982_v3 = vpack.c.bf16 %v8113_v38, %v8111_v59  ;;  %v8595_v59 = vld [vmem:[%s17030_s19 + $0x2c8] sm:$0xff] }
0x2708   : > { %11953 = vmatprep.subr.bf16.mxu1 %v11952_v20  ;;  %v7832_v20 = vadd.f32 %v15967_v42, %v7521_v13  ;;  %v8578_v13 = vld [vmem:[%s17030_s19 + $0x240] sm:$0xff] }
0x270a   : > { %v7848_v7 = vmax.f32 %v7832_v20, 0.0  ;;  %v8586_v20 = vld [vmem:[%s17030_s19 + $0x280] sm:$0xff] }
0x270b   : > { %11955 = vmatpush1.bf16.msra.mxu1 %v11954_v14  ;;  %v9677_v14 = vld [vmem:[%s16952_s12 + $0x2] sm:$0x3] }
0x270c   : > { %11957 = vmatprep.subr.bf16.mxu1 %v11956_v39  ;;  %v8121_v39 = vrot.slane %v9677_v14, %v13518_v33  ;;  %v8125_v42 = vrot.slane %v9677_v14, %v13651_v43  ;;  %v8602_v14 = vld [vmem:[%s17030_s19 + $0x300] sm:$0xff] }
0x270f   : > { %11959 = vmatpush1.bf16.msra.mxu1 %v11958_v37 }
0x2710   : > { %11961 = vmatprep.subr.bf16.mxu1 %v11960_v45 }
0x2713   : > { %11963 = vmatpush1.bf16.msra.mxu1 %v11962_v27  ;;  %v8515_v27 = vld [vmem:[%s17030_s19 + $0x48] sm:$0xff] }
0x2714   : > { %11965 = vmatprep.subr.bf16.mxu1 %v11964_v41 }
0x2717   : > { %11967 = vmatpush1.bf16.msra.mxu1 %v11966_v10  ;;  %v8522_v10 = vld [vmem:[%s17030_s19 + $0x80] sm:$0xff] }
0x2718   : > { %11969 = vmatprep.subr.bf16.mxu1 %v11968_v35  ;;  %v8530_v35 = vld [vmem:[%s17030_s19 + $0xc0] sm:$0xff] }
0x2719   : > { %v11990_v31 = vpack.c.bf16 %v8530_v35, %v8522_v10  ;;  %v12022_v10 = vpack.c.bf16 %v8658_v28, %v8650_v26 }
0x271b   : > { %11971 = vmatpush1.bf16.msra.mxu1 %v11970_v25  ;;  %v8538_v25 = vld [vmem:[%s17030_s19 + $0x100] sm:$0xff] }
0x271c   : > { %11973 = vmatprep.subr.bf16.mxu1 %v11972_v16  ;;  %v8546_v16 = vld [vmem:[%s17030_s19 + $0x140] sm:$0xff] }
0x271d   : > { %v11994_v53 = vpack.c.bf16 %v8546_v16, %v8538_v25 }
0x271f   : > { %11975 = vmatpush1.bf16.msra.mxu1 %v11974_v40  ;;  %v8554_v40 = vld [vmem:[%s17030_s19 + $0x180] sm:$0xff] }
0x2720   : > { %11977 = vmatprep.subr.bf16.mxu1 %v11976_v12  ;;  %v8562_v12 = vld [vmem:[%s17030_s19 + $0x1c0] sm:$0xff] }
0x2721   : > { %v11998_v63 = vpack.c.bf16 %v8562_v12, %v8554_v40 }
0x2723   : > { %11979 = vmatpush1.bf16.msra.mxu1 %v11978_v19  ;;  %v8570_v19 = vld [vmem:[%s17030_s19 + $0x200] sm:$0xff] }
0x2724   : > { %11981 = vmatprep.subr.bf16.mxu1 %v11980_v23  ;;  %v8587_v23 = vld [vmem:[%s17030_s19 + $0x288] sm:$0xff]  ;;  %v12002_v38 = vpack.c.bf16 %v8578_v13, %v8570_v19  ;;  %v8682_v19 = vld [vmem:[%s17030_s19 + $0x580] sm:$0xff] }
0x2725   : > { %v8690_v13 = vld [vmem:[%s17030_s19 + $0x5c0] sm:$0xff] }
0x2727   : > { %11983 = vmatpush1.bf16.msra.mxu1 %v11982_v3  ;;  %v12004_v3 = vpack.c.bf16 %v8595_v59, %v8587_v23  ;;  %v12030_v23 = vpack.c.bf16 %v8690_v13, %v8682_v19  ;;  %v8699_v59 = vld [vmem:[%s17030_s19 + $0x608] sm:$0xff] }
0x272a   : > { %8424 = vmatmul.mubr.f32.vlgmr.msra.gmra.mrb[94].mxu1 %v7848_v7  ;;  %v8603_v7 = vld [vmem:[%s17030_s19 + $0x308] sm:$0xff] }
0x272b   : > { %8429 = vmatprep.mubr.f32.mxu1 %v7857_v62  ;;  %v12006_v62 = vpack.c.bf16 %v8594_v6, %v8586_v20  ;;  %v8698_v20 = vld [vmem:[%s17030_s19 + $0x600] sm:$0xff] }
0x272c   : > { %v8706_v6 = vld [vmem:[%s17030_s19 + $0x640] sm:$0xff] }
0x272e   : > { %8430 = vmatmul.mubr.f32.gmra.mrb[96].mxu1 %v7856_v36  ;;  %v12008_v36 = vpack.c.bf16 %v8611_v61, %v8603_v7  ;;  %v12034_v7 = vpack.c.bf16 %v8706_v6, %v8698_v20  ;;  %v8715_v61 = vld [vmem:[%s17030_s19 + $0x688] sm:$0xff] }
0x27fd   : > { %v8425_v15 = vpop.f32.mrb[94].mxu1 }
0x27fe   : > { %v12248_v24 = vadd.f32 %v8425_v15, %v8121_v39  ;;  %v8427_v55 = vpop.f32.mrb[95].mxu1  ;;  %v8627_v15 = vld [vmem:[%s17030_s19 + $0x3c8] sm:$0xff] }
0x27ff   : > { %v12249_v32 = vadd.f32 %v8427_v55, %v8125_v42 }
0x2800   : > { %v16012_v21 = vadd.f32 %v12248_v24, %v15571_v60 }
0x2801   : > { %v16015_v29 = vadd.f32 %v12249_v32, %v15569_v30  ;;  %v8431_v51 = vpop.f32.mrb[96].mxu1  ;;  %v8507_v30 = vld [vmem:[%s17030_s19 + $0x8] sm:$0xff]  ;;  %v8618_v32 = vld [vmem:[%s17030_s19 + $0x380] sm:$0xff] }
0x2802   : > { %v12250_v37 = vadd.f32 %v8431_v51, %v8121_v39  ;;  %v8433_v45 = vpop.f32.mrb[97].mxu1  ;;  %v11984_v41 = vpack.c.bf16 %v8515_v27, %v8507_v30  ;;  %v8610_v39 = vld [vmem:[%s17030_s19 + $0x340] sm:$0xff]  ;;  %v8651_v27 = vld [vmem:[%s17030_s19 + $0x488] sm:$0xff] }
0x2803   : > { %v12251_v58 = vadd.f32 %v8433_v45, %v8125_v42  ;;  %v8444_v9 = vadd.f32 %v16015_v29, %v16012_v21  ;;  %v8619_v42 = vld [vmem:[%s17030_s19 + $0x388] sm:$0xff]  ;;  %v12010_v24 = vpack.c.bf16 %v8610_v39, %v8602_v14  ;;  %v8626_v51 = vld [vmem:[%s17030_s19 + $0x3c0] sm:$0xff] }
0x2804   : > { %v16020_v56 = vadd.f32 %v12250_v37, %v15611_v22  ;;  %v8506_v22 = vld [vmem:[%s17030_s19] sm:$0xff]  ;;  %11985 = vmatprep.subr.bf16.mxu0 %v11984_v41  ;;  %v12012_v55 = vpack.c.bf16 %v8627_v15, %v8619_v42  ;;  %v8635_v37 = vld [vmem:[%s17030_s19 + $0x408] sm:$0xff] }
0x2805   : > { %v16023_v34 = vadd.f32 %v12251_v58, %v15609_v17  ;;  %8445 = vadd.xlane.f32.xlu0 %v8444_v9  ;;  %v8514_v17 = vld [vmem:[%s17030_s19 + $0x40] sm:$0xff]  ;;  %v8643_v45 = vld [vmem:[%s17030_s19 + $0x448] sm:$0xff]  ;;  %v12014_v58 = vpack.c.bf16 %v8626_v51, %v8618_v32 }
0x2806   : > { %v11986_v50 = vpack.c.bf16 %v8514_v17, %v8506_v22  ;;  %v12016_v9 = vpack.c.bf16 %v8643_v45, %v8635_v37  ;;  %v8642_v30 = vld [vmem:[%s17030_s19 + $0x440] sm:$0xff]  ;;  %v8659_v22 = vld [vmem:[%s17030_s19 + $0x4c8] sm:$0xff] }
0x2807   : > { %v8447_v60 = vadd.f32 %v16023_v34, %v16020_v56  ;;  %v12020_v17 = vpack.c.bf16 %v8659_v22, %v8651_v27  ;;  %v8714_v14 = vld [vmem:[%s17030_s19 + $0x680] sm:$0xff]  ;;  %v8731_v15 = vld [vmem:[%s17030_s19 + $0x708] sm:$0xff]  ;;  %v8509_v22 = vld [vmem:[%s17030_s19 + $0x18] sm:$0xff] }
0x2808   : > { %11987 = vmatpush1.bf16.msra.mxu0 %v11986_v50  ;;  %v8667_v50 = vld [vmem:[%s17030_s19 + $0x508] sm:$0xff]  ;;  %v8722_v39 = vld [vmem:[%s17030_s19 + $0x6c0] sm:$0xff] }
0x2809   : > { %8448 = vadd.xlane.f32.xlu1 %v8447_v60  ;;  %11989 = vmatprep.subr.bf16.mxu0 %v11988_v8  ;;  %v8634_v60 = vld [vmem:[%s17030_s19 + $0x400] sm:$0xff]  ;;  %v8675_v8 = vld [vmem:[%s17030_s19 + $0x548] sm:$0xff]  ;;  %v12038_v42 = vpack.c.bf16 %v8722_v39, %v8714_v14  ;;  %v8540_v14 = vld [vmem:[%s17030_s19 + $0x110] sm:$0xff] }
0x280a   : > { %v12018_v41 = vpack.c.bf16 %v8642_v30, %v8634_v60  ;;  %v12024_v35 = vpack.c.bf16 %v8675_v8, %v8667_v50  ;;  %v8730_v32 = vld [vmem:[%s17030_s19 + $0x700] sm:$0xff]  ;;  %v8747_v45 = vld [vmem:[%s17030_s19 + $0x788] sm:$0xff]  ;;  %v8548_v39 = vld [vmem:[%s17030_s19 + $0x150] sm:$0xff] }
0x280b   : > { %v8738_v51 = vld [vmem:[%s17030_s19 + $0x740] sm:$0xff] }
0x280c   : > { %11991 = vmatpush1.bf16.msra.mxu0 %v11990_v31  ;;  %v12026_v31 = vpack.c.bf16 %v8674_v57, %v8666_v48  ;;  %v12042_v37 = vpack.c.bf16 %v8738_v51, %v8730_v32  ;;  %v8754_v30 = vld [vmem:[%s17030_s19 + $0x7c0] sm:$0xff]  ;;  %v8556_v32 = vld [vmem:[%s17030_s19 + $0x190] sm:$0xff] }
0x280d   : > { %11993 = vmatprep.subr.bf16.mxu0 %v11992_v5  ;;  %v9678_v48 = vld [vmem:[%s17028_s15 + $0x2] sm:$0x3]  ;;  %v8564_v51 = vld [vmem:[%s17030_s19 + $0x1d0] sm:$0xff] }
0x280e   : > { %v9679_v57 = vld [vmem:[%s17029_s7 + $0x2] sm:$0x3] }
0x2810   : > { %11995 = vmatpush1.bf16.msra.mxu0 %v11994_v53 }
0x2811   : > { %11997 = vmatprep.subr.bf16.mxu0 %v11996_v4 }
0x2814   : > { %11999 = vmatpush1.bf16.msra.mxu0 %v11998_v63 }
0x2815   : > { %12001 = vmatprep.subr.bf16.mxu0 %v12000_v54  ;;  %v8683_v54 = vld [vmem:[%s17030_s19 + $0x588] sm:$0xff] }
0x2818   : > { %12003 = vmatpush1.bf16.msra.mxu0 %v12002_v38  ;;  %v8707_v38 = vld [vmem:[%s17030_s19 + $0x648] sm:$0xff] }
0x2819   : > { %12005 = vmatprep.subr.bf16.mxu0 %v12004_v3  ;;  %v12032_v3 = vpack.c.bf16 %v8707_v38, %v8699_v59  ;;  %v8524_v38 = vld [vmem:[%s17030_s19 + $0x90] sm:$0xff] }
0x281c   : > { %12007 = vmatpush1.bf16.msra.mxu0 %v12006_v62  ;;  %v8723_v62 = vld [vmem:[%s17030_s19 + $0x6c8] sm:$0xff] }
0x281d   : > { %12009 = vmatprep.subr.bf16.mxu0 %v12008_v36  ;;  %v12036_v36 = vpack.c.bf16 %v8723_v62, %v8715_v61 }
0x2820   : > { %12011 = vmatpush1.bf16.msra.mxu0 %v12010_v24  ;;  %v8739_v24 = vld [vmem:[%s17030_s19 + $0x748] sm:$0xff] }
0x2821   : > { %12013 = vmatprep.subr.bf16.mxu0 %v12012_v55  ;;  %v12040_v55 = vpack.c.bf16 %v8739_v24, %v8731_v15  ;;  %v8565_v15 = vld [vmem:[%s17030_s19 + $0x1d8] sm:$0xff]  ;;  %v12058_v24 = vpack.c.bf16 %v8548_v39, %v8540_v14 }
0x2824   : > { %12015 = vmatpush1.bf16.msra.mxu0 %v12014_v58  ;;  %v8755_v58 = vld [vmem:[%s17030_s19 + $0x7c8] sm:$0xff] }
0x2825   : > { %12017 = vmatprep.subr.bf16.mxu0 %v12016_v9  ;;  %v8746_v9 = vld [vmem:[%s17030_s19 + $0x780] sm:$0xff]  ;;  %v12044_v60 = vpack.c.bf16 %v8755_v58, %v8747_v45  ;;  %v8581_v45 = vld [vmem:[%s17030_s19 + $0x258] sm:$0xff]  ;;  %v12062_v58 = vpack.c.bf16 %v8564_v51, %v8556_v32 }
0x2826   : > { %v12046_v27 = vpack.c.bf16 %v8754_v30, %v8746_v9  ;;  %v8580_v30 = vld [vmem:[%s17030_s19 + $0x250] sm:$0xff] }
0x2828   : > { %12019 = vmatpush1.bf16.msra.mxu0 %v12018_v41  ;;  %v8517_v41 = vld [vmem:[%s17030_s19 + $0x58] sm:$0xff] }
0x2829   : > { %12021 = vmatprep.subr.bf16.mxu0 %v12020_v17  ;;  %v12048_v17 = vpack.c.bf16 %v8517_v41, %v8509_v22  ;;  %v8597_v22 = vld [vmem:[%s17030_s19 + $0x2d8] sm:$0xff] }
0x282c   : > { %12023 = vmatpush1.bf16.msra.mxu0 %v12022_v10 }
0x282d   : > { %12025 = vmatprep.subr.bf16.mxu0 %v12024_v35 }
0x2830   : > { %12027 = vmatpush1.bf16.msra.mxu0 %v12026_v31  ;;  %v8480_v31 = vrot.slane %v9678_v48, %v13518_v33 }
0x2892   : > { %v8446_v5 = vpop.xlane.xlu0 %8445 }
0x2893   : > { %v8450_v25 = vmul.f32 0.00390625, %v8446_v5  ;;  %v8484_v5 = vrot.slane %v9678_v48, %v13651_v43  ;;  %v8604_v48 = vld [vmem:[%s17030_s19 + $0x310] sm:$0xff] }
0x2895   : > { %v16160_v16 = vsub.f32 %v16012_v21, %v8450_v25  ;;  %v16163_v52 = vsub.f32 %v16015_v29, %v8450_v25 }
0x2896   : > { %v8449_v18 = vpop.xlane.xlu1 %8448 }
0x2897   : > { %v8456_v53 = vmul.f32 %v16160_v16, %v16160_v16  ;;  %v8457_v4 = vmul.f32 %v16163_v52, %v16163_v52  ;;  %v8451_v40 = vmul.f32 0.00390625, %v8449_v18 }
0x2899   : > { %v16170_v12 = vsub.f32 %v16020_v56, %v8451_v40  ;;  %v16173_v11 = vsub.f32 %v16023_v34, %v8451_v40  ;;  %v8460_v44 = vadd.f32 %v8457_v4, %v8456_v53  ;;  %v8691_v56 = vld [vmem:[%s17030_s19 + $0x5c8] sm:$0xff]  ;;  %v8495_v4 = vrot.slane %v9679_v57, %v13518_v33 }
0x289a   : > { %v12028_v34 = vpack.c.bf16 %v8691_v56, %v8683_v54  ;;  %v8499_v40 = vrot.slane %v9679_v57, %v13651_v43  ;;  %v8612_v57 = vld [vmem:[%s17030_s19 + $0x350] sm:$0xff] }
0x289b   : > { %v8458_v21 = vmul.f32 %v16170_v12, %v16170_v12  ;;  %v8459_v29 = vmul.f32 %v16173_v11, %v16173_v11  ;;  %8461 = vadd.xlane.f32.xlu0 %v8460_v44  ;;  %v8508_v44 = vld [vmem:[%s17030_s19 + $0x10] sm:$0xff] }
0x289c   : > { %12029 = vmatprep.subr.bf16.mxu0 %v12028_v34 }
0x289d   : > { %v8463_v63 = vadd.f32 %v8459_v29, %v8458_v21  ;;  %12031 = vmatpush1.bf16.msra.mxu0 %v12030_v23  ;;  %v8516_v21 = vld [vmem:[%s17030_s19 + $0x50] sm:$0xff] }
0x289e   : > { %12033 = vmatprep.subr.bf16.mxu0 %v12032_v3  ;;  %v12050_v56 = vpack.c.bf16 %v8516_v21, %v8508_v44  ;;  %v8532_v3 = vld [vmem:[%s17030_s19 + $0xd0] sm:$0xff]  ;;  %v8645_v44 = vld [vmem:[%s17030_s19 + $0x458] sm:$0xff] }
0x289f   : > { %8464 = vadd.xlane.f32.xlu1 %v8463_v63  ;;  %v12054_v62 = vpack.c.bf16 %v8532_v3, %v8524_v38  ;;  %v8669_v38 = vld [vmem:[%s17030_s19 + $0x518] sm:$0xff] }
0x28a0   : > { %v8677_v3 = vld [vmem:[%s17030_s19 + $0x558] sm:$0xff] }
0x28a1   : > { %12035 = vmatpush1.bf16.msra.mxu0 %v12034_v7  ;;  %v8541_v7 = vld [vmem:[%s17030_s19 + $0x118] sm:$0xff] }
0x28a2   : > { %12037 = vmatprep.subr.bf16.mxu0 %v12036_v36 }
0x28a5   : > { %12039 = vmatpush1.bf16.msra.mxu0 %v12038_v42  ;;  %v8557_v42 = vld [vmem:[%s17030_s19 + $0x198] sm:$0xff] }
0x28a6   : > { %12041 = vmatprep.subr.bf16.mxu0 %v12040_v55  ;;  %v12060_v55 = vpack.c.bf16 %v8565_v15, %v8557_v42  ;;  %v8684_v42 = vld [vmem:[%s17030_s19 + $0x590] sm:$0xff] }
0x28a7   : > { %v8692_v15 = vld [vmem:[%s17030_s19 + $0x5d0] sm:$0xff] }
0x28a8   : > { %v12094_v32 = vpack.c.bf16 %v8692_v15, %v8684_v42 }
0x28a9   : > { %12043 = vmatpush1.bf16.msra.mxu0 %v12042_v37  ;;  %v8573_v37 = vld [vmem:[%s17030_s19 + $0x218] sm:$0xff] }
0x28aa   : > { %12045 = vmatprep.subr.bf16.mxu0 %v12044_v60  ;;  %v12064_v9 = vpack.c.bf16 %v8581_v45, %v8573_v37  ;;  %v8572_v60 = vld [vmem:[%s17030_s19 + $0x210] sm:$0xff] }
0x28ab   : > { %v12066_v41 = vpack.c.bf16 %v8580_v30, %v8572_v60  ;;  %v8700_v37 = vld [vmem:[%s17030_s19 + $0x610] sm:$0xff] }
0x28ac   : > { %v8708_v45 = vld [vmem:[%s17030_s19 + $0x650] sm:$0xff] }
0x28ad   : > { %12047 = vmatpush1.bf16.msra.mxu0 %v12046_v27  ;;  %v8589_v27 = vld [vmem:[%s17030_s19 + $0x298] sm:$0xff]  ;;  %v12098_v60 = vpack.c.bf16 %v8708_v45, %v8700_v37 }
0x28ae   : > { %12049 = vmatprep.subr.bf16.mxu0 %v12048_v17  ;;  %v12068_v17 = vpack.c.bf16 %v8597_v22, %v8589_v27  ;;  %v8716_v27 = vld [vmem:[%s17030_s19 + $0x690] sm:$0xff] }
0x28af   : > { %v8724_v22 = vld [vmem:[%s17030_s19 + $0x6d0] sm:$0xff] }
0x2928   : > { %v8462_v26 = vpop.xlane.xlu0 %8461 }
0x2929   : > { %v8466_v28 = vmul.f32 0.00390625, %v8462_v26  ;;  %v8588_v26 = vld [vmem:[%s17030_s19 + $0x290] sm:$0xff] }
0x292b   : > { %v8468_v50 = vadd.f32 1e-05, %v8466_v28  ;;  %v8596_v28 = vld [vmem:[%s17030_s19 + $0x2d0] sm:$0xff] }
0x292c   : > { %v8465_v8 = vpop.xlane.xlu1 %8464 }
0x292d   : > { %12744 = vrsqrt.f32 %v8468_v50  ;;  %v8467_v10 = vmul.f32 0.00390625, %v8465_v8  ;;  %v8605_v50 = vld [vmem:[%s17030_s19 + $0x318] sm:$0xff] }
0x292e   : > { %v8613_v8 = vld [vmem:[%s17030_s19 + $0x358] sm:$0xff] }
0x292f   : > { %v8469_v35 = vadd.f32 1e-05, %v8467_v10  ;;  %v12070_v10 = vpack.c.bf16 %v8596_v28, %v8588_v26  ;;  %v12102_v26 = vpack.c.bf16 %v8724_v22, %v8716_v27 }
0x2931   : > { %12746 = vrsqrt.f32 %v8469_v35  ;;  %v12072_v35 = vpack.c.bf16 %v8613_v8, %v8605_v50  ;;  %v8732_v50 = vld [vmem:[%s17030_s19 + $0x710] sm:$0xff] }
0x2932   : > { %v8740_v8 = vld [vmem:[%s17030_s19 + $0x750] sm:$0xff] }
0x2937   : > { %v12745_v25 = vpop.eup %12744 }
0x2938   : > { %v8472_v18 = vmul.f32 %v12745_v25, %v16160_v16  ;;  %v8473_v53 = vmul.f32 %v12745_v25, %v16163_v52  ;;  %v8525_v16 = vld [vmem:[%s17030_s19 + $0x98] sm:$0xff]  ;;  %v12074_v25 = vpack.c.bf16 %v8612_v57, %v8604_v48  ;;  %v12106_v48 = vpack.c.bf16 %v8740_v8, %v8732_v50 }
0x2939   : > { %v8533_v52 = vld [vmem:[%s17030_s19 + $0xd8] sm:$0xff] }
0x293a   : > { %v8488_v29 = vmul.f32 %v8484_v5, %v8473_v53  ;;  %v8487_v63 = vmul.f32 %v8480_v31, %v8472_v18  ;;  %v12052_v59 = vpack.c.bf16 %v8533_v52, %v8525_v16  ;;  %v8620_v53 = vld [vmem:[%s17030_s19 + $0x390] sm:$0xff]  ;;  %v8653_v52 = vld [vmem:[%s17030_s19 + $0x498] sm:$0xff] }
0x293b   : > { %v12747_v54 = vpop.eup %12746  ;;  %v8644_v16 = vld [vmem:[%s17030_s19 + $0x450] sm:$0xff] }
0x293c   : > { %v16269_v34 = vadd.f32 %v8499_v40, %v8488_v29  ;;  %v16271_v19 = vadd.f32 %v8495_v4, %v8487_v63  ;;  %v8475_v13 = vmul.f32 %v12747_v54, %v16173_v11  ;;  %v8474_v23 = vmul.f32 %v12747_v54, %v16170_v12  ;;  %v8549_v12 = vld [vmem:[%s17030_s19 + $0x158] sm:$0xff]  ;;  %v8636_v63 = vld [vmem:[%s17030_s19 + $0x410] sm:$0xff] }
0x293d   : > { %v12056_v36 = vpack.c.bf16 %v8549_v12, %v8541_v7  ;;  %v8661_v54 = vld [vmem:[%s17030_s19 + $0x4d8] sm:$0xff]  ;;  %v8668_v7 = vld [vmem:[%s17030_s19 + $0x510] sm:$0xff] }
0x293e   : > { %8868 = vmatprep.mubr.f32.mxu0 %v16269_v34  ;;  %v8490_v20 = vmul.f32 %v8484_v5, %v8475_v13  ;;  %v8489_v6 = vmul.f32 %v8480_v31, %v8474_v23  ;;  %v8621_v31 = vld [vmem:[%s17030_s19 + $0x398] sm:$0xff]  ;;  %v12084_v13 = vpack.c.bf16 %v8661_v54, %v8653_v52  ;;  %v8652_v23 = vld [vmem:[%s17030_s19 + $0x490] sm:$0xff]  ;;  %v8526_v52 = vld [vmem:[%s17030_s19 + $0xa0] sm:$0xff] }
0x293f   : > { %8869 = vmatmul.mubr.f32.vlgmr.msra.gmra.mrb[42].mxu0 %v16271_v19  ;;  %v8629_v5 = vld [vmem:[%s17030_s19 + $0x3d8] sm:$0xff]  ;;  %v8676_v12 = vld [vmem:[%s17030_s19 + $0x550] sm:$0xff]  ;;  %v8534_v54 = vld [vmem:[%s17030_s19 + $0xe0] sm:$0xff] }
0x2940   : > { %12051 = vmatpush1.bf16.msra.mxu0 %v12050_v56  ;;  %v16289_v11 = vadd.f32 %v8499_v40, %v8490_v20  ;;  %v16291_v61 = vadd.f32 %v8495_v4, %v8489_v6  ;;  %v12076_v18 = vpack.c.bf16 %v8629_v5, %v8621_v31  ;;  %v8628_v4 = vld [vmem:[%s17030_s19 + $0x3d0] sm:$0xff]  ;;  %v8637_v40 = vld [vmem:[%s17030_s19 + $0x418] sm:$0xff]  ;;  %v12082_v56 = vpack.c.bf16 %v8644_v16, %v8636_v63 }
0x2941   : > { %12053 = vmatprep.subr.bf16.mxu0 %v12052_v59  ;;  %v12078_v21 = vpack.c.bf16 %v8628_v4, %v8620_v53  ;;  %v12080_v29 = vpack.c.bf16 %v8645_v44, %v8637_v40  ;;  %v8660_v59 = vld [vmem:[%s17030_s19 + $0x4d0] sm:$0xff]  ;;  %v12088_v6 = vpack.c.bf16 %v8677_v3, %v8669_v38  ;;  %v12090_v14 = vpack.c.bf16 %v8676_v12, %v8668_v7  ;;  %v8510_v40 = vld [vmem:[%s17030_s19 + $0x20] sm:$0xff] }
0x2942   : > { %8874 = vmatprep.mubr.f32.mxu0 %v16289_v11  ;;  %v12086_v20 = vpack.c.bf16 %v8660_v59, %v8652_v23  ;;  %v8748_v31 = vld [vmem:[%s17030_s19 + $0x790] sm:$0xff]  ;;  %v8518_v44 = vld [vmem:[%s17030_s19 + $0x60] sm:$0xff]  ;;  %v12118_v23 = vpack.c.bf16 %v8534_v54, %v8526_v52 }
0x2943   : > { %8875 = vmatmul.mubr.f32.gmra.mrb[44].mxu0 %v16291_v61  ;;  %v8756_v5 = vld [vmem:[%s17030_s19 + $0x7d0] sm:$0xff]  ;;  %v12114_v63 = vpack.c.bf16 %v8518_v44, %v8510_v40  ;;  %v8542_v38 = vld [vmem:[%s17030_s19 + $0x120] sm:$0xff] }
0x2944   : > { %12055 = vmatpush1.bf16.msra.mxu0 %v12054_v62  ;;  %8945 = vmatprep.mubr.f32.mxu0 %v16269_v34  ;;  %v8685_v62 = vld [vmem:[%s17030_s19 + $0x598] sm:$0xff]  ;;  %v12110_v53 = vpack.c.bf16 %v8756_v5, %v8748_v31  ;;  %v8550_v3 = vld [vmem:[%s17030_s19 + $0x160] sm:$0xff] }
0x2945   : > { %12057 = vmatprep.subr.bf16.mxu0 %v12056_v36  ;;  %v8693_v36 = vld [vmem:[%s17030_s19 + $0x5d8] sm:$0xff]  ;;  %v12122_v7 = vpack.c.bf16 %v8550_v3, %v8542_v38 }
0x2946   : > { %v12092_v39 = vpack.c.bf16 %v8693_v36, %v8685_v62  ;;  %v8558_v62 = vld [vmem:[%s17030_s19 + $0x1a0] sm:$0xff] }
0x2947   : > { %v8566_v36 = vld [vmem:[%s17030_s19 + $0x1e0] sm:$0xff] }
0x2948   : > { %12059 = vmatpush1.bf16.msra.mxu0 %v12058_v24  ;;  %v8701_v24 = vld [vmem:[%s17030_s19 + $0x618] sm:$0xff]  ;;  %v12126_v42 = vpack.c.bf16 %v8566_v36, %v8558_v62 }
0x2949   : > { %12061 = vmatprep.subr.bf16.mxu0 %v12060_v55  ;;  %v8709_v55 = vld [vmem:[%s17030_s19 + $0x658] sm:$0xff] }
0x294a   : > { %v12096_v51 = vpack.c.bf16 %v8709_v55, %v8701_v24  ;;  %v8574_v24 = vld [vmem:[%s17030_s19 + $0x220] sm:$0xff] }
0x294b   : > { %v8582_v55 = vld [vmem:[%s17030_s19 + $0x260] sm:$0xff] }
0x294c   : > { %12063 = vmatpush1.bf16.msra.mxu0 %v12062_v58  ;;  %v8717_v58 = vld [vmem:[%s17030_s19 + $0x698] sm:$0xff]  ;;  %v12130_v37 = vpack.c.bf16 %v8582_v55, %v8574_v24 }
0x294d   : > { %12065 = vmatprep.subr.bf16.mxu0 %v12064_v9  ;;  %v8725_v9 = vld [vmem:[%s17030_s19 + $0x6d8] sm:$0xff] }
0x294e   : > { %v12100_v30 = vpack.c.bf16 %v8725_v9, %v8717_v58  ;;  %v8590_v58 = vld [vmem:[%s17030_s19 + $0x2a0] sm:$0xff] }
0x294f   : > { %v8598_v9 = vld [vmem:[%s17030_s19 + $0x2e0] sm:$0xff] }
0x2950   : > { %12067 = vmatpush1.bf16.msra.mxu0 %v12066_v41  ;;  %v8733_v41 = vld [vmem:[%s17030_s19 + $0x718] sm:$0xff]  ;;  %v12134_v27 = vpack.c.bf16 %v8598_v9, %v8590_v58 }
0x2951   : > { %12069 = vmatprep.subr.bf16.mxu0 %v12068_v17  ;;  %v8741_v17 = vld [vmem:[%s17030_s19 + $0x758] sm:$0xff] }
0x2952   : > { %v12104_v28 = vpack.c.bf16 %v8741_v17, %v8733_v41  ;;  %v8606_v41 = vld [vmem:[%s17030_s19 + $0x320] sm:$0xff] }
0x2953   : > { %v8614_v17 = vld [vmem:[%s17030_s19 + $0x360] sm:$0xff] }
0x2954   : > { %12071 = vmatpush1.bf16.msra.mxu0 %v12070_v10  ;;  %v8749_v10 = vld [vmem:[%s17030_s19 + $0x798] sm:$0xff]  ;;  %v12138_v50 = vpack.c.bf16 %v8614_v17, %v8606_v41 }
0x2955   : > { %12073 = vmatprep.subr.bf16.mxu0 %v12072_v35  ;;  %v8757_v35 = vld [vmem:[%s17030_s19 + $0x7d8] sm:$0xff] }
0x2956   : > { %v12108_v57 = vpack.c.bf16 %v8757_v35, %v8749_v10  ;;  %v8622_v10 = vld [vmem:[%s17030_s19 + $0x3a0] sm:$0xff] }
0x2957   : > { %v8630_v35 = vld [vmem:[%s17030_s19 + $0x3e0] sm:$0xff] }
0x2958   : > { %12075 = vmatpush1.bf16.msra.mxu0 %v12074_v25  ;;  %v8511_v25 = vld [vmem:[%s17030_s19 + $0x28] sm:$0xff]  ;;  %v12142_v31 = vpack.c.bf16 %v8630_v35, %v8622_v10 }
0x2959   : > { %12077 = vmatprep.subr.bf16.mxu0 %v12076_v18  ;;  %v8519_v18 = vld [vmem:[%s17030_s19 + $0x68] sm:$0xff] }
0x295a   : > { %v12112_v4 = vpack.c.bf16 %v8519_v18, %v8511_v25  ;;  %v8638_v25 = vld [vmem:[%s17030_s19 + $0x420] sm:$0xff] }
0x295b   : > { %v8646_v18 = vld [vmem:[%s17030_s19 + $0x460] sm:$0xff] }
0x295c   : > { %12079 = vmatpush1.bf16.msra.mxu0 %v12078_v21  ;;  %v8527_v21 = vld [vmem:[%s17030_s19 + $0xa8] sm:$0xff]  ;;  %v12146_v40 = vpack.c.bf16 %v8646_v18, %v8638_v25 }
0x295d   : > { %12081 = vmatprep.subr.bf16.mxu0 %v12080_v29  ;;  %v8535_v29 = vld [vmem:[%s17030_s19 + $0xe8] sm:$0xff] }
0x295e   : > { %v12116_v16 = vpack.c.bf16 %v8535_v29, %v8527_v21  ;;  %v8654_v21 = vld [vmem:[%s17030_s19 + $0x4a0] sm:$0xff] }
0x295f   : > { %v8662_v29 = vld [vmem:[%s17030_s19 + $0x4e0] sm:$0xff] }
0x2960   : > { %12083 = vmatpush1.bf16.msra.mxu0 %v12082_v56  ;;  %v8543_v56 = vld [vmem:[%s17030_s19 + $0x128] sm:$0xff]  ;;  %v12150_v52 = vpack.c.bf16 %v8662_v29, %v8654_v21 }
0x2961   : > { %12085 = vmatprep.subr.bf16.mxu0 %v12084_v13  ;;  %v8551_v13 = vld [vmem:[%s17030_s19 + $0x168] sm:$0xff] }
0x2962   : > { %v12120_v59 = vpack.c.bf16 %v8551_v13, %v8543_v56  ;;  %v8670_v56 = vld [vmem:[%s17030_s19 + $0x520] sm:$0xff] }
0x2963   : > { %v8678_v13 = vld [vmem:[%s17030_s19 + $0x560] sm:$0xff] }
0x2964   : > { %12087 = vmatpush1.bf16.msra.mxu0 %v12086_v20  ;;  %v8559_v20 = vld [vmem:[%s17030_s19 + $0x1a8] sm:$0xff]  ;;  %v12154_v38 = vpack.c.bf16 %v8678_v13, %v8670_v56 }
0x2965   : > { %12089 = vmatprep.subr.bf16.mxu0 %v12088_v6  ;;  %v8567_v6 = vld [vmem:[%s17030_s19 + $0x1e8] sm:$0xff] }
0x2966   : > { %v12124_v12 = vpack.c.bf16 %v8567_v6, %v8559_v20  ;;  %v8686_v20 = vld [vmem:[%s17030_s19 + $0x5a0] sm:$0xff] }
0x2967   : > { %v8694_v6 = vld [vmem:[%s17030_s19 + $0x5e0] sm:$0xff] }
0x2968   : > { %12091 = vmatpush1.bf16.msra.mxu0 %v12090_v14  ;;  %v8575_v14 = vld [vmem:[%s17030_s19 + $0x228] sm:$0xff]  ;;  %v12158_v62 = vpack.c.bf16 %v8694_v6, %v8686_v20  ;;  %v8576_v6 = vld [vmem:[%s17030_s19 + $0x230] sm:$0xff] }
0x2969   : > { %12093 = vmatprep.subr.bf16.mxu0 %v12092_v39  ;;  %v8583_v39 = vld [vmem:[%s17030_s19 + $0x268] sm:$0xff] }
0x296a   : > { %v12128_v15 = vpack.c.bf16 %v8583_v39, %v8575_v14  ;;  %v8702_v14 = vld [vmem:[%s17030_s19 + $0x620] sm:$0xff] }
0x296b   : > { %v8710_v39 = vld [vmem:[%s17030_s19 + $0x660] sm:$0xff] }
0x296c   : > { %12095 = vmatpush1.bf16.msra.mxu0 %v12094_v32  ;;  %v8591_v32 = vld [vmem:[%s17030_s19 + $0x2a8] sm:$0xff]  ;;  %v12162_v24 = vpack.c.bf16 %v8710_v39, %v8702_v14  ;;  %v8592_v39 = vld [vmem:[%s17030_s19 + $0x2b0] sm:$0xff] }
0x296d   : > { %12097 = vmatprep.subr.bf16.mxu0 %v12096_v51  ;;  %v8599_v51 = vld [vmem:[%s17030_s19 + $0x2e8] sm:$0xff] }
0x296e   : > { %v12132_v45 = vpack.c.bf16 %v8599_v51, %v8591_v32  ;;  %v8718_v32 = vld [vmem:[%s17030_s19 + $0x6a0] sm:$0xff] }
0x296f   : > { %v8726_v51 = vld [vmem:[%s17030_s19 + $0x6e0] sm:$0xff] }
0x2970   : > { %12099 = vmatpush1.bf16.msra.mxu0 %v12098_v60  ;;  %v8607_v60 = vld [vmem:[%s17030_s19 + $0x328] sm:$0xff]  ;;  %v12166_v58 = vpack.c.bf16 %v8726_v51, %v8718_v32  ;;  %v8608_v51 = vld [vmem:[%s17030_s19 + $0x330] sm:$0xff] }
0x2971   : > { %12101 = vmatprep.subr.bf16.mxu0 %v12100_v30  ;;  %v8615_v30 = vld [vmem:[%s17030_s19 + $0x368] sm:$0xff] }
0x2972   : > { %v12136_v22 = vpack.c.bf16 %v8615_v30, %v8607_v60  ;;  %v8734_v60 = vld [vmem:[%s17030_s19 + $0x720] sm:$0xff] }
0x2973   : > { %v8742_v30 = vld [vmem:[%s17030_s19 + $0x760] sm:$0xff] }
0x2974   : > { %12103 = vmatpush1.bf16.msra.mxu0 %v12102_v26  ;;  %v8623_v26 = vld [vmem:[%s17030_s19 + $0x3a8] sm:$0xff]  ;;  %v12170_v41 = vpack.c.bf16 %v8742_v30, %v8734_v60  ;;  %v8624_v30 = vld [vmem:[%s17030_s19 + $0x3b0] sm:$0xff] }
0x2975   : > { %12105 = vmatprep.subr.bf16.mxu0 %v12104_v28  ;;  %v8631_v28 = vld [vmem:[%s17030_s19 + $0x3e8] sm:$0xff] }
0x2976   : > { %v12140_v8 = vpack.c.bf16 %v8631_v28, %v8623_v26  ;;  %v8750_v26 = vld [vmem:[%s17030_s19 + $0x7a0] sm:$0xff] }
0x2977   : > { %v8758_v28 = vld [vmem:[%s17030_s19 + $0x7e0] sm:$0xff] }
0x2978   : > { %12107 = vmatpush1.bf16.msra.mxu0 %v12106_v48  ;;  %v8639_v48 = vld [vmem:[%s17030_s19 + $0x428] sm:$0xff]  ;;  %v12174_v10 = vpack.c.bf16 %v8758_v28, %v8750_v26  ;;  %v8640_v28 = vld [vmem:[%s17030_s19 + $0x430] sm:$0xff] }
0x2979   : > { %12109 = vmatprep.subr.bf16.mxu0 %v12108_v57  ;;  %v8647_v57 = vld [vmem:[%s17030_s19 + $0x468] sm:$0xff] }
0x297a   : > { %v12144_v5 = vpack.c.bf16 %v8647_v57, %v8639_v48  ;;  %v8512_v48 = vld [vmem:[%s17030_s19 + $0x30] sm:$0xff] }
0x297b   : > { %v8520_v57 = vld [vmem:[%s17030_s19 + $0x70] sm:$0xff] }
0x297c   : > { %12111 = vmatpush1.bf16.msra.mxu0 %v12110_v53  ;;  %v8655_v53 = vld [vmem:[%s17030_s19 + $0x4a8] sm:$0xff]  ;;  %v12178_v25 = vpack.c.bf16 %v8520_v57, %v8512_v48  ;;  %v8656_v57 = vld [vmem:[%s17030_s19 + $0x4b0] sm:$0xff] }
0x297d   : > { %12113 = vmatprep.subr.bf16.mxu0 %v12112_v4  ;;  %v8663_v4 = vld [vmem:[%s17030_s19 + $0x4e8] sm:$0xff] }
0x297e   : > { %v12148_v44 = vpack.c.bf16 %v8663_v4, %v8655_v53  ;;  %v8528_v53 = vld [vmem:[%s17030_s19 + $0xb0] sm:$0xff] }
0x297f   : > { %8946 = vmatmul.mubr.f32.vlgmr.msra.gmra.mrb[46].mxu0 %v16271_v19  ;;  %v8536_v4 = vld [vmem:[%s17030_s19 + $0xf0] sm:$0xff] }
0x2980   : > { %8951 = vmatprep.mubr.f32.mxu0 %v16289_v11  ;;  %12115 = vmatpush1.bf16.msra.mxu0 %v12114_v63  ;;  %v8671_v63 = vld [vmem:[%s17030_s19 + $0x528] sm:$0xff]  ;;  %v12182_v21 = vpack.c.bf16 %v8536_v4, %v8528_v53  ;;  %v8672_v4 = vld [vmem:[%s17030_s19 + $0x530] sm:$0xff] }
0x2981   : > { %12117 = vmatprep.subr.bf16.mxu0 %v12116_v16  ;;  %v8679_v16 = vld [vmem:[%s17030_s19 + $0x568] sm:$0xff] }
0x2982   : > { %v12152_v54 = vpack.c.bf16 %v8679_v16, %v8671_v63  ;;  %v8544_v63 = vld [vmem:[%s17030_s19 + $0x130] sm:$0xff] }
0x2983   : > { %8952 = vmatmul.mubr.f32.gmra.mrb[48].mxu0 %v16291_v61  ;;  %v8552_v16 = vld [vmem:[%s17030_s19 + $0x170] sm:$0xff] }
0x2984   : > { %12119 = vmatpush1.bf16.msra.mxu0 %v12118_v23  ;;  %9022 = vmatprep.mubr.f32.mxu0 %v16269_v34  ;;  %v8687_v23 = vld [vmem:[%s17030_s19 + $0x5a8] sm:$0xff]  ;;  %v12186_v56 = vpack.c.bf16 %v8552_v16, %v8544_v63  ;;  %v8688_v16 = vld [vmem:[%s17030_s19 + $0x5b0] sm:$0xff] }
0x2985   : > { %12121 = vmatprep.subr.bf16.mxu0 %v12120_v59  ;;  %v8695_v59 = vld [vmem:[%s17030_s19 + $0x5e8] sm:$0xff] }
0x2986   : > { %v12156_v3 = vpack.c.bf16 %v8695_v59, %v8687_v23  ;;  %v8560_v23 = vld [vmem:[%s17030_s19 + $0x1b0] sm:$0xff] }
0x2987   : > { %v8568_v59 = vld [vmem:[%s17030_s19 + $0x1f0] sm:$0xff] }
0x2988   : > { %12123 = vmatpush1.bf16.msra.mxu0 %v12122_v7  ;;  %v8703_v7 = vld [vmem:[%s17030_s19 + $0x628] sm:$0xff] }
0x2989   : > { %12125 = vmatprep.subr.bf16.mxu0 %v12124_v12  ;;  %v8711_v12 = vld [vmem:[%s17030_s19 + $0x668] sm:$0xff] }
0x298a   : > { %v12160_v36 = vpack.c.bf16 %v8711_v12, %v8703_v7  ;;  %v8584_v7 = vld [vmem:[%s17030_s19 + $0x270] sm:$0xff]  ;;  %v8593_v12 = vld [vmem:[%s17030_s19 + $0x2b8] sm:$0xff] }
0x298c   : > { %12127 = vmatpush1.bf16.msra.mxu0 %v12126_v42  ;;  %v8719_v42 = vld [vmem:[%s17030_s19 + $0x6a8] sm:$0xff] }
0x298d   : > { %12129 = vmatprep.subr.bf16.mxu0 %v12128_v15  ;;  %v8727_v15 = vld [vmem:[%s17030_s19 + $0x6e8] sm:$0xff] }
0x298e   : > { %v12164_v55 = vpack.c.bf16 %v8727_v15, %v8719_v42  ;;  %v8600_v42 = vld [vmem:[%s17030_s19 + $0x2f0] sm:$0xff]  ;;  %v8609_v15 = vld [vmem:[%s17030_s19 + $0x338] sm:$0xff] }
0x2990   : > { %12131 = vmatpush1.bf16.msra.mxu0 %v12130_v37  ;;  %v8735_v37 = vld [vmem:[%s17030_s19 + $0x728] sm:$0xff] }
0x2991   : > { %12133 = vmatprep.subr.bf16.mxu0 %v12132_v45  ;;  %v8743_v45 = vld [vmem:[%s17030_s19 + $0x768] sm:$0xff] }
0x2992   : > { %v12168_v9 = vpack.c.bf16 %v8743_v45, %v8735_v37  ;;  %v8616_v37 = vld [vmem:[%s17030_s19 + $0x370] sm:$0xff]  ;;  %v8625_v45 = vld [vmem:[%s17030_s19 + $0x3b8] sm:$0xff] }
0x2994   : > { %12135 = vmatpush1.bf16.msra.mxu0 %v12134_v27  ;;  %v8751_v27 = vld [vmem:[%s17030_s19 + $0x7a8] sm:$0xff] }
0x2995   : > { %12137 = vmatprep.subr.bf16.mxu0 %v12136_v22  ;;  %v8759_v22 = vld [vmem:[%s17030_s19 + $0x7e8] sm:$0xff] }
0x2996   : > { %v12172_v17 = vpack.c.bf16 %v8759_v22, %v8751_v27  ;;  %v8632_v27 = vld [vmem:[%s17030_s19 + $0x3f0] sm:$0xff]  ;;  %v8641_v22 = vld [vmem:[%s17030_s19 + $0x438] sm:$0xff] }
0x2998   : > { %12139 = vmatpush1.bf16.msra.mxu0 %v12138_v50  ;;  %v8513_v50 = vld [vmem:[%s17030_s19 + $0x38] sm:$0xff] }
0x2999   : > { %12141 = vmatprep.subr.bf16.mxu0 %v12140_v8  ;;  %v8521_v8 = vld [vmem:[%s17030_s19 + $0x78] sm:$0xff] }
0x299a   : > { %v12176_v35 = vpack.c.bf16 %v8521_v8, %v8513_v50  ;;  %v8648_v50 = vld [vmem:[%s17030_s19 + $0x470] sm:$0xff]  ;;  %v8657_v8 = vld [vmem:[%s17030_s19 + $0x4b8] sm:$0xff] }
0x299c   : > { %12143 = vmatpush1.bf16.msra.mxu0 %v12142_v31  ;;  %v8529_v31 = vld [vmem:[%s17030_s19 + $0xb8] sm:$0xff] }
0x299d   : > { %12145 = vmatprep.subr.bf16.mxu0 %v12144_v5  ;;  %v8537_v5 = vld [vmem:[%s17030_s19 + $0xf8] sm:$0xff] }
0x299e   : > { %v12180_v18 = vpack.c.bf16 %v8537_v5, %v8529_v31  ;;  %v8664_v31 = vld [vmem:[%s17030_s19 + $0x4f0] sm:$0xff]  ;;  %v8673_v5 = vld [vmem:[%s17030_s19 + $0x538] sm:$0xff] }
0x29a0   : > { %12147 = vmatpush1.bf16.msra.mxu0 %v12146_v40  ;;  %v8545_v40 = vld [vmem:[%s17030_s19 + $0x138] sm:$0xff] }
0x29a1   : > { %12149 = vmatprep.subr.bf16.mxu0 %v12148_v44  ;;  %v8553_v44 = vld [vmem:[%s17030_s19 + $0x178] sm:$0xff] }
0x29a2   : > { %v12184_v29 = vpack.c.bf16 %v8553_v44, %v8545_v40  ;;  %v8680_v40 = vld [vmem:[%s17030_s19 + $0x570] sm:$0xff]  ;;  %v8689_v44 = vld [vmem:[%s17030_s19 + $0x5b8] sm:$0xff] }
0x29a4   : > { %12151 = vmatpush1.bf16.msra.mxu0 %v12150_v52  ;;  %v8561_v52 = vld [vmem:[%s17030_s19 + $0x1b8] sm:$0xff] }
0x29a5   : > { %12153 = vmatprep.subr.bf16.mxu0 %v12152_v54  ;;  %v8569_v54 = vld [vmem:[%s17030_s19 + $0x1f8] sm:$0xff] }
0x29a6   : > { %v12188_v13 = vpack.c.bf16 %v8569_v54, %v8561_v52  ;;  %v8696_v52 = vld [vmem:[%s17030_s19 + $0x5f0] sm:$0xff]  ;;  %v8705_v54 = vld [vmem:[%s17030_s19 + $0x638] sm:$0xff] }
0x29a8   : > { %12155 = vmatpush1.bf16.msra.mxu0 %v12154_v38  ;;  %v8577_v38 = vld [vmem:[%s17030_s19 + $0x238] sm:$0xff] }
0x29a9   : > { %12157 = vmatprep.subr.bf16.mxu0 %v12156_v3  ;;  %v8585_v3 = vld [vmem:[%s17030_s19 + $0x278] sm:$0xff] }
0x29aa   : > { %v12192_v20 = vpack.c.bf16 %v8585_v3, %v8577_v38  ;;  %v8712_v38 = vld [vmem:[%s17030_s19 + $0x670] sm:$0xff]  ;;  %v8721_v3 = vld [vmem:[%s17030_s19 + $0x6b8] sm:$0xff] }
0x29ac   : > { %12159 = vmatpush1.bf16.msra.mxu0 %v12158_v62  ;;  %v8601_v62 = vld [vmem:[%s17030_s19 + $0x2f8] sm:$0xff] }
0x29ad   : > { %12161 = vmatprep.subr.bf16.mxu0 %v12160_v36  ;;  %v12194_v36 = vpack.c.bf16 %v8584_v7, %v8576_v6  ;;  %v12196_v14 = vpack.c.bf16 %v8601_v62, %v8593_v12  ;;  %v8720_v7 = vld [vmem:[%s17030_s19 + $0x6b0] sm:$0xff]  ;;  %v8737_v62 = vld [vmem:[%s17030_s19 + $0x738] sm:$0xff] }
0x29ae   : > { %v8728_v12 = vld [vmem:[%s17030_s19 + $0x6f0] sm:$0xff] }
0x29b0   : > { %12163 = vmatpush1.bf16.msra.mxu0 %v12162_v24  ;;  %v8617_v24 = vld [vmem:[%s17030_s19 + $0x378] sm:$0xff] }
0x29b1   : > { %12165 = vmatprep.subr.bf16.mxu0 %v12164_v55  ;;  %v12198_v55 = vpack.c.bf16 %v8600_v42, %v8592_v39  ;;  %v12200_v32 = vpack.c.bf16 %v8617_v24, %v8609_v15  ;;  %v8736_v42 = vld [vmem:[%s17030_s19 + $0x730] sm:$0xff]  ;;  %v8753_v24 = vld [vmem:[%s17030_s19 + $0x7b8] sm:$0xff] }
0x29b2   : > { %v8744_v15 = vld [vmem:[%s17030_s19 + $0x770] sm:$0xff] }
0x29b4   : > { %12167 = vmatpush1.bf16.msra.mxu0 %v12166_v58  ;;  %v8633_v58 = vld [vmem:[%s17030_s19 + $0x3f8] sm:$0xff] }
0x29b5   : > { %12169 = vmatprep.subr.bf16.mxu0 %v12168_v9  ;;  %v12202_v9 = vpack.c.bf16 %v8616_v37, %v8608_v51  ;;  %v12204_v60 = vpack.c.bf16 %v8633_v58, %v8625_v45  ;;  %v8752_v37 = vld [vmem:[%s17030_s19 + $0x7b0] sm:$0xff] }
0x29b6   : > { %v8760_v45 = vld [vmem:[%s17030_s19 + $0x7f0] sm:$0xff] }
0x29b7   : > { %v12238_v58 = vpack.c.bf16 %v8760_v45, %v8752_v37 }
0x29b8   : > { %12171 = vmatpush1.bf16.msra.mxu0 %v12170_v41  ;;  %v8649_v41 = vld [vmem:[%s17030_s19 + $0x478] sm:$0xff] }
0x29b9   : > { %12173 = vmatprep.subr.bf16.mxu0 %v12172_v17  ;;  %v12206_v17 = vpack.c.bf16 %v8632_v27, %v8624_v30  ;;  %v12208_v26 = vpack.c.bf16 %v8649_v41, %v8641_v22 }
0x29bc   : > { %12175 = vmatpush1.bf16.msra.mxu0 %v12174_v10  ;;  %v8665_v10 = vld [vmem:[%s17030_s19 + $0x4f8] sm:$0xff] }
0x29bd   : > { %12177 = vmatprep.subr.bf16.mxu0 %v12176_v35  ;;  %v12210_v35 = vpack.c.bf16 %v8648_v50, %v8640_v28  ;;  %v12212_v48 = vpack.c.bf16 %v8665_v10, %v8657_v8 }
0x29bf   : > { %9023 = vmatmul.mubr.f32.vlgmr.msra.gmra.mrb[50].mxu0 %v16271_v19 }
0x29c0   : > { %9028 = vmatprep.mubr.f32.mxu0 %v16289_v11  ;;  %12179 = vmatpush1.bf16.msra.mxu0 %v12178_v25  ;;  %v8681_v25 = vld [vmem:[%s17030_s19 + $0x578] sm:$0xff] }
0x29c1   : > { %12181 = vmatprep.subr.bf16.mxu0 %v12180_v18  ;;  %v12214_v18 = vpack.c.bf16 %v8664_v31, %v8656_v57  ;;  %v12216_v53 = vpack.c.bf16 %v8681_v25, %v8673_v5 }
0x29c3   : > { %9029 = vmatmul.mubr.f32.gmra.mrb[52].mxu0 %v16291_v61 }
0x29c4   : > { %12183 = vmatpush1.bf16.msra.mxu0 %v12182_v21  ;;  %9099 = vmatprep.mubr.f32.mxu0 %v16269_v34  ;;  %v12190_v34 = vpack.c.bf16 %v8568_v59, %v8560_v23  ;;  %v8697_v21 = vld [vmem:[%s17030_s19 + $0x5f8] sm:$0xff]  ;;  %v8704_v59 = vld [vmem:[%s17030_s19 + $0x630] sm:$0xff] }
0x29c5   : > { %12185 = vmatprep.subr.bf16.mxu0 %v12184_v29  ;;  %v12218_v29 = vpack.c.bf16 %v8680_v40, %v8672_v4  ;;  %v12220_v63 = vpack.c.bf16 %v8697_v21, %v8689_v44 }
0x29c8   : > { %12187 = vmatpush1.bf16.msra.mxu0 %v12186_v56  ;;  %v8713_v56 = vld [vmem:[%s17030_s19 + $0x678] sm:$0xff] }
0x29c9   : > { %12189 = vmatprep.subr.bf16.mxu0 %v12188_v13  ;;  %v12222_v13 = vpack.c.bf16 %v8696_v52, %v8688_v16  ;;  %v12224_v23 = vpack.c.bf16 %v8713_v56, %v8705_v54 }
0x29cc   : > { %12191 = vmatpush1.bf16.msra.mxu0 %v12190_v34  ;;  %v8729_v34 = vld [vmem:[%s17030_s19 + $0x6f8] sm:$0xff] }
0x29cd   : > { %12193 = vmatprep.subr.bf16.mxu0 %v12192_v20  ;;  %v12226_v20 = vpack.c.bf16 %v8712_v38, %v8704_v59  ;;  %v12228_v6 = vpack.c.bf16 %v8729_v34, %v8721_v3 }
0x29d0   : > { %12195 = vmatpush1.bf16.msra.mxu0 %v12194_v36  ;;  %v8745_v36 = vld [vmem:[%s17030_s19 + $0x778] sm:$0xff] }
0x29d1   : > { %12197 = vmatprep.subr.bf16.mxu0 %v12196_v14  ;;  %v12230_v14 = vpack.c.bf16 %v8728_v12, %v8720_v7  ;;  %v12232_v39 = vpack.c.bf16 %v8745_v36, %v8737_v62 }
0x29d4   : > { %12199 = vmatpush1.bf16.msra.mxu0 %v12198_v55  ;;  %v8761_v55 = vld [vmem:[%s17030_s19 + $0x7f8] sm:$0xff] }
0x29d5   : > { %12201 = vmatprep.subr.bf16.mxu0 %v12200_v32  ;;  %v12234_v32 = vpack.c.bf16 %v8744_v15, %v8736_v42  ;;  %v12236_v51 = vpack.c.bf16 %v8761_v55, %v8753_v24 }
0x29d8   : > { %12203 = vmatpush1.bf16.msra.mxu0 %v12202_v9  ;;  %v8762_v9 = vld [vmem:[%s17032_s14] sm:$0xff] }
0x29d9   : > { %12205 = vmatprep.subr.bf16.mxu0 %v12204_v60  ;;  %v8767_v60 = vrot.slane %v8762_v9, %v13518_v33  ;;  %v8771_v30 = vrot.slane %v8762_v9, %v13651_v43  ;;  %v8775_v43 = vrot.slane %v8762_v9, %v13535_v46  ;;  %v8783_v46 = vrot.slane %v8762_v9, %v13563_v1 }
0x29da   : > { %v8791_v1 = vrot.slane %v8762_v9, %v14689_v0 }
0x29dc   : > { %12207 = vmatpush1.bf16.msra.mxu0 %v12206_v17 }
0x29dd   : > { %12209 = vmatprep.subr.bf16.mxu0 %v12208_v26  ;;  %v8779_v26 = vrot.slane %v8762_v9, %v13538_v47  ;;  %v8787_v47 = vrot.slane %v8762_v9, %v13566_v2  ;;  %v8795_v2 = vrot.slane %v8762_v9, %v14676_v49 }
0x29e0   : > { %12211 = vmatpush1.bf16.msra.mxu0 %v12210_v35 }
0x29e1   : > { %12213 = vmatprep.subr.bf16.mxu0 %v12212_v48 }
0x29e4   : > { %12215 = vmatpush1.bf16.msra.mxu0 %v12214_v18 }
0x29e5   : > { %12217 = vmatprep.subr.bf16.mxu0 %v12216_v53 }
0x29e8   : > { %12219 = vmatpush1.bf16.msra.mxu0 %v12218_v29 }
0x29e9   : > { %12221 = vmatprep.subr.bf16.mxu0 %v12220_v63 }
0x29ec   : > { %12223 = vmatpush1.bf16.msra.mxu0 %v12222_v13 }
0x29ed   : > { %12225 = vmatprep.subr.bf16.mxu0 %v12224_v23 }
0x29f0   : > { %12227 = vmatpush1.bf16.msra.mxu0 %v12226_v20 }
0x29f1   : > { %12229 = vmatprep.subr.bf16.mxu0 %v12228_v6 }
0x29f4   : > { %12231 = vmatpush1.bf16.msra.mxu0 %v12230_v14 }
0x29f5   : > { %12233 = vmatprep.subr.bf16.mxu0 %v12232_v39 }
0x29f8   : > { %12235 = vmatpush1.bf16.msra.mxu0 %v12234_v32 }
0x29f9   : > { %12237 = vmatprep.subr.bf16.mxu0 %v12236_v51 }
0x29fc   : > { %12239 = vmatpush1.bf16.msra.mxu0 %v12238_v58 }
0x29ff   : > { %9100 = vmatmul.mubr.f32.vlgmr.msra.gmra.mrb[54].mxu0 %v16271_v19 }
0x2a00   : > { %9105 = vmatprep.mubr.f32.mxu0 %v16289_v11 }
0x2a03   : > { %9106 = vmatmul.mubr.f32.gmra.mrb[56].mxu0 %v16291_v61 }
0x2a12   : > { %v8870_v27 = vpop.f32.mrb[42].mxu0 }
0x2a13   : > { %v8871_v22 = vadd.f32 %v8870_v27, %v8767_v60  ;;  %v8872_v41 = vpop.f32.mrb[43].mxu0 }
0x2a14   : > { %v8873_v17 = vadd.f32 %v8872_v41, %v8771_v30 }
0x2a15   : > { %9112 = vst [vmem:[%s16861_s25] sm:$0xff] %v8871_v22 }
0x2a16   : > { %9113 = vst [vmem:[%s16861_s25 + $0x8] sm:$0xff] %v8873_v17  ;;  %v8876_v19 = vpop.f32.mrb[44].mxu0 }
0x2a17   : > { %v8877_v11 = vadd.f32 %v8876_v19, %v8767_v60  ;;  %v8878_v61 = vpop.f32.mrb[45].mxu0 }
0x2a18   : > { %v8879_v33 = vadd.f32 %v8878_v61, %v8771_v30 }
0x2a19   : > { %9120 = vst [vmem:[%s16861_s25 + $0x40] sm:$0xff] %v8877_v11 }
0x2a1a   : > { %9121 = vst [vmem:[%s16861_s25 + $0x48] sm:$0xff] %v8879_v33 }
0x2a52   : > { %v8947_v28 = vpop.f32.mrb[46].mxu0 }
0x2a53   : > { %v8948_v50 = vadd.f32 %v8947_v28, %v8775_v43  ;;  %v8949_v8 = vpop.f32.mrb[47].mxu0 }
0x2a54   : > { %v8950_v10 = vadd.f32 %v8949_v8, %v8779_v26 }
0x2a55   : > { %9114 = vst [vmem:[%s16861_s25 + $0x10] sm:$0xff] %v8948_v50 }
0x2a56   : > { %9115 = vst [vmem:[%s16861_s25 + $0x18] sm:$0xff] %v8950_v10  ;;  %v8953_v35 = vpop.f32.mrb[48].mxu0 }
0x2a57   : > { %v8954_v48 = vadd.f32 %v8953_v35, %v8775_v43  ;;  %v8955_v57 = vpop.f32.mrb[49].mxu0 }
0x2a58   : > { %v8956_v31 = vadd.f32 %v8955_v57, %v8779_v26 }
0x2a59   : > { %9122 = vst [vmem:[%s16861_s25 + $0x50] sm:$0xff] %v8954_v48 }
0x2a5a   : > { %9123 = vst [vmem:[%s16861_s25 + $0x58] sm:$0xff] %v8956_v31 }
0x2a92   : > { %v9024_v5 = vpop.f32.mrb[50].mxu0 }
0x2a93   : > { %v9025_v25 = vadd.f32 %v9024_v5, %v8783_v46  ;;  %v9026_v18 = vpop.f32.mrb[51].mxu0 }
0x2a94   : > { %v9027_v53 = vadd.f32 %v9026_v18, %v8787_v47 }
0x2a95   : > { %9116 = vst [vmem:[%s16861_s25 + $0x20] sm:$0xff] %v9025_v25 }
0x2a96   : > { %9117 = vst [vmem:[%s16861_s25 + $0x28] sm:$0xff] %v9027_v53  ;;  %v9030_v4 = vpop.f32.mrb[52].mxu0 }
0x2a97   : > { %v9031_v40 = vadd.f32 %v9030_v4, %v8783_v46  ;;  %v9032_v44 = vpop.f32.mrb[53].mxu0 }
0x2a98   : > { %v9033_v21 = vadd.f32 %v9032_v44, %v8787_v47 }
0x2a99   : > { %9124 = vst [vmem:[%s16861_s25 + $0x60] sm:$0xff] %v9031_v40 }
0x2a9a   : > { %9125 = vst [vmem:[%s16861_s25 + $0x68] sm:$0xff] %v9033_v21 }
0x2ad2   : > { %v9101_v29 = vpop.f32.mrb[54].mxu0 }
0x2ad3   : > { %v9102_v63 = vadd.f32 %v9101_v29, %v8791_v1  ;;  %v9103_v16 = vpop.f32.mrb[55].mxu0 }
0x2ad4   : > { %v9104_v52 = vadd.f32 %v9103_v16, %v8795_v2 }
0x2ad5   : > { %9118 = vst [vmem:[%s16861_s25 + $0x30] sm:$0xff] %v9102_v63 }
0x2ad6   : > { %9119 = vst.msk [vmem:[%s16861_s25 + $0x38] sm:$0xff] %vm970_vm12, %v9104_v52  ;;  %v9107_v54 = vpop.f32.mrb[56].mxu0 }
0x2ad7   : > { %v9108_v56 = vadd.f32 %v9107_v54, %v8791_v1  ;;  %v9109_v13 = vpop.f32.mrb[57].mxu0 }
0x2ad8   : > { %v9110_v49 = vadd.f32 %v9109_v13, %v8795_v2 }
0x2ad9   : > { %9126 = vst [vmem:[%s16861_s25 + $0x70] sm:$0xff] %v9108_v56 }
0x2ada   : > { %9127 = vst.msk [vmem:[%s16861_s25 + $0x78] sm:$0xff] %vm970_vm12, %v9110_v49 }
0x2adb   : > { %12985 = shalt.err (!%p12982_p13)
}
0x2adc   : > { %s12986_s22 = scalar_lea.hbm %s16889_s18, 2048  ;;  %s12990_s2 = scalar_lea.hbm %s17035_s30, 4096 }
0x2add   : > { %p12987_p12 = scmp.ne.s32.totalorder %s16889_s18, %s12986_s22  ;;  %p12991_p3 = scmp.lt.u32.totalorder %s16889_s18, %s17035_s30 }
0x2ade   : > { %p12992_p4 = scmp.lt.u32.totalorder %s12990_s2, %s12986_s22  ;;  %p12994_p8 = scmp.lt.u32.totalorder %s12986_s22, %s16889_s18 }
0x2adf   : > { %p12988_p1 = pnand %p12987_p12, %p17036_p11 }
0x2ae0   : > { %p12993_p7 = por %p12992_p4, %p12991_p3 }
0x2ae1   : > { %p12989_p2 = pneg %p12988_p1 }
0x2ae2   : > { %p12995_p5 = por %p12994_p8, %p12993_p7 }
0x2ae4   : > { %p12996_p0 = pnand %p12995_p5, %p12989_p2 }
0x2ae6   : > { %12999 = shalt.err (!%p12996_p0)
}
0x2ae7   : > { %s13079_s29 = smov 1024  }
0x2ae8   : > { %12320 = dma.vmem_to_hbm [thread:$0]  (%p17036_p11), %s16891_s21, 2048, %s16889_s18, %s16898_s28, %s13079_s29, %s13079_s29, %s13076_s26  }
0x2ae9 PF: > { %s17037_s4 = sld [smem:[#allocation26_spill]]  ;;  %s17038_s27 = sld [smem:[#allocation23_spill]] }
0x2aea   : > { %s17039_s24 = sld [smem:[#allocation30_spill]] }
0x2aef   : > { %p12367_p6 = scmp.ge.s32.totalorder %s17037_s4, 2  ;;  %s9158_s1 = sand.u32 1, %s17038_s27  }
0x2af0   : > { %p17040_p9 = scmp.ne.s32.totalorder %s17039_s24, 0  ;;  %s9159_s0 = scalar_lea.sflag [#allocation4], %s9158_s1 }
0x2af2   : > { %p12348_p10 = pnand %p12367_p6, %p17040_p9 }
0x2af4   : > { %13037 = dma.done.wait (!%p12348_p10), %s9159_s0, 2048  }
0x2af5   : > { %13039 = vsyncadd (!%p12348_p10), %s9159_s0, 4294965248  ;;  %s17041_s27 = sld [smem:[#allocation27_spill]]  ;;  %s17042_s24 = sld [smem:[#allocation24_spill]] }
0x2af6   : > { %s17043_s25 = sld [smem:[#allocation25_spill]]  ;;  %s17044_s26 = sld [smem:[#allocation28_spill]] }
0x2afb   : > { %p32_p13 = scmp.ge.s32.totalorder %s17041_s27, 4  }
0x2afd   :  { %34 = sbr.rel (!%p32_p13) target bundleno = 19 (0x13), region = 168 }
0x2b04   :  { %9164 = vsyncpa [#allocation3], 1 }
0x2b05   :  { %9166 = vsyncpa [#allocation3 + $0x1], 1 }
0x2b06   :  { %9167 = vsyncpa [#allocation6], 1 }
0x2b07   :  { %9168 = vsyncpa [#allocation9], 1 }
0x2b08   :  { %9169 = vsyncpa [#allocation12], 1 }
0x2b09   :  { %9170 = vsyncpa [#allocation15], 1 }
0x2b0a   :  { %9171 = vsyncpa [#allocation4], 1 }
0x2b0b   :  { %9173 = vsyncpa [#allocation4 + $0x1], 1 }

</bundles_post_ra>
